<compile_context>
chip_gen: v7x
topology: tpu7x:2x2x1
jax: 0.10.0
libtpu: 0.0.40
codegen_flags: <defaults>
</compile_context>

<pallas_src>
import functools

import jax
import jax.numpy as jnp
from jax import lax
from jax.experimental import pallas as pl
from jax.experimental.pallas import tpu as pltpu

EPS = 1e-5  # PyTorch InstanceNorm2d default eps


# ----------------------------- in-kernel helpers -----------------------------

def _conv3x3_in_relu(xpad_ref, wflat_ref, Hout, Wout, Cin, mm_dtype):
    """3x3 'same' conv as ONE im2col matmul (K = 9*Cin) + InstanceNorm + ReLU.

    xpad_ref : (Hout+2, Wout+2, Cin) zero-padded f32 VMEM scratch
    wflat_ref: (9*Cin, Cout), row index = (dh*3 + dw)*Cin + ci  (HWIO flattened)
    returns  : (Hout*Wout, Cout) float32, normalized + ReLU'd
    """
    taps = [
        xpad_ref[dh:dh + Hout, dw:dw + Wout, :]
        .reshape(Hout * Wout, Cin).astype(mm_dtype)
        for dh in range(3) for dw in range(3)
    ]
    slab = jnp.concatenate(taps, axis=-1)                 # (Hout*Wout, 9*Cin)
    acc = jnp.dot(slab, wflat_ref[...],
                  preferred_element_type=jnp.float32)     # (Hout*Wout, Cout)
    # one-pass InstanceNorm stats (per channel, over all pixels), f32
    n = jnp.float32(Hout * Wout)
    mean = jnp.sum(acc, axis=0, keepdims=True) / n
    var = jnp.sum(acc * acc, axis=0, keepdims=True) / n - mean * mean
    return jnp.maximum((acc - mean) * lax.rsqrt(var + EPS), 0.0)


# ------------------------------ fused up-block --------------------------------

@functools.partial(jax.jit, static_argnames=("compute_dtype",))
def unet_up_block(x1, x2, wup, w1, w2, *, compute_dtype=jnp.bfloat16):
    """ConvTranspose2d(2,2)+IN+ReLU -> cat(skip, .) -> 2 x (Conv3x3+IN+ReLU)."""
    N, H, W, Cin = x1.shape
    Ch = Cin // 2
    H2, W2 = 2 * H, 2 * W
    assert x2.shape == (N, H2, W2, Ch), x2.shape
    Cmid = w1.shape[3]
    Cout = w2.shape[3]
    cdt = jnp.dtype(compute_dtype)

    # pack weights once (tiny) into matmul-ready layouts
    wup_flat = wup.transpose(1, 0, 2).reshape(Cin, 4 * Ch).astype(cdt)  # col = k*Ch + co
    w1_flat = w1.reshape(9 * Cin, Cmid).astype(cdt)                     # row = (dh*3+dw)*Cin + ci
    w2_flat = w2.reshape(9 * Cmid, Cout).astype(cdt)

    def kernel(x1_ref, x2_ref, wup_ref, w1_ref, w2_ref, out_ref,
               xcat_ref, hpad_ref):
        f32 = jnp.float32

        # zero-padded scratch: the 1-pixel border supplies the conv p=1 zero pad
        # (re-zeroed every grid step so it stays correct even if the batch grid
        #  is sharded across TensorCores; interior is fully overwritten below).
        xcat_ref[...] = jnp.zeros_like(xcat_ref)
        hpad_ref[...] = jnp.zeros_like(hpad_ref)

        # ---- stage 1: ConvTranspose2d(k=2, s=2, bias=False) + IN + ReLU -----
        # single matmul for all 4 output phases (phase k = a*2 + b)
        x1v = x1_ref[0].reshape(H * W, Cin).astype(cdt)
        y = jnp.dot(x1v, wup_ref[...], preferred_element_type=f32)  # (HW, 4*Ch)
        y_tap = [y[:, k * Ch:(k + 1) * Ch] for k in range(4)]
        # one-pass per-channel stats over the full 2H x 2W upsampled image
        s1 = jnp.zeros((1, Ch), f32)
        s2 = jnp.zeros((1, Ch), f32)
        for yk in y_tap:
            s1 = s1 + jnp.sum(yk, axis=0, keepdims=True)
            s2 = s2 + jnp.sum(yk * yk, axis=0, keepdims=True)
        cnt = jnp.float32(4 * H * W)
        mean = s1 / cnt
        inv = lax.rsqrt(s2 / cnt - mean * mean + EPS)
        u = [jnp.maximum((yk - mean) * inv, 0.0).reshape(H, W, Ch)
             for yk in y_tap]
        # interleave phases back to image layout: up[2i+a, 2j+b, c] = u[a*2+b][i, j, c]
        even = jnp.stack([u[0], u[1]], axis=2).reshape(H, W2, Ch)   # rows 2i
        odd = jnp.stack([u[2], u[3]], axis=2).reshape(H, W2, Ch)    # rows 2i+1
        up = jnp.stack([even, odd], axis=1).reshape(H2, W2, Ch)

        # ---- channel concat with skip connection: x = cat([x2, up], C) ------
        xcat_ref[1:1 + H2, 1:1 + W2, :] = jnp.concatenate(
            [x2_ref[0], up], axis=-1)

        # ---- stage 2: Conv3x3(p=1) + IN + ReLU   (conv1: Cin -> Cmid) -------
        h = _conv3x3_in_relu(xcat_ref, w1_ref, H2, W2, Cin, cdt)
        hpad_ref[1:1 + H2, 1:1 + W2, :] = h.reshape(H2, W2, Cmid)

        # ---- stage 3: Conv3x3(p=1) + IN + ReLU   (conv2: Cmid -> Cout) ------
        o = _conv3x3_in_relu(hpad_ref, w2_ref, H2, W2, Cmid, cdt)
        out_ref[0] = o.reshape(H2, W2, Cout).astype(out_ref.dtype)

    return pl.pallas_call(
        kernel,
        out_shape=jax.ShapeDtypeStruct((N, H2, W2, Cout), jnp.float32),
        grid=(N,),
        in_specs=[
            pl.BlockSpec((1, H, W, Cin), lambda n: (n, 0, 0, 0)),
            pl.BlockSpec((1, H2, W2, Ch), lambda n: (n, 0, 0, 0)),
            pl.BlockSpec((Cin, 4 * Ch), lambda n: (0, 0)),
            pl.BlockSpec((9 * Cin, Cmid), lambda n: (0, 0)),
            pl.BlockSpec((9 * Cmid, Cout), lambda n: (0, 0)),
        ],
        out_specs=pl.BlockSpec((1, H2, W2, Cout), lambda n: (n, 0, 0, 0)),
        scratch_shapes=[
            pltpu.VMEM((H2 + 2, W2 + 2, Cin), jnp.float32),   # padded cat([x2, up])
            pltpu.VMEM((H2 + 2, W2 + 2, Cmid), jnp.float32),  # padded conv1 output
        ],
        compiler_params=pltpu.CompilerParams(
            dimension_semantics=("parallel",)),
    )(x1, x2, wup_flat, w1_flat, w2_flat)


# ------------------------------ reference -----------------------------------

def _inorm(x):
    m = jnp.mean(x, axis=(1, 2), keepdims=True)
    v = jnp.mean((x - m) ** 2, axis=(1, 2), keepdims=True)
    return (x - m) * lax.rsqrt(v + EPS)


def reference(x1, x2, wup, w1, w2):
    N, H, W, Cin = x1.shape
    Ch = Cin // 2
    up = jnp.einsum('nijc,kcd->nijkd', x1, wup)           # (N,H,W,4,Ch)
    up = up.reshape(N, H, W, 2, 2, Ch).transpose(0, 1, 3, 2, 4, 5)
    up = up.reshape(N, 2 * H, 2 * W, Ch)
    up = jnp.maximum(_inorm(up), 0.0)
    x = jnp.concatenate([x2, up], axis=-1)
    dn = ('NHWC', 'HWIO', 'NHWC')
    h = lax.conv_general_dilated(x, w1, (1, 1), ((1, 1), (1, 1)),
                                 dimension_numbers=dn)
    h = jnp.maximum(_inorm(h), 0.0)
    o = lax.conv_general_dilated(h, w2, (1, 1), ((1, 1), (1, 1)),
                                 dimension_numbers=dn)
    return jnp.maximum(_inorm(o), 0.0)


# -------------------------------- main ---------------------------------------

if __name__ == "__main__":
    N, H, W = 2, 8, 8
    in_channel, out_channel = 8, 4
    Ch = in_channel // 2

    key = jax.random.PRNGKey(0)
    k1, k2, k3, k4, k5 = jax.random.split(key, 5)
    x1 = jax.random.normal(k1, (N, H, W, in_channel), jnp.float32)
    x2 = jax.random.normal(k2, (N, 2 * H, 2 * W, Ch), jnp.float32)
    wup = 0.2 * jax.random.normal(k3, (4, in_channel, Ch), jnp.float32)
    w1 = 0.2 * jax.random.normal(k4, (3, 3, in_channel, out_channel), jnp.float32)
    w2 = 0.2 * jax.random.normal(k5, (3, 3, out_channel, out_channel), jnp.float32)

    ref = jax.block_until_ready(reference(x1, x2, wup, w1, w2))

    # f32 MXU-operand path: tight-ish correctness check (tolerance covers the
    # MXU's internal f32-via-bf16-passes accumulation).
    out_f32 = jax.block_until_ready(
        unet_up_block(x1, x2, wup, w1, w2, compute_dtype=jnp.float32))
    assert out_f32.shape == (N, 2 * H, 2 * W, out_channel), out_f32.shape
    err_f32 = float(jnp.max(jnp.abs(out_f32 - ref)))
    assert err_f32 < 2e-2, f"f32 max abs error {err_f32}"

    # fast path (bf16 MXU operands, f32 accumulation / InstanceNorm): loose check
    out_bf16 = jax.block_until_ready(
        unet_up_block(x1, x2, wup, w1, w2, compute_dtype=jnp.bfloat16))
    assert bool(jnp.all(jnp.isfinite(out_bf16)))
    err_bf16 = float(jnp.max(jnp.abs(out_bf16 - ref)))
    assert err_bf16 < 5e-1, f"bf16 max abs error {err_bf16}"

    print("KERNEL_OK")
</pallas_src>

<mosaic_0001>
module attributes {stable_mosaic.version = 11 : i64} {
  func.func @kernel(%arg0: i32, %arg1: memref<1x8x8x8xf32, #tpu.memory_space<vmem>>, %arg2: memref<1x16x16x4xf32, #tpu.memory_space<vmem>>, %arg3: memref<8x16xf32, #tpu.memory_space<vmem>>, %arg4: memref<72x4xf32, #tpu.memory_space<vmem>>, %arg5: memref<36x4xf32, #tpu.memory_space<vmem>>, %arg6: memref<1x16x16x4xf32, #tpu.memory_space<vmem>>, %arg7: memref<18x18x8xf32, #tpu.memory_space<vmem>>, %arg8: memref<18x18x4xf32, #tpu.memory_space<vmem>>) attributes {dimension_semantics = [#tpu.dimension_semantics<parallel>], iteration_bounds = array<i64: 2>, scalar_prefetch = 0 : i64, scratch_operands = 2 : i64, tpu.core_type = #tpu.core_type<tc>, window_params = [{transform_indices = @transform_0, window_bounds = array<i64: 1, 8, 8, 8>}, {transform_indices = @transform_1, window_bounds = array<i64: 1, 16, 16, 4>}, {pipeline_mode = #tpu.pipeline_mode<synchronous>, transform_indices = @transform_2, window_bounds = array<i64: 8, 16>}, {pipeline_mode = #tpu.pipeline_mode<synchronous>, transform_indices = @transform_3, window_bounds = array<i64: 72, 4>}, {pipeline_mode = #tpu.pipeline_mode<synchronous>, transform_indices = @transform_4, window_bounds = array<i64: 36, 4>}, {transform_indices = @transform_5, window_bounds = array<i64: 1, 16, 16, 4>}]} {
    %cst = arith.constant 0.000000e+00 : f32
    %0 = vector.broadcast %cst : f32 to vector<18x18x8xf32>
    %c0 = arith.constant 0 : index
    %c0_0 = arith.constant 0 : index
    %c0_1 = arith.constant 0 : index
    %1 = vector.load %arg7[%c0, %c0_0, %c0_1] : memref<18x18x8xf32, #tpu.memory_space<vmem>>, vector<18x18x8xf32>
    tpu.vector_store %arg7[%c0, %c0_0, %c0_1], %0 {strides = array<i32>} : memref<18x18x8xf32, #tpu.memory_space<vmem>>, vector<18x18x8xf32>,
    %cst_2 = arith.constant 0.000000e+00 : f32
    %2 = vector.broadcast %cst_2 : f32 to vector<18x18x4xf32>
    %c0_3 = arith.constant 0 : index
    %c0_4 = arith.constant 0 : index
    %c0_5 = arith.constant 0 : index
    %3 = vector.load %arg8[%c0_3, %c0_4, %c0_5] : memref<18x18x4xf32, #tpu.memory_space<vmem>>, vector<18x18x4xf32>
    tpu.vector_store %arg8[%c0_3, %c0_4, %c0_5], %2 {strides = array<i32>} : memref<18x18x4xf32, #tpu.memory_space<vmem>>, vector<18x18x4xf32>,
    %c0_6 = arith.constant 0 : index
    %c0_7 = arith.constant 0 : index
    %c0_8 = arith.constant 0 : index
    %c0_9 = arith.constant 0 : index
    %4 = vector.load %arg1[%c0_6, %c0_7, %c0_8, %c0_9] : memref<1x8x8x8xf32, #tpu.memory_space<vmem>>, vector<1x8x8x8xf32>
    %5 = vector.shape_cast %4 : vector<1x8x8x8xf32> to vector<8x8x8xf32>
    %6 = vector.shape_cast %5 : vector<8x8x8xf32> to vector<64x8xf32>
    %c0_10 = arith.constant 0 : index
    %c0_11 = arith.constant 0 : index
    %7 = vector.load %arg3[%c0_10, %c0_11] : memref<8x16xf32, #tpu.memory_space<vmem>>, vector<8x16xf32>
    %cst_12 = arith.constant dense<0.000000e+00> : vector<64x16xf32>
    %8 = tpu.matmul %6, %7, %cst_12 {dimension_numbers = #tpu.dot_dimension_numbers<[1], [0], [0], [1], [0, 0, 1, 1], [], []>} : vector<64x8xf32>, vector<8x16xf32>, vector<64x16xf32> -> vector<64x16xf32>
    %9 = vector.extract_strided_slice %8 {offsets = [0, 0], sizes = [64, 4], strides = [1, 1]} : vector<64x16xf32> to vector<64x4xf32>
    %10 = vector.extract_strided_slice %8 {offsets = [0, 4], sizes = [64, 4], strides = [1, 1]} : vector<64x16xf32> to vector<64x4xf32>
    %11 = vector.extract_strided_slice %8 {offsets = [0, 8], sizes = [64, 4], strides = [1, 1]} : vector<64x16xf32> to vector<64x4xf32>
    %12 = vector.extract_strided_slice %8 {offsets = [0, 12], sizes = [64, 4], strides = [1, 1]} : vector<64x16xf32> to vector<64x4xf32>
    %cst_13 = arith.constant 0.000000e+00 : f32
    %13 = vector.broadcast %cst_13 : f32 to vector<1x4xf32>
    %cst_14 = arith.constant 0.000000e+00 : f32
    %14 = vector.broadcast %cst_14 : f32 to vector<1x4xf32>
    %cst_15 = arith.constant dense<0.000000e+00> : vector<4xf32>
    %15 = vector.multi_reduction <add>, %9, %cst_15 [0] : vector<64x4xf32> to vector<4xf32>
    %16 = vector.shape_cast %15 : vector<4xf32> to vector<1x4xf32>
    %17 = arith.addf %13, %16 : vector<1x4xf32>
    %18 = arith.mulf %9, %9 : vector<64x4xf32>
    %cst_16 = arith.constant dense<0.000000e+00> : vector<4xf32>
    %19 = vector.multi_reduction <add>, %18, %cst_16 [0] : vector<64x4xf32> to vector<4xf32>
    %20 = vector.shape_cast %19 : vector<4xf32> to vector<1x4xf32>
    %21 = arith.addf %14, %20 : vector<1x4xf32>
    %cst_17 = arith.constant dense<0.000000e+00> : vector<4xf32>
    %22 = vector.multi_reduction <add>, %10, %cst_17 [0] : vector<64x4xf32> to vector<4xf32>
    %23 = vector.shape_cast %22 : vector<4xf32> to vector<1x4xf32>
    %24 = arith.addf %17, %23 : vector<1x4xf32>
    %25 = arith.mulf %10, %10 : vector<64x4xf32>
    %cst_18 = arith.constant dense<0.000000e+00> : vector<4xf32>
    %26 = vector.multi_reduction <add>, %25, %cst_18 [0] : vector<64x4xf32> to vector<4xf32>
    %27 = vector.shape_cast %26 : vector<4xf32> to vector<1x4xf32>
    %28 = arith.addf %21, %27 : vector<1x4xf32>
    %cst_19 = arith.constant dense<0.000000e+00> : vector<4xf32>
    %29 = vector.multi_reduction <add>, %11, %cst_19 [0] : vector<64x4xf32> to vector<4xf32>
    %30 = vector.shape_cast %29 : vector<4xf32> to vector<1x4xf32>
    %31 = arith.addf %24, %30 : vector<1x4xf32>
    %32 = arith.mulf %11, %11 : vector<64x4xf32>
    %cst_20 = arith.constant dense<0.000000e+00> : vector<4xf32>
    %33 = vector.multi_reduction <add>, %32, %cst_20 [0] : vector<64x4xf32> to vector<4xf32>
    %34 = vector.shape_cast %33 : vector<4xf32> to vector<1x4xf32>
    %35 = arith.addf %28, %34 : vector<1x4xf32>
    %cst_21 = arith.constant dense<0.000000e+00> : vector<4xf32>
    %36 = vector.multi_reduction <add>, %12, %cst_21 [0] : vector<64x4xf32> to vector<4xf32>
    %37 = vector.shape_cast %36 : vector<4xf32> to vector<1x4xf32>
    %38 = arith.addf %31, %37 : vector<1x4xf32>
    %39 = arith.mulf %12, %12 : vector<64x4xf32>
    %cst_22 = arith.constant dense<0.000000e+00> : vector<4xf32>
    %40 = vector.multi_reduction <add>, %39, %cst_22 [0] : vector<64x4xf32> to vector<4xf32>
    %41 = vector.shape_cast %40 : vector<4xf32> to vector<1x4xf32>
    %42 = arith.addf %35, %41 : vector<1x4xf32>
    %cst_23 = arith.constant 2.560000e+02 : f32
    %43 = vector.broadcast %cst_23 : f32 to vector<1x4xf32>
    %44 = arith.divf %38, %43 : vector<1x4xf32>
    %cst_24 = arith.constant 2.560000e+02 : f32
    %45 = vector.broadcast %cst_24 : f32 to vector<1x4xf32>
    %46 = arith.divf %42, %45 : vector<1x4xf32>
    %47 = arith.mulf %44, %44 : vector<1x4xf32>
    %48 = arith.subf %46, %47 : vector<1x4xf32>
    %cst_25 = arith.constant 9.99999974E-6 : f32
    %49 = vector.broadcast %cst_25 : f32 to vector<1x4xf32>
    %50 = arith.addf %48, %49 : vector<1x4xf32>
    %51 = math.rsqrt %50 : vector<1x4xf32>
    %52 = vector.broadcast %44 : vector<1x4xf32> to vector<64x4xf32>
    %53 = arith.subf %9, %52 : vector<64x4xf32>
    %54 = vector.broadcast %51 : vector<1x4xf32> to vector<64x4xf32>
    %55 = arith.mulf %53, %54 : vector<64x4xf32>
    %cst_26 = arith.constant 0.000000e+00 : f32
    %56 = vector.broadcast %cst_26 : f32 to vector<64x4xf32>
    %57 = arith.maximumf %55, %56 : vector<64x4xf32>
    %58 = vector.shape_cast %57 : vector<64x4xf32> to vector<8x8x4xf32>
    %59 = vector.broadcast %44 : vector<1x4xf32> to vector<64x4xf32>
    %60 = arith.subf %10, %59 : vector<64x4xf32>
    %61 = vector.broadcast %51 : vector<1x4xf32> to vector<64x4xf32>
    %62 = arith.mulf %60, %61 : vector<64x4xf32>
    %cst_27 = arith.constant 0.000000e+00 : f32
    %63 = vector.broadcast %cst_27 : f32 to vector<64x4xf32>
    %64 = arith.maximumf %62, %63 : vector<64x4xf32>
    %65 = vector.shape_cast %64 : vector<64x4xf32> to vector<8x8x4xf32>
    %66 = vector.broadcast %44 : vector<1x4xf32> to vector<64x4xf32>
    %67 = arith.subf %11, %66 : vector<64x4xf32>
    %68 = vector.broadcast %51 : vector<1x4xf32> to vector<64x4xf32>
    %69 = arith.mulf %67, %68 : vector<64x4xf32>
    %cst_28 = arith.constant 0.000000e+00 : f32
    %70 = vector.broadcast %cst_28 : f32 to vector<64x4xf32>
    %71 = arith.maximumf %69, %70 : vector<64x4xf32>
    %72 = vector.shape_cast %71 : vector<64x4xf32> to vector<8x8x4xf32>
    %73 = vector.broadcast %44 : vector<1x4xf32> to vector<64x4xf32>
    %74 = arith.subf %12, %73 : vector<64x4xf32>
    %75 = vector.broadcast %51 : vector<1x4xf32> to vector<64x4xf32>
    %76 = arith.mulf %74, %75 : vector<64x4xf32>
    %cst_29 = arith.constant 0.000000e+00 : f32
    %77 = vector.broadcast %cst_29 : f32 to vector<64x4xf32>
    %78 = arith.maximumf %76, %77 : vector<64x4xf32>
    %79 = vector.shape_cast %78 : vector<64x4xf32> to vector<8x8x4xf32>
    %80 = vector.shape_cast %58 : vector<8x8x4xf32> to vector<8x8x1x4xf32>
    %81 = vector.shape_cast %65 : vector<8x8x4xf32> to vector<8x8x1x4xf32>
    %82 = tpu.concatenate %80, %81 in 2 : vector<8x8x1x4xf32>, vector<8x8x1x4xf32> -> vector<8x8x2x4xf32>
    %83 = vector.shape_cast %82 : vector<8x8x2x4xf32> to vector<8x16x4xf32>
    %84 = vector.shape_cast %72 : vector<8x8x4xf32> to vector<8x8x1x4xf32>
    %85 = vector.shape_cast %79 : vector<8x8x4xf32> to vector<8x8x1x4xf32>
    %86 = tpu.concatenate %84, %85 in 2 : vector<8x8x1x4xf32>, vector<8x8x1x4xf32> -> vector<8x8x2x4xf32>
    %87 = vector.shape_cast %86 : vector<8x8x2x4xf32> to vector<8x16x4xf32>
    %88 = vector.shape_cast %83 : vector<8x16x4xf32> to vector<8x1x16x4xf32>
    %89 = vector.shape_cast %87 : vector<8x16x4xf32> to vector<8x1x16x4xf32>
    %90 = tpu.concatenate %88, %89 in 1 : vector<8x1x16x4xf32>, vector<8x1x16x4xf32> -> vector<8x2x16x4xf32>
    %91 = vector.shape_cast %90 : vector<8x2x16x4xf32> to vector<16x16x4xf32>
    %c0_30 = arith.constant 0 : index
    %c0_31 = arith.constant 0 : index
    %c0_32 = arith.constant 0 : index
    %c0_33 = arith.constant 0 : index
    %92 = vector.load %arg2[%c0_30, %c0_31, %c0_32, %c0_33] : memref<1x16x16x4xf32, #tpu.memory_space<vmem>>, vector<1x16x16x4xf32>
    %93 = vector.shape_cast %92 : vector<1x16x16x4xf32> to vector<16x16x4xf32>
    %94 = tpu.concatenate %93, %91 in 2 : vector<16x16x4xf32>, vector<16x16x4xf32> -> vector<16x16x8xf32>
    %c1 = arith.constant 1 : index
    %c1_34 = arith.constant 1 : index
    %c0_35 = arith.constant 0 : index
    %95 = vector.load %arg7[%c1, %c1_34, %c0_35] : memref<18x18x8xf32, #tpu.memory_space<vmem>>, vector<16x16x8xf32>
    tpu.vector_store %arg7[%c1, %c1_34, %c0_35], %94 {strides = array<i32>} : memref<18x18x8xf32, #tpu.memory_space<vmem>>, vector<16x16x8xf32>,
    %c0_36 = arith.constant 0 : index
    %c0_37 = arith.constant 0 : index
    %c0_38 = arith.constant 0 : index
    %96 = vector.load %arg7[%c0_36, %c0_37, %c0_38] : memref<18x18x8xf32, #tpu.memory_space<vmem>>, vector<16x16x8xf32>
    %97 = vector.shape_cast %96 : vector<16x16x8xf32> to vector<256x8xf32>
    %c0_39 = arith.constant 0 : index
    %c1_40 = arith.constant 1 : index
    %c0_41 = arith.constant 0 : index
    %98 = vector.load %arg7[%c0_39, %c1_40, %c0_41] : memref<18x18x8xf32, #tpu.memory_space<vmem>>, vector<16x16x8xf32>
    %99 = vector.shape_cast %98 : vector<16x16x8xf32> to vector<256x8xf32>
    %c0_42 = arith.constant 0 : index
    %c2 = arith.constant 2 : index
    %c0_43 = arith.constant 0 : index
    %100 = vector.load %arg7[%c0_42, %c2, %c0_43] : memref<18x18x8xf32, #tpu.memory_space<vmem>>, vector<16x16x8xf32>
    %101 = vector.shape_cast %100 : vector<16x16x8xf32> to vector<256x8xf32>
    %c1_44 = arith.constant 1 : index
    %c0_45 = arith.constant 0 : index
    %c0_46 = arith.constant 0 : index
    %102 = vector.load %arg7[%c1_44, %c0_45, %c0_46] : memref<18x18x8xf32, #tpu.memory_space<vmem>>, vector<16x16x8xf32>
    %103 = vector.shape_cast %102 : vector<16x16x8xf32> to vector<256x8xf32>
    %c1_47 = arith.constant 1 : index
    %c1_48 = arith.constant 1 : index
    %c0_49 = arith.constant 0 : index
    %104 = vector.load %arg7[%c1_47, %c1_48, %c0_49] : memref<18x18x8xf32, #tpu.memory_space<vmem>>, vector<16x16x8xf32>
    %105 = vector.shape_cast %104 : vector<16x16x8xf32> to vector<256x8xf32>
    %c1_50 = arith.constant 1 : index
    %c2_51 = arith.constant 2 : index
    %c0_52 = arith.constant 0 : index
    %106 = vector.load %arg7[%c1_50, %c2_51, %c0_52] : memref<18x18x8xf32, #tpu.memory_space<vmem>>, vector<16x16x8xf32>
    %107 = vector.shape_cast %106 : vector<16x16x8xf32> to vector<256x8xf32>
    %c2_53 = arith.constant 2 : index
    %c0_54 = arith.constant 0 : index
    %c0_55 = arith.constant 0 : index
    %108 = vector.load %arg7[%c2_53, %c0_54, %c0_55] : memref<18x18x8xf32, #tpu.memory_space<vmem>>, vector<16x16x8xf32>
    %109 = vector.shape_cast %108 : vector<16x16x8xf32> to vector<256x8xf32>
    %c2_56 = arith.constant 2 : index
    %c1_57 = arith.constant 1 : index
    %c0_58 = arith.constant 0 : index
    %110 = vector.load %arg7[%c2_56, %c1_57, %c0_58] : memref<18x18x8xf32, #tpu.memory_space<vmem>>, vector<16x16x8xf32>
    %111 = vector.shape_cast %110 : vector<16x16x8xf32> to vector<256x8xf32>
    %c2_59 = arith.constant 2 : index
    %c2_60 = arith.constant 2 : index
    %c0_61 = arith.constant 0 : index
    %112 = vector.load %arg7[%c2_59, %c2_60, %c0_61] : memref<18x18x8xf32, #tpu.memory_space<vmem>>, vector<16x16x8xf32>
    %113 = vector.shape_cast %112 : vector<16x16x8xf32> to vector<256x8xf32>
    %114 = tpu.concatenate %97, %99, %101, %103, %105, %107, %109, %111, %113 in 1 : vector<256x8xf32>, vector<256x8xf32>, vector<256x8xf32>, vector<256x8xf32>, vector<256x8xf32>, vector<256x8xf32>, vector<256x8xf32>, vector<256x8xf32>, vector<256x8xf32> -> vector<256x72xf32>
    %c0_62 = arith.constant 0 : index
    %c0_63 = arith.constant 0 : index
    %115 = vector.load %arg4[%c0_62, %c0_63] : memref<72x4xf32, #tpu.memory_space<vmem>>, vector<72x4xf32>
    %cst_64 = arith.constant dense<0.000000e+00> : vector<256x4xf32>
    %116 = tpu.matmul %114, %115, %cst_64 {dimension_numbers = #tpu.dot_dimension_numbers<[1], [0], [0], [1], [0, 0, 1, 1], [], []>} : vector<256x72xf32>, vector<72x4xf32>, vector<256x4xf32> -> vector<256x4xf32>
    %cst_65 = arith.constant dense<0.000000e+00> : vector<4xf32>
    %117 = vector.multi_reduction <add>, %116, %cst_65 [0] : vector<256x4xf32> to vector<4xf32>
    %118 = vector.shape_cast %117 : vector<4xf32> to vector<1x4xf32>
    %cst_66 = arith.constant 2.560000e+02 : f32
    %119 = vector.broadcast %cst_66 : f32 to vector<1x4xf32>
    %120 = arith.divf %118, %119 : vector<1x4xf32>
    %121 = arith.mulf %116, %116 : vector<256x4xf32>
    %cst_67 = arith.constant dense<0.000000e+00> : vector<4xf32>
    %122 = vector.multi_reduction <add>, %121, %cst_67 [0] : vector<256x4xf32> to vector<4xf32>
    %123 = vector.shape_cast %122 : vector<4xf32> to vector<1x4xf32>
    %cst_68 = arith.constant 2.560000e+02 : f32
    %124 = vector.broadcast %cst_68 : f32 to vector<1x4xf32>
    %125 = arith.divf %123, %124 : vector<1x4xf32>
    %126 = arith.mulf %120, %120 : vector<1x4xf32>
    %127 = arith.subf %125, %126 : vector<1x4xf32>
    %128 = vector.broadcast %120 : vector<1x4xf32> to vector<256x4xf32>
    %129 = arith.subf %116, %128 : vector<256x4xf32>
    %cst_69 = arith.constant 9.99999974E-6 : f32
    %130 = vector.broadcast %cst_69 : f32 to vector<1x4xf32>
    %131 = arith.addf %127, %130 : vector<1x4xf32>
    %132 = math.rsqrt %131 : vector<1x4xf32>
    %133 = vector.broadcast %132 : vector<1x4xf32> to vector<256x4xf32>
    %134 = arith.mulf %129, %133 : vector<256x4xf32>
    %cst_70 = arith.constant 0.000000e+00 : f32
    %135 = vector.broadcast %cst_70 : f32 to vector<256x4xf32>
    %136 = arith.maximumf %134, %135 : vector<256x4xf32>
    %137 = vector.shape_cast %136 : vector<256x4xf32> to vector<16x16x4xf32>
    %c1_71 = arith.constant 1 : index
    %c1_72 = arith.constant 1 : index
    %c0_73 = arith.constant 0 : index
    %138 = vector.load %arg8[%c1_71, %c1_72, %c0_73] : memref<18x18x4xf32, #tpu.memory_space<vmem>>, vector<16x16x4xf32>
    tpu.vector_store %arg8[%c1_71, %c1_72, %c0_73], %137 {strides = array<i32>} : memref<18x18x4xf32, #tpu.memory_space<vmem>>, vector<16x16x4xf32>,
    %c0_74 = arith.constant 0 : index
    %c0_75 = arith.constant 0 : index
    %c0_76 = arith.constant 0 : index
    %139 = vector.load %arg8[%c0_74, %c0_75, %c0_76] : memref<18x18x4xf32, #tpu.memory_space<vmem>>, vector<16x16x4xf32>
    %140 = vector.shape_cast %139 : vector<16x16x4xf32> to vector<256x4xf32>
    %c0_77 = arith.constant 0 : index
    %c1_78 = arith.constant 1 : index
    %c0_79 = arith.constant 0 : index
    %141 = vector.load %arg8[%c0_77, %c1_78, %c0_79] : memref<18x18x4xf32, #tpu.memory_space<vmem>>, vector<16x16x4xf32>
    %142 = vector.shape_cast %141 : vector<16x16x4xf32> to vector<256x4xf32>
    %c0_80 = arith.constant 0 : index
    %c2_81 = arith.constant 2 : index
    %c0_82 = arith.constant 0 : index
    %143 = vector.load %arg8[%c0_80, %c2_81, %c0_82] : memref<18x18x4xf32, #tpu.memory_space<vmem>>, vector<16x16x4xf32>
    %144 = vector.shape_cast %143 : vector<16x16x4xf32> to vector<256x4xf32>
    %c1_83 = arith.constant 1 : index
    %c0_84 = arith.constant 0 : index
    %c0_85 = arith.constant 0 : index
    %145 = vector.load %arg8[%c1_83, %c0_84, %c0_85] : memref<18x18x4xf32, #tpu.memory_space<vmem>>, vector<16x16x4xf32>
    %146 = vector.shape_cast %145 : vector<16x16x4xf32> to vector<256x4xf32>
    %c1_86 = arith.constant 1 : index
    %c1_87 = arith.constant 1 : index
    %c0_88 = arith.constant 0 : index
    %147 = vector.load %arg8[%c1_86, %c1_87, %c0_88] : memref<18x18x4xf32, #tpu.memory_space<vmem>>, vector<16x16x4xf32>
    %148 = vector.shape_cast %147 : vector<16x16x4xf32> to vector<256x4xf32>
    %c1_89 = arith.constant 1 : index
    %c2_90 = arith.constant 2 : index
    %c0_91 = arith.constant 0 : index
    %149 = vector.load %arg8[%c1_89, %c2_90, %c0_91] : memref<18x18x4xf32, #tpu.memory_space<vmem>>, vector<16x16x4xf32>
    %150 = vector.shape_cast %149 : vector<16x16x4xf32> to vector<256x4xf32>
    %c2_92 = arith.constant 2 : index
    %c0_93 = arith.constant 0 : index
    %c0_94 = arith.constant 0 : index
    %151 = vector.load %arg8[%c2_92, %c0_93, %c0_94] : memref<18x18x4xf32, #tpu.memory_space<vmem>>, vector<16x16x4xf32>
    %152 = vector.shape_cast %151 : vector<16x16x4xf32> to vector<256x4xf32>
    %c2_95 = arith.constant 2 : index
    %c1_96 = arith.constant 1 : index
    %c0_97 = arith.constant 0 : index
    %153 = vector.load %arg8[%c2_95, %c1_96, %c0_97] : memref<18x18x4xf32, #tpu.memory_space<vmem>>, vector<16x16x4xf32>
    %154 = vector.shape_cast %153 : vector<16x16x4xf32> to vector<256x4xf32>
    %c2_98 = arith.constant 2 : index
    %c2_99 = arith.constant 2 : index
    %c0_100 = arith.constant 0 : index
    %155 = vector.load %arg8[%c2_98, %c2_99, %c0_100] : memref<18x18x4xf32, #tpu.memory_space<vmem>>, vector<16x16x4xf32>
    %156 = vector.shape_cast %155 : vector<16x16x4xf32> to vector<256x4xf32>
    %157 = tpu.concatenate %140, %142, %144, %146, %148, %150, %152, %154, %156 in 1 : vector<256x4xf32>, vector<256x4xf32>, vector<256x4xf32>, vector<256x4xf32>, vector<256x4xf32>, vector<256x4xf32>, vector<256x4xf32>, vector<256x4xf32>, vector<256x4xf32> -> vector<256x36xf32>
    %c0_101 = arith.constant 0 : index
    %c0_102 = arith.constant 0 : index
    %158 = vector.load %arg5[%c0_101, %c0_102] : memref<36x4xf32, #tpu.memory_space<vmem>>, vector<36x4xf32>
    %cst_103 = arith.constant dense<0.000000e+00> : vector<256x4xf32>
    %159 = tpu.matmul %157, %158, %cst_103 {dimension_numbers = #tpu.dot_dimension_numbers<[1], [0], [0], [1], [0, 0, 1, 1], [], []>} : vector<256x36xf32>, vector<36x4xf32>, vector<256x4xf32> -> vector<256x4xf32>
    %cst_104 = arith.constant dense<0.000000e+00> : vector<4xf32>
    %160 = vector.multi_reduction <add>, %159, %cst_104 [0] : vector<256x4xf32> to vector<4xf32>
    %161 = vector.shape_cast %160 : vector<4xf32> to vector<1x4xf32>
    %cst_105 = arith.constant 2.560000e+02 : f32
    %162 = vector.broadcast %cst_105 : f32 to vector<1x4xf32>
    %163 = arith.divf %161, %162 : vector<1x4xf32>
    %164 = arith.mulf %159, %159 : vector<256x4xf32>
    %cst_106 = arith.constant dense<0.000000e+00> : vector<4xf32>
    %165 = vector.multi_reduction <add>, %164, %cst_106 [0] : vector<256x4xf32> to vector<4xf32>
    %166 = vector.shape_cast %165 : vector<4xf32> to vector<1x4xf32>
    %cst_107 = arith.constant 2.560000e+02 : f32
    %167 = vector.broadcast %cst_107 : f32 to vector<1x4xf32>
    %168 = arith.divf %166, %167 : vector<1x4xf32>
    %169 = arith.mulf %163, %163 : vector<1x4xf32>
    %170 = arith.subf %168, %169 : vector<1x4xf32>
    %171 = vector.broadcast %163 : vector<1x4xf32> to vector<256x4xf32>
    %172 = arith.subf %159, %171 : vector<256x4xf32>
    %cst_108 = arith.constant 9.99999974E-6 : f32
    %173 = vector.broadcast %cst_108 : f32 to vector<1x4xf32>
    %174 = arith.addf %170, %173 : vector<1x4xf32>
    %175 = math.rsqrt %174 : vector<1x4xf32>
    %176 = vector.broadcast %175 : vector<1x4xf32> to vector<256x4xf32>
    %177 = arith.mulf %172, %176 : vector<256x4xf32>
    %cst_109 = arith.constant 0.000000e+00 : f32
    %178 = vector.broadcast %cst_109 : f32 to vector<256x4xf32>
    %179 = arith.maximumf %177, %178 : vector<256x4xf32>
    %180 = vector.shape_cast %179 : vector<256x4xf32> to vector<16x16x4xf32>
    %c0_110 = arith.constant 0 : index
    %c0_111 = arith.constant 0 : index
    %c0_112 = arith.constant 0 : index
    %c0_113 = arith.constant 0 : index
    %181 = vector.load %arg6[%c0_110, %c0_111, %c0_112, %c0_113] : memref<1x16x16x4xf32, #tpu.memory_space<vmem>>, vector<1x16x16x4xf32>
    %182 = vector.shape_cast %181 : vector<1x16x16x4xf32> to vector<16x16x4xf32>
    %183 = vector.shape_cast %180 : vector<16x16x4xf32> to vector<1x16x16x4xf32>
    tpu.vector_store %arg6[%c0_110, %c0_111, %c0_112, %c0_113], %183 {strides = array<i32>} : memref<1x16x16x4xf32, #tpu.memory_space<vmem>>, vector<1x16x16x4xf32>,
    return
  }
  func.func @transform_0(%arg0: i32) -> (i32, i32, i32, i32) {
    %c0_i32 = arith.constant 0 : i32
    %c0_i32_0 = arith.constant 0 : i32
    %c0_i32_1 = arith.constant 0 : i32
    %c0_i32_2 = arith.constant 0 : i32
    return %arg0, %c0_i32, %c0_i32_0, %c0_i32_1 : i32, i32, i32, i32
  }
  func.func @transform_1(%arg0: i32) -> (i32, i32, i32, i32) {
    %c0_i32 = arith.constant 0 : i32
    %c0_i32_0 = arith.constant 0 : i32
    %c0_i32_1 = arith.constant 0 : i32
    %c0_i32_2 = arith.constant 0 : i32
    return %arg0, %c0_i32, %c0_i32_0, %c0_i32_1 : i32, i32, i32, i32
  }
  func.func @transform_2(%arg0: i32) -> (i32, i32) {
    %c0_i32 = arith.constant 0 : i32
    %c0_i32_0 = arith.constant 0 : i32
    %c0_i32_1 = arith.constant 0 : i32
    return %c0_i32, %c0_i32_0 : i32, i32
  }
  func.func @transform_3(%arg0: i32) -> (i32, i32) {
    %c0_i32 = arith.constant 0 : i32
    %c0_i32_0 = arith.constant 0 : i32
    %c0_i32_1 = arith.constant 0 : i32
    return %c0_i32, %c0_i32_0 : i32, i32
  }
  func.func @transform_4(%arg0: i32) -> (i32, i32) {
    %c0_i32 = arith.constant 0 : i32
    %c0_i32_0 = arith.constant 0 : i32
    %c0_i32_1 = arith.constant 0 : i32
    return %c0_i32, %c0_i32_0 : i32, i32
  }
  func.func @transform_5(%arg0: i32) -> (i32, i32, i32, i32) {
    %c0_i32 = arith.constant 0 : i32
    %c0_i32_0 = arith.constant 0 : i32
    %c0_i32_1 = arith.constant 0 : i32
    %c0_i32_2 = arith.constant 0 : i32
    return %arg0, %c0_i32, %c0_i32_0, %c0_i32_1 : i32, i32, i32, i32
  }
}

</mosaic_0001>

<bundles_post_ra>
// kernel: unet_up_block.1
= control target key start
LH: loop header
LB: loop body
LE: loop exit
PB: predicated region body
PF: predicated region fallthrough
CT: control target
= control target key end

     0   :  { %s9516_s18 = smov 0   ;;  %s15625_s0 = inlined_call_operand.vmem [shape: f32[2,8,8,8], index: 0, kind: input, shape index: {}]   ;;  %s15626_s1 = inlined_call_operand.vmem [shape: f32[2,16,16,4], index: 1, kind: input, shape index: {}]   ;;  %s15627_s2 = inlined_call_operand.vmem [shape: f32[8,16], index: 2, kind: input, shape index: {}]   ;;  %s15628_s3 = inlined_call_operand.vmem [shape: f32[72,4], index: 3, kind: input, shape index: {}]   ;;  %s15629_s4 = inlined_call_operand.vmem [shape: f32[36,4], index: 4, kind: input, shape index: {}]   ;;  %s15630_s5 = inlined_call_operand.vmem [shape: f32[2,16,16,4], index: 5, kind: output, shape index: {}]  }
   0x1 LB: > { %s9069_s19 = sadd.s32 4294967295, %s9466_s18   ;;  %p9073_p0 = scmp.ge.s32.totalorder %s9466_s18, 1  ;;  %s9466_s18 = sphi %s9516_s18, %s15_s18  }
   0x2   : > { %p197_p1 = scmp.lt.s32.totalorder %s9466_s18, 3 }
   0x4   : > { %p198_p2 = pnand %p9073_p0, %p197_p1 }
   0x6   : > { %201 = sbr.rel (%p198_p2) target bundleno = 2836 (0xb14), region = 40 }
   0xd   : > { %v365_v0 = vld [vmem:[%s15627_s2] sm:$0xff]  ;;  %p230_p3 = scmp.lt.s32.totalorder %s9069_s19, 1  ;;  %vm245_vm0 = vcmask 64512   ;;  %v15631_v9 = vmov 0.0   ;;  %vm248_vm1 = vcmask 58368   ;;  %vm301_vm2 = vcmask 31744  }
   0xe   : > { %9245 = vmatprep.subr.mxu0 %v365_v0  ;;  %246 = vst.msk [vmem:[#allocation2] sm:$0xff] %vm245_vm0, %v15631_v9  ;;  %247 = vst.msk [vmem:[#allocation2 + $0x8] sm:$0xff] %vm245_vm0, %v15631_v9  ;;  %s9469_s26 = smov 8   ;;  %s9470_s27 = smov 16   ;;  %vm600_vm3 = vcmask 97344   ;;  %vm547_vm4 = vcmask 64544  }
   0xf   : > { %9246 = vmatpush3.msra.mxu0 %v365_v0  ;;  %s16220_s19 = smov (!%p230_p3, %s9069_s19), 1  ;;  %250 = vst.msk [vmem:[#allocation2 + $0x18] sm:$0xff] %vm245_vm0, %v15631_v9  ;;  %251 = vst.msk [vmem:[#allocation2 + $0x20] sm:$0xff] %vm245_vm0, %v15631_v9  ;;  %vm653_vm5 = vcmask 130144   ;;  %s9471_s28 = smov 120   ;;  %vm2149_vm6 = vcmask 1040384  }
  0x10   : > { %s9155_s22 = sshll.u32 %s16220_s19, 6  ;;  %253 = vst.msk [vmem:[#allocation2 + $0x30] sm:$0xff] %vm245_vm0, %v15631_v9  ;;  %254 = vst.msk [vmem:[#allocation2 + $0x38] sm:$0xff] %vm245_vm0, %v15631_v9  ;;  %s9472_s29 = smov 124   ;;  %vm5928_vm7 = vcmask 130048   ;;  %vm5961_vm8 = vcmask 195584  }
  0x11   : > { %s234_s25 = scalar_lea.vmem %s15625_s0, %s9155_s22  ;;  %256 = vst.msk [vmem:[#allocation2 + $0x48] sm:$0xff] %vm245_vm0, %v15631_v9  ;;  %257 = vst.msk [vmem:[#allocation2 + $0x50] sm:$0xff] %vm245_vm0, %v15631_v9  ;;  %s9473_s30 = smov 116   ;;  %vm5994_vm9 = vcmask 261120   ;;  %vm6027_vm10 = vcmask 326656   ;;  %vm6060_vm11 = vcmask 392192  }
  0x12   : > { %v357_v1 = vld [vmem:[%s234_s25] sm:$0xff]  ;;  %v358_v2 = vld [vmem:[%s234_s25 + $0x8] sm:$0xff]  ;;  %v359_v3 = vld [vmem:[%s234_s25 + $0x10] sm:$0xff]  ;;  %259 = vst.msk [vmem:[#allocation2 + $0x60] sm:$0xff] %vm245_vm0, %v15631_v9  ;;  %s9474_s6 = smov 4   ;;  %s9475_s7 = smov 12  }
  0x13   : > { %9247 = vmatprep.mubr.msk.f32.mxu0 %vm245_vm0, %v357_v1  ;;  %v360_v4 = vld [vmem:[%s234_s25 + $0x18] sm:$0xff]  ;;  %v361_v5 = vld [vmem:[%s234_s25 + $0x20] sm:$0xff]  ;;  %v362_v6 = vld [vmem:[%s234_s25 + $0x28] sm:$0xff]  ;;  %260 = vst.msk [vmem:[#allocation2 + $0x68] sm:$0xff] %vm245_vm0, %v15631_v9  ;;  %s9156_s8 = sshll.u32 %s16220_s19, 8  ;;  %s9478_s12 = smov 24  }
  0x14   : > { %9248 = vmatmul.mubr.msk.f32.vlgmr.msra.gmra.mrb[0].mxu0 %vm245_vm0, %v358_v2  ;;  %v363_v7 = vld [vmem:[%s234_s25 + $0x30] sm:$0xff]  ;;  %v364_v8 = vld [vmem:[%s234_s25 + $0x38] sm:$0xff]  ;;  %262 = vst.msk [vmem:[#allocation2 + $0x78] sm:$0xff] %vm245_vm0, %v15631_v9  ;;  %263 = vst.msk [vmem:[#allocation2 + $0x80] sm:$0xff] %vm245_vm0, %v15631_v9  ;;  %s12149_s11 = scalar_lea.vmem %s15626_s1, %s9156_s8  ;;  %s9479_s13 = smov 32   ;;  %vm6093_vm12 = vcmask 457728  }
  0x15   : > { %9250 = vmatprep.mubr.msk.f32.mxu0 %vm245_vm0, %v359_v3  ;;  %265 = vst.msk [vmem:[#allocation2 + $0x90] sm:$0xff] %vm245_vm0, %v15631_v9  ;;  %266 = vst.msk [vmem:[#allocation2 + $0x98] sm:$0xff] %vm245_vm0, %v15631_v9  ;;  %v4615_v10 = vld [vmem:[#allocation2 + $0x1] sm:$0xff]  ;;  %s9480_s14 = smov 48   ;;  %s9481_s15 = smov 56   ;;  %vm6126_vm13 = vcmask 523264  }
  0x16   : > { %268 = vst.msk [vmem:[#allocation2 + $0xa8] sm:$0xff] %vm245_vm0, %v15631_v9  ;;  %269 = vst.msk [vmem:[#allocation2 + $0xb0] sm:$0xff] %vm245_vm0, %v15631_v9  ;;  %4904 = vrot.lane.b32.xlu0 %v4615_v10, %s9469_s26  ;;  %v4647_v12 = vld [vmem:[#allocation2 + $0x2] sm:$0xff]  ;;  %s9482_s16 = smov 40   ;;  %s9483_s17 = smov 64   ;;  %vm6168_vm14 = vcmask 588800  }
  0x17   : > { %271 = vst.msk [vmem:[#allocation2 + $0xc0] sm:$0xff] %vm245_vm0, %v15631_v9  ;;  %272 = vst.msk [vmem:[#allocation2 + $0xc8] sm:$0xff] %vm245_vm0, %v15631_v9  ;;  %vm304_vm15 = vcmask 25600  }
  0x18   : > { %9251 = vmatmul.mubr.msk.f32.gmra.mrb[2].mxu0 %vm245_vm0, %v360_v4  ;;  %274 = vst.msk [vmem:[#allocation2 + $0xd8] sm:$0xff] %vm245_vm0, %v15631_v9  ;;  %275 = vst.msk [vmem:[#allocation2 + $0xe0] sm:$0xff] %vm245_vm0, %v15631_v9 }
  0x19   : > { %9253 = vmatprep.mubr.msk.f32.mxu0 %vm245_vm0, %v361_v5  ;;  %277 = vst.msk [vmem:[#allocation2 + $0xf0] sm:$0xff] %vm245_vm0, %v15631_v9  ;;  %278 = vst.msk [vmem:[#allocation2 + $0xf8] sm:$0xff] %vm245_vm0, %v15631_v9 }
  0x1a   : > { %280 = vst.msk [vmem:[#allocation2 + $0x108] sm:$0xff] %vm245_vm0, %v15631_v9  ;;  %281 = vst.msk [vmem:[#allocation2 + $0x110] sm:$0xff] %vm245_vm0, %v15631_v9  ;;  %5032 = vrot.lane.b32.xlu0 %v4647_v12, %s9470_s27 }
  0x1b   : > { %283 = vst.msk [vmem:[#allocation2 + $0x120] sm:$0xff] %vm245_vm0, %v15631_v9  ;;  %284 = vst.msk [vmem:[#allocation2 + $0x128] sm:$0xff] %vm245_vm0, %v15631_v9 }
  0x1c   : > { %9254 = vmatmul.mubr.msk.f32.gmra.mrb[4].mxu0 %vm245_vm0, %v362_v6  ;;  %286 = vst.msk [vmem:[#allocation2 + $0x138] sm:$0xff] %vm245_vm0, %v15631_v9  ;;  %287 = vst.msk [vmem:[#allocation2 + $0x140] sm:$0xff] %vm245_vm0, %v15631_v9 }
  0x1d   : > { %9256 = vmatprep.mubr.msk.f32.mxu0 %vm245_vm0, %v363_v7  ;;  %289 = vst.msk [vmem:[#allocation2 + $0x150] sm:$0xff] %vm245_vm0, %v15631_v9  ;;  %290 = vst.msk [vmem:[#allocation2 + $0x158] sm:$0xff] %vm245_vm0, %v15631_v9 }
  0x1e   : > { %292 = vst.msk [vmem:[#allocation2 + $0x168] sm:$0xff] %vm245_vm0, %v15631_v9  ;;  %293 = vst.msk [vmem:[#allocation2 + $0x170] sm:$0xff] %vm245_vm0, %v15631_v9 }
  0x1f   : > { %295 = vst.msk [vmem:[#allocation2 + $0x180] sm:$0xff] %vm245_vm0, %v15631_v9  ;;  %296 = vst.msk [vmem:[#allocation2 + $0x188] sm:$0xff] %vm245_vm0, %v15631_v9 }
  0x20   : > { %9257 = vmatmul.mubr.msk.f32.gmra.mrb[6].mxu0 %vm245_vm0, %v364_v8  ;;  %298 = vst.msk [vmem:[#allocation2 + $0x198] sm:$0xff] %vm245_vm0, %v15631_v9  ;;  %299 = vst.msk [vmem:[#allocation2 + $0x1a0] sm:$0xff] %vm245_vm0, %v15631_v9 }
  0x21   : > { %249 = vst.msk [vmem:[#allocation2 + $0x10] sm:$0x3] %vm248_vm1, %v15631_v9  ;;  %252 = vst.msk [vmem:[#allocation2 + $0x28] sm:$0x3] %vm248_vm1, %v15631_v9 }
  0x22   : > { %255 = vst.msk [vmem:[#allocation2 + $0x40] sm:$0x3] %vm248_vm1, %v15631_v9  ;;  %258 = vst.msk [vmem:[#allocation2 + $0x58] sm:$0x3] %vm248_vm1, %v15631_v9 }
  0x23   : > { %261 = vst.msk [vmem:[#allocation2 + $0x70] sm:$0x3] %vm248_vm1, %v15631_v9  ;;  %264 = vst.msk [vmem:[#allocation2 + $0x88] sm:$0x3] %vm248_vm1, %v15631_v9 }
  0x24   : > { %267 = vst.msk [vmem:[#allocation2 + $0xa0] sm:$0x3] %vm248_vm1, %v15631_v9  ;;  %270 = vst.msk [vmem:[#allocation2 + $0xb8] sm:$0x3] %vm248_vm1, %v15631_v9 }
  0x25   : > { %273 = vst.msk [vmem:[#allocation2 + $0xd0] sm:$0x3] %vm248_vm1, %v15631_v9  ;;  %276 = vst.msk [vmem:[#allocation2 + $0xe8] sm:$0x3] %vm248_vm1, %v15631_v9 }
  0x26   : > { %279 = vst.msk [vmem:[#allocation2 + $0x100] sm:$0x3] %vm248_vm1, %v15631_v9  ;;  %282 = vst.msk [vmem:[#allocation2 + $0x118] sm:$0x3] %vm248_vm1, %v15631_v9 }
  0x27   : > { %285 = vst.msk [vmem:[#allocation2 + $0x130] sm:$0x3] %vm248_vm1, %v15631_v9  ;;  %288 = vst.msk [vmem:[#allocation2 + $0x148] sm:$0x3] %vm248_vm1, %v15631_v9 }
  0x28   : > { %291 = vst.msk [vmem:[#allocation2 + $0x160] sm:$0x3] %vm248_vm1, %v15631_v9  ;;  %294 = vst.msk [vmem:[#allocation2 + $0x178] sm:$0x3] %vm248_vm1, %v15631_v9  ;;  %v4616_v11 = vld [vmem:[#allocation2 + $0x9] sm:$0xff] }
  0x29   : > { %297 = vst.msk [vmem:[#allocation2 + $0x190] sm:$0x3] %vm248_vm1, %v15631_v9  ;;  %300 = vst.msk [vmem:[#allocation2 + $0x1a8] sm:$0x3] %vm248_vm1, %v15631_v9  ;;  %4906 = vrot.lane.b32.xlu1 %v4616_v11, %s9469_s26  ;;  %v4648_v13 = vld [vmem:[#allocation2 + $0xa] sm:$0xff]  ;;  %vm8469_vm1 = vcmask 1043456  }
  0x2a   : > { %302 = vst.msk [vmem:[#allocation3] sm:$0xff] %vm301_vm2, %v15631_v9  ;;  %303 = vst.msk [vmem:[#allocation3 + $0x8] sm:$0xff] %vm301_vm2, %v15631_v9 }
  0x2b   : > { %306 = vst.msk [vmem:[#allocation3 + $0x18] sm:$0xff] %vm301_vm2, %v15631_v9  ;;  %307 = vst.msk [vmem:[#allocation3 + $0x20] sm:$0xff] %vm301_vm2, %v15631_v9 }
  0x2c   : > { %309 = vst.msk [vmem:[#allocation3 + $0x30] sm:$0xff] %vm301_vm2, %v15631_v9  ;;  %310 = vst.msk [vmem:[#allocation3 + $0x38] sm:$0xff] %vm301_vm2, %v15631_v9 }
  0x2d   : > { %312 = vst.msk [vmem:[#allocation3 + $0x48] sm:$0xff] %vm301_vm2, %v15631_v9  ;;  %313 = vst.msk [vmem:[#allocation3 + $0x50] sm:$0xff] %vm301_vm2, %v15631_v9  ;;  %5034 = vrot.lane.b32.xlu1 %v4648_v13, %s9470_s27 }
  0x2e   : > { %315 = vst.msk [vmem:[#allocation3 + $0x60] sm:$0xff] %vm301_vm2, %v15631_v9  ;;  %316 = vst.msk [vmem:[#allocation3 + $0x68] sm:$0xff] %vm301_vm2, %v15631_v9 }
  0x2f   : > { %318 = vst.msk [vmem:[#allocation3 + $0x78] sm:$0xff] %vm301_vm2, %v15631_v9  ;;  %319 = vst.msk [vmem:[#allocation3 + $0x80] sm:$0xff] %vm301_vm2, %v15631_v9 }
  0x30   : > { %321 = vst.msk [vmem:[#allocation3 + $0x90] sm:$0xff] %vm301_vm2, %v15631_v9  ;;  %322 = vst.msk [vmem:[#allocation3 + $0x98] sm:$0xff] %vm301_vm2, %v15631_v9 }
  0x31   : > { %324 = vst.msk [vmem:[#allocation3 + $0xa8] sm:$0xff] %vm301_vm2, %v15631_v9  ;;  %325 = vst.msk [vmem:[#allocation3 + $0xb0] sm:$0xff] %vm301_vm2, %v15631_v9 }
  0x32   : > { %327 = vst.msk [vmem:[#allocation3 + $0xc0] sm:$0xff] %vm301_vm2, %v15631_v9  ;;  %328 = vst.msk [vmem:[#allocation3 + $0xc8] sm:$0xff] %vm301_vm2, %v15631_v9 }
  0x33   : > { %330 = vst.msk [vmem:[#allocation3 + $0xd8] sm:$0xff] %vm301_vm2, %v15631_v9  ;;  %331 = vst.msk [vmem:[#allocation3 + $0xe0] sm:$0xff] %vm301_vm2, %v15631_v9 }
  0x34   : > { %333 = vst.msk [vmem:[#allocation3 + $0xf0] sm:$0xff] %vm301_vm2, %v15631_v9  ;;  %334 = vst.msk [vmem:[#allocation3 + $0xf8] sm:$0xff] %vm301_vm2, %v15631_v9 }
  0x35   : > { %336 = vst.msk [vmem:[#allocation3 + $0x108] sm:$0xff] %vm301_vm2, %v15631_v9  ;;  %337 = vst.msk [vmem:[#allocation3 + $0x110] sm:$0xff] %vm301_vm2, %v15631_v9 }
  0x36   : > { %339 = vst.msk [vmem:[#allocation3 + $0x120] sm:$0xff] %vm301_vm2, %v15631_v9  ;;  %340 = vst.msk [vmem:[#allocation3 + $0x128] sm:$0xff] %vm301_vm2, %v15631_v9 }
  0x37   : > { %342 = vst.msk [vmem:[#allocation3 + $0x138] sm:$0xff] %vm301_vm2, %v15631_v9  ;;  %343 = vst.msk [vmem:[#allocation3 + $0x140] sm:$0xff] %vm301_vm2, %v15631_v9 }
  0x38   : > { %345 = vst.msk [vmem:[#allocation3 + $0x150] sm:$0xff] %vm301_vm2, %v15631_v9  ;;  %346 = vst.msk [vmem:[#allocation3 + $0x158] sm:$0xff] %vm301_vm2, %v15631_v9 }
  0x39   : > { %348 = vst.msk [vmem:[#allocation3 + $0x168] sm:$0xff] %vm301_vm2, %v15631_v9  ;;  %349 = vst.msk [vmem:[#allocation3 + $0x170] sm:$0xff] %vm301_vm2, %v15631_v9 }
  0x3a   : > { %351 = vst.msk [vmem:[#allocation3 + $0x180] sm:$0xff] %vm301_vm2, %v15631_v9  ;;  %352 = vst.msk [vmem:[#allocation3 + $0x188] sm:$0xff] %vm301_vm2, %v15631_v9 }
  0x3b   : > { %354 = vst.msk [vmem:[#allocation3 + $0x198] sm:$0xff] %vm301_vm2, %v15631_v9  ;;  %355 = vst.msk [vmem:[#allocation3 + $0x1a0] sm:$0xff] %vm301_vm2, %v15631_v9 }
  0xe7   : > { %v9725_v14 = vpop.f32.mrb[0].mxu0 }
  0xe8   : > { %v9729_v15 = vmul.f32 %v9725_v14, %v9725_v14  ;;  %v9731_v16 = vpop.f32.mrb[1].mxu0  ;;  %v602_v17 = vsel %vm600_vm3, %v9725_v14, 0.0  ;;  %v549_v18 = vsel %vm547_vm4, %v9725_v14, 0.0  ;;  %v655_v19 = vsel %vm653_vm5, %v9725_v14, 0.0 }
  0xe9   : > { %v9741_v20 = vmul.f32 %v9731_v16, %v9731_v16  ;;  %v601_v21 = vsel %vm600_vm3, %v9731_v16, 0.0  ;;  %v548_v22 = vsel %vm547_vm4, %v9731_v16, 0.0  ;;  %v654_v23 = vsel %vm653_vm5, %v9731_v16, 0.0 }
  0xea   : > { %v603_v24 = vadd.f32 %v602_v17, %v601_v21  ;;  %v550_v25 = vadd.f32 %v549_v18, %v548_v22  ;;  %v656_v26 = vadd.f32 %v655_v19, %v654_v23  ;;  %v628_v29 = vsel %vm600_vm3, %v9729_v15, 0.0 }
  0xeb   : > { %v9749_v27 = vpop.f32.mrb[2].mxu0  ;;  %v627_v28 = vsel %vm600_vm3, %v9741_v20, 0.0  ;;  %v680_v30 = vsel %vm653_vm5, %v9741_v20, 0.0  ;;  %v681_v31 = vsel %vm653_vm5, %v9729_v15, 0.0  ;;  %v9771_v36 = vsel %vm547_vm4, %v9741_v20, 0.0 }
  0xec   : > { %v9761_v32 = vmul.f32 %v9749_v27, %v9749_v27  ;;  %v9763_v33 = vpop.f32.mrb[3].mxu0  ;;  %v606_v34 = vsel %vm600_vm3, %v9749_v27, 0.0  ;;  %v553_v35 = vsel %vm547_vm4, %v9749_v27, 0.0  ;;  %v629_v44 = vadd.f32 %v628_v29, %v627_v28 }
  0xed   : > { %v9775_v37 = vmul.f32 %v9763_v33, %v9763_v33  ;;  %v604_v38 = vsel %vm600_vm3, %v9763_v33, 0.0  ;;  %v551_v39 = vsel %vm547_vm4, %v9763_v33, 0.0  ;;  %v657_v40 = vsel %vm653_vm5, %v9763_v33, 0.0 }
  0xee   : > { %v605_v41 = vadd.f32 %v604_v38, %v603_v24  ;;  %v552_v42 = vadd.f32 %v551_v39, %v550_v25  ;;  %v658_v43 = vadd.f32 %v657_v40, %v656_v26  ;;  %v659_v46 = vsel %vm653_vm5, %v9749_v27, 0.0 }
  0xef   : > { %v9783_v45 = vpop.f32.mrb[4].mxu0  ;;  %v630_v47 = vsel %vm600_vm3, %v9775_v37, 0.0  ;;  %v632_v48 = vsel %vm600_vm3, %v9761_v32, 0.0  ;;  %v682_v49 = vadd.f32 %v681_v31, %v680_v30  ;;  %v683_v54 = vsel %vm653_vm5, %v9775_v37, 0.0 }
  0xf0   : > { %15654 = vst [vmem:[#allocation4_spill] sm:$0xff] %v9783_v45  ;;  %v9791_v50 = vpop.f32.mrb[5].mxu0  ;;  %v607_v51 = vadd.f32 %v606_v34, %v605_v41  ;;  %v610_v52 = vsel %vm600_vm3, %v9783_v45, 0.0  ;;  %v554_v53 = vadd.f32 %v553_v35, %v552_v42  ;;  %v660_v58 = vadd.f32 %v659_v46, %v658_v43 }
  0xf1   : > { %15655 = vst [vmem:[#allocation5_spill] sm:$0xff] %v9791_v50  ;;  %v9799_v55 = vmul.f32 %v9791_v50, %v9791_v50  ;;  %v608_v56 = vsel %vm600_vm3, %v9791_v50, 0.0  ;;  %v555_v57 = vsel %vm547_vm4, %v9791_v50, 0.0  ;;  %v557_v61 = vsel %vm547_vm4, %v9783_v45, 0.0 }
  0xf2   : > { %v609_v59 = vadd.f32 %v608_v56, %v607_v51  ;;  %v556_v60 = vadd.f32 %v555_v57, %v554_v53  ;;  %v661_v62 = vsel %vm653_vm5, %v9791_v50, 0.0  ;;  %v663_v1 = vsel %vm653_vm5, %v9783_v45, 0.0 }
  0xf3   : > { %v9809_v63 = vpop.f32.mrb[6].mxu0  ;;  %v662_v0 = vadd.f32 %v661_v62, %v660_v58  ;;  %v9815_v2 = vmul.f32 %v9783_v45, %v9783_v45  ;;  %v631_v3 = vadd.f32 %v630_v47, %v629_v44  ;;  %v634_v8 = vsel %vm600_vm3, %v9799_v55, 0.0 }
  0xf4   : > { %15656 = vst [vmem:[#allocation6_spill] sm:$0xff] %v9809_v63  ;;  %v9817_v4 = vpop.f32.mrb[7].mxu0  ;;  %v611_v5 = vadd.f32 %v610_v52, %v609_v59  ;;  %v614_v6 = vsel %vm600_vm3, %v9809_v63, 0.0  ;;  %v558_v7 = vadd.f32 %v557_v61, %v556_v60  ;;  %v561_v19 = vsel %vm547_vm4, %v9809_v63, 0.0 }
  0xf5   : > { %15657 = vst [vmem:[#allocation7_spill] sm:$0xff] %v9817_v4  ;;  %v612_v10 = vsel %vm600_vm3, %v9817_v4, 0.0  ;;  %v559_v11 = vsel %vm547_vm4, %v9817_v4, 0.0  ;;  %v664_v12 = vadd.f32 %v663_v1, %v662_v0  ;;  %v665_v13 = vsel %vm653_vm5, %v9817_v4, 0.0 }
  0xf6   : > { %v613_v17 = vadd.f32 %v612_v10, %v611_v5  ;;  %v560_v18 = vadd.f32 %v559_v11, %v558_v7  ;;  %v9833_v21 = vmul.f32 %v9817_v4, %v9817_v4  ;;  %v667_v23 = vsel %vm653_vm5, %v9809_v63, 0.0 }
  0xf7   : > { %v666_v22 = vadd.f32 %v665_v13, %v664_v12  ;;  %v9839_v24 = vmul.f32 %v9809_v63, %v9809_v63  ;;  %v633_v25 = vadd.f32 %v632_v48, %v631_v3  ;;  %v636_v29 = vsel %vm600_vm3, %v9815_v2, 0.0 }
  0xf8   : > { %v615_v26 = vadd.f32 %v614_v6, %v613_v17  ;;  %v562_v28 = vadd.f32 %v561_v19, %v560_v18  ;;  %v684_v30 = vadd.f32 %v683_v54, %v682_v49  ;;  %v638_v35 = vsel %vm600_vm3, %v9833_v21, 0.0 }
  0xf9   : > { %v668_v31 = vadd.f32 %v667_v23, %v666_v22  ;;  %v635_v34 = vadd.f32 %v634_v8, %v633_v25  ;;  %v685_v38 = vsel %vm653_vm5, %v9761_v32, 0.0  ;;  %v687_v42 = vsel %vm653_vm5, %v9799_v55, 0.0 }
  0xfa   : > { %v616_v39 = vrot.slane %v615_v26, 4  ;;  %v563_v40 = vrot.slane %v562_v28, 4  ;;  %v686_v41 = vadd.f32 %v685_v38, %v684_v30  ;;  %v640_v46 = vsel %vm600_vm3, %v9839_v24, 0.0 }
  0xfb   : > { %v669_v43 = vrot.slane %v668_v31, 4  ;;  %v637_v44 = vadd.f32 %v636_v29, %v635_v34  ;;  %v689_v47 = vsel %vm653_vm5, %v9815_v2, 0.0  ;;  %v691_v52 = vsel %vm653_vm5, %v9833_v21, 0.0 }
  0xfc   : > { %v617_v48 = vadd.f32 %v616_v39, %v615_v26  ;;  %v564_v49 = vadd.f32 %v563_v40, %v562_v28  ;;  %v688_v51 = vadd.f32 %v687_v42, %v686_v41  ;;  %v575_v56 = vsel %vm547_vm4, %v9729_v15, 0.0 }
  0xfd   : > { %v670_v53 = vadd.f32 %v669_v43, %v668_v31  ;;  %v639_v54 = vadd.f32 %v638_v35, %v637_v44  ;;  %v577_v57 = vsel %vm547_vm4, %v9775_v37, 0.0  ;;  %v576_v61 = vadd.f32 %v575_v56, %v9771_v36 }
  0xfe   : > { %v618_v58 = vrot.slane %v617_v48, 2  ;;  %v565_v59 = vrot.slane %v564_v49, 2  ;;  %v690_v60 = vadd.f32 %v689_v47, %v688_v51  ;;  %v693_v1 = vsel %vm653_vm5, %v9839_v24, 0.0 }
  0xff   : > { %v671_v62 = vrot.slane %v670_v53, 2  ;;  %v641_v0 = vadd.f32 %v640_v46, %v639_v54  ;;  %v578_v7 = vadd.f32 %v577_v57, %v576_v61  ;;  %v579_v11 = vsel %vm547_vm4, %v9761_v32, 0.0 }
 0x100   : > { %v619_v3 = vadd.f32 %v618_v58, %v617_v48  ;;  %v566_v5 = vadd.f32 %v565_v59, %v564_v49  ;;  %v692_v6 = vadd.f32 %v691_v52, %v690_v60  ;;  %v581_v12 = vsel %vm547_vm4, %v9799_v55, 0.0 }
 0x101   : > { %v672_v8 = vadd.f32 %v671_v62, %v670_v53  ;;  %v642_v10 = vrot.slane %v641_v0, 4  ;;  %v580_v18 = vadd.f32 %v579_v11, %v578_v7  ;;  %v583_v30 = vsel %vm547_vm4, %v9815_v2, 0.0 }
 0x102   : > { %v620_v13 = vrot.slane %v619_v3, 1  ;;  %v567_v17 = vrot.slane %v566_v5, 1  ;;  %v694_v36 = vadd.f32 %v693_v1, %v692_v6  ;;  %v585_v31 = vsel %vm547_vm4, %v9833_v21, 0.0 }
 0x103   : > { %v673_v19 = vrot.slane %v672_v8, 1  ;;  %v643_v22 = vadd.f32 %v642_v10, %v641_v0  ;;  %v582_v28 = vadd.f32 %v581_v12, %v580_v18  ;;  %v495_v38 = vsel %vm301_vm2, %v9731_v16, 0.0 }
 0x104   : > { %v621_v23 = vadd.f32 %v620_v13, %v619_v3  ;;  %v568_v25 = vadd.f32 %v567_v17, %v566_v5  ;;  %v695_v26 = vrot.slane %v694_v36, 4  ;;  %v496_v40 = vsel %vm301_vm2, %v9725_v14, 0.0 }
 0x105   : > { %v644_v29 = vrot.slane %v643_v22, 2  ;;  %v584_v35 = vadd.f32 %v583_v30, %v582_v28  ;;  %v498_v41 = vsel %vm301_vm2, %v9763_v33, 0.0  ;;  %v674_v42 = vadd.f32 %v673_v19, %v672_v8 }
 0x106   : > { %623 = vrot.lane.b32.xlu1 %v621_v23, %s9471_s28  ;;  %570 = vrot.lane.b32.xlu0 %v568_v25, %s9472_s29  ;;  %v696_v34 = vadd.f32 %v695_v26, %v694_v36  ;;  %v497_v46 = vadd.f32 %v496_v40, %v495_v38  ;;  %v587_v48 = vsel %vm547_vm4, %v9839_v24, 0.0  ;;  %v500_v53 = vsel %vm301_vm2, %v9749_v27, 0.0 }
 0x107   : > { %v645_v39 = vadd.f32 %v644_v29, %v643_v22  ;;  %v586_v44 = vadd.f32 %v585_v31, %v584_v35  ;;  %v502_v56 = vsel %vm301_vm2, %v9791_v50, 0.0  ;;  %v525_v57 = vsel %vm301_vm2, %v9741_v20, 0.0  ;;  %v9910_v35 = vpop.permute.xlu1 %4906 }
 0x108   : > { %v697_v43 = vrot.slane %v696_v34, 2  ;;  %v499_v52 = vadd.f32 %v498_v41, %v497_v46  ;;  %v526_v58 = vsel %vm301_vm2, %v9729_v15, 0.0  ;;  %v528_v62 = vsel %vm301_vm2, %v9775_v37, 0.0  ;;  %15659 = vst [vmem:[#allocation9_spill] sm:$0xff] %v9910_v35 }
 0x109   : > { %v646_v47 = vrot.slane %v645_v39, 1  ;;  %v588_v51 = vadd.f32 %v587_v48, %v586_v44  ;;  %v527_v0 = vadd.f32 %v526_v58, %v525_v57  ;;  %v504_v6 = vsel %vm301_vm2, %v9783_v45, 0.0 }
 0x10a   : > { %676 = vrot.lane.b32.xlu0 %v674_v42, %s9473_s30  ;;  %v698_v49 = vadd.f32 %v697_v43, %v696_v34  ;;  %v501_v61 = vadd.f32 %v500_v53, %v499_v52  ;;  %v506_v20 = vsel %vm301_vm2, %v9817_v4, 0.0  ;;  %v530_v10 = vsel %vm301_vm2, %v9761_v32, 0.0  ;;  %v9908_v34 = vpop.permute.xlu0 %4904 }
 0x10b   : > { %v647_v54 = vadd.f32 %v646_v47, %v645_v39  ;;  %v589_v60 = vrot.slane %v588_v51, 4  ;;  %v529_v7 = vadd.f32 %v528_v62, %v527_v0  ;;  %v532_v37 = vsel %vm301_vm2, %v9799_v55, 0.0  ;;  %15658 = vst [vmem:[#allocation8_spill] sm:$0xff] %v9908_v34 }
 0x10c   : > { %v699_v59 = vrot.slane %v698_v49, 1  ;;  %v503_v3 = vadd.f32 %v502_v56, %v501_v61  ;;  %v508_v17 = vsel %vm301_vm2, %v9809_v63, 0.0  ;;  %v534_v22 = vsel %vm301_vm2, %v9815_v2, 0.0 }
 0x10d   : > { %649 = vrot.lane.b32.xlu1 %v647_v54, %s9471_s28  ;;  %v590_v1 = vadd.f32 %v589_v60, %v588_v51  ;;  %v531_v11 = vadd.f32 %v530_v10, %v529_v7  ;;  %v536_v23 = vsel %vm301_vm2, %v9833_v21, 0.0  ;;  %v538_v55 = vsel %vm301_vm2, %v9839_v24, 0.0  ;;  %v9914_v21 = vpop.permute.xlu1 %5034 }
 0x10e   : > { %v700_v5 = vadd.f32 %v699_v59, %v698_v49  ;;  %v505_v8 = vadd.f32 %v504_v6, %v503_v3  ;;  %v9912_v39 = vpop.permute.xlu0 %5032  ;;  %15661 = vst [vmem:[#allocation11_spill] sm:$0xff] %v9914_v21  ;;  %v713_v40 = vlaneseq  ;;  %vm8172_vm3 = vcmask 97280  }
 0x10f   : > { %v591_v15 = vrot.slane %v590_v1, 2  ;;  %v533_v36 = vadd.f32 %v532_v37, %v531_v11  ;;  %15660 = vst [vmem:[#allocation10_spill] sm:$0xff] %v9912_v39  ;;  %vm8237_vm4 = vcmask 162816   ;;  %vm8302_vm5 = vcmask 228352  }
 0x110   : > { %v507_v13 = vadd.f32 %v506_v20, %v505_v8  ;;  %v9916_v24 = vshrl.u32 %v713_v40, 7 }
 0x111   : > { %702 = vrot.lane.b32.xlu1 %v700_v5, %s9473_s30  ;;  %v592_v12 = vadd.f32 %v591_v15, %v590_v1  ;;  %v535_v32 = vadd.f32 %v534_v22, %v533_v36 }
 0x112   : > { %v509_v19 = vadd.f32 %v508_v17, %v507_v13  ;;  %15662 = vst [vmem:[#allocation12_spill] sm:$0xff] %v9916_v24  ;;  %v9919_v51 = vsub.s32 0, %v9916_v24 }
 0x113   : > { %v593_v18 = vrot.slane %v592_v12, 1  ;;  %v537_v26 = vadd.f32 %v536_v23, %v535_v32 }
 0x114   : > { %v510_v29 = vrot.slane %v509_v19, 4 }
 0x115   : > { %v594_v25 = vadd.f32 %v593_v18, %v592_v12  ;;  %v539_v28 = vadd.f32 %v538_v55, %v537_v26 }
 0x116   : > { %v511_v30 = vadd.f32 %v510_v29, %v509_v19  ;;  %v9476_v29 = vmov 1966171168  }
 0x117   : > { %596 = vrot.lane.b32.xlu0 %v594_v25, %s9472_s29  ;;  %v540_v41 = vrot.slane %v539_v28, 4 }
 0x118   : > { %v512_v31 = vrot.slane %v511_v30, 2 }
 0x119   : > { %v541_v46 = vadd.f32 %v540_v41, %v539_v28 }
 0x11a   : > { %v513_v2 = vadd.f32 %v512_v31, %v511_v30  ;;  %v847_v30 = vunpack.c.l.s4 %v9476_v29 }
 0x11b   : > { %v542_v53 = vrot.slane %v541_v46, 2 }
 0x11c   : > { %v514_v38 = vrot.slane %v513_v2, 1 }
 0x11d   : > { %v543_v57 = vadd.f32 %v542_v53, %v541_v46 }
 0x11e   : > { %v515_v42 = vadd.f32 %v514_v38, %v513_v2  ;;  %v848_v2 = vunpack.c.0.s8 %v847_v30 }
 0x11f   : > { %v544_v5 = vrot.slane %v543_v57, 1 }
 0x121   : > { %v545_v20 = vadd.f32 %v544_v5, %v543_v57 }
 0x178   : > { %v571_v43 = vpop.permute.xlu0 %570  ;;  %v624_v47 = vpop.permute.xlu1 %623 }
 0x179   : > { %v573_v44 = vadd.f32 %v571_v43, %v515_v42 }
 0x17b   : > { %v626_v48 = vadd.f32 %v624_v47, %v573_v44 }
 0x17c   : > { %v677_v49 = vpop.permute.xlu0 %676 }
 0x17d   : > { %v679_v52 = vadd.f32 %v677_v49, %v626_v48  ;;  %v9958_v49 = vsub.s32 %v848_v2, %v9916_v24 }
 0x17f   : > { %v707_v54 = vmul.f32 0.00390625, %v679_v52  ;;  %v650_v6 = vpop.permute.xlu1 %649 }
 0x181   : > { %v716_v56 = vrot.slane %v707_v54, %v9919_v51  ;;  %v709_v11 = vmul.f32 %v707_v54, %v707_v54 }
 0x183   : > { %746 = vrot.lane.b32.xlu0 %v716_v56, %s9474_s6  ;;  %v717_v58 = vsub.f32 %v9731_v16, %v716_v56  ;;  %v718_v59 = vsub.f32 %v9725_v14, %v716_v56  ;;  %v719_v60 = vsub.f32 %v9763_v33, %v716_v56  ;;  %v720_v61 = vsub.f32 %v9749_v27, %v716_v56  ;;  %v703_v10 = vpop.permute.xlu1 %702 }
 0x184   : > { %v721_v62 = vsub.f32 %v9791_v50, %v716_v56  ;;  %v722_v0 = vsub.f32 %v9783_v45, %v716_v56  ;;  %v723_v1 = vsub.f32 %v9817_v4, %v716_v56  ;;  %v724_v3 = vsub.f32 %v9809_v63, %v716_v56 }
 0x187   : > { %777 = vrot.lane.b32.xlu0 %v716_v56, %s9469_s26 }
 0x189   : > { %v597_v7 = vpop.permute.xlu0 %596 }
 0x18a   : > { %v599_v15 = vadd.f32 %v597_v7, %v545_v20 }
 0x18b   : > { %807 = vrot.lane.b32.xlu0 %v716_v56, %s9475_s7 }
 0x18c   : > { %v652_v8 = vadd.f32 %v650_v6, %v599_v15 }
 0x18e   : > { %v705_v37 = vadd.f32 %v703_v10, %v652_v8 }
 0x190   : > { %v708_v12 = vmul.f32 0.00390625, %v705_v37 }
 0x192   : > { %v710_v13 = vsub.f32 %v708_v12, %v709_v11 }
 0x194   : > { %v711_v17 = vadd.f32 1e-05, %v710_v13 }
 0x196   : > { %9433 = vrsqrt.f32 %v711_v17 }
 0x1a0   : > { %v9434_v36 = vpop.eup %9433 }
 0x1a1   : > { %v728_v18 = vrot.slane %v9434_v36, %v9919_v51 }
 0x1a3   : > { %758 = vrot.lane.b32.xlu1 %v728_v18, %s9474_s6  ;;  %v9935_v19 = vmul.f32 %v728_v18, %v717_v58  ;;  %v9937_v22 = vmul.f32 %v728_v18, %v718_v59  ;;  %v9939_v23 = vmul.f32 %v728_v18, %v719_v60  ;;  %v9941_v32 = vmul.f32 %v728_v18, %v720_v61 }
 0x1a4   : > { %v9943_v25 = vmul.f32 %v728_v18, %v721_v62  ;;  %v9945_v26 = vmul.f32 %v728_v18, %v722_v0  ;;  %v9947_v55 = vmul.f32 %v728_v18, %v723_v1  ;;  %v9949_v28 = vmul.f32 %v728_v18, %v724_v3 }
 0x1a5   : > { %15663 = vst [vmem:[#allocation13_spill] sm:$0xff] %v9935_v19  ;;  %15664 = vst [vmem:[#allocation14_spill] sm:$0xff] %v9937_v22 }
 0x1a6   : > { %15665 = vst [vmem:[#allocation15_spill] sm:$0xff] %v9939_v23  ;;  %15666 = vst [vmem:[#allocation16_spill] sm:$0xff] %v9941_v32 }
 0x1a7   : > { %15667 = vst [vmem:[#allocation17_spill] sm:$0xff] %v9943_v25  ;;  %15668 = vst [vmem:[#allocation18_spill] sm:$0xff] %v9945_v26  ;;  %788 = vrot.lane.b32.xlu1 %v728_v18, %s9469_s26 }
 0x1a8   : > { %15669 = vst [vmem:[#allocation19_spill] sm:$0xff] %v9947_v55  ;;  %15670 = vst [vmem:[#allocation20_spill] sm:$0xff] %v9949_v28 }
 0x1ab   : > { %818 = vrot.lane.b32.xlu1 %v728_v18, %s9475_s7 }
 0x1f5   : > { %v747_v31 = vpop.permute.xlu0 %746 }
 0x1f6   : > { %v749_v38 = vsub.f32 %v9731_v16, %v747_v31  ;;  %v750_v40 = vsub.f32 %v9725_v14, %v747_v31  ;;  %v751_v41 = vsub.f32 %v9763_v33, %v747_v31  ;;  %v752_v43 = vsub.f32 %v9749_v27, %v747_v31 }
 0x1f7   : > { %v753_v56 = vsub.f32 %v9791_v50, %v747_v31  ;;  %v754_v3 = vsub.f32 %v9783_v45, %v747_v31  ;;  %v755_v13 = vsub.f32 %v9817_v4, %v747_v31 }
 0x1f9   : > { %v9997_v12 = vpop.permute.xlu0 %777 }
 0x215   : > { %v759_v42 = vpop.permute.xlu1 %758 }
 0x216   : > { %v761_v44 = vmul.f32 %v759_v42, %v749_v38  ;;  %v762_v46 = vmul.f32 %v759_v42, %v750_v40  ;;  %v763_v47 = vmul.f32 %v759_v42, %v751_v41  ;;  %v764_v48 = vmul.f32 %v759_v42, %v752_v43 }
 0x217   : > { %v765_v60 = vmul.f32 %v759_v42, %v753_v56  ;;  %v766_v15 = vmul.f32 %v759_v42, %v754_v3  ;;  %v767_v30 = vmul.f32 %v759_v42, %v755_v13  ;;  %v756_v43 = vsub.f32 %v9809_v63, %v747_v31 }
 0x218   : > { %v9960_v52 = vmax.f32 %v761_v44, 0.0  ;;  %v9962_v53 = vmax.f32 %v762_v46, 0.0  ;;  %v9964_v54 = vmax.f32 %v763_v47, 0.0  ;;  %v9971_v59 = vmax.f32 %v764_v48, 0.0  ;;  %v10025_v47 = vpop.permute.xlu0 %807 }
 0x219   : > { %v9987_v7 = vmax.f32 %v765_v60, 0.0  ;;  %v10006_v18 = vpop.permute.xlu1 %788  ;;  %v10008_v29 = vmax.f32 %v766_v15, 0.0  ;;  %v10027_v48 = vmax.f32 %v767_v30, 0.0  ;;  %v768_v56 = vmul.f32 %v759_v42, %v756_v43 }
 0x21a   : > { %v1316_v57 = vrot.slane %v9960_v52, %v9958_v49  ;;  %v1365_v58 = vrot.slane %v9962_v53, %v9958_v49  ;;  %v1414_v1 = vrot.slane %v9964_v54, %v9958_v49  ;;  %v1463_v11 = vrot.slane %v9971_v59, %v9958_v49 }
 0x21b   : > { %v1512_v41 = vrot.slane %v9987_v7, %v9958_v49  ;;  %v1561_v60 = vrot.slane %v10008_v29, %v9958_v49  ;;  %v1610_v3 = vrot.slane %v10027_v48, %v9958_v49  ;;  %v811_v30 = vsub.f32 %v9725_v14, %v10025_v47 }
 0x21c   : > { %v9974_v61 = vrot.slane %v1316_v57, %v9958_v49  ;;  %v1324_v62 = vcombine.high %v1316_v57, %v1316_v57  ;;  %v1373_v0 = vcombine.high %v1365_v58, %v1365_v58  ;;  %v9985_v20 = vrot.slane %v1365_v58, %v9958_v49 }
 0x21d   : > { %v1422_v37 = vcombine.high %v1414_v1, %v1414_v1  ;;  %v10004_v36 = vrot.slane %v1414_v1, %v9958_v49  ;;  %v1471_v40 = vcombine.high %v1463_v11, %v1463_v11  ;;  %v10023_v46 = vrot.slane %v1463_v11, %v9958_v49 }
 0x21e   : > { %v1704_v5 = vrot.slane %v9974_v61, %v9919_v51  ;;  %v9982_v6 = vrot.slane %v1324_v62, %v9958_v49  ;;  %v9993_v10 = vrot.slane %v1373_v0, %v9958_v49  ;;  %v1736_v17 = vrot.slane %v9985_v20, %v9919_v51  ;;  %v10037_v62 = vpop.permute.xlu1 %818 }
 0x21f   : > { %v10014_v38 = vrot.slane %v1422_v37, %v9958_v49  ;;  %v1768_v44 = vrot.slane %v10004_v36, %v9919_v51  ;;  %v10033_v31 = vrot.slane %v1471_v40, %v9958_v49  ;;  %v1520_v58 = vcombine.high %v1512_v41, %v1512_v41 }
 0x220   : > { %1957 = vrot.lane.b32.xlu0 %v1704_v5, %s9472_s29  ;;  %v1708_v8 = vrot.slane %v9982_v6, %v9919_v51  ;;  %v1740_v2 = vrot.slane %v9993_v10, %v9919_v51  ;;  %v1800_v0 = vrot.slane %v10023_v46, %v9919_v51  ;;  %v10043_v42 = vrot.slane %v1512_v41, %v9958_v49 }
 0x221   : > { %v1772_v57 = vrot.slane %v10014_v38, %v9919_v51  ;;  %v810_v1 = vsub.f32 %v9731_v16, %v10025_v47  ;;  %v10049_v5 = vmax.f32 %v768_v56, 0.0  ;;  %v1804_v15 = vrot.slane %v10033_v31, %v9919_v51 }
 0x222   : > { %1959 = vrot.lane.b32.xlu1 %v1708_v8, %s9472_s29  ;;  %v10055_v8 = vrot.slane %v1520_v58, %v9958_v49  ;;  %v1569_v37 = vcombine.high %v1561_v60, %v1561_v60  ;;  %v1832_v13 = vrot.slane %v10043_v42, %v9919_v51  ;;  %v822_v56 = vmul.f32 %v10037_v62, %v811_v30 }
 0x223   : > { %v821_v11 = vmul.f32 %v10037_v62, %v810_v1  ;;  %v1659_v40 = vrot.slane %v10049_v5, %v9958_v49  ;;  %v10081_v58 = vrot.slane %v1610_v3, %v9958_v49  ;;  %v815_v35 = vsub.f32 %v9783_v45, %v10025_v47 }
 0x224   : > { %1973 = vrot.lane.b32.xlu0 %v1736_v17, %s9472_s29  ;;  %v10062_v17 = vrot.slane %v1561_v60, %v9958_v49  ;;  %v1836_v41 = vrot.slane %v10055_v8, %v9919_v51  ;;  %v10072_v43 = vrot.slane %v1569_v37, %v9958_v49  ;;  %v812_v60 = vsub.f32 %v9763_v33, %v10025_v47 }
 0x225   : > { %v1667_v1 = vcombine.high %v1659_v40, %v1659_v40  ;;  %v1896_v30 = vrot.slane %v10081_v58, %v9919_v51 }
 0x226   : > { %1975 = vrot.lane.b32.xlu1 %v1740_v2, %s9472_s29  ;;  %v1618_v2 = vcombine.high %v1610_v3, %v1610_v3  ;;  %v823_v3 = vmul.f32 %v10037_v62, %v812_v60 }
 0x228   : > { %1989 = vrot.lane.b32.xlu0 %v1768_v44, %s9472_s29  ;;  %v10074_v44 = vmax.f32 %v821_v11, 0.0  ;;  %v10093_v11 = vmax.f32 %v822_v56, 0.0  ;;  %v10113_v9 = vmax.f32 %v823_v3, 0.0 }
 0x22a   : > { %1991 = vrot.lane.b32.xlu1 %v1772_v57, %s9472_s29  ;;  %v1864_v57 = vrot.slane %v10062_v17, %v9919_v51  ;;  %v2693_v37 = vrot.slane %v10074_v44, %v9958_v49  ;;  %v2791_v39 = vrot.slane %v10113_v9, %v9958_v49 }
 0x22c   : > { %2005 = vrot.lane.b32.xlu0 %v1800_v0, %s9472_s29  ;;  %v10086_v0 = vrot.slane %v1618_v2, %v9958_v49  ;;  %v10102_v2 = vrot.slane %v1659_v40, %v9958_v49  ;;  %v2701_v60 = vcombine.high %v2693_v37, %v2693_v37 }
 0x22e   : > { %2007 = vrot.lane.b32.xlu1 %v1804_v15, %s9472_s29  ;;  %v1868_v15 = vrot.slane %v10072_v43, %v9919_v51  ;;  %v1900_v56 = vrot.slane %v10086_v0, %v9919_v51  ;;  %v1928_v40 = vrot.slane %v10102_v2, %v9919_v51  ;;  %v10129_v3 = vrot.slane %v2701_v60, %v9958_v49 }
 0x230   : > { %2021 = vrot.lane.b32.xlu0 %v1832_v13, %s9472_s29  ;;  %v813_v13 = vsub.f32 %v9749_v27, %v10025_v47 }
 0x232   : > { %2023 = vrot.lane.b32.xlu1 %v1836_v41, %s9472_s29  ;;  %v10105_v41 = vrot.slane %v1667_v1, %v9958_v49  ;;  %v10119_v1 = vrot.slane %v2693_v37, %v9958_v49 }
 0x234   : > { %2037 = vrot.lane.b32.xlu0 %v1864_v57, %s9472_s29  ;;  %v824_v57 = vmul.f32 %v10037_v62, %v813_v13  ;;  %v814_v13 = vsub.f32 %v9791_v50, %v10025_v47 }
 0x236   : > { %2039 = vrot.lane.b32.xlu1 %v1868_v15, %s9472_s29  ;;  %v2742_v15 = vrot.slane %v10093_v11, %v9958_v49  ;;  %v10125_v21 = vmax.f32 %v824_v57, 0.0  ;;  %v825_v37 = vmul.f32 %v10037_v62, %v814_v13  ;;  %v3081_v57 = vrot.slane %v10119_v1, %v9919_v51 }
 0x237   : > { %v3085_v13 = vrot.slane %v10129_v3, %v9919_v51 }
 0x238   : > { %2053 = vrot.lane.b32.xlu0 %v1896_v30, %s9472_s29  ;;  %v1932_v30 = vrot.slane %v10105_v41, %v9919_v51  ;;  %v10140_v34 = vrot.slane %v2742_v15, %v9958_v49  ;;  %v2840_v60 = vrot.slane %v10125_v21, %v9958_v49  ;;  %v10151_v28 = vmax.f32 %v825_v37, 0.0 }
 0x23a   : > { %2055 = vrot.lane.b32.xlu1 %v1900_v56, %s9472_s29  ;;  %v2750_v56 = vcombine.high %v2742_v15, %v2742_v15  ;;  %v816_v15 = vsub.f32 %v9817_v4, %v10025_v47  ;;  %v3113_v55 = vrot.slane %v10140_v34, %v9919_v51  ;;  %v1309_v4 = vcombine.high %v9960_v52, %v9960_v52 }
 0x23c   : > { %2069 = vrot.lane.b32.xlu0 %v1928_v40, %s9472_s29  ;;  %v826_v40 = vmul.f32 %v10037_v62, %v815_v35  ;;  %v10149_v24 = vrot.slane %v2750_v56, %v9958_v49  ;;  %v10159_v35 = vrot.slane %v2791_v39, %v9958_v49  ;;  %v827_v26 = vmul.f32 %v10037_v62, %v816_v15 }
 0x23d   : > { %v1323_v45 = vrot.slane %v1309_v4, %v9958_v49  ;;  %v1358_v4 = vcombine.high %v9962_v53, %v9962_v53 }
 0x23e   : > { %2071 = vrot.lane.b32.xlu1 %v1932_v30, %s9472_s29  ;;  %v2799_v30 = vcombine.high %v2791_v39, %v2791_v39  ;;  %v3117_v56 = vrot.slane %v10149_v24, %v9919_v51  ;;  %v10170_v25 = vmax.f32 %v826_v40, 0.0  ;;  %v817_v39 = vsub.f32 %v9809_v63, %v10025_v47 }
 0x23f   : > { %v3145_v15 = vrot.slane %v10159_v35, %v9919_v51  ;;  %v10263_v50 = vrot.slane %v1323_v45, %v9958_v49 }
 0x240   : > { %3334 = vrot.lane.b32.xlu0 %v3081_v57, %s9472_s29  ;;  %v2848_v57 = vcombine.high %v2840_v60, %v2840_v60  ;;  %v10166_v37 = vrot.slane %v2799_v30, %v9958_v49  ;;  %v828_v30 = vmul.f32 %v10037_v62, %v817_v39  ;;  %v2938_v47 = vrot.slane %v10170_v25, %v9958_v49 }
 0x241   : > { %v1720_v53 = vrot.slane %v10263_v50, %v9919_v51 }
 0x242   : > { %3336 = vrot.lane.b32.xlu1 %v3085_v13, %s9472_s29  ;;  %v2889_v13 = vrot.slane %v10151_v28, %v9958_v49  ;;  %v10181_v32 = vrot.slane %v2848_v57, %v9958_v49  ;;  %v3149_v40 = vrot.slane %v10166_v37, %v9919_v51  ;;  %v10205_v22 = vmax.f32 %v828_v30, 0.0 }
 0x244   : > { %3350 = vrot.lane.b32.xlu0 %v3113_v55, %s9472_s29  ;;  %v10178_v55 = vrot.slane %v2840_v60, %v9958_v49  ;;  %v2897_v23 = vcombine.high %v2889_v13, %v2889_v13  ;;  %v10195_v57 = vrot.slane %v2889_v13, %v9958_v49  ;;  %v3181_v62 = vrot.slane %v10181_v32, %v9919_v51 }
 0x245   : > { %v3036_v30 = vrot.slane %v10205_v22, %v9958_v49 }
 0x246   : > { %3352 = vrot.lane.b32.xlu1 %v3117_v56, %s9472_s29  ;;  %v10189_v56 = vmax.f32 %v827_v26, 0.0  ;;  %v3177_v60 = vrot.slane %v10178_v55, %v9919_v51  ;;  %v10201_v39 = vrot.slane %v2897_v23, %v9958_v49  ;;  %v3209_v13 = vrot.slane %v10195_v57, %v9919_v51 }
 0x247   : > { %v3044_v63 = vcombine.high %v3036_v30, %v3036_v30 }
 0x248   : > { %3366 = vrot.lane.b32.xlu0 %v3145_v15, %s9472_s29  ;;  %v2946_v15 = vcombine.high %v2938_v47, %v2938_v47  ;;  %v2987_v26 = vrot.slane %v10189_v56, %v9958_v49  ;;  %v3213_v23 = vrot.slane %v10201_v39, %v9919_v51 }
 0x24a   : > { %3368 = vrot.lane.b32.xlu1 %v3149_v40, %s9472_s29  ;;  %v10211_v40 = vrot.slane %v2938_v47, %v9958_v49  ;;  %v2995_v19 = vcombine.high %v2987_v26, %v2987_v26  ;;  %v10225_v47 = vrot.slane %v2987_v26, %v9958_v49  ;;  %v10239_v26 = vrot.slane %v3036_v30, %v9958_v49 }
 0x24c   : > { %3382 = vrot.lane.b32.xlu0 %v3177_v60, %s9472_s29  ;;  %v10217_v60 = vrot.slane %v2946_v15, %v9958_v49  ;;  %v10231_v15 = vrot.slane %v2995_v19, %v9958_v49  ;;  %v10245_v19 = vrot.slane %v3044_v63, %v9958_v49  ;;  %v3305_v52 = vrot.slane %v10239_v26, %v9919_v51 }
 0x24d   : > { %v1325_v63 = vcombine.high %v1323_v45, %v1323_v45 }
 0x24e   : > { %3384 = vrot.lane.b32.xlu1 %v3181_v62, %s9472_s29  ;;  %v3241_v62 = vrot.slane %v10211_v40, %v9919_v51  ;;  %v3309_v30 = vrot.slane %v10245_v19, %v9919_v51 }
 0x250   : > { %3398 = vrot.lane.b32.xlu0 %v3209_v13, %s9472_s29  ;;  %v3245_v13 = vrot.slane %v10217_v60, %v9919_v51 }
 0x252   : > { %3400 = vrot.lane.b32.xlu1 %v3213_v23, %s9472_s29  ;;  %v3273_v23 = vrot.slane %v10225_v47, %v9919_v51 }
 0x254   : > { %3414 = vrot.lane.b32.xlu0 %v3241_v62, %s9472_s29  ;;  %v3277_v62 = vrot.slane %v10231_v15, %v9919_v51 }
 0x256   : > { %3416 = vrot.lane.b32.xlu1 %v3245_v13, %s9472_s29  ;;  %v1354_v13 = vcombine.high %v9974_v61, %v9974_v61 }
 0x258   : > { %3430 = vrot.lane.b32.xlu0 %v3273_v23, %s9472_s29  ;;  %v1356_v23 = vcombine.high %v9982_v6, %v9982_v6  ;;  %v1372_v6 = vrot.slane %v1358_v4, %v9958_v49 }
 0x25a   : > { %3432 = vrot.lane.b32.xlu1 %v3277_v62, %s9472_s29  ;;  %v1712_v62 = vrot.slane %v1354_v13, %v9919_v51  ;;  %v1716_v61 = vrot.slane %v1356_v23, %v9919_v51  ;;  %v1403_v13 = vcombine.high %v9985_v20, %v9985_v20  ;;  %v1374_v23 = vcombine.high %v1372_v6, %v1372_v6 }
 0x25c   : > { %3446 = vrot.lane.b32.xlu0 %v3305_v52, %s9472_s29  ;;  %v10268_v52 = vrot.slane %v1325_v63, %v9958_v49  ;;  %v1407_v63 = vcombine.high %v9964_v54, %v9964_v54  ;;  %v1744_v4 = vrot.slane %v1403_v13, %v9919_v51  ;;  %v1454_v13 = vcombine.high %v10014_v38, %v10014_v38 }
 0x25e   : > { %3448 = vrot.lane.b32.xlu1 %v3309_v30, %s9472_s29  ;;  %v1724_v45 = vrot.slane %v10268_v52, %v9919_v51  ;;  %v1405_v30 = vcombine.high %v9993_v10, %v9993_v10  ;;  %v1421_v10 = vrot.slane %v1407_v63, %v9958_v49 }
 0x260   : > { %1961 = vrot.lane.b32.xlu0 %v1712_v62, %s9472_s29  ;;  %v10286_v62 = vrot.slane %v1372_v6, %v9958_v49  ;;  %v1748_v20 = vrot.slane %v1405_v30, %v9919_v51  ;;  %v1456_v30 = vcombine.high %v9971_v59, %v9971_v59  ;;  %v10309_v63 = vrot.slane %v1421_v10, %v9958_v49 }
 0x262   : > { %1963 = vrot.lane.b32.xlu1 %v1716_v61, %s9472_s29  ;;  %v10291_v61 = vrot.slane %v1374_v23, %v9958_v49  ;;  %v1752_v54 = vrot.slane %v10286_v62, %v9919_v51  ;;  %v1470_v38 = vrot.slane %v1456_v30, %v9958_v49  ;;  %v1784_v59 = vrot.slane %v10309_v63, %v9919_v51 }
 0x264   : > { %1965 = vrot.lane.b32.xlu0 %v1720_v53, %s9472_s29  ;;  %v1452_v53 = vcombine.high %v10004_v36, %v10004_v36  ;;  %v1756_v6 = vrot.slane %v10291_v61, %v9919_v51  ;;  %v1780_v36 = vrot.slane %v1454_v13, %v9919_v51 }
 0x266   : > { %1967 = vrot.lane.b32.xlu1 %v1724_v45, %s9472_s29  ;;  %v1423_v45 = vcombine.high %v1421_v10, %v1421_v10  ;;  %v1776_v23 = vrot.slane %v1452_v53, %v9919_v51  ;;  %v1472_v53 = vcombine.high %v1470_v38, %v1470_v38 }
 0x268   : > { %1977 = vrot.lane.b32.xlu0 %v1744_v4, %s9472_s29  ;;  %v10314_v4 = vrot.slane %v1423_v45, %v9958_v49  ;;  %v10332_v45 = vrot.slane %v1470_v38, %v9958_v49  ;;  %v10337_v30 = vrot.slane %v1472_v53, %v9958_v49  ;;  %v1552_v38 = vcombine.high %v10055_v8, %v10055_v8 }
 0x26a   : > { %1979 = vrot.lane.b32.xlu1 %v1748_v20, %s9472_s29  ;;  %v1501_v20 = vcombine.high %v10023_v46, %v10023_v46  ;;  %v1788_v10 = vrot.slane %v10314_v4, %v9919_v51 }
 0x26c   : > { %1981 = vrot.lane.b32.xlu0 %v1752_v54, %s9472_s29  ;;  %v1503_v54 = vcombine.high %v10033_v31, %v10033_v31  ;;  %v1808_v13 = vrot.slane %v1501_v20, %v9919_v51  ;;  %v1554_v20 = vcombine.high %v10008_v29, %v10008_v29 }
 0x26e   : > { %1983 = vrot.lane.b32.xlu1 %v1756_v6, %s9472_s29  ;;  %v1505_v6 = vcombine.high %v9987_v7, %v9987_v7  ;;  %v1812_v46 = vrot.slane %v1503_v54, %v9919_v51  ;;  %v1816_v7 = vrot.slane %v10332_v45, %v9919_v51  ;;  %v1568_v8 = vrot.slane %v1554_v20, %v9958_v49 }
 0x270   : > { %1993 = vrot.lane.b32.xlu0 %v1776_v23, %s9472_s29  ;;  %v1519_v31 = vrot.slane %v1505_v6, %v9958_v49  ;;  %v1550_v23 = vcombine.high %v10043_v42, %v10043_v42  ;;  %v1844_v42 = vrot.slane %v1552_v38, %v9919_v51  ;;  %v1599_v6 = vcombine.high %v10062_v17, %v10062_v17 }
 0x272   : > { %1995 = vrot.lane.b32.xlu1 %v1780_v36, %s9472_s29  ;;  %v1820_v36 = vrot.slane %v10337_v30, %v9919_v51  ;;  %v10355_v54 = vrot.slane %v1519_v31, %v9958_v49 }
 0x274   : > { %1997 = vrot.lane.b32.xlu0 %v1784_v59, %s9472_s29  ;;  %v1521_v59 = vcombine.high %v1519_v31, %v1519_v31  ;;  %v1848_v29 = vrot.slane %v10355_v54, %v9919_v51  ;;  %v1570_v31 = vcombine.high %v1568_v8, %v1568_v8 }
 0x276   : > { %1999 = vrot.lane.b32.xlu1 %v1788_v10, %s9472_s29  ;;  %v1840_v10 = vrot.slane %v1550_v23, %v9919_v51  ;;  %v10360_v53 = vrot.slane %v1521_v59, %v9958_v49  ;;  %v1872_v23 = vrot.slane %v1599_v6, %v9919_v51  ;;  %v10383_v38 = vrot.slane %v1570_v31, %v9958_v49 }
 0x277   : > { %v1648_v59 = vcombine.high %v10081_v58, %v10081_v58  ;;  %v1697_v31 = vcombine.high %v10102_v2, %v10102_v2 }
 0x278   : > { %2009 = vrot.lane.b32.xlu0 %v1808_v13, %s9472_s29  ;;  %v1852_v13 = vrot.slane %v10360_v53, %v9919_v51  ;;  %v1884_v20 = vrot.slane %v10383_v38, %v9919_v51 }
 0x279   : > { %v1936_v2 = vrot.slane %v1697_v31, %v9919_v51  ;;  %v2733_v31 = vcombine.high %v10129_v3, %v10129_v3 }
 0x27a   : > { %2011 = vrot.lane.b32.xlu1 %v1812_v46, %s9472_s29  ;;  %v1601_v46 = vcombine.high %v10072_v43, %v10072_v43 }
 0x27c   : > { %2013 = vrot.lane.b32.xlu0 %v1816_v7, %s9472_s29  ;;  %v1603_v7 = vcombine.high %v10027_v48, %v10027_v48  ;;  %v1876_v17 = vrot.slane %v1601_v46, %v9919_v51 }
 0x27e   : > { %2015 = vrot.lane.b32.xlu1 %v1820_v36, %s9472_s29  ;;  %v10378_v36 = vrot.slane %v1568_v8, %v9958_v49  ;;  %v1617_v43 = vrot.slane %v1603_v7, %v9958_v49  ;;  %v1652_v8 = vcombine.high %v10049_v5, %v10049_v5 }
 0x280   : > { %2025 = vrot.lane.b32.xlu0 %v1840_v10, %s9472_s29  ;;  %v1880_v48 = vrot.slane %v10378_v36, %v9919_v51  ;;  %v1650_v10 = vcombine.high %v10086_v0, %v10086_v0  ;;  %v10401_v6 = vrot.slane %v1617_v43, %v9958_v49  ;;  %v1666_v0 = vrot.slane %v1652_v8, %v9958_v49 }
 0x282   : > { %2027 = vrot.lane.b32.xlu1 %v1844_v42, %s9472_s29  ;;  %v1619_v42 = vcombine.high %v1617_v43, %v1617_v43  ;;  %v1908_v58 = vrot.slane %v1650_v10, %v9919_v51  ;;  %v1912_v5 = vrot.slane %v10401_v6, %v9919_v51  ;;  %v1668_v43 = vcombine.high %v1666_v0, %v1666_v0 }
 0x284   : > { %2029 = vrot.lane.b32.xlu0 %v1848_v29, %s9472_s29  ;;  %v1904_v29 = vrot.slane %v1648_v59, %v9919_v51 }
 0x286   : > { %2031 = vrot.lane.b32.xlu1 %v1852_v13, %s9472_s29  ;;  %v10406_v13 = vrot.slane %v1619_v42, %v9958_v49 }
 0x288   : > { %2041 = vrot.lane.b32.xlu0 %v1872_v23, %s9472_s29  ;;  %v1916_v23 = vrot.slane %v10406_v13, %v9919_v51 }
 0x28a   : > { %2043 = vrot.lane.b32.xlu1 %v1876_v17, %s9472_s29  ;;  %v1699_v17 = vcombine.high %v10105_v41, %v10105_v41  ;;  %v10437_v41 = vrot.slane %v1668_v43, %v9958_v49 }
 0x28c   : > { %2045 = vrot.lane.b32.xlu0 %v1880_v48, %s9472_s29  ;;  %v2686_v48 = vcombine.high %v10074_v44, %v10074_v44  ;;  %v1940_v42 = vrot.slane %v1699_v17, %v9919_v51  ;;  %v2735_v17 = vcombine.high %v10093_v11, %v10093_v11 }
 0x28e   : > { %2047 = vrot.lane.b32.xlu1 %v1884_v20, %s9472_s29  ;;  %v10430_v20 = vrot.slane %v1666_v0, %v9958_v49  ;;  %v2700_v44 = vrot.slane %v2686_v48, %v9958_v49  ;;  %v2749_v11 = vrot.slane %v2735_v17, %v9958_v49 }
 0x290   : > { %2057 = vrot.lane.b32.xlu0 %v1904_v29, %s9472_s29  ;;  %v1944_v29 = vrot.slane %v10430_v20, %v9919_v51  ;;  %v10461_v48 = vrot.slane %v2700_v44, %v9958_v49  ;;  %v2751_v17 = vcombine.high %v2749_v11, %v2749_v11 }
 0x292   : > { %v10409_v46 = vpop.permute.xlu0 %1957  ;;  %2059 = vrot.lane.b32.xlu1 %v1908_v58, %s9472_s29  ;;  %v2731_v58 = vcombine.high %v10119_v1, %v10119_v1 }
 0x293   : > { %15671 = vst [vmem:[#allocation21_spill] sm:$0xff] %v10409_v46 }
 0x294   : > { %2061 = vrot.lane.b32.xlu0 %v1912_v5, %s9472_s29  ;;  %v10417_v7 = vpop.permute.xlu1 %1959  ;;  %v1948_v5 = vrot.slane %v10437_v41, %v9919_v51  ;;  %v3089_v1 = vrot.slane %v2731_v58, %v9919_v51  ;;  %v3097_v58 = vrot.slane %v10461_v48, %v9919_v51 }
 0x295   : > { %15672 = vst [vmem:[#allocation22_spill] sm:$0xff] %v10417_v7 }
 0x296   : > { %v10425_v59 = vpop.permute.xlu0 %1973  ;;  %2063 = vrot.lane.b32.xlu1 %v1916_v23, %s9472_s29  ;;  %v2702_v23 = vcombine.high %v2700_v44, %v2700_v44  ;;  %v2780_v44 = vcombine.high %v10140_v34, %v10140_v34 }
 0x297   : > { %15673 = vst [vmem:[#allocation23_spill] sm:$0xff] %v10425_v59 }
 0x298   : > { %2073 = vrot.lane.b32.xlu0 %v1936_v2, %s9472_s29  ;;  %v10433_v10 = vpop.permute.xlu1 %1975  ;;  %v10468_v3 = vrot.slane %v2702_v23, %v9958_v49  ;;  %v2782_v23 = vcombine.high %v10149_v24, %v10149_v24  ;;  %v3121_v34 = vrot.slane %v2780_v44, %v9919_v51  ;;  %v10499_v24 = vrot.slane %v2751_v17, %v9958_v49 }
 0x299   : > { %15674 = vst [vmem:[#allocation24_spill] sm:$0xff] %v10433_v10  ;;  %v2831_v17 = vcombine.high %v10166_v37, %v10166_v37  ;;  %v3025_v10 = vcombine.high %v10225_v47, %v10225_v47 }
 0x29a   : > { %v10440_v8 = vpop.permute.xlu0 %1989  ;;  %2075 = vrot.lane.b32.xlu1 %v1940_v42, %s9472_s29  ;;  %v3093_v42 = vrot.slane %v2733_v31, %v9919_v51  ;;  %v3101_v31 = vrot.slane %v10468_v3, %v9919_v51 }
 0x29b   : > { %15675 = vst [vmem:[#allocation25_spill] sm:$0xff] %v10440_v8 }
 0x29c   : > { %2077 = vrot.lane.b32.xlu0 %v1944_v29, %s9472_s29  ;;  %v10448_v0 = vpop.permute.xlu1 %1991 }
 0x29d   : > { %15676 = vst [vmem:[#allocation26_spill] sm:$0xff] %v10448_v0  ;;  %v2976_v0 = vcombine.high %v10211_v40, %v10211_v40 }
 0x29e   : > { %v10456_v43 = vpop.permute.xlu0 %2005  ;;  %2079 = vrot.lane.b32.xlu1 %v1948_v5, %s9472_s29 }
 0x29f   : > { %15677 = vst [vmem:[#allocation27_spill] sm:$0xff] %v10456_v43 }
 0x2a0   : > { %3338 = vrot.lane.b32.xlu0 %v3089_v1, %s9472_s29  ;;  %v10464_v2 = vpop.permute.xlu1 %2007  ;;  %v2784_v1 = vcombine.high %v10113_v9, %v10113_v9 }
 0x2a1   : > { %15678 = vst [vmem:[#allocation28_spill] sm:$0xff] %v10464_v2 }
 0x2a2   : > { %v10471_v29 = vpop.permute.xlu0 %2021  ;;  %3340 = vrot.lane.b32.xlu1 %v3093_v42, %s9472_s29  ;;  %v2798_v9 = vrot.slane %v2784_v1, %v9958_v49 }
 0x2a3   : > { %15679 = vst [vmem:[#allocation29_spill] sm:$0xff] %v10471_v29  ;;  %v3125_v29 = vrot.slane %v2782_v23, %v9919_v51  ;;  %v3133_v23 = vrot.slane %v10499_v24, %v9919_v51 }
 0x2a4   : > { %3342 = vrot.lane.b32.xlu0 %v3097_v58, %s9472_s29  ;;  %v10479_v5 = vpop.permute.xlu1 %2023  ;;  %v10492_v58 = vrot.slane %v2749_v11, %v9958_v49  ;;  %v2829_v11 = vcombine.high %v10159_v35, %v10159_v35  ;;  %v2800_v1 = vcombine.high %v2798_v9, %v2798_v9 }
 0x2a5   : > { %15680 = vst [vmem:[#allocation30_spill] sm:$0xff] %v10479_v5 }
 0x2a6   : > { %v10487_v42 = vpop.permute.xlu0 %2037  ;;  %3344 = vrot.lane.b32.xlu1 %v3101_v31, %s9472_s29  ;;  %v3129_v44 = vrot.slane %v10492_v58, %v9919_v51  ;;  %v3153_v35 = vrot.slane %v2829_v11, %v9919_v51  ;;  %v10530_v37 = vrot.slane %v2800_v1, %v9958_v49 }
 0x2a7   : > { %15681 = vst [vmem:[#allocation31_spill] sm:$0xff] %v10487_v42 }
 0x2a8   : > { %3354 = vrot.lane.b32.xlu0 %v3121_v34, %s9472_s29  ;;  %v10495_v5 = vpop.permute.xlu1 %2039  ;;  %v3165_v1 = vrot.slane %v10530_v37, %v9919_v51 }
 0x2a9   : > { %15682 = vst [vmem:[#allocation32_spill] sm:$0xff] %v10495_v5 }
 0x2aa   : > { %v10502_v43 = vpop.permute.xlu0 %2053  ;;  %3356 = vrot.lane.b32.xlu1 %v3125_v29, %s9472_s29  ;;  %v2833_v29 = vcombine.high %v10125_v21, %v10125_v21 }
 0x2ab   : > { %15683 = vst [vmem:[#allocation33_spill] sm:$0xff] %v10502_v43  ;;  %v3157_v43 = vrot.slane %v2831_v17, %v9919_v51 }
 0x2ac   : > { %3358 = vrot.lane.b32.xlu0 %v3129_v44, %s9472_s29  ;;  %v10510_v31 = vpop.permute.xlu1 %2055  ;;  %v10523_v44 = vrot.slane %v2798_v9, %v9958_v49  ;;  %v2847_v21 = vrot.slane %v2833_v29, %v9958_v49  ;;  %v2878_v9 = vcombine.high %v10178_v55, %v10178_v55  ;;  %v2880_v29 = vcombine.high %v10181_v32, %v10181_v32 }
 0x2ad   : > { %15684 = vst [vmem:[#allocation34_spill] sm:$0xff] %v10510_v31 }
 0x2ae   : > { %v10518_v34 = vpop.permute.xlu0 %2069  ;;  %3360 = vrot.lane.b32.xlu1 %v3133_v23, %s9472_s29  ;;  %v3161_v11 = vrot.slane %v10523_v44, %v9919_v51  ;;  %v2882_v23 = vcombine.high %v10151_v28, %v10151_v28  ;;  %v3185_v55 = vrot.slane %v2878_v9, %v9919_v51 }
 0x2af   : > { %15685 = vst [vmem:[#allocation35_spill] sm:$0xff] %v10518_v34  ;;  %v10554_v34 = vrot.slane %v2847_v21, %v9958_v49 }
 0x2b0   : > { %3370 = vrot.lane.b32.xlu0 %v3153_v35, %s9472_s29  ;;  %v10526_v31 = vpop.permute.xlu1 %2071  ;;  %v2896_v32 = vrot.slane %v2882_v23, %v9958_v49 }
 0x2b1   : > { %15686 = vst [vmem:[#allocation36_spill] sm:$0xff] %v10526_v31  ;;  %v3193_v9 = vrot.slane %v10554_v34, %v9919_v51 }
 0x2b2   : > { %v10533_v42 = vpop.permute.xlu0 %3334  ;;  %3372 = vrot.lane.b32.xlu1 %v3157_v43, %s9472_s29  ;;  %v2849_v43 = vcombine.high %v2847_v21, %v2847_v21  ;;  %v2927_v21 = vcombine.high %v10195_v57, %v10195_v57  ;;  %v10585_v2 = vrot.slane %v2896_v32, %v9958_v49 }
 0x2b4   : > { %3374 = vrot.lane.b32.xlu0 %v3161_v11, %s9472_s29  ;;  %v10543_v17 = vpop.permute.xlu1 %3336  ;;  %v3189_v11 = vrot.slane %v2880_v29, %v9919_v51  ;;  %v10561_v31 = vrot.slane %v2849_v43, %v9958_v49  ;;  %v2929_v43 = vcombine.high %v10201_v39, %v10201_v39  ;;  %v3217_v57 = vrot.slane %v2927_v21, %v9919_v51 }
 0x2b5   : > { %v2978_v21 = vcombine.high %v10217_v60, %v10217_v60 }
 0x2b6   : > { %v10549_v35 = vpop.permute.xlu0 %3350  ;;  %3376 = vrot.lane.b32.xlu1 %v3165_v1, %s9472_s29  ;;  %v2931_v1 = vcombine.high %v10170_v25, %v10170_v25  ;;  %v3197_v23 = vrot.slane %v10561_v31, %v9919_v51 }
 0x2b7   : > { %v3253_v60 = vrot.slane %v2978_v21, %v9919_v51  ;;  %v3029_v21 = vcombine.high %v10205_v22, %v10205_v22 }
 0x2b8   : > { %3386 = vrot.lane.b32.xlu0 %v3185_v55, %s9472_s29  ;;  %v10557_v28 = vpop.permute.xlu1 %3352  ;;  %v2898_v55 = vcombine.high %v2896_v32, %v2896_v32  ;;  %v2945_v39 = vrot.slane %v2931_v1, %v9958_v49  ;;  %v3225_v32 = vrot.slane %v10585_v2, %v9919_v51 }
 0x2ba   : > { %v10564_v5 = vpop.permute.xlu0 %3366  ;;  %3388 = vrot.lane.b32.xlu1 %v3189_v11, %s9472_s29  ;;  %v10592_v8 = vrot.slane %v2898_v55, %v9958_v49  ;;  %v2947_v1 = vcombine.high %v2945_v39, %v2945_v39  ;;  %v10616_v59 = vrot.slane %v2945_v39, %v9958_v49  ;;  %v3027_v39 = vcombine.high %v10231_v15, %v10231_v15 }
 0x2bc   : > { %3390 = vrot.lane.b32.xlu0 %v3193_v9, %s9472_s29  ;;  %v10574_v29 = vpop.permute.xlu1 %3368  ;;  %v3221_v9 = vrot.slane %v2929_v43, %v9919_v51  ;;  %v2980_v43 = vcombine.high %v10189_v56, %v10189_v56  ;;  %v3229_v40 = vrot.slane %v10592_v8, %v9919_v51  ;;  %v3285_v15 = vrot.slane %v3027_v39, %v9919_v51 }
 0x2be   : > { %v10580_v11 = vpop.permute.xlu0 %3382  ;;  %3392 = vrot.lane.b32.xlu1 %v3197_v23, %s9472_s29  ;;  %v2994_v46 = vrot.slane %v2980_v43, %v9958_v49 }
 0x2c0   : > { %3402 = vrot.lane.b32.xlu0 %v3217_v57, %s9472_s29  ;;  %v10588_v25 = vpop.permute.xlu1 %3384  ;;  %v2996_v43 = vcombine.high %v2994_v46, %v2994_v46  ;;  %v10647_v7 = vrot.slane %v2994_v46, %v9958_v49 }
 0x2c2   : > { %v10597_v23 = vpop.permute.xlu0 %3398  ;;  %3404 = vrot.lane.b32.xlu1 %v3221_v9, %s9472_s29  ;;  %v3249_v9 = vrot.slane %v2976_v0, %v9919_v51  ;;  %v3257_v0 = vrot.slane %v10616_v59, %v9919_v51  ;;  %v3289_v46 = vrot.slane %v10647_v7, %v9919_v51 }
 0x2c4   : > { %3406 = vrot.lane.b32.xlu0 %v3225_v32, %s9472_s29  ;;  %v10607_v55 = vpop.permute.xlu1 %3400  ;;  %v10623_v32 = vrot.slane %v2947_v1, %v9958_v49 }
 0x2c6   : > { %v10611_v57 = vpop.permute.xlu0 %3414  ;;  %3408 = vrot.lane.b32.xlu1 %v3229_v40, %s9472_s29  ;;  %v3261_v47 = vrot.slane %v10623_v32, %v9919_v51 }
 0x2c8   : > { %3418 = vrot.lane.b32.xlu0 %v3249_v9, %s9472_s29  ;;  %v10619_v56 = vpop.permute.xlu1 %3416 }
 0x2ca   : > { %v10628_v40 = vpop.permute.xlu0 %3430  ;;  %3420 = vrot.lane.b32.xlu1 %v3253_v60, %s9472_s29  ;;  %v3281_v60 = vrot.slane %v3025_v10, %v9919_v51  ;;  %v3076_v10 = vcombine.high %v10245_v19, %v10245_v19 }
 0x2cc   : > { %3422 = vrot.lane.b32.xlu0 %v3257_v0, %s9472_s29  ;;  %v10638_v1 = vpop.permute.xlu1 %3432  ;;  %v10654_v0 = vrot.slane %v2996_v43, %v9958_v49 }
 0x2cd   : > { %15687 = vst [vmem:[#allocation37_spill] sm:$0xff] %v10638_v1  ;;  %v3043_v1 = vrot.slane %v3029_v21, %v9958_v49 }
 0x2ce   : > { %v10642_v9 = vpop.permute.xlu0 %3446  ;;  %3424 = vrot.lane.b32.xlu1 %v3261_v47, %s9472_s29  ;;  %v3293_v21 = vrot.slane %v10654_v0, %v9919_v51 }
 0x2cf   : > { %15688 = vst [vmem:[#allocation38_spill] sm:$0xff] %v10642_v9  ;;  %v3074_v9 = vcombine.high %v10239_v26, %v10239_v26  ;;  %v3045_v43 = vcombine.high %v3043_v1, %v3043_v1 }
 0x2d0   : > { %3434 = vrot.lane.b32.xlu0 %v3281_v60, %s9472_s29  ;;  %v10650_v22 = vpop.permute.xlu1 %3448 }
 0x2d1   : > { %v3313_v26 = vrot.slane %v3074_v9, %v9919_v51  ;;  %v1357_v9 = vcombine.high %v10268_v52, %v10268_v52 }
 0x2d2   : > { %v10659_v47 = vpop.permute.xlu0 %1961  ;;  %3436 = vrot.lane.b32.xlu1 %v3285_v15, %s9472_s29  ;;  %v10676_v15 = vrot.slane %v3043_v1, %v9958_v49 }
 0x2d3   : > { %15689 = vst [vmem:[#allocation39_spill] sm:$0xff] %v10659_v47  ;;  %v10683_v47 = vrot.slane %v3045_v43, %v9958_v49 }
 0x2d4   : > { %3438 = vrot.lane.b32.xlu0 %v3289_v46, %s9472_s29  ;;  %v10667_v39 = vpop.permute.xlu1 %1963  ;;  %v3317_v46 = vrot.slane %v3076_v10, %v9919_v51  ;;  %v3321_v1 = vrot.slane %v10676_v15, %v9919_v51 }
 0x2d5   : > { %15690 = vst [vmem:[#allocation40_spill] sm:$0xff] %v10667_v39  ;;  %v1355_v39 = vcombine.high %v10263_v50, %v10263_v50  ;;  %v3325_v10 = vrot.slane %v10683_v47, %v9919_v51  ;;  %v1404_v50 = vcombine.high %v10286_v62, %v10286_v62 }
 0x2d6   : > { %v10671_v60 = vpop.permute.xlu0 %1965  ;;  %3440 = vrot.lane.b32.xlu1 %v3293_v21, %s9472_s29 }
 0x2d7   : > { %15691 = vst [vmem:[#allocation41_spill] sm:$0xff] %v10671_v60  ;;  %v1760_v62 = vrot.slane %v1404_v50, %v9919_v51  ;;  %v1504_v50 = vcombine.high %v10337_v30, %v10337_v30 }
 0x2d8   : > { %3450 = vrot.lane.b32.xlu0 %v3313_v26, %s9472_s29  ;;  %v10679_v19 = vpop.permute.xlu1 %1967  ;;  %v1728_v26 = vrot.slane %v1355_v39, %v9919_v51  ;;  %v1455_v39 = vcombine.high %v10314_v4, %v10314_v4 }
 0x2d9   : > { %15692 = vst [vmem:[#allocation42_spill] sm:$0xff] %v10679_v19 }
 0x2da   : > { %v10687_v60 = vpop.permute.xlu0 %1977  ;;  %3452 = vrot.lane.b32.xlu1 %v3317_v46, %s9472_s29  ;;  %v1406_v46 = vcombine.high %v10291_v61, %v10291_v61 }
 0x2db   : > { %15693 = vst [vmem:[#allocation43_spill] sm:$0xff] %v10687_v60  ;;  %v1453_v60 = vcombine.high %v10309_v63, %v10309_v63 }
 0x2dc   : > { %3454 = vrot.lane.b32.xlu0 %v3321_v1, %s9472_s29  ;;  %v10695_v21 = vpop.permute.xlu1 %1979  ;;  %v1732_v1 = vrot.slane %v1357_v9, %v9919_v51  ;;  %v1502_v9 = vcombine.high %v10332_v45, %v10332_v45 }
 0x2dd   : > { %v1792_v63 = vrot.slane %v1453_v60, %v9919_v51  ;;  %v1553_v60 = vcombine.high %v10360_v53, %v10360_v53 }
 0x2de   : > { %v10701_v43 = vpop.permute.xlu0 %1981  ;;  %3456 = vrot.lane.b32.xlu1 %v3325_v10, %s9472_s29  ;;  %v1764_v10 = vrot.slane %v1406_v46, %v9919_v51  ;;  %v1551_v46 = vcombine.high %v10355_v54, %v10355_v54  ;;  %v1824_v45 = vrot.slane %v1502_v9, %v9919_v51  ;;  %v1602_v9 = vcombine.high %v10383_v38, %v10383_v38 }
 0x2df   : > { %15694 = vst [vmem:[#allocation44_spill] sm:$0xff] %v10701_v43 }
 0x2e0   : > { %1969 = vrot.lane.b32.xlu0 %v1728_v26, %s9472_s29  ;;  %v10708_v52 = vpop.permute.xlu1 %1983  ;;  %v1856_v54 = vrot.slane %v1551_v46, %v9919_v51  ;;  %v1651_v46 = vcombine.high %v10406_v13, %v10406_v13 }
 0x2e2   : > { %v10713_v19 = vpop.permute.xlu0 %1993  ;;  %1971 = vrot.lane.b32.xlu1 %v1732_v1, %s9472_s29  ;;  %v1796_v1 = vrot.slane %v1455_v39, %v9919_v51  ;;  %v1600_v39 = vcombine.high %v10378_v36, %v10378_v36 }
 0x2e3   : > { %15695 = vst [vmem:[#allocation45_spill] sm:$0xff] %v10713_v19 }
 0x2e4   : > { %1985 = vrot.lane.b32.xlu0 %v1760_v62, %s9472_s29  ;;  %v10720_v61 = vpop.permute.xlu1 %1995  ;;  %v1888_v36 = vrot.slane %v1600_v39, %v9919_v51  ;;  %v1700_v39 = vcombine.high %v10437_v41, %v10437_v41 }
 0x2e5   : > { %15696 = vst [vmem:[#allocation46_spill] sm:$0xff] %v10720_v61 }
 0x2e6   : > { %v10725_v26 = vpop.permute.xlu0 %1997  ;;  %1987 = vrot.lane.b32.xlu1 %v1764_v10, %s9472_s29  ;;  %v1828_v10 = vrot.slane %v1504_v50, %v9919_v51  ;;  %v1649_v50 = vcombine.high %v10401_v6, %v10401_v6 }
 0x2e7   : > { %15697 = vst [vmem:[#allocation47_spill] sm:$0xff] %v10725_v26 }
 0x2e8   : > { %2001 = vrot.lane.b32.xlu0 %v1792_v63, %s9472_s29  ;;  %v10732_v4 = vpop.permute.xlu1 %1999  ;;  %v1920_v6 = vrot.slane %v1649_v50, %v9919_v51  ;;  %v2734_v50 = vcombine.high %v10468_v3, %v10468_v3 }
 0x2e9   : > { %15698 = vst [vmem:[#allocation48_spill] sm:$0xff] %v10732_v4 }
 0x2ea   : > { %v10737_v62 = vpop.permute.xlu0 %2009  ;;  %2003 = vrot.lane.b32.xlu1 %v1796_v1, %s9472_s29  ;;  %v1860_v1 = vrot.slane %v1553_v60, %v9919_v51  ;;  %v1698_v60 = vcombine.high %v10430_v20, %v10430_v20 }
 0x2eb   : > { %15699 = vst [vmem:[#allocation49_spill] sm:$0xff] %v10737_v62 }
 0x2ec   : > { %2017 = vrot.lane.b32.xlu0 %v1824_v45, %s9472_s29  ;;  %v10744_v30 = vpop.permute.xlu1 %2011  ;;  %v1952_v20 = vrot.slane %v1698_v60, %v9919_v51  ;;  %v2783_v60 = vcombine.high %v10499_v24, %v10499_v24 }
 0x2ed   : > { %15700 = vst [vmem:[#allocation50_spill] sm:$0xff] %v10744_v30 }
 0x2ee   : > { %v10749_v63 = vpop.permute.xlu0 %2013  ;;  %2019 = vrot.lane.b32.xlu1 %v1828_v10, %s9472_s29  ;;  %v1892_v10 = vrot.slane %v1602_v9, %v9919_v51  ;;  %v2732_v9 = vcombine.high %v10461_v48, %v10461_v48 }
 0x2ef   : > { %15701 = vst [vmem:[#allocation51_spill] sm:$0xff] %v10749_v63 }
 0x2f0   : > { %2033 = vrot.lane.b32.xlu0 %v1856_v54, %s9472_s29  ;;  %v10756_v53 = vpop.permute.xlu1 %2015  ;;  %v3105_v48 = vrot.slane %v2732_v9, %v9919_v51  ;;  %v2832_v9 = vcombine.high %v10530_v37, %v10530_v37 }
 0x2f1   : > { %15702 = vst [vmem:[#allocation52_spill] sm:$0xff] %v10756_v53 }
 0x2f2   : > { %v10761_v45 = vpop.permute.xlu0 %2025  ;;  %2035 = vrot.lane.b32.xlu1 %v1860_v1, %s9472_s29  ;;  %v1924_v1 = vrot.slane %v1651_v46, %v9919_v51  ;;  %v2781_v46 = vcombine.high %v10492_v58, %v10492_v58 }
 0x2f3   : > { %15703 = vst [vmem:[#allocation53_spill] sm:$0xff] %v10761_v45 }
 0x2f4   : > { %2049 = vrot.lane.b32.xlu0 %v1888_v36, %s9472_s29  ;;  %v10768_v38 = vpop.permute.xlu1 %2027  ;;  %v3137_v58 = vrot.slane %v2781_v46, %v9919_v51  ;;  %v2881_v46 = vcombine.high %v10561_v31, %v10561_v31 }
 0x2f5   : > { %15704 = vst [vmem:[#allocation54_spill] sm:$0xff] %v10768_v38 }
 0x2f6   : > { %v10773_v54 = vpop.permute.xlu0 %2029  ;;  %2051 = vrot.lane.b32.xlu1 %v1892_v10, %s9472_s29  ;;  %v1956_v10 = vrot.slane %v1700_v39, %v9919_v51  ;;  %v2830_v39 = vcombine.high %v10523_v44, %v10523_v44  ;;  %v3205_v31 = vrot.slane %v2881_v46, %v9919_v51 }
 0x2f7   : > { %15705 = vst [vmem:[#allocation55_spill] sm:$0xff] %v10773_v54 }
 0x2f8   : > { %2065 = vrot.lane.b32.xlu0 %v1920_v6, %s9472_s29  ;;  %v10780_v13 = vpop.permute.xlu1 %2031  ;;  %v3169_v44 = vrot.slane %v2830_v39, %v9919_v51 }
 0x2f9   : > { %15706 = vst [vmem:[#allocation56_spill] sm:$0xff] %v10780_v13 }
 0x2fa   : > { %v10785_v36 = vpop.permute.xlu0 %2041  ;;  %2067 = vrot.lane.b32.xlu1 %v1924_v1, %s9472_s29  ;;  %v3109_v1 = vrot.slane %v2734_v50, %v9919_v51  ;;  %v2879_v50 = vcombine.high %v10554_v34, %v10554_v34 }
 0x2fb   : > { %15707 = vst [vmem:[#allocation57_spill] sm:$0xff] %v10785_v36 }
 0x2fc   : > { %2081 = vrot.lane.b32.xlu0 %v1952_v20, %s9472_s29  ;;  %v10792_v41 = vpop.permute.xlu1 %2043  ;;  %v3201_v34 = vrot.slane %v2879_v50, %v9919_v51 }
 0x2fd   : > { %15708 = vst [vmem:[#allocation58_spill] sm:$0xff] %v10792_v41 }
 0x2fe   : > { %v10797_v6 = vpop.permute.xlu0 %2045  ;;  %2083 = vrot.lane.b32.xlu1 %v1956_v10, %s9472_s29  ;;  %v3141_v10 = vrot.slane %v2783_v60, %v9919_v51  ;;  %v2928_v60 = vcombine.high %v10585_v2, %v10585_v2  ;;  %v2977_v2 = vcombine.high %v10616_v59, %v10616_v59 }
 0x2ff   : > { %15709 = vst [vmem:[#allocation59_spill] sm:$0xff] %v10797_v6 }
 0x300   : > { %3346 = vrot.lane.b32.xlu0 %v3105_v48, %s9472_s29  ;;  %v10804_v3 = vpop.permute.xlu1 %2047  ;;  %v3233_v50 = vrot.slane %v2928_v60, %v9919_v51  ;;  %v3265_v59 = vrot.slane %v2977_v2, %v9919_v51  ;;  %v3026_v60 = vcombine.high %v10647_v7, %v10647_v7 }
 0x301   : > { %15710 = vst [vmem:[#allocation60_spill] sm:$0xff] %v10804_v3 }
 0x302   : > { %v10809_v20 = vpop.permute.xlu0 %2057  ;;  %3348 = vrot.lane.b32.xlu1 %v3109_v1, %s9472_s29  ;;  %v3173_v1 = vrot.slane %v2832_v9, %v9919_v51  ;;  %v780_v9 = vsub.f32 %v9731_v16, %v9997_v12  ;;  %v2979_v16 = vcombine.high %v10623_v32, %v10623_v32  ;;  %v3297_v7 = vrot.slane %v3026_v60, %v9919_v51 }
 0x303   : > { %15711 = vst [vmem:[#allocation61_spill] sm:$0xff] %v10809_v20  ;;  %v783_v60 = vsub.f32 %v9749_v27, %v9997_v12 }
 0x304   : > { %3362 = vrot.lane.b32.xlu0 %v3137_v58, %s9472_s29  ;;  %v10816_v24 = vpop.permute.xlu1 %2059 }
 0x305   : > { %15712 = vst [vmem:[#allocation62_spill] sm:$0xff] %v10816_v24  ;;  %v15722_v24 = vld [vmem:[#allocation6_spill] sm:$0xff] }
 0x306   : > { %v10821_v48 = vpop.permute.xlu0 %2061  ;;  %3364 = vrot.lane.b32.xlu1 %v3141_v10, %s9472_s29  ;;  %v2930_v10 = vcombine.high %v10592_v8, %v10592_v8 }
 0x307   : > { %15713 = vst [vmem:[#allocation63_spill] sm:$0xff] %v10821_v48 }
 0x308   : > { %3378 = vrot.lane.b32.xlu0 %v3169_v44, %s9472_s29  ;;  %v10828_v37 = vpop.permute.xlu1 %2063  ;;  %v3237_v8 = vrot.slane %v2930_v10, %v9919_v51  ;;  %v782_v10 = vsub.f32 %v9763_v33, %v9997_v12  ;;  %v3075_v33 = vcombine.high %v10676_v15, %v10676_v15 }
 0x309   : > { %15714 = vst [vmem:[#allocation64_spill] sm:$0xff] %v10828_v37 }
 0x30a   : > { %v10831_v58 = vpop.permute.xlu0 %2073  ;;  %3380 = vrot.lane.b32.xlu1 %v3173_v1, %s9472_s29  ;;  %v791_v1 = vmul.f32 %v10006_v18, %v780_v9  ;;  %v793_v2 = vmul.f32 %v10006_v18, %v782_v10 }
 0x30b   : > { %15715 = vst [vmem:[#allocation65_spill] sm:$0xff] %v10831_v58 }
 0x30c   : > { %3394 = vrot.lane.b32.xlu0 %v3201_v34, %s9472_s29  ;;  %v10838_v39 = vpop.permute.xlu1 %2075  ;;  %v781_v34 = vsub.f32 %v9725_v14, %v9997_v12  ;;  %v10866_v9 = vmax.f32 %v791_v1, 0.0  ;;  %v3269_v14 = vrot.slane %v2979_v16, %v9919_v51  ;;  %v10896_v10 = vmax.f32 %v793_v2, 0.0 }
 0x30d   : > { %15716 = vst [vmem:[#allocation66_spill] sm:$0xff] %v10838_v39 }
 0x30e   : > { %v10845_v44 = vpop.permute.xlu0 %2077  ;;  %3396 = vrot.lane.b32.xlu1 %v3205_v31, %s9472_s29  ;;  %v2229_v1 = vrot.slane %v10866_v9, %v9958_v49  ;;  %v2222_v45 = vcombine.high %v10866_v9, %v10866_v9 }
 0x30f   : > { %15717 = vst [vmem:[#allocation67_spill] sm:$0xff] %v10845_v44 }
 0x310   : > { %3410 = vrot.lane.b32.xlu0 %v3233_v50, %s9472_s29  ;;  %v10853_v46 = vpop.permute.xlu1 %2079  ;;  %v792_v50 = vmul.f32 %v10006_v18, %v781_v34  ;;  %v10912_v58 = vrot.slane %v2229_v1, %v9958_v49 }
 0x311   : > { %15718 = vst [vmem:[#allocation68_spill] sm:$0xff] %v10853_v46  ;;  %v15719_v46 = vld [vmem:[#allocation5_spill] sm:$0xff] }
 0x312   : > { %v10860_v31 = vpop.permute.xlu0 %3338  ;;  %3412 = vrot.lane.b32.xlu1 %v3237_v8, %s9472_s29  ;;  %v3028_v8 = vcombine.high %v10654_v0, %v10654_v0  ;;  %v10886_v34 = vmax.f32 %v792_v50, 0.0  ;;  %v3329_v50 = vrot.slane %v3075_v33, %v9919_v51  ;;  %v2327_v33 = vrot.slane %v10896_v10, %v9958_v49 }
 0x314   : > { %3426 = vrot.lane.b32.xlu0 %v3265_v59, %s9472_s29  ;;  %v10872_v32 = vpop.permute.xlu1 %3340  ;;  %v3301_v0 = vrot.slane %v3028_v8, %v9919_v51  ;;  %v3077_v59 = vcombine.high %v10683_v47, %v10683_v47  ;;  %v794_v8 = vmul.f32 %v10006_v18, %v783_v60  ;;  %v784_v47 = vsub.f32 %v15719_v46, %v9997_v12 }
 0x315   : > { %v3526_v46 = vsel %vm2149_vm6, %v10912_v58, %v10533_v42  ;;  %v2335_v37 = vcombine.high %v2327_v33, %v2327_v33 }
 0x316   : > { %v10878_v44 = vpop.permute.xlu0 %3342  ;;  %3428 = vrot.lane.b32.xlu1 %v3269_v14, %s9472_s29  ;;  %v2237_v14 = vcombine.high %v2229_v1, %v2229_v1  ;;  %v3333_v2 = vrot.slane %v3077_v59, %v9919_v51  ;;  %v10926_v1 = vmax.f32 %v794_v8, 0.0  ;;  %v15720_v59 = vld [vmem:[#allocation4_spill] sm:$0xff] }
 0x318   : > { %3442 = vrot.lane.b32.xlu0 %v3297_v7, %s9472_s29  ;;  %v10889_v16 = vpop.permute.xlu1 %3344  ;;  %v2278_v7 = vrot.slane %v10886_v34, %v9958_v49  ;;  %v10924_v60 = vrot.slane %v2237_v14, %v9958_v49 }
 0x31a   : > { %v10898_v15 = vpop.permute.xlu0 %3354  ;;  %3444 = vrot.lane.b32.xlu1 %v3301_v0, %s9472_s29  ;;  %v795_v0 = vmul.f32 %v10006_v18, %v784_v47  ;;  %v2286_v51 = vcombine.high %v2278_v7, %v2278_v7  ;;  %v10937_v39 = vrot.slane %v2278_v7, %v9958_v49 }
 0x31c   : > { %3458 = vrot.lane.b32.xlu0 %v3329_v50, %s9472_s29  ;;  %v10908_v27 = vpop.permute.xlu1 %3356  ;;  %v785_v50 = vsub.f32 %v15720_v59, %v9997_v12  ;;  %v10939_v42 = vmax.f32 %v795_v0, 0.0  ;;  %v10949_v59 = vrot.slane %v2286_v51, %v9958_v49 }
 0x31e   : > { %v10917_v48 = vpop.permute.xlu0 %3358  ;;  %3460 = vrot.lane.b32.xlu1 %v3333_v2, %s9472_s29  ;;  %v3527_v2 = vsel %vm2149_vm6, %v10924_v60, %v10543_v17  ;;  %v796_v14 = vmul.f32 %v10006_v18, %v785_v50  ;;  %v2376_v17 = vrot.slane %v10926_v1, %v9958_v49  ;;  %v3535_v0 = vsel %vm2149_vm6, %v10949_v59, %v10557_v28 }
 0x31f   : > { %v10960_v50 = vrot.slane %v2327_v33, %v9958_v49  ;;  %v2425_v51 = vrot.slane %v10939_v42, %v9958_v49  ;;  %v10975_v28 = vrot.slane %v2335_v37, %v9958_v49 }
 0x320   : > { %3654 = vrot.lane.b32.xlu0 %v3526_v46, %s9471_s28  ;;  %v10931_v47 = vpop.permute.xlu1 %3360  ;;  %v3534_v46 = vsel %vm2149_vm6, %v10937_v39, %v10549_v35  ;;  %v15721_v35 = vld [vmem:[#allocation7_spill] sm:$0xff]  ;;  %v10966_v6 = vmax.f32 %v796_v14, 0.0  ;;  %v2384_v33 = vcombine.high %v2376_v17, %v2376_v17 }
 0x321   : > { %v3543_v14 = vsel %vm2149_vm6, %v10975_v28, %v10574_v29  ;;  %v2433_v36 = vcombine.high %v2425_v51, %v2425_v51 }
 0x322   : > { %v10942_v8 = vpop.permute.xlu0 %3370  ;;  %3656 = vrot.lane.b32.xlu1 %v3527_v2, %s9471_s28  ;;  %v786_v2 = vsub.f32 %v15721_v35, %v9997_v12  ;;  %v2474_v37 = vrot.slane %v10966_v6, %v9958_v49  ;;  %v10998_v29 = vrot.slane %v2384_v33, %v9958_v49 }
 0x324   : > { %3670 = vrot.lane.b32.xlu0 %v3534_v46, %s9471_s28  ;;  %v10954_v7 = vpop.permute.xlu1 %3372  ;;  %v3542_v46 = vsel %vm2149_vm6, %v10960_v50, %v10564_v5  ;;  %v797_v3 = vmul.f32 %v10006_v18, %v786_v2  ;;  %v787_v5 = vsub.f32 %v15722_v24, %v9997_v12  ;;  %v3551_v24 = vsel %vm2149_vm6, %v10998_v29, %v10588_v25 }
 0x326   : > { %v10968_v20 = vpop.permute.xlu0 %3374  ;;  %3672 = vrot.lane.b32.xlu1 %v3535_v0, %s9471_s28  ;;  %v10985_v0 = vrot.slane %v2376_v17, %v9958_v49  ;;  %v11000_v17 = vmax.f32 %v797_v3, 0.0  ;;  %v2482_v3 = vcombine.high %v2474_v37, %v2474_v37 }
 0x328   : > { %3686 = vrot.lane.b32.xlu0 %v3542_v46, %s9471_s28  ;;  %v10979_v35 = vpop.permute.xlu1 %3376  ;;  %v3550_v2 = vsel %vm2149_vm6, %v10985_v0, %v10580_v11  ;;  %v798_v46 = vmul.f32 %v10006_v18, %v787_v5  ;;  %v11013_v11 = vrot.slane %v2433_v36, %v9958_v49  ;;  %v2523_v5 = vrot.slane %v11000_v17, %v9958_v49 }
 0x32a   : > { %v10991_v54 = vpop.permute.xlu0 %3386  ;;  %3688 = vrot.lane.b32.xlu1 %v3543_v14, %s9471_s28  ;;  %v11010_v14 = vrot.slane %v2425_v51, %v9958_v49  ;;  %v3559_v36 = vsel %vm2149_vm6, %v11013_v11, %v10607_v55  ;;  %v11032_v51 = vrot.slane %v2474_v37, %v9958_v49 }
 0x32c   : > { %3702 = vrot.lane.b32.xlu0 %v3550_v2, %s9471_s28  ;;  %v11004_v12 = vpop.permute.xlu1 %3388  ;;  %v3558_v18 = vsel %vm2149_vm6, %v11010_v14, %v10597_v23  ;;  %v11023_v2 = vmax.f32 %v798_v46, 0.0  ;;  %v3566_v23 = vsel %vm2149_vm6, %v11032_v51, %v10611_v57  ;;  %v11041_v46 = vrot.slane %v2482_v3, %v9958_v49 }
 0x32e   : > { %v11015_v33 = vpop.permute.xlu0 %3390  ;;  %3704 = vrot.lane.b32.xlu1 %v3551_v24, %s9471_s28  ;;  %v2572_v41 = vrot.slane %v11023_v2, %v9958_v49  ;;  %v3567_v37 = vsel %vm2149_vm6, %v11041_v46, %v10619_v56 }
 0x330   : > { %3718 = vrot.lane.b32.xlu0 %v3558_v18, %s9471_s28  ;;  %v11026_v25 = vpop.permute.xlu1 %3392  ;;  %v2531_v18 = vcombine.high %v2523_v5, %v2523_v5 }
 0x332   : > { %v11034_v24 = vpop.permute.xlu0 %3402  ;;  %3720 = vrot.lane.b32.xlu1 %v3559_v36, %s9471_s28  ;;  %v11052_v36 = vrot.slane %v2523_v5, %v9958_v49  ;;  %v11061_v3 = vrot.slane %v2531_v18, %v9958_v49  ;;  %v15723_v5 = vld [vmem:[#allocation37_spill] sm:$0xff] }
 0x334   : > { %3734 = vrot.lane.b32.xlu0 %v3566_v23, %s9471_s28  ;;  %v11046_v55 = vpop.permute.xlu1 %3404  ;;  %v3574_v57 = vsel %vm2149_vm6, %v11052_v36, %v10628_v40  ;;  %v2580_v23 = vcombine.high %v2572_v41, %v2572_v41  ;;  %v3575_v38 = vsel %vm2149_vm6, %v11061_v3, %v15723_v5  ;;  %v15724_v40 = vld [vmem:[#allocation38_spill] sm:$0xff]  ;;  %v2563_v4 = vcombine.high %v11061_v3, %v11061_v3 }
 0x336   : > { %v11054_v13 = vpop.permute.xlu0 %3406  ;;  %3736 = vrot.lane.b32.xlu1 %v3567_v37, %s9471_s28  ;;  %v11072_v37 = vrot.slane %v2572_v41, %v9958_v49  ;;  %v11081_v9 = vrot.slane %v2580_v23, %v9958_v49 }
 0x338   : > { %3750 = vrot.lane.b32.xlu0 %v3574_v57, %s9471_s28  ;;  %v11066_v56 = vpop.permute.xlu1 %3408  ;;  %v3582_v18 = vsel %vm2149_vm6, %v11072_v37, %v15724_v40  ;;  %v2236_v57 = vrot.slane %v2222_v45, %v9958_v49  ;;  %v3583_v41 = vsel %vm2149_vm6, %v11081_v9, %v10650_v22  ;;  %v2269_v45 = vcombine.high %v10924_v60, %v10924_v60 }
 0x33a   : > { %v11074_v63 = vpop.permute.xlu0 %3418  ;;  %3752 = vrot.lane.b32.xlu1 %v3575_v38, %s9471_s28  ;;  %v2267_v38 = vcombine.high %v10912_v58, %v10912_v58  ;;  %v2238_v40 = vcombine.high %v2236_v57, %v2236_v57  ;;  %v3529_v58 = vsel %vm2149_vm6, %v2269_v45, %v10872_v32  ;;  %v11107_v26 = vrot.slane %v2236_v57, %v9958_v49 }
 0x33b   : > { %v2316_v57 = vcombine.high %v10937_v39, %v10937_v39  ;;  %v2318_v45 = vcombine.high %v10949_v59, %v10949_v59 }
 0x33c   : > { %3766 = vrot.lane.b32.xlu0 %v3582_v18, %s9471_s28  ;;  %v11085_v53 = vpop.permute.xlu1 %3420  ;;  %v3528_v23 = vsel %vm2149_vm6, %v2267_v38, %v10860_v31  ;;  %v2271_v18 = vcombine.high %v10886_v34, %v10886_v34  ;;  %v3530_v31 = vsel %vm2149_vm6, %v11107_v26, %v10878_v44  ;;  %v11116_v34 = vrot.slane %v2238_v40, %v9958_v49 }
 0x33d   : > { %v3536_v44 = vsel %vm2149_vm6, %v2316_v57, %v10898_v15  ;;  %v3537_v39 = vsel %vm2149_vm6, %v2318_v45, %v10908_v27 }
 0x33e   : > { %v11092_v5 = vpop.permute.xlu0 %3422  ;;  %3768 = vrot.lane.b32.xlu1 %v3583_v41, %s9471_s28  ;;  %v2285_v60 = vrot.slane %v2271_v18, %v9958_v49  ;;  %v3531_v32 = vsel %vm2149_vm6, %v11116_v34, %v10889_v16  ;;  %v2320_v18 = vcombine.high %v10896_v10, %v10896_v10 }
 0x340   : > { %3658 = vrot.lane.b32.xlu0 %v3528_v23, %s9471_s28  ;;  %v11102_v22 = vpop.permute.xlu1 %3424  ;;  %v2287_v40 = vcombine.high %v2285_v60, %v2285_v60  ;;  %v2334_v59 = vrot.slane %v2320_v18, %v9958_v49 }
 0x342   : > { %v11109_v41 = vpop.permute.xlu0 %3434  ;;  %3660 = vrot.lane.b32.xlu1 %v3529_v58, %s9471_s28  ;;  %v11142_v58 = vrot.slane %v2285_v60, %v9958_v49  ;;  %v11151_v10 = vrot.slane %v2287_v40, %v9958_v49  ;;  %v2365_v60 = vcombine.high %v10960_v50, %v10960_v50  ;;  %v2336_v45 = vcombine.high %v2334_v59, %v2334_v59 }
 0x343   : > { %v2369_v40 = vcombine.high %v10926_v1, %v10926_v1  ;;  %v11177_v18 = vrot.slane %v2334_v59, %v9958_v49  ;;  %v2414_v59 = vcombine.high %v10985_v0, %v10985_v0 }
 0x344   : > { %3662 = vrot.lane.b32.xlu0 %v3530_v31, %s9471_s28  ;;  %v11120_v38 = vpop.permute.xlu1 %3436  ;;  %v3538_v15 = vsel %vm2149_vm6, %v11142_v58, %v10917_v48  ;;  %v3539_v27 = vsel %vm2149_vm6, %v11151_v10, %v10931_v47  ;;  %v3544_v48 = vsel %vm2149_vm6, %v2365_v60, %v10942_v8  ;;  %v11186_v1 = vrot.slane %v2336_v45, %v9958_v49 }
 0x345   : > { %v3546_v8 = vsel %vm2149_vm6, %v11177_v18, %v10968_v20  ;;  %v3552_v20 = vsel %vm2149_vm6, %v2414_v59, %v10991_v54  ;;  %v2416_v60 = vcombine.high %v10998_v29, %v10998_v29 }
 0x346   : > { %v11127_v23 = vpop.permute.xlu0 %3438  ;;  %3664 = vrot.lane.b32.xlu1 %v3531_v32, %s9471_s28 }
 0x347   : > { %v3553_v0 = vsel %vm2149_vm6, %v2416_v60, %v11004_v12 }
 0x348   : > { %3674 = vrot.lane.b32.xlu0 %v3536_v44, %s9471_s28  ;;  %v11137_v16 = vpop.permute.xlu1 %3440  ;;  %v2367_v44 = vcombine.high %v10975_v28, %v10975_v28  ;;  %v2383_v28 = vrot.slane %v2369_v40, %v9958_v49 }
 0x34a   : > { %v11144_v31 = vpop.permute.xlu0 %3450  ;;  %3676 = vrot.lane.b32.xlu1 %v3537_v39, %s9471_s28  ;;  %v3545_v50 = vsel %vm2149_vm6, %v2367_v44, %v10954_v7  ;;  %v3547_v7 = vsel %vm2149_vm6, %v11186_v1, %v10979_v35  ;;  %v2418_v44 = vcombine.high %v10939_v42, %v10939_v42  ;;  %v11212_v45 = vrot.slane %v2383_v28, %v9958_v49 }
 0x34c   : > { %3678 = vrot.lane.b32.xlu0 %v3538_v15, %s9471_s28  ;;  %v11155_v32 = vpop.permute.xlu1 %3452  ;;  %v3554_v54 = vsel %vm2149_vm6, %v11212_v45, %v11015_v33  ;;  %v2432_v29 = vrot.slane %v2418_v44, %v9958_v49 }
 0x34e   : > { %v11162_v57 = vpop.permute.xlu0 %3454  ;;  %3680 = vrot.lane.b32.xlu1 %v3539_v27, %s9471_s28  ;;  %v2434_v59 = vcombine.high %v2432_v29, %v2432_v29  ;;  %v11247_v60 = vrot.slane %v2432_v29, %v9958_v49  ;;  %v2512_v29 = vcombine.high %v11032_v51, %v11032_v51 }
 0x350   : > { %3690 = vrot.lane.b32.xlu0 %v3544_v48, %s9471_s28  ;;  %v11172_v47 = vpop.permute.xlu1 %3456  ;;  %v2385_v48 = vcombine.high %v2383_v28, %v2383_v28 }
 0x352   : > { %v11179_v39 = vpop.permute.xlu0 %1969  ;;  %3692 = vrot.lane.b32.xlu1 %v3545_v50, %s9471_s28  ;;  %v11221_v42 = vrot.slane %v2385_v48, %v9958_v49 }
 0x354   : > { %3694 = vrot.lane.b32.xlu0 %v3546_v8, %s9471_s28  ;;  %v11190_v15 = vpop.permute.xlu1 %1971  ;;  %v3555_v12 = vsel %vm2149_vm6, %v11221_v42, %v11026_v25  ;;  %v2463_v8 = vcombine.high %v11010_v14, %v11010_v14 }
 0x356   : > { %v11197_v27 = vpop.permute.xlu0 %1985  ;;  %3696 = vrot.lane.b32.xlu1 %v3547_v7, %s9471_s28  ;;  %v3560_v33 = vsel %vm2149_vm6, %v2463_v8, %v11034_v24  ;;  %v2465_v7 = vcombine.high %v11013_v11, %v11013_v11  ;;  %v3562_v11 = vsel %vm2149_vm6, %v11247_v60, %v11054_v13  ;;  %v15733_v13 = vld [vmem:[#allocation14_spill] sm:$0xff]  ;;  %v15734_v8 = vld [vmem:[#allocation15_spill] sm:$0xff] }
 0x357   : > { %15725 = vst [vmem:[#allocation5_spill] sm:$0xff] %v11197_v27 }
 0x358   : > { %3706 = vrot.lane.b32.xlu0 %v3552_v20, %s9471_s28  ;;  %v11207_v35 = vpop.permute.xlu1 %1987  ;;  %v2467_v20 = vcombine.high %v10966_v6, %v10966_v6  ;;  %v3561_v14 = vsel %vm2149_vm6, %v2465_v7, %v11046_v55  ;;  %v11256_v6 = vrot.slane %v2434_v59, %v9958_v49  ;;  %v15732_v55 = vld [vmem:[#allocation13_spill] sm:$0xff]  ;;  %v15735_v7 = vld [vmem:[#allocation16_spill] sm:$0xff] }
 0x359   : > { %v11277_v59 = vmax.f32 %v15735_v7, 0.0 }
 0x35a   : > { %v11214_v40 = vpop.permute.xlu0 %2001  ;;  %3708 = vrot.lane.b32.xlu1 %v3553_v0, %s9471_s28  ;;  %v2481_v24 = vrot.slane %v2467_v20, %v9958_v49  ;;  %v11263_v0 = vmax.f32 %v15732_v55, 0.0  ;;  %v15737_v55 = vld [vmem:[#allocation17_spill] sm:$0xff] }
 0x35b   : > { %15726 = vst [vmem:[#allocation4_spill] sm:$0xff] %v11214_v40 }
 0x35c   : > { %3710 = vrot.lane.b32.xlu0 %v3554_v54, %s9471_s28  ;;  %v11225_v50 = vpop.permute.xlu1 %2003  ;;  %v3563_v54 = vsel %vm2149_vm6, %v11256_v6, %v11066_v56  ;;  %v2514_v56 = vcombine.high %v11041_v46, %v11041_v46  ;;  %v2483_v51 = vcombine.high %v2481_v24, %v2481_v24 }
 0x35d   : > { %15727 = vst [vmem:[#allocation7_spill] sm:$0xff] %v11225_v50 }
 0x35e   : > { %v11232_v28 = vpop.permute.xlu0 %2017  ;;  %3712 = vrot.lane.b32.xlu1 %v3555_v12, %s9471_s28  ;;  %v11271_v12 = vmax.f32 %v15733_v13, 0.0  ;;  %v11289_v13 = vmax.f32 %v15737_v55, 0.0  ;;  %v3569_v46 = vsel %vm2149_vm6, %v2514_v56, %v11085_v53 }
 0x35f   : > { %15728 = vst [vmem:[#allocation6_spill] sm:$0xff] %v11232_v28 }
 0x360   : > { %3722 = vrot.lane.b32.xlu0 %v3560_v33, %s9471_s28  ;;  %v11242_v25 = vpop.permute.xlu1 %2019  ;;  %v11274_v33 = vmax.f32 %v15734_v8, 0.0  ;;  %v15738_v8 = vld [vmem:[#allocation18_spill] sm:$0xff]  ;;  %v901_v55 = vrot.slane %v11271_v12, %v9958_v49  ;;  %v894_v19 = vcombine.high %v11271_v12, %v11271_v12 }
 0x361   : > { %15729 = vst [vmem:[#allocation37_spill] sm:$0xff] %v11242_v25  ;;  %v11292_v7 = vmax.f32 %v15738_v8, 0.0  ;;  %v999_v8 = vrot.slane %v11277_v59, %v9958_v49 }
 0x362   : > { %v11249_v48 = vpop.permute.xlu0 %2033  ;;  %3724 = vrot.lane.b32.xlu1 %v3561_v14, %s9471_s28  ;;  %v3568_v14 = vsel %vm2149_vm6, %v2512_v29, %v11074_v63  ;;  %v852_v63 = vrot.slane %v11263_v0, %v9958_v49  ;;  %v11355_v30 = vrot.slane %v901_v55, %v9958_v49 }
 0x363   : > { %15730 = vst [vmem:[#allocation38_spill] sm:$0xff] %v11249_v48  ;;  %v1007_v40 = vcombine.high %v999_v8, %v999_v8 }
 0x364   : > { %3726 = vrot.lane.b32.xlu0 %v3562_v11, %s9471_s28  ;;  %v11260_v44 = vpop.permute.xlu1 %2035  ;;  %v2516_v11 = vcombine.high %v11000_v17, %v11000_v17  ;;  %v11305_v17 = vrot.slane %v2481_v24, %v9958_v49  ;;  %v11323_v24 = vrot.slane %v2483_v51, %v9958_v49  ;;  %v2561_v51 = vcombine.high %v11052_v36, %v11052_v36 }
 0x365   : > { %15731 = vst [vmem:[#allocation69_spill] sm:$0xff] %v11260_v44  ;;  %v1048_v44 = vrot.slane %v11289_v13, %v9958_v49  ;;  %v2565_v36 = vcombine.high %v11023_v2, %v11023_v2  ;;  %v11352_v50 = vrot.slane %v852_v63, %v9958_v49  ;;  %v3577_v2 = vsel %vm2149_vm6, %v2563_v4, %v11120_v38 }
 0x366   : > { %v11279_v20 = vpop.permute.xlu0 %2049  ;;  %3728 = vrot.lane.b32.xlu1 %v3563_v54, %s9471_s28  ;;  %v15740_v54 = vld [vmem:[#allocation19_spill] sm:$0xff]  ;;  %v3570_v53 = vsel %vm2149_vm6, %v11305_v17, %v11092_v5  ;;  %v2530_v56 = vrot.slane %v2516_v11, %v9958_v49  ;;  %v3571_v5 = vsel %vm2149_vm6, %v11323_v24, %v11102_v22  ;;  %v909_v11 = vcombine.high %v901_v55, %v901_v55 }
 0x367   : > { %15736 = vst [vmem:[#allocation13_spill] sm:$0xff] %v11279_v20  ;;  %v11300_v29 = vmax.f32 %v15740_v54, 0.0 }
 0x368   : > { %3738 = vrot.lane.b32.xlu0 %v3568_v14, %s9471_s28  ;;  %v11295_v20 = vpop.permute.xlu1 %2051  ;;  %v950_v14 = vrot.slane %v11274_v33, %v9958_v49  ;;  %v2532_v22 = vcombine.high %v2530_v56, %v2530_v56  ;;  %v11375_v55 = vrot.slane %v909_v11, %v9958_v49 }
 0x369   : > { %15739 = vst [vmem:[#allocation14_spill] sm:$0xff] %v11295_v20  ;;  %v15741_v20 = vld [vmem:[#allocation20_spill] sm:$0xff]  ;;  %v1146_v28 = vrot.slane %v11300_v29, %v9958_v49 }
 0x36a   : > { %v11314_v48 = vmax.f32 %v15741_v20, 0.0  ;;  %v11316_v54 = vpop.permute.xlu0 %2065  ;;  %3740 = vrot.lane.b32.xlu1 %v3569_v46, %s9471_s28  ;;  %v1097_v20 = vrot.slane %v11292_v7, %v9958_v49  ;;  %v860_v46 = vcombine.high %v852_v63, %v852_v63  ;;  %v958_v25 = vcombine.high %v950_v14, %v950_v14 }
 0x36b   : > { %15742 = vst [vmem:[#allocation15_spill] sm:$0xff] %v11316_v54  ;;  %v11372_v63 = vrot.slane %v2530_v56, %v9958_v49  ;;  %v11393_v38 = vrot.slane %v2532_v22, %v9958_v49  ;;  %v11403_v11 = vrot.slane %v1146_v28, %v9958_v49  ;;  %v845_v22 = vcombine.high %v11263_v0, %v11263_v0 }
 0x36c   : > { %3742 = vrot.lane.b32.xlu0 %v3570_v53, %s9471_s28  ;;  %v11331_v54 = vpop.permute.xlu1 %2067  ;;  %v1195_v62 = vrot.slane %v11314_v48, %v9958_v49  ;;  %v11364_v3 = vrot.slane %v860_v46, %v9958_v49  ;;  %v1105_v46 = vcombine.high %v1097_v20, %v1097_v20  ;;  %v11400_v56 = vrot.slane %v1097_v20, %v9958_v49 }
 0x36d   : > { %15743 = vst [vmem:[#allocation16_spill] sm:$0xff] %v11331_v54  ;;  %v3576_v54 = vsel %vm2149_vm6, %v2561_v51, %v11109_v41  ;;  %v11367_v51 = vrot.slane %v999_v8, %v9958_v49  ;;  %v11387_v8 = vrot.slane %v1007_v40, %v9958_v49  ;;  %v3578_v4 = vsel %vm2149_vm6, %v11372_v63, %v11127_v23 }
 0x36e   : > { %v11342_v53 = vpop.permute.xlu0 %2081  ;;  %3744 = vrot.lane.b32.xlu1 %v3571_v5, %s9471_s28  ;;  %v1056_v5 = vcombine.high %v1048_v44, %v1048_v44  ;;  %v1154_v40 = vcombine.high %v1146_v28, %v1146_v28  ;;  %v11409_v23 = vrot.slane %v1195_v62, %v9958_v49  ;;  %v2610_v20 = vcombine.high %v11072_v37, %v11072_v37 }
 0x36f   : > { %15744 = vst [vmem:[#allocation17_spill] sm:$0xff] %v11342_v53  ;;  %v11358_v53 = vrot.slane %v950_v14, %v9958_v49  ;;  %v11378_v14 = vrot.slane %v958_v25, %v9958_v49  ;;  %v2579_v25 = vrot.slane %v2565_v36, %v9958_v49  ;;  %v3579_v36 = vsel %vm2149_vm6, %v11393_v38, %v11137_v16 }
 0x370   : > { %3754 = vrot.lane.b32.xlu0 %v3576_v54, %s9471_s28  ;;  %v11361_v41 = vpop.permute.xlu1 %2083  ;;  %v11381_v54 = vrot.slane %v1048_v44, %v9958_v49  ;;  %v11397_v44 = vrot.slane %v1056_v5, %v9958_v49  ;;  %15746 = vst [vmem:[#allocation19_spill] sm:$0xff] %v11409_v23  ;;  %v11419_v5 = vrot.slane %v1105_v46, %v9958_v49 }
 0x371   : > { %15745 = vst [vmem:[#allocation18_spill] sm:$0xff] %v11361_v41  ;;  %v1203_v28 = vcombine.high %v1195_v62, %v1195_v62  ;;  %v943_v16 = vcombine.high %v11274_v33, %v11274_v33  ;;  %v3584_v37 = vsel %vm2149_vm6, %v2610_v20, %v11144_v31  ;;  %v2612_v0 = vcombine.high %v11081_v9, %v11081_v9 }
 0x372   : > { %v11383_v41 = vpop.permute.xlu0 %3346  ;;  %3756 = vrot.lane.b32.xlu1 %v3577_v2, %s9471_s28  ;;  %v2581_v62 = vcombine.high %v2579_v25, %v2579_v25  ;;  %v11435_v46 = vrot.slane %v1154_v40, %v9958_v49  ;;  %v859_v31 = vrot.slane %v845_v22, %v9958_v49  ;;  %v11452_v20 = vrot.slane %v2579_v25, %v9958_v49 }
 0x373   : > { %v3585_v40 = vsel %vm2149_vm6, %v2612_v0, %v11155_v32  ;;  %v1041_v22 = vcombine.high %v11289_v13, %v11289_v13  ;;  %v957_v25 = vrot.slane %v943_v16, %v9958_v49  ;;  %v2268_v0 = vcombine.high %v11107_v26, %v11107_v26 }
 0x374   : > { %3758 = vrot.lane.b32.xlu0 %v3578_v4, %s9471_s28  ;;  %v11406_v2 = vpop.permute.xlu1 %3348  ;;  %v11455_v4 = vrot.slane %v1203_v28, %v9958_v49  ;;  %v3586_v28 = vsel %vm2149_vm6, %v11452_v20, %v11162_v57  ;;  %v861_v32 = vcombine.high %v859_v31, %v859_v31 }
 0x375   : > { %v3532_v26 = vsel %vm2149_vm6, %v2268_v0, %v11383_v41  ;;  %v11520_v41 = vrot.slane %v957_v25, %v9958_v49  ;;  %v2317_v0 = vcombine.high %v11142_v58, %v11142_v58 }
 0x376   : > { %v11425_v43 = vpop.permute.xlu0 %3362  ;;  %3760 = vrot.lane.b32.xlu1 %v3579_v36, %s9471_s28  ;;  %v992_v36 = vcombine.high %v11277_v59, %v11277_v59  ;;  %v908_v59 = vrot.slane %v894_v19, %v9958_v49  ;;  %v11472_v19 = vrot.slane %v2581_v62, %v9958_v49  ;;  %v11517_v61 = vrot.slane %v861_v32, %v9958_v49 }
 0x377   : > { %v3540_v58 = vsel %vm2149_vm6, %v2317_v0, %v11425_v43 }
 0x378   : > { %3770 = vrot.lane.b32.xlu0 %v3584_v37, %s9471_s28  ;;  %v11444_v33 = vpop.permute.xlu1 %3364  ;;  %v3587_v62 = vsel %vm2149_vm6, %v11472_v19, %v11172_v47  ;;  %v910_v13 = vcombine.high %v908_v59, %v908_v59  ;;  %v1055_v37 = vrot.slane %v1041_v22, %v9958_v49  ;;  %v11501_v57 = vrot.slane %v908_v59, %v9958_v49 }
 0x379   : > { %v959_v47 = vcombine.high %v957_v25, %v957_v25 }
 0x37a   : > { %v11462_v12 = vpop.permute.xlu0 %3378  ;;  %3772 = vrot.lane.b32.xlu1 %v3585_v40, %s9471_s28  ;;  %v1006_v40 = vrot.slane %v992_v36, %v9958_v49  ;;  %v11492_v36 = vrot.slane %v859_v31, %v9958_v49  ;;  %v2270_v31 = vcombine.high %v11116_v34, %v11116_v34 }
 0x37b   : > { %v11537_v25 = vrot.slane %v959_v47, %v9958_v49 }
 0x37c   : > { %3774 = vrot.lane.b32.xlu0 %v3586_v28, %s9471_s28  ;;  %v11482_v16 = vpop.permute.xlu1 %3380  ;;  %v1090_v28 = vcombine.high %v11292_v7, %v11292_v7  ;;  %v1008_v27 = vcombine.high %v1006_v40, %v1006_v40  ;;  %v1139_v7 = vcombine.high %v11300_v29, %v11300_v29  ;;  %v3533_v34 = vsel %vm2149_vm6, %v2270_v31, %v11406_v2  ;;  %v15753_v2 = vld [vmem:[#allocation26_spill] sm:$0xff] }
 0x37d   : > { %v11527_v29 = vrot.slane %v910_v13, %v9958_v49  ;;  %v2319_v13 = vcombine.high %v11151_v10, %v11151_v10 }
 0x37e   : > { %v11497_v9 = vpop.permute.xlu0 %3394  ;;  %3776 = vrot.lane.b32.xlu1 %v3587_v62, %s9471_s28  ;;  %v1188_v62 = vcombine.high %v11314_v48, %v11314_v48  ;;  %v11530_v48 = vrot.slane %v1006_v40, %v9958_v49  ;;  %v1104_v22 = vrot.slane %v1090_v28, %v9958_v49  ;;  %v11546_v40 = vrot.slane %v1008_v27, %v9958_v49 }
 0x37f   : > { %v11549_v28 = vrot.slane %v1055_v37, %v9958_v49  ;;  %v1153_v31 = vrot.slane %v1139_v7, %v9958_v49  ;;  %v3541_v27 = vsel %vm2149_vm6, %v2319_v13, %v11444_v33 }
 0x380   : > { %3666 = vrot.lane.b32.xlu0 %v3532_v26, %s9471_s28  ;;  %v11514_v59 = vpop.permute.xlu1 %3396  ;;  %v1057_v26 = vcombine.high %v1055_v37, %v1055_v37  ;;  %v1202_v47 = vrot.slane %v1188_v62, %v9958_v49  ;;  %v2366_v37 = vcombine.high %v11177_v18, %v11177_v18  ;;  %v1106_v62 = vcombine.high %v1104_v22, %v1104_v22 }
 0x381   : > { %v11581_v13 = vrot.slane %v1104_v22, %v9958_v49  ;;  %v1155_v0 = vcombine.high %v1153_v31, %v1153_v31  ;;  %v2415_v22 = vcombine.high %v11212_v45, %v11212_v45 }
 0x382   : > { %v11533_v32 = vpop.permute.xlu0 %3410  ;;  %3668 = vrot.lane.b32.xlu1 %v3533_v34, %s9471_s28  ;;  %v11565_v7 = vrot.slane %v1057_v26, %v9958_v49  ;;  %v3548_v18 = vsel %vm2149_vm6, %v2366_v37, %v11462_v12  ;;  %v2368_v26 = vcombine.high %v11186_v1, %v11186_v1  ;;  %v1204_v10 = vcombine.high %v1202_v47, %v1202_v47 }
 0x383   : > { %v9477_v37 = vmov 1983009808  }
 0x384   : > { %3682 = vrot.lane.b32.xlu0 %v3540_v58, %s9471_s28  ;;  %v11554_v34 = vpop.permute.xlu1 %3412  ;;  %v3549_v1 = vsel %vm2149_vm6, %v2368_v26, %v11482_v16  ;;  %v3881_v33 = vunpack.c.l.s4 %v9477_v37  ;;  %v11597_v58 = vrot.slane %v1106_v62, %v9958_v49  ;;  %v3556_v62 = vsel %vm2149_vm6, %v2415_v22, %v11497_v9 }
 0x385   : > { %v11616_v26 = vrot.slane %v1155_v0, %v9958_v49  ;;  %v11619_v37 = vrot.slane %v1202_v47, %v9958_v49  ;;  %v2466_v0 = vcombine.high %v11256_v6, %v11256_v6 }
 0x386   : > { %v11571_v43 = vpop.permute.xlu0 %3426  ;;  %3684 = vrot.lane.b32.xlu1 %v3541_v27, %s9471_s28 }
 0x387   : > { %15747 = vst [vmem:[#allocation20_spill] sm:$0xff] %v11619_v37  ;;  %v3565_v22 = vsel %vm2149_vm6, %v2466_v0, %v11554_v34  ;;  %v2515_v37 = vcombine.high %v11323_v24, %v11323_v24  ;;  %v15757_v34 = vcombine.high %v11364_v3, %v11364_v3  ;;  %v2562_v24 = vcombine.high %v11372_v63, %v11372_v63 }
 0x388   : > { %3698 = vrot.lane.b32.xlu0 %v3548_v18, %s9471_s28  ;;  %v11586_v27 = vpop.permute.xlu1 %3428  ;;  %v11600_v18 = vrot.slane %v1153_v31, %v9958_v49  ;;  %v2417_v31 = vcombine.high %v11221_v42, %v11221_v42  ;;  %v15749_v42 = vld [vmem:[#allocation22_spill] sm:$0xff] }
 0x38a   : > { %v11604_v23 = vpop.permute.xlu0 %3442  ;;  %3700 = vrot.lane.b32.xlu1 %v3549_v1, %s9471_s28  ;;  %v11622_v1 = vrot.slane %v1204_v10, %v9958_v49  ;;  %v3557_v47 = vsel %vm2149_vm6, %v2417_v31, %v11514_v59  ;;  %v2464_v49 = vcombine.high %v11247_v60, %v11247_v60  ;;  %v3882_v10 = vunpack.c.0.s8 %v3881_v33  ;;  %v15750_v31 = vld [vmem:[#allocation24_spill] sm:$0xff] }
 0x38b   : > { %v2151_v59 = vsel %vm2149_vm6, %v11364_v3, %v15749_v42  ;;  %v2159_v60 = vsel %vm2149_vm6, %v11375_v55, %v15750_v31  ;;  %v2513_v42 = vcombine.high %v11305_v17, %v11305_v17  ;;  %v15754_v17 = vld [vmem:[#allocation12_spill] sm:$0xff] }
 0x38c   : > { %15748 = vst [vmem:[#allocation70_spill] sm:$0xff] %v11622_v1  ;;  %3714 = vrot.lane.b32.xlu0 %v3556_v62, %s9471_s28  ;;  %v11627_v45 = vpop.permute.xlu1 %3444  ;;  %v3564_v33 = vsel %vm2149_vm6, %v2464_v49, %v11533_v32  ;;  %v15751_v32 = vld [vmem:[#allocation21_spill] sm:$0xff]  ;;  %v15752_v49 = vld [vmem:[#allocation23_spill] sm:$0xff]  ;;  %v11679_v16 = vsub.s32 %v3882_v10, %v15754_v17  ;;  %v15762_v17 = vld [vmem:[#allocation28_spill] sm:$0xff] }
 0x38d   : > { %v2150_v6 = vsel %vm2149_vm6, %v11352_v50, %v15751_v32  ;;  %v2158_v62 = vsel %vm2149_vm6, %v11355_v30, %v15752_v49  ;;  %v15755_v49 = vld [vmem:[#allocation25_spill] sm:$0xff]  ;;  %v3572_v0 = vsel %vm2149_vm6, %v2513_v42, %v11571_v43  ;;  %v15759_v43 = vcombine.high %v11352_v50, %v11352_v50 }
 0x38e   : > { %v11643_v9 = vpop.permute.xlu0 %3458  ;;  %3716 = vrot.lane.b32.xlu1 %v3557_v47, %s9471_s28  ;;  %v2167_v47 = vsel %vm2149_vm6, %v11378_v14, %v15753_v2  ;;  %v3946_v12 = vcombine.low %v2158_v62, %v2159_v60  ;;  %v2166_v1 = vsel %vm2149_vm6, %v11358_v53, %v15755_v49  ;;  %v15756_v2 = vld [vmem:[#allocation40_spill] sm:$0xff]  ;;  %v2613_v60 = vcombine.high %v11472_v19, %v11472_v19 }
 0x38f   : > { %v2153_v10 = vsel %vm2149_vm6, %v15757_v34, %v15756_v2  ;;  %v4014_v62 = vcombine.low %v2166_v1, %v2167_v47  ;;  %v3573_v47 = vsel %vm2149_vm6, %v2515_v37, %v11586_v27  ;;  %v15763_v2 = vld [vmem:[#allocation42_spill] sm:$0xff]  ;;  %v15764_v34 = vld [vmem:[#allocation43_spill] sm:$0xff]  ;;  %v15765_v27 = vcombine.high %v11355_v30, %v11355_v30 }
 0x390   : > { %3730 = vrot.lane.b32.xlu0 %v3564_v33, %s9471_s28  ;;  %v11665_v31 = vpop.permute.xlu1 %3460  ;;  %v3878_v33 = vcombine.low %v2150_v6, %v2151_v59  ;;  %v2611_v59 = vcombine.high %v11452_v20, %v11452_v20  ;;  %v15758_v6 = vld [vmem:[#allocation39_spill] sm:$0xff]  ;;  %v15761_v20 = vcombine.high %v11517_v61, %v11517_v61  ;;  %v11726_v50 = vrot.slane %v3946_v12, %v11679_v16 }
 0x391   : > { %v2152_v63 = vsel %vm2149_vm6, %v15759_v43, %v15758_v6  ;;  %v2160_v12 = vsel %vm2149_vm6, %v15765_v27, %v15764_v34  ;;  %v15766_v37 = vcombine.high %v11492_v36, %v11492_v36  ;;  %v15767_v6 = vld [vmem:[#allocation27_spill] sm:$0xff]  ;;  %v15774_v27 = vld [vmem:[#allocation5_spill] sm:$0xff] }
 0x392   : > { %v11683_v32 = vpop.permute.xlu0 %3654  ;;  %3732 = vrot.lane.b32.xlu1 %v3565_v22, %s9471_s28  ;;  %v2564_v22 = vcombine.high %v11393_v38, %v11393_v38  ;;  %v15760_v38 = vcombine.high %v11375_v55, %v11375_v55  ;;  %v2157_v19 = vsel %vm2149_vm6, %v15761_v20, %v11190_v15  ;;  %v3886_v42 = vrot.slane %v3878_v33, %v11679_v16  ;;  %v15768_v20 = vld [vmem:[#allocation41_spill] sm:$0xff] }
 0x393   : > { %v2175_v55 = vsel %vm2149_vm6, %v11387_v8, %v15762_v17  ;;  %v3879_v49 = vcombine.low %v2152_v63, %v2153_v10  ;;  %v2155_v15 = vsel %vm2149_vm6, %v11517_v61, %v15763_v2  ;;  %v2156_v33 = vsel %vm2149_vm6, %v15766_v37, %v11179_v39 }
 0x394   : > { %3746 = vrot.lane.b32.xlu0 %v3572_v0, %s9471_s28  ;;  %v11705_v3 = vpop.permute.xlu1 %3656  ;;  %v2161_v1 = vsel %vm2149_vm6, %v15760_v38, %v10695_v21  ;;  %v3580_v10 = vsel %vm2149_vm6, %v2562_v24, %v11604_v23  ;;  %v11750_v0 = vrot.slane %v4014_v62, %v11679_v16  ;;  %v2174_v61 = vsel %vm2149_vm6, %v11367_v51, %v15767_v6  ;;  %v15777_v6 = vld [vmem:[#allocation45_spill] sm:$0xff] }
 0x395   : > { %v3947_v43 = vcombine.low %v2160_v12, %v2161_v1  ;;  %v3896_v30 = vcombine.low %v2156_v33, %v2157_v19  ;;  %v4082_v38 = vcombine.low %v2174_v61, %v2175_v55  ;;  %v2154_v39 = vsel %vm2149_vm6, %v11492_v36, %v15768_v20  ;;  %v15770_v1 = vld [vmem:[#allocation29_spill] sm:$0xff]  ;;  %v15776_v33 = vld [vmem:[#allocation44_spill] sm:$0xff] }
 0x396   : > { %v11731_v21 = vpop.permute.xlu0 %3670  ;;  %3748 = vrot.lane.b32.xlu1 %v3573_v47, %s9471_s28  ;;  %v15769_v23 = vcombine.high %v11527_v29, %v11527_v29  ;;  %v3581_v62 = vsel %vm2149_vm6, %v2564_v22, %v11627_v45  ;;  %v2182_v19 = vsel %vm2149_vm6, %v11381_v54, %v15770_v1  ;;  %v15771_v47 = vld [vmem:[#allocation30_spill] sm:$0xff]  ;;  %v3893_v55 = vrot.slane %v3879_v49, %v11679_v16 }
 0x397   : > { %v2183_v17 = vsel %vm2149_vm6, %v11397_v44, %v15771_v47  ;;  %v3895_v36 = vcombine.low %v2154_v39, %v2155_v15  ;;  %v15772_v45 = vld [vmem:[#allocation46_spill] sm:$0xff]  ;;  %v15773_v22 = vcombine.high %v11378_v14, %v11378_v14  ;;  %v15775_v12 = vcombine.high %v11501_v57, %v11501_v57 }
 0x398   : > { %3762 = vrot.lane.b32.xlu0 %v3580_v10, %s9471_s28  ;;  %v11756_v63 = vpop.permute.xlu1 %3672  ;;  %v2165_v24 = vsel %vm2149_vm6, %v15769_v23, %v11207_v35  ;;  %v2163_v35 = vsel %vm2149_vm6, %v11527_v29, %v10708_v52  ;;  %v3588_v15 = vsel %vm2149_vm6, %v2611_v59, %v11643_v9  ;;  %v3961_v37 = vrot.slane %v3947_v43, %v11679_v16  ;;  %v15779_v9 = vld [vmem:[#allocation50_spill] sm:$0xff] }
 0x399   : > { %v2169_v34 = vsel %vm2149_vm6, %v15773_v22, %v15772_v45  ;;  %v2164_v49 = vsel %vm2149_vm6, %v15775_v12, %v15774_v27  ;;  %v2162_v52 = vsel %vm2149_vm6, %v11501_v57, %v15776_v33  ;;  %v3910_v29 = vrot.slane %v3896_v30, %v11679_v16  ;;  %v15781_v57 = vld [vmem:[#allocation7_spill] sm:$0xff]  ;;  %v15783_v45 = vld [vmem:[#allocation48_spill] sm:$0xff]  ;;  %v15784_v27 = vld [vmem:[#allocation49_spill] sm:$0xff] }
 0x39a   : > { %v11775_v2 = vpop.permute.xlu0 %3686  ;;  %3764 = vrot.lane.b32.xlu1 %v3581_v62, %s9471_s28  ;;  %v3964_v14 = vcombine.low %v2164_v49, %v2165_v24  ;;  %v15778_v61 = vcombine.high %v11358_v53, %v11358_v53  ;;  %v15780_v59 = vcombine.high %v11387_v8, %v11387_v8  ;;  %v15782_v30 = vcombine.high %v11537_v25, %v11537_v25 }
 0x39b   : > { %v3589_v23 = vsel %vm2149_vm6, %v2613_v60, %v11665_v31  ;;  %v3894_v24 = vcombine.low %v3886_v42, %v3893_v55  ;;  %v3903_v53 = vrot.slane %v3895_v36, %v11679_v16  ;;  %v3963_v62 = vcombine.low %v2162_v52, %v2163_v35  ;;  %v15786_v42 = vld [vmem:[#allocation4_spill] sm:$0xff]  ;;  %v15789_v52 = vld [vmem:[#allocation37_spill] sm:$0xff] }
 0x39c   : > { %3778 = vrot.lane.b32.xlu0 %v3588_v15, %s9471_s28  ;;  %v11799_v10 = vpop.permute.xlu1 %3688  ;;  %v2168_v20 = vsel %vm2149_vm6, %v15778_v61, %v15777_v6  ;;  %v2177_v43 = vsel %vm2149_vm6, %v15780_v59, %v15779_v9  ;;  %v2173_v39 = vsel %vm2149_vm6, %v15782_v30, %v15781_v57  ;;  %v11823_v8 = vrot.slane %v4082_v38, %v11679_v16  ;;  %v15788_v15 = vld [vmem:[#allocation47_spill] sm:$0xff]  ;;  %v15791_v9 = vld [vmem:[#allocation52_spill] sm:$0xff] }
 0x39d   : > { %v4015_v1 = vcombine.low %v2168_v20, %v2169_v34  ;;  %v2171_v22 = vsel %vm2149_vm6, %v11537_v25, %v15783_v45  ;;  %v15785_v31 = vcombine.high %v11367_v51, %v11367_v51  ;;  %v15787_v55 = vcombine.high %v11520_v41, %v11520_v41 }
 0x39e   : > { %v11819_v47 = vpop.permute.xlu0 %3702  ;;  %3780 = vrot.lane.b32.xlu1 %v3589_v23, %s9471_s28  ;;  %v3911_v34 = vcombine.low %v3903_v53, %v3910_v29  ;;  %v3978_v38 = vrot.slane %v3964_v14, %v11679_v16  ;;  %v4150_v25 = vcombine.low %v2182_v19, %v2183_v17  ;;  %v3962_v51 = vcombine.low %v11726_v50, %v3961_v37  ;;  %v15793_v37 = vld [vmem:[#allocation51_spill] sm:$0xff] }
 0x39f   : > { %v2176_v60 = vsel %vm2149_vm6, %v15785_v31, %v15784_v27  ;;  %v2172_v36 = vsel %vm2149_vm6, %v15787_v55, %v15786_v42  ;;  %v2170_v33 = vsel %vm2149_vm6, %v11520_v41, %v15788_v15  ;;  %v15790_v6 = vcombine.high %v11546_v40, %v11546_v40  ;;  %v15792_v41 = vld [vmem:[#allocation32_spill] sm:$0xff]  ;;  %v15799_v31 = vld [vmem:[#allocation53_spill] sm:$0xff] }
 0x3a0   : > { %v4083_v35 = vcombine.low %v2176_v60, %v2177_v43  ;;  %v4032_v12 = vcombine.low %v2172_v36, %v2173_v39  ;;  %v11839_v49 = vpop.permute.xlu1 %3704  ;;  %4422 = vrot.lane.b32.xlu0 %v3894_v24, %s9474_s6  ;;  %v3971_v14 = vrot.slane %v3963_v62, %v11679_v16  ;;  %v4029_v61 = vrot.slane %v4015_v1, %v11679_v16  ;;  %v15794_v43 = vld [vmem:[#allocation54_spill] sm:$0xff]  ;;  %v15801_v42 = vld [vmem:[#allocation69_spill] sm:$0xff]  ;;  %v15803_v15 = vld [vmem:[#allocation56_spill] sm:$0xff] }
 0x3a1   : > { %v2181_v29 = vsel %vm2149_vm6, %v15790_v6, %v15789_v52  ;;  %v4031_v20 = vcombine.low %v2170_v33, %v2171_v22  ;;  %v2179_v19 = vsel %vm2149_vm6, %v11546_v40, %v15791_v9  ;;  %v2191_v17 = vsel %vm2149_vm6, %v11419_v5, %v15792_v41  ;;  %v15796_v39 = vld [vmem:[#allocation6_spill] sm:$0xff]  ;;  %v15798_v22 = vld [vmem:[#allocation31_spill] sm:$0xff] }
 0x3a2   : > { %v11856_v50 = vpop.permute.xlu0 %3718  ;;  %4424 = vrot.lane.b32.xlu1 %v3911_v34, %s9474_s6  ;;  %v2178_v59 = vsel %vm2149_vm6, %v11530_v48, %v15793_v37  ;;  %v15795_v57 = vcombine.high %v11397_v44, %v11397_v44  ;;  %v15797_v40 = vcombine.high %v11530_v48, %v11530_v48  ;;  %v4097_v24 = vrot.slane %v4083_v35, %v11679_v16  ;;  %v15804_v52 = vld [vmem:[#allocation58_spill] sm:$0xff]  ;;  %v15809_v37 = vld [vmem:[#allocation57_spill] sm:$0xff] }
 0x3a3   : > { %v3979_v53 = vcombine.low %v3971_v14, %v3978_v38  ;;  %v4046_v62 = vrot.slane %v4032_v12, %v11679_v16  ;;  %v2190_v44 = vsel %vm2149_vm6, %v11400_v56, %v15798_v22  ;;  %v4099_v27 = vcombine.low %v2178_v59, %v2179_v19  ;;  %v15816_v22 = vld [vmem:[#allocation34_spill] sm:$0xff] }
 0x3a4   : > { %v2185_v30 = vsel %vm2149_vm6, %v15795_v57, %v15794_v43  ;;  %v2180_v23 = vsel %vm2149_vm6, %v15797_v40, %v15796_v39  ;;  %v11877_v45 = vpop.permute.xlu1 %3720  ;;  %4430 = vrot.lane.b32.xlu0 %v3962_v51, %s9474_s6  ;;  %v15800_v48 = vcombine.high %v11381_v54, %v11381_v54  ;;  %v15802_v55 = vcombine.high %v11565_v7, %v11565_v7  ;;  %v15811_v43 = vld [vmem:[#allocation14_spill] sm:$0xff] }
 0x3a5   : > { %v4100_v1 = vcombine.low %v2180_v23, %v2181_v29  ;;  %v4158_v35 = vrot.slane %v4150_v25, %v11679_v16  ;;  %v4030_v34 = vcombine.low %v11750_v0, %v4029_v61  ;;  %v4039_v38 = vrot.slane %v4031_v20, %v11679_v16  ;;  %v15806_v29 = vld [vmem:[#allocation38_spill] sm:$0xff] }
 0x3a6   : > { %v2184_v60 = vsel %vm2149_vm6, %v15800_v48, %v15799_v31  ;;  %v2189_v36 = vsel %vm2149_vm6, %v15802_v55, %v15801_v42  ;;  %v11896_v51 = vpop.permute.xlu0 %3734  ;;  %4432 = vrot.lane.b32.xlu1 %v3979_v53, %s9474_s6  ;;  %v4218_v54 = vcombine.low %v2190_v44, %v2191_v17  ;;  %v2187_v33 = vsel %vm2149_vm6, %v11565_v7, %v15803_v15  ;;  %v15808_v7 = vld [vmem:[#allocation55_spill] sm:$0xff]  ;;  %v15818_v48 = vld [vmem:[#allocation13_spill] sm:$0xff] }
 0x3a7   : > { %v4151_v12 = vcombine.low %v2184_v60, %v2185_v30  ;;  %v15805_v6 = vcombine.high %v11419_v5, %v11419_v5  ;;  %v15807_v0 = vcombine.high %v11549_v28, %v11549_v28  ;;  %v4098_v61 = vcombine.low %v11823_v8, %v4097_v24  ;;  %v15813_v24 = vld [vmem:[#allocation62_spill] sm:$0xff]  ;;  %v15820_v55 = vld [vmem:[#allocation61_spill] sm:$0xff] }
 0x3a8   : > { %v4047_v20 = vcombine.low %v4039_v38, %v4046_v62  ;;  %v4114_v9 = vrot.slane %v4100_v1, %v11679_v16  ;;  %v11914_v41 = vpop.permute.xlu1 %3736  ;;  %4438 = vrot.lane.b32.xlu0 %v4030_v34, %s9474_s6  ;;  %v4107_v5 = vrot.slane %v4099_v27, %v11679_v16  ;;  %v2186_v17 = vsel %vm2149_vm6, %v11549_v28, %v15808_v7  ;;  %v15817_v27 = vld [vmem:[#allocation60_spill] sm:$0xff] }
 0x3a9   : > { %v2193_v25 = vsel %vm2149_vm6, %v15805_v6, %v15804_v52  ;;  %v2188_v14 = vsel %vm2149_vm6, %v15807_v0, %v15806_v29  ;;  %v15810_v59 = vcombine.high %v11400_v56, %v11400_v56  ;;  %v15812_v57 = vcombine.high %v11597_v58, %v11597_v58  ;;  %v15815_v56 = vld [vmem:[#allocation33_spill] sm:$0xff] }
 0x3aa   : > { %v4168_v19 = vcombine.low %v2188_v14, %v2189_v36  ;;  %v4165_v39 = vrot.slane %v4151_v12, %v11679_v16  ;;  %v4167_v40 = vcombine.low %v2186_v17, %v2187_v33  ;;  %v15814_v28 = vcombine.high %v11435_v46, %v11435_v46  ;;  %v11937_v62 = vpop.permute.xlu0 %3750  ;;  %4440 = vrot.lane.b32.xlu1 %v4047_v20, %s9474_s6  ;;  %v15822_v33 = vld [vmem:[#allocation59_spill] sm:$0xff] }
 0x3ab   : > { %v2192_v8 = vsel %vm2149_vm6, %v15810_v59, %v15809_v37  ;;  %v2197_v30 = vsel %vm2149_vm6, %v15812_v57, %v15811_v43  ;;  %v2198_v1 = vsel %vm2149_vm6, %v11403_v11, %v15815_v56  ;;  %v2199_v44 = vsel %vm2149_vm6, %v11435_v46, %v15816_v22  ;;  %v15828_v17 = vld [vmem:[#allocation15_spill] sm:$0xff]  ;;  %v15836_v22 = vld [vmem:[#allocation70_spill] sm:$0xff] }
 0x3ac   : > { %v4219_v23 = vcombine.low %v2192_v8, %v2193_v25  ;;  %v2201_v53 = vsel %vm2149_vm6, %v15814_v28, %v15813_v24  ;;  %v2195_v31 = vsel %vm2149_vm6, %v11597_v58, %v15817_v27  ;;  %v15819_v60 = vcombine.high %v11581_v13, %v11581_v13  ;;  %v11960_v15 = vpop.permute.xlu1 %3752  ;;  %4446 = vrot.lane.b32.xlu0 %v4098_v61, %s9474_s6  ;;  %v15823_v25 = vld [vmem:[#allocation16_spill] sm:$0xff]  ;;  %v15832_v28 = vld [vmem:[#allocation65_spill] sm:$0xff] }
 0x3ad   : > { %v15821_v36 = vcombine.high %v11403_v11, %v11403_v11  ;;  %v4115_v38 = vcombine.low %v4107_v5, %v4114_v9  ;;  %v4182_v12 = vrot.slane %v4168_v19, %v11679_v16  ;;  %v4226_v58 = vrot.slane %v4218_v54, %v11679_v16  ;;  %v15825_v19 = vld [vmem:[#allocation64_spill] sm:$0xff]  ;;  %v15826_v5 = vld [vmem:[#allocation66_spill] sm:$0xff] }
 0x3ae   : > { %v2196_v42 = vsel %vm2149_vm6, %v15819_v60, %v15818_v48  ;;  %v2194_v52 = vsel %vm2149_vm6, %v11581_v13, %v15822_v33  ;;  %v15824_v11 = vcombine.high %v11616_v26, %v11616_v26  ;;  %v4166_v0 = vcombine.low %v4158_v35, %v4165_v39  ;;  %v11974_v61 = vpop.permute.xlu0 %3766  ;;  %v15830_v8 = vld [vmem:[#allocation36_spill] sm:$0xff] }
 0x3af   : > { %v2200_v34 = vsel %vm2149_vm6, %v15821_v36, %v15820_v55  ;;  %v4236_v46 = vcombine.low %v2196_v42, %v2197_v30  ;;  %v4175_v14 = vrot.slane %v4167_v40, %v11679_v16  ;;  %v4233_v20 = vrot.slane %v4219_v23, %v11679_v16  ;;  %4448 = vrot.lane.b32.xlu1 %v4115_v38, %s9474_s6  ;;  %v15831_v23 = vld [vmem:[#allocation63_spill] sm:$0xff]  ;;  %v15839_v38 = vld [vmem:[#allocation68_spill] sm:$0xff] }
 0x3b0   : > { %v4287_v6 = vcombine.low %v2200_v34, %v2201_v53  ;;  %v2205_v29 = vsel %vm2149_vm6, %v15824_v11, %v15823_v25  ;;  %v4235_v9 = vcombine.low %v2194_v52, %v2195_v31  ;;  %v4286_v54 = vcombine.low %v2198_v1, %v2199_v44  ;;  %v11994_v39 = vpop.permute.xlu1 %3768  ;;  %4454 = vrot.lane.b32.xlu0 %v4166_v0, %s9474_s6  ;;  %v15833_v53 = vld [vmem:[#allocation19_spill] sm:$0xff]  ;;  %v15835_v1 = vld [vmem:[#allocation18_spill] sm:$0xff]  ;;  %v15841_v33 = vld [vmem:[#allocation20_spill] sm:$0xff] }
 0x3b1   : > { %v2203_v13 = vsel %vm2149_vm6, %v11616_v26, %v15825_v19  ;;  %v15827_v7 = vcombine.high %v11455_v4, %v11455_v4  ;;  %v15829_v37 = vcombine.high %v11600_v18, %v11600_v18  ;;  %v2207_v43 = vsel %vm2149_vm6, %v11455_v4, %v15830_v8  ;;  %v15838_v36 = vld [vmem:[#allocation35_spill] sm:$0xff] }
 0x3b2   : > { %v4183_v57 = vcombine.low %v4175_v14, %v4182_v12  ;;  %v4250_v30 = vrot.slane %v4236_v46, %v11679_v16  ;;  %v4301_v40 = vrot.slane %v4287_v6, %v11679_v16  ;;  %v2202_v24 = vsel %vm2149_vm6, %v11600_v18, %v15831_v23  ;;  %v3659_v55 = vpop.permute.xlu0 %3658  ;;  %v15840_v46 = vld [vmem:[#allocation17_spill] sm:$0xff] }
 0x3b3   : > { %v2209_v35 = vsel %vm2149_vm6, %v15827_v7, %v15826_v5  ;;  %v2204_v59 = vsel %vm2149_vm6, %v15829_v37, %v15828_v17  ;;  %v15834_v56 = vcombine.high %v15833_v53, %v15833_v53  ;;  %v15837_v44 = vcombine.high %v15836_v22, %v15836_v22 }
 0x3b4   : > { %v4304_v26 = vcombine.low %v2204_v59, %v2205_v29  ;;  %v4234_v31 = vcombine.low %v4226_v58, %v4233_v20  ;;  %v4243_v48 = vrot.slane %v4235_v9, %v11679_v16  ;;  %v4303_v60 = vcombine.low %v2202_v24, %v2203_v13  ;;  %4456 = vrot.lane.b32.xlu1 %v4183_v57, %s9474_s6  ;;  %v3661_v0 = vpop.permute.xlu1 %3660  ;;  %v15843_v20 = vld [vmem:[#allocation67_spill] sm:$0xff] }
 0x3b5   : > { %v2208_v4 = vsel %vm2149_vm6, %v15834_v56, %v15832_v28  ;;  %v2213_v27 = vsel %vm2149_vm6, %v15837_v44, %v15835_v1  ;;  %v4294_v18 = vrot.slane %v4286_v54, %v11679_v16  ;;  %v2206_v34 = vsel %vm2149_vm6, %v15833_v53, %v15838_v36 }
 0x3b6   : > { %v4355_v42 = vcombine.low %v2208_v4, %v2209_v35  ;;  %v2211_v12 = vsel %vm2149_vm6, %v15836_v22, %v15839_v38  ;;  %v15842_v58 = vcombine.high %v15841_v33, %v15841_v33  ;;  %v4354_v6 = vcombine.low %v2206_v34, %v2207_v43  ;;  %4462 = vrot.lane.b32.xlu0 %v4234_v31, %s9474_s6  ;;  %v12032_v7 = vpop.permute.xlu0 %3662 }
 0x3b7   : > { %v4251_v25 = vcombine.low %v4243_v48, %v4250_v30  ;;  %v4318_v11 = vrot.slane %v4304_v26, %v11679_v16  ;;  %v4302_v14 = vcombine.low %v4294_v18, %v4301_v40  ;;  %v2210_v9 = vsel %vm2149_vm6, %v15841_v33, %v15843_v20 }
 0x3b8   : > { %v2212_v52 = vsel %vm2149_vm6, %v15842_v58, %v15840_v46  ;;  %v4311_v54 = vrot.slane %v4303_v60, %v11679_v16  ;;  %v4369_v19 = vrot.slane %v4355_v42, %v11679_v16  ;;  %v4371_v13 = vcombine.low %v2210_v9, %v2211_v12  ;;  %v12039_v8 = vpop.permute.xlu1 %3664 }
 0x3b9   : > { %v4372_v29 = vcombine.low %v2212_v52, %v2213_v27  ;;  %v3913_v5 = vcombine.low %v3659_v55, %v3661_v0  ;;  %4464 = vrot.lane.b32.xlu1 %v4251_v25, %s9474_s6  ;;  %v4362_v35 = vrot.slane %v4354_v6, %v11679_v16  ;;  %v3912_v59 = vcombine.low %v11683_v32, %v11705_v3 }
 0x3ba   : > { %v4319_v17 = vcombine.low %v4311_v54, %v4318_v11  ;;  %4470 = vrot.lane.b32.xlu0 %v4302_v14, %s9474_s6  ;;  %v4379_v57 = vrot.slane %v4371_v13, %v11679_v16  ;;  %v3675_v26 = vpop.permute.xlu0 %3674  ;;  %v3980_v40 = vcombine.low %v11731_v21, %v11756_v63  ;;  %v4048_v22 = vcombine.low %v11775_v2, %v11799_v10 }
 0x3bb   : > { %v4386_v37 = vrot.slane %v4372_v29, %v11679_v16  ;;  %v4370_v43 = vcombine.low %v4362_v35, %v4369_v19  ;;  %v3927_v30 = vrot.slane %v3913_v5, %v11679_v16  ;;  %v3920_v24 = vrot.slane %v3912_v59, %v11679_v16 }
 0x3bc   : > { %v3677_v28 = vpop.permute.xlu1 %3676  ;;  %v3988_v56 = vrot.slane %v3980_v40, %v11679_v16  ;;  %v4056_v48 = vrot.slane %v4048_v22, %v11679_v16  ;;  %v4116_v36 = vcombine.low %v11819_v47, %v11839_v49  ;;  %v4184_v52 = vcombine.low %v11856_v50, %v11877_v45 }
 0x3bd   : > { %4472 = vrot.lane.b32.xlu1 %v4319_v17, %s9474_s6  ;;  %v4387_v23 = vcombine.low %v4379_v57, %v4386_v37  ;;  %v3981_v32 = vcombine.low %v3675_v26, %v3677_v28  ;;  %v3928_v3 = vcombine.low %v3920_v24, %v3927_v30  ;;  %v4252_v20 = vcombine.low %v11896_v51, %v11914_v41 }
 0x3be   : > { %4478 = vrot.lane.b32.xlu0 %v4370_v43, %s9474_s6  ;;  %v12049_v53 = vpop.permute.xlu0 %3678  ;;  %v4124_v38 = vrot.slane %v4116_v36, %v11679_v16  ;;  %v4192_v25 = vrot.slane %v4184_v52, %v11679_v16  ;;  %v4320_v17 = vcombine.low %v11937_v62, %v11960_v15  ;;  %v4388_v40 = vcombine.low %v11974_v61, %v11994_v39 }
 0x3bf   : > { %v3995_v4 = vrot.slane %v3981_v32, %v11679_v16  ;;  %v4260_v54 = vrot.slane %v4252_v20, %v11679_v16  ;;  %vm8372_vm6 = vcmask 293888  }
 0x3c0   : > { %v12054_v1 = vpop.permute.xlu1 %3680  ;;  %v4328_v59 = vrot.slane %v4320_v17, %v11679_v16  ;;  %v4396_v24 = vrot.slane %v4388_v40, %v11679_v16  ;;  %v3783_v40 = vld [vmem:[%s12149_s11 + $0x8] sm:$0xff] }
 0x3c1   : > { %4480 = vrot.lane.b32.xlu1 %v4387_v23, %s9474_s6  ;;  %v3996_v21 = vcombine.low %v3988_v56, %v3995_v4  ;;  %v3929_v4 = vcombine.low %v12032_v7, %v12039_v8  ;;  %v3997_v22 = vcombine.low %v12049_v53, %v12054_v1 }
 0x3c2   : > { %4426 = vrot.lane.b32.xlu0 %v3928_v3, %s9474_s6  ;;  %v3691_v63 = vpop.permute.xlu0 %3690 }
 0x3c4   : > { %v3693_v44 = vpop.permute.xlu1 %3692 }
 0x3c5   : > { %v4049_v27 = vcombine.low %v3691_v63, %v3693_v44  ;;  %v3937_v63 = vrot.slane %v3929_v4, %v11679_v16  ;;  %v3787_v4 = vld [vmem:[%s12149_s11 + $0x28] sm:$0xff] }
 0x3c6   : > { %4434 = vrot.lane.b32.xlu0 %v3996_v21, %s9474_s6  ;;  %v12060_v31 = vpop.permute.xlu0 %3694 }
 0x3c7   : > { %v4063_v60 = vrot.slane %v4049_v27, %v11679_v16 }
 0x3c8   : > { %v12064_v42 = vpop.permute.xlu1 %3696 }
 0x3c9   : > { %v4064_v55 = vcombine.low %v4056_v48, %v4063_v60  ;;  %v4065_v7 = vcombine.low %v12060_v31, %v12064_v42 }
 0x3ca   : > { %v3707_v18 = vpop.permute.xlu0 %3706 }
 0x3cb   : > { %4442 = vrot.lane.b32.xlu0 %v4064_v55, %s9474_s6  ;;  %v4073_v53 = vrot.slane %v4065_v7, %v11679_v16 }
 0x3cc   : > { %v3709_v2 = vpop.permute.xlu1 %3708 }
 0x3cd   : > { %v4117_v10 = vcombine.low %v3707_v18, %v3709_v2  ;;  %v4005_v18 = vrot.slane %v3997_v22, %v11679_v16  ;;  %v3791_v22 = vld [vmem:[%s12149_s11 + $0x48] sm:$0xff] }
 0x3ce   : > { %v12069_v34 = vpop.permute.xlu0 %3710 }
 0x3cf   : > { %v4131_v12 = vrot.slane %v4117_v10, %v11679_v16 }
 0x3d0   : > { %v12073_v46 = vpop.permute.xlu1 %3712 }
 0x3d1   : > { %v4132_v33 = vcombine.low %v4124_v38, %v4131_v12  ;;  %v4133_v1 = vcombine.low %v12069_v34, %v12073_v46 }
 0x3d2   : > { %v3723_v58 = vpop.permute.xlu0 %3722 }
 0x3d3   : > { %4450 = vrot.lane.b32.xlu0 %v4132_v33, %s9474_s6  ;;  %v4141_v52 = vrot.slane %v4133_v1, %v11679_v16 }
 0x3d4   : > { %v3725_v47 = vpop.permute.xlu1 %3724 }
 0x3d5   : > { %v4185_v49 = vcombine.low %v3723_v58, %v3725_v47 }
 0x3d6   : > { %v12078_v6 = vpop.permute.xlu0 %3726 }
 0x3d7   : > { %v4199_v11 = vrot.slane %v4185_v49, %v11679_v16 }
 0x3d8   : > { %v12082_v29 = vpop.permute.xlu1 %3728 }
 0x3d9   : > { %v4200_v0 = vcombine.low %v4192_v25, %v4199_v11  ;;  %v4201_v47 = vcombine.low %v12078_v6, %v12082_v29 }
 0x3da   : > { %v3739_v14 = vpop.permute.xlu0 %3738 }
 0x3db   : > { %4458 = vrot.lane.b32.xlu0 %v4200_v0, %s9474_s6  ;;  %v4209_v0 = vrot.slane %v4201_v47, %v11679_v16 }
 0x3dc   : > { %v3741_v50 = vpop.permute.xlu1 %3740 }
 0x3dd   : > { %v4253_v45 = vcombine.low %v3739_v14, %v3741_v50 }
 0x3de   : > { %v12087_v9 = vpop.permute.xlu0 %3742 }
 0x3df   : > { %v4267_v19 = vrot.slane %v4253_v45, %v11679_v16 }
 0x3e0   : > { %v12091_v13 = vpop.permute.xlu1 %3744 }
 0x3e1   : > { %v4268_v5 = vcombine.low %v4260_v54, %v4267_v19  ;;  %v4269_v14 = vcombine.low %v12087_v9, %v12091_v13 }
 0x3e2   : > { %v3755_v35 = vpop.permute.xlu0 %3754 }
 0x3e3   : > { %4466 = vrot.lane.b32.xlu0 %v4268_v5, %s9474_s6  ;;  %v4277_v54 = vrot.slane %v4269_v14, %v11679_v16  ;;  %v3806_v14 = vld [vmem:[%s12149_s11 + $0xc0] sm:$0xff] }
 0x3e4   : > { %v3757_v51 = vpop.permute.xlu1 %3756 }
 0x3e5   : > { %v4321_v41 = vcombine.low %v3755_v35, %v3757_v51 }
 0x3e6   : > { %v12096_v37 = vpop.permute.xlu0 %3758 }
 0x3e7   : > { %v4335_v43 = vrot.slane %v4321_v41, %v11679_v16 }
 0x3e8   : > { %v12100_v57 = vpop.permute.xlu1 %3760 }
 0x3e9   : > { %v4336_v30 = vcombine.low %v4328_v59, %v4335_v43  ;;  %v4337_v19 = vcombine.low %v12096_v37, %v12100_v57  ;;  %v3782_v43 = vld [vmem:[%s12149_s11] sm:$0xff] }
 0x3ea   : > { %v3771_v26 = vpop.permute.xlu0 %3770 }
 0x3eb   : > { %4474 = vrot.lane.b32.xlu0 %v4336_v30, %s9474_s6  ;;  %v4345_v51 = vrot.slane %v4337_v19, %v11679_v16 }
 0x3ec   : > { %v3773_v62 = vpop.permute.xlu1 %3772 }
 0x3ed   : > { %v4389_v15 = vcombine.low %v3771_v26, %v3773_v62 }
 0x3ee   : > { %v12105_v23 = vpop.permute.xlu0 %3774 }
 0x3ef   : > { %v4403_v28 = vrot.slane %v4389_v15, %v11679_v16 }
 0x3f0   : > { %v12109_v32 = vpop.permute.xlu1 %3776 }
 0x3f1   : > { %v4404_v3 = vcombine.low %v4396_v24, %v4403_v28  ;;  %v4405_v41 = vcombine.low %v12105_v23, %v12109_v32  ;;  %v3786_v28 = vld [vmem:[%s12149_s11 + $0x20] sm:$0xff] }
 0x3f2   : > { %v3667_v56 = vpop.permute.xlu0 %3666 }
 0x3f3   : > { %4482 = vrot.lane.b32.xlu0 %v4404_v3, %s9474_s6  ;;  %v4413_v62 = vrot.slane %v4405_v41, %v11679_v16 }
 0x3f4   : > { %v3669_v61 = vpop.permute.xlu1 %3668 }
 0x3f5   : > { %v3930_v39 = vcombine.low %v3667_v56, %v3669_v61 }
 0x3f6   : > { %v3683_v21 = vpop.permute.xlu0 %3682 }
 0x3f7   : > { %v3944_v44 = vrot.slane %v3930_v39, %v11679_v16  ;;  %v3790_v39 = vld [vmem:[%s12149_s11 + $0x40] sm:$0xff] }
 0x3f8   : > { %v3685_v27 = vpop.permute.xlu1 %3684 }
 0x3f9   : > { %v3945_v48 = vcombine.low %v3937_v63, %v3944_v44  ;;  %v3998_v60 = vcombine.low %v3683_v21, %v3685_v27 }
 0x3fa   : > { %v3699_v55 = vpop.permute.xlu0 %3698 }
 0x3fb   : > { %v4012_v8 = vrot.slane %v3998_v60, %v11679_v16  ;;  %4428 = vrot.lane.b32.xlu1 %v3945_v48, %s9474_s6  ;;  %v3794_v60 = vld [vmem:[%s12149_s11 + $0x60] sm:$0xff] }
 0x3fc   : > { %v3701_v36 = vpop.permute.xlu1 %3700 }
 0x3fd   : > { %v4013_v2 = vcombine.low %v4005_v18, %v4012_v8  ;;  %v4066_v10 = vcombine.low %v3699_v55, %v3701_v36  ;;  %v3795_v8 = vld [vmem:[%s12149_s11 + $0x68] sm:$0xff] }
 0x3fe   : > { %v3715_v38 = vpop.permute.xlu0 %3714 }
 0x3ff   : > { %v4080_v12 = vrot.slane %v4066_v10, %v11679_v16  ;;  %4436 = vrot.lane.b32.xlu1 %v4013_v2, %s9474_s6 }
 0x400   : > { %v3717_v33 = vpop.permute.xlu1 %3716 }
 0x401   : > { %v4081_v58 = vcombine.low %v4073_v53, %v4080_v12  ;;  %v4134_v31 = vcombine.low %v3715_v38, %v3717_v33  ;;  %v3798_v38 = vld [vmem:[%s12149_s11 + $0x80] sm:$0xff]  ;;  %v3799_v33 = vld [vmem:[%s12149_s11 + $0x88] sm:$0xff] }
 0x402   : > { %v3731_v42 = vpop.permute.xlu0 %3730 }
 0x403   : > { %v4148_v49 = vrot.slane %v4134_v31, %v11679_v16  ;;  %4444 = vrot.lane.b32.xlu1 %v4081_v58, %s9474_s6 }
 0x404   : > { %v3733_v25 = vpop.permute.xlu1 %3732 }
 0x405   : > { %v4149_v34 = vcombine.low %v4141_v52, %v4148_v49  ;;  %v4202_v46 = vcombine.low %v3731_v42, %v3733_v25  ;;  %v3802_v52 = vld [vmem:[%s12149_s11 + $0xa0] sm:$0xff] }
 0x406   : > { %v3747_v11 = vpop.permute.xlu0 %3746 }
 0x407   : > { %v4216_v20 = vrot.slane %v4202_v46, %v11679_v16  ;;  %4452 = vrot.lane.b32.xlu1 %v4149_v34, %s9474_s6  ;;  %v3803_v34 = vld [vmem:[%s12149_s11 + $0xa8] sm:$0xff] }
 0x408   : > { %v3749_v50 = vpop.permute.xlu1 %3748 }
 0x409   : > { %v4217_v6 = vcombine.low %v4209_v0, %v4216_v20  ;;  %v4270_v29 = vcombine.low %v3747_v11, %v3749_v50 }
 0x40a   : > { %v3763_v45 = vpop.permute.xlu0 %3762 }
 0x40b   : > { %v4284_v5 = vrot.slane %v4270_v29, %v11679_v16  ;;  %4460 = vrot.lane.b32.xlu1 %v4217_v6, %s9474_s6  ;;  %v3807_v29 = vld [vmem:[%s12149_s11 + $0xc8] sm:$0xff] }
 0x40c   : > { %v3765_v35 = vpop.permute.xlu1 %3764 }
 0x40d   : > { %v4285_v9 = vcombine.low %v4277_v54, %v4284_v5  ;;  %v4338_v13 = vcombine.low %v3763_v45, %v3765_v35  ;;  %v3810_v5 = vld [vmem:[%s12149_s11 + $0xe0] sm:$0xff] }
 0x40e   : > { %v3779_v17 = vpop.permute.xlu0 %3778 }
 0x40f   : > { %v4352_v37 = vrot.slane %v4338_v13, %v11679_v16  ;;  %4468 = vrot.lane.b32.xlu1 %v4285_v9, %s9474_s6 }
 0x410   : > { %v3781_v59 = vpop.permute.xlu1 %3780 }
 0x411   : > { %v4353_v57 = vcombine.low %v4345_v51, %v4352_v37  ;;  %v4406_v30 = vcombine.low %v3779_v17, %v3781_v59  ;;  %v3811_v17 = vld [vmem:[%s12149_s11 + $0xe8] sm:$0xff]  ;;  %v3784_v59 = vld [vmem:[%s12149_s11 + $0x10] sm:$0xff] }
 0x412   : > { %v4423_v26 = vpop.permute.xlu0 %4422 }
 0x413   : > { %v4420_v15 = vrot.slane %v4406_v30, %v11679_v16  ;;  %v4518_v24 = vsel %vm301_vm2, %v3782_v43, %v4423_v26  ;;  %4476 = vrot.lane.b32.xlu1 %v4353_v57, %s9474_s6 }
 0x414   : > { %4551 = vst.msk [vmem:[#allocation2 + $0x19] sm:$0xff] %vm245_vm0, %v4518_v24  ;;  %v4425_v23 = vpop.permute.xlu1 %4424 }
 0x415   : > { %v4421_v32 = vcombine.low %v4413_v62, %v4420_v15  ;;  %v4519_v3 = vsel %vm301_vm2, %v3783_v40, %v4425_v23  ;;  %v3788_v62 = vld [vmem:[%s12149_s11 + $0x30] sm:$0xff] }
 0x416   : > { %4552 = vst.msk [vmem:[#allocation2 + $0x21] sm:$0xff] %vm245_vm0, %v4519_v3  ;;  %v4431_v56 = vpop.permute.xlu0 %4430 }
 0x417   : > { %v4522_v61 = vsel %vm301_vm2, %v3786_v28, %v4431_v56  ;;  %4484 = vrot.lane.b32.xlu1 %v4421_v32, %s9474_s6  ;;  %v3792_v56 = vld [vmem:[%s12149_s11 + $0x50] sm:$0xff] }
 0x418   : > { %4555 = vst.msk [vmem:[#allocation2 + $0x49] sm:$0xff] %vm245_vm0, %v4522_v61  ;;  %v4433_v16 = vpop.permute.xlu1 %4432 }
 0x419   : > { %v4523_v21 = vsel %vm301_vm2, %v3787_v4, %v4433_v16 }
 0x41a   : > { %4556 = vst.msk [vmem:[#allocation2 + $0x51] sm:$0xff] %vm245_vm0, %v4523_v21  ;;  %v4439_v63 = vpop.permute.xlu0 %4438 }
 0x41b   : > { %v4526_v44 = vsel %vm301_vm2, %v3790_v39, %v4439_v63  ;;  %v12175_v27 = vld [vmem:[#allocation2 + $0x19] sm:$0xff] }
 0x41c   : > { %4559 = vst.msk [vmem:[#allocation2 + $0x79] sm:$0xff] %vm245_vm0, %v4526_v44  ;;  %4908 = vrot.lane.b32.xlu0 %v12175_v27, %s9469_s26  ;;  %v4441_v48 = vpop.permute.xlu1 %4440  ;;  %v4679_v3 = vld [vmem:[#allocation2 + $0x18] sm:$0xff] }
 0x41d   : > { %v4527_v55 = vsel %vm301_vm2, %v3791_v22, %v4441_v48  ;;  %v12182_v18 = vld [vmem:[#allocation2 + $0x21] sm:$0xff]  ;;  %v3796_v22 = vld [vmem:[%s12149_s11 + $0x70] sm:$0xff] }
 0x41e   : > { %4560 = vst.msk [vmem:[#allocation2 + $0x81] sm:$0xff] %vm245_vm0, %v4527_v55  ;;  %v4447_v7 = vpop.permute.xlu0 %4446  ;;  %4910 = vrot.lane.b32.xlu1 %v12182_v18, %s9469_s26  ;;  %v12280_v61 = vld [vmem:[#allocation2 + $0x22] sm:$0xff] }
 0x41f   : > { %v4530_v36 = vsel %vm301_vm2, %v3794_v60, %v4447_v7  ;;  %v12189_v2 = vld [vmem:[#allocation2 + $0x49] sm:$0xff] }
 0x420   : > { %4563 = vst.msk [vmem:[#allocation2 + $0xa9] sm:$0xff] %vm245_vm0, %v4530_v36  ;;  %4916 = vrot.lane.b32.xlu0 %v12189_v2, %s9469_s26  ;;  %v12286_v39 = vld [vmem:[#allocation2 + $0x48] sm:$0xff]  ;;  %v3800_v36 = vld [vmem:[%s12149_s11 + $0x90] sm:$0xff] }
 0x421   : > { %v4449_v10 = vpop.permute.xlu1 %4448  ;;  %v12196_v1 = vld [vmem:[#allocation2 + $0x51] sm:$0xff] }
 0x422   : > { %v4531_v53 = vsel %vm301_vm2, %v3795_v8, %v4449_v10  ;;  %v4455_v12 = vpop.permute.xlu0 %4454  ;;  %4918 = vrot.lane.b32.xlu1 %v12196_v1, %s9469_s26  ;;  %v12290_v21 = vld [vmem:[#allocation2 + $0x52] sm:$0xff] }
 0x423   : > { %4564 = vst.msk [vmem:[#allocation2 + $0xb1] sm:$0xff] %vm245_vm0, %v4531_v53  ;;  %v4534_v58 = vsel %vm301_vm2, %v3798_v38, %v4455_v12  ;;  %v12203_v31 = vld [vmem:[#allocation2 + $0x79] sm:$0xff] }
 0x424   : > { %4567 = vst.msk [vmem:[#allocation2 + $0xd9] sm:$0xff] %vm245_vm0, %v4534_v58  ;;  %4924 = vrot.lane.b32.xlu0 %v12203_v31, %s9469_s26  ;;  %v12294_v63 = vld [vmem:[#allocation2 + $0x78] sm:$0xff] }
 0x425   : > { %v12210_v49 = vld [vmem:[#allocation2 + $0x81] sm:$0xff] }
 0x426   : > { %v4457_v42 = vpop.permute.xlu1 %4456  ;;  %4926 = vrot.lane.b32.xlu1 %v12210_v49, %s9469_s26  ;;  %v12299_v48 = vld [vmem:[#allocation2 + $0x82] sm:$0xff] }
 0x427   : > { %v4535_v47 = vsel %vm301_vm2, %v3799_v33, %v4457_v42  ;;  %v12217_v11 = vld [vmem:[#allocation2 + $0xa9] sm:$0xff] }
 0x428   : > { %4568 = vst.msk [vmem:[#allocation2 + $0xe1] sm:$0xff] %vm245_vm0, %v4535_v47  ;;  %v4463_v25 = vpop.permute.xlu0 %4462  ;;  %4932 = vrot.lane.b32.xlu0 %v12217_v11, %s9469_s26  ;;  %v12305_v55 = vld [vmem:[#allocation2 + $0xa8] sm:$0xff]  ;;  %v3804_v42 = vld [vmem:[%s12149_s11 + $0xb0] sm:$0xff] }
 0x429   : > { %v4538_v46 = vsel %vm301_vm2, %v3802_v52, %v4463_v25 }
 0x42a   : > { %4571 = vst.msk [vmem:[#allocation2 + $0x109] sm:$0xff] %vm245_vm0, %v4538_v46  ;;  %v12224_v50 = vld [vmem:[#allocation2 + $0xb1] sm:$0xff] }
 0x42b   : > { %v4465_v0 = vpop.permute.xlu1 %4464  ;;  %4934 = vrot.lane.b32.xlu1 %v12224_v50, %s9469_s26  ;;  %v12231_v54 = vld [vmem:[#allocation2 + $0xd9] sm:$0xff] }
 0x42c   : > { %v4539_v20 = vsel %vm301_vm2, %v3803_v34, %v4465_v0  ;;  %v4471_v6 = vpop.permute.xlu0 %4470  ;;  %4940 = vrot.lane.b32.xlu0 %v12231_v54, %s9469_s26  ;;  %v12309_v7 = vld [vmem:[#allocation2 + $0xb2] sm:$0xff] }
 0x42d   : > { %4572 = vst.msk [vmem:[#allocation2 + $0x111] sm:$0xff] %vm245_vm0, %v4539_v20  ;;  %v4542_v45 = vsel %vm301_vm2, %v3806_v14, %v4471_v6  ;;  %v12313_v8 = vld [vmem:[#allocation2 + $0xd8] sm:$0xff]  ;;  %v3808_v0 = vld [vmem:[%s12149_s11 + $0xd0] sm:$0xff]  ;;  %v4680_v20 = vld [vmem:[#allocation2 + $0x20] sm:$0xff] }
 0x42e   : > { %4575 = vst.msk [vmem:[#allocation2 + $0x139] sm:$0xff] %vm245_vm0, %v4542_v45  ;;  %v3812_v45 = vld [vmem:[%s12149_s11 + $0xf0] sm:$0xff] }
 0x42f   : > { %v4473_v19 = vpop.permute.xlu1 %4472  ;;  %v12238_v9 = vld [vmem:[#allocation2 + $0xe1] sm:$0xff] }
 0x430   : > { %v4543_v35 = vsel %vm301_vm2, %v3807_v29, %v4473_v19  ;;  %v4479_v13 = vpop.permute.xlu0 %4478  ;;  %4942 = vrot.lane.b32.xlu1 %v12238_v9, %s9469_s26  ;;  %v12318_v38 = vld [vmem:[#allocation2 + $0xe2] sm:$0xff]  ;;  %v12344_v29 = vld [vmem:[#allocation2 + $0x50] sm:$0xff] }
 0x431   : > { %4576 = vst.msk [vmem:[#allocation2 + $0x141] sm:$0xff] %vm245_vm0, %v4543_v35  ;;  %v4546_v51 = vsel %vm301_vm2, %v3810_v5, %v4479_v13  ;;  %v12245_v41 = vld [vmem:[#allocation2 + $0x109] sm:$0xff]  ;;  %v12351_v19 = vld [vmem:[#allocation2 + $0x80] sm:$0xff]  ;;  %v3785_v13 = vld [vmem:[%s12149_s11 + $0x18] sm:$0xff] }
 0x432   : > { %4579 = vst.msk [vmem:[#allocation2 + $0x169] sm:$0xff] %vm245_vm0, %v4546_v51  ;;  %4948 = vrot.lane.b32.xlu0 %v12245_v41, %s9469_s26  ;;  %v12324_v12 = vld [vmem:[#allocation2 + $0x108] sm:$0xff]  ;;  %v12359_v35 = vld [vmem:[#allocation2 + $0xb0] sm:$0xff]  ;;  %v12366_v51 = vld [vmem:[#allocation2 + $0xe0] sm:$0xff] }
 0x433   : > { %v4481_v37 = vpop.permute.xlu1 %4480 }
 0x434   : > { %v4547_v43 = vsel %vm301_vm2, %v3811_v17, %v4481_v37  ;;  %v12252_v57 = vld [vmem:[#allocation2 + $0x111] sm:$0xff]  ;;  %v4427_v30 = vpop.permute.xlu0 %4426 }
 0x435   : > { %4580 = vst.msk [vmem:[#allocation2 + $0x171] sm:$0xff] %vm245_vm0, %v4547_v43  ;;  %4950 = vrot.lane.b32.xlu1 %v12252_v57, %s9469_s26  ;;  %v4520_v26 = vsel %vm301_vm2, %v3784_v59, %v4427_v30  ;;  %v12258_v40 = vld [vmem:[#allocation2 + $0x139] sm:$0xff]  ;;  %v12375_v30 = vld [vmem:[#allocation2 + $0x110] sm:$0xff] }
 0x436   : > { %4553 = vst.msk [vmem:[#allocation2 + $0x31] sm:$0xff] %vm245_vm0, %v4520_v26  ;;  %4956 = vrot.lane.b32.xlu0 %v12258_v40, %s9469_s26  ;;  %v4670_v33 = vld [vmem:[#allocation2 + $0x112] sm:$0xff] }
 0x437   : > { %v4703_v58 = vld [vmem:[#allocation2 + $0x138] sm:$0xff] }
 0x438   : > { %v12264_v15 = vld [vmem:[#allocation2 + $0x141] sm:$0xff]  ;;  %v4435_v24 = vpop.permute.xlu0 %4434  ;;  %v3789_v59 = vld [vmem:[%s12149_s11 + $0x38] sm:$0xff] }
 0x439   : > { %4958 = vrot.lane.b32.xlu1 %v12264_v15, %s9469_s26  ;;  %v4524_v23 = vsel %vm301_vm2, %v3788_v62, %v4435_v24  ;;  %v12269_v28 = vld [vmem:[#allocation2 + $0x169] sm:$0xff]  ;;  %v3793_v62 = vld [vmem:[%s12149_s11 + $0x58] sm:$0xff] }
 0x43a   : > { %4557 = vst.msk [vmem:[#allocation2 + $0x61] sm:$0xff] %vm245_vm0, %v4524_v23  ;;  %4964 = vrot.lane.b32.xlu0 %v12269_v28, %s9469_s26  ;;  %v4674_v47 = vld [vmem:[#allocation2 + $0x142] sm:$0xff] }
 0x43b   : > { %v4707_v34 = vld [vmem:[#allocation2 + $0x168] sm:$0xff]  ;;  %v4704_v23 = vld [vmem:[#allocation2 + $0x140] sm:$0xff] }
 0x43c   : > { %v12274_v32 = vld [vmem:[#allocation2 + $0x171] sm:$0xff] }
 0x43d   : > { %4966 = vrot.lane.b32.xlu1 %v12274_v32, %s9469_s26  ;;  %v4443_v4 = vpop.permute.xlu0 %4442  ;;  %v4678_v46 = vld [vmem:[#allocation2 + $0x172] sm:$0xff] }
 0x43e   : > { %5160 = vrot.lane.b32.xlu0 %v4679_v3, %s9478_s12  ;;  %v4528_v16 = vsel %vm301_vm2, %v3792_v56, %v4443_v4  ;;  %v3797_v56 = vld [vmem:[%s12149_s11 + $0x78] sm:$0xff] }
 0x43f   : > { %4561 = vst.msk [vmem:[#allocation2 + $0x91] sm:$0xff] %vm245_vm0, %v4528_v16  ;;  %v4708_v16 = vld [vmem:[#allocation2 + $0x170] sm:$0xff] }
 0x441   : > { %5038 = vrot.lane.b32.xlu1 %v12280_v61, %s9470_s27 }
 0x442   : > { %5168 = vrot.lane.b32.xlu0 %v12286_v39, %s9478_s12 }
 0x445   : > { %5046 = vrot.lane.b32.xlu1 %v12290_v21, %s9470_s27  ;;  %v4451_v44 = vpop.permute.xlu0 %4450 }
 0x446   : > { %5176 = vrot.lane.b32.xlu0 %v12294_v63, %s9478_s12  ;;  %v4532_v60 = vsel %vm301_vm2, %v3796_v22, %v4451_v44 }
 0x447   : > { %4565 = vst.msk [vmem:[#allocation2 + $0xc1] sm:$0xff] %vm245_vm0, %v4532_v60 }
 0x449   : > { %5054 = vrot.lane.b32.xlu1 %v12299_v48, %s9470_s27 }
 0x44a   : > { %5184 = vrot.lane.b32.xlu0 %v12305_v55, %s9478_s12 }
 0x44d   : > { %5062 = vrot.lane.b32.xlu1 %v12309_v7, %s9470_s27  ;;  %v4459_v10 = vpop.permute.xlu0 %4458 }
 0x44e   : > { %5192 = vrot.lane.b32.xlu0 %v12313_v8, %s9478_s12  ;;  %v4536_v53 = vsel %vm301_vm2, %v3800_v36, %v4459_v10 }
 0x44f   : > { %4569 = vst.msk [vmem:[#allocation2 + $0xf1] sm:$0xff] %vm245_vm0, %v4536_v53 }
 0x451   : > { %5070 = vrot.lane.b32.xlu1 %v12318_v38, %s9470_s27 }
 0x452   : > { %5200 = vrot.lane.b32.xlu0 %v12324_v12, %s9478_s12 }
 0x455   : > { %5078 = vrot.lane.b32.xlu1 %v4670_v33, %s9470_s27  ;;  %v4467_v52 = vpop.permute.xlu0 %4466 }
 0x456   : > { %5208 = vrot.lane.b32.xlu0 %v4703_v58, %s9478_s12  ;;  %v4540_v25 = vsel %vm301_vm2, %v3804_v42, %v4467_v52 }
 0x457   : > { %4573 = vst.msk [vmem:[#allocation2 + $0x121] sm:$0xff] %vm245_vm0, %v4540_v25 }
 0x459   : > { %5086 = vrot.lane.b32.xlu1 %v4674_v47, %s9470_s27 }
 0x45a   : > { %5216 = vrot.lane.b32.xlu0 %v4707_v34, %s9478_s12 }
 0x45d   : > { %5094 = vrot.lane.b32.xlu1 %v4678_v46, %s9470_s27  ;;  %v4475_v14 = vpop.permute.xlu0 %4474 }
 0x45e   : > { %5288 = vrot.lane.b32.xlu0 %v12175_v27, %s9479_s13  ;;  %v4544_v6 = vsel %vm301_vm2, %v3808_v0, %v4475_v14  ;;  %v4657_v0 = vld [vmem:[#allocation2 + $0x7a] sm:$0xff] }
 0x45f   : > { %4577 = vst.msk [vmem:[#allocation2 + $0x151] sm:$0xff] %vm245_vm0, %v4544_v6 }
 0x461   : > { %5162 = vrot.lane.b32.xlu1 %v4680_v20, %s9478_s12 }
 0x462   : > { %5296 = vrot.lane.b32.xlu0 %v12189_v2, %s9479_s13 }
 0x465   : > { %5170 = vrot.lane.b32.xlu1 %v12344_v29, %s9478_s12  ;;  %v4483_v27 = vpop.permute.xlu0 %4482 }
 0x466   : > { %5304 = vrot.lane.b32.xlu0 %v12203_v31, %s9479_s13  ;;  %v4548_v5 = vsel %vm301_vm2, %v3812_v45, %v4483_v27  ;;  %v4665_v45 = vld [vmem:[#allocation2 + $0xda] sm:$0xff] }
 0x467   : > { %4581 = vst.msk [vmem:[#allocation2 + $0x181] sm:$0xff] %vm245_vm0, %v4548_v5 }
 0x469   : > { %5178 = vrot.lane.b32.xlu1 %v12351_v19, %s9478_s12 }
 0x46a   : > { %5312 = vrot.lane.b32.xlu0 %v12217_v11, %s9479_s13 }
 0x46d   : > { %5186 = vrot.lane.b32.xlu1 %v12359_v35, %s9478_s12  ;;  %v4429_v17 = vpop.permute.xlu1 %4428 }
 0x46e   : > { %5320 = vrot.lane.b32.xlu0 %v12231_v54, %s9479_s13  ;;  %v4521_v37 = vsel %vm301_vm2, %v3785_v13, %v4429_v17  ;;  %v4669_v13 = vld [vmem:[#allocation2 + $0x10a] sm:$0xff] }
 0x46f   : > { %4554 = vst.msk [vmem:[#allocation2 + $0x39] sm:$0xff] %vm245_vm0, %v4521_v37 }
 0x471   : > { %5194 = vrot.lane.b32.xlu1 %v12366_v51, %s9478_s12  ;;  %v4437_v43 = vpop.permute.xlu1 %4436 }
 0x472   : > { %5328 = vrot.lane.b32.xlu0 %v12245_v41, %s9479_s13  ;;  %v4525_v26 = vsel %vm301_vm2, %v3789_v59, %v4437_v43 }
 0x473   : > { %4558 = vst.msk [vmem:[#allocation2 + $0x69] sm:$0xff] %vm245_vm0, %v4525_v26 }
 0x475   : > { %5202 = vrot.lane.b32.xlu1 %v12375_v30, %s9478_s12  ;;  %v4445_v24 = vpop.permute.xlu1 %4444 }
 0x476   : > { %5336 = vrot.lane.b32.xlu0 %v12258_v40, %s9479_s13  ;;  %v4529_v3 = vsel %vm301_vm2, %v3793_v62, %v4445_v24  ;;  %v3801_v40 = vld [vmem:[%s12149_s11 + $0x98] sm:$0xff] }
 0x477   : > { %4562 = vst.msk [vmem:[#allocation2 + $0x99] sm:$0xff] %vm245_vm0, %v4529_v3 }
 0x479   : > { %5210 = vrot.lane.b32.xlu1 %v4704_v23, %s9478_s12  ;;  %v4453_v4 = vpop.permute.xlu1 %4452 }
 0x47a   : > { %5344 = vrot.lane.b32.xlu0 %v12269_v28, %s9479_s13  ;;  %v4533_v22 = vsel %vm301_vm2, %v3797_v56, %v4453_v4  ;;  %v3805_v28 = vld [vmem:[%s12149_s11 + $0xb8] sm:$0xff] }
 0x47b   : > { %4566 = vst.msk [vmem:[#allocation2 + $0xc9] sm:$0xff] %vm245_vm0, %v4533_v22 }
 0x47d   : > { %5218 = vrot.lane.b32.xlu1 %v4708_v16, %s9478_s12  ;;  %v4461_v44 = vpop.permute.xlu1 %4460 }
 0x47e   : > { %5548 = vrot.lane.b32.xlu0 %v12286_v39, %s9480_s14  ;;  %v4537_v60 = vsel %vm301_vm2, %v3801_v40, %v4461_v44  ;;  %v3809_v39 = vld [vmem:[%s12149_s11 + $0xd8] sm:$0xff] }
 0x47f   : > { %4570 = vst.msk [vmem:[#allocation2 + $0xf9] sm:$0xff] %vm245_vm0, %v4537_v60 }
 0x481   : > { %5290 = vrot.lane.b32.xlu1 %v12182_v18, %s9479_s13  ;;  %v4469_v36 = vpop.permute.xlu1 %4468 }
 0x482   : > { %5676 = vrot.lane.b32.xlu0 %v12189_v2, %s9481_s15  ;;  %v4541_v10 = vsel %vm301_vm2, %v3805_v28, %v4469_v36  ;;  %v3813_v2 = vld [vmem:[%s12149_s11 + $0xf8] sm:$0xff]  ;;  %s9485_s11 = smov 28  }
 0x483   : > { %4574 = vst.msk [vmem:[#allocation2 + $0x129] sm:$0xff] %vm245_vm0, %v4541_v10 }
 0x485   : > { %5298 = vrot.lane.b32.xlu1 %v12196_v1, %s9479_s13  ;;  %v4477_v18 = vpop.permute.xlu1 %4476 }
 0x486   : > { %5556 = vrot.lane.b32.xlu0 %v12294_v63, %s9480_s14  ;;  %v4545_v53 = vsel %vm301_vm2, %v3809_v39, %v4477_v18  ;;  %v12595_v39 = vld [vmem:[#allocation2 + $0x31] sm:$0xff] }
 0x487   : > { %4578 = vst.msk [vmem:[#allocation2 + $0x159] sm:$0xff] %vm245_vm0, %v4545_v53 }
 0x489   : > { %5306 = vrot.lane.b32.xlu1 %v12210_v49, %s9479_s13  ;;  %v4485_v33 = vpop.permute.xlu1 %4484 }
 0x48a   : > { %5684 = vrot.lane.b32.xlu0 %v12203_v31, %s9481_s15  ;;  %v4549_v58 = vsel %vm301_vm2, %v3813_v2, %v4485_v33  ;;  %v12613_v2 = vld [vmem:[#allocation2 + $0x69] sm:$0xff] }
 0x48b   : > { %4582 = vst.msk [vmem:[#allocation2 + $0x189] sm:$0xff] %vm245_vm0, %v4549_v58  ;;  %v12619_v58 = vld [vmem:[#allocation2 + $0x91] sm:$0xff] }
 0x48d   : > { %5314 = vrot.lane.b32.xlu1 %v12224_v50, %s9479_s13 }
 0x48e   : > { %5564 = vrot.lane.b32.xlu0 %v12305_v55, %s9480_s14  ;;  %v12423_v63 = vpop.permute.xlu0 %4908 }
 0x490   : > { %v12429_v31 = vpop.permute.xlu1 %4910 }
 0x491   : > { %5322 = vrot.lane.b32.xlu1 %v12238_v9, %s9479_s13 }
 0x492   : > { %5692 = vrot.lane.b32.xlu0 %v12217_v11, %s9481_s15  ;;  %v12431_v42 = vpop.permute.xlu0 %4916 }
 0x494   : > { %v12437_v52 = vpop.permute.xlu1 %4918 }
 0x495   : > { %5330 = vrot.lane.b32.xlu1 %v12252_v57, %s9479_s13 }
 0x496   : > { %5572 = vrot.lane.b32.xlu0 %v12313_v8, %s9480_s14  ;;  %v12439_v55 = vpop.permute.xlu0 %4924 }
 0x498   : > { %v12445_v11 = vpop.permute.xlu1 %4926 }
 0x499   : > { %5338 = vrot.lane.b32.xlu1 %v12264_v15, %s9479_s13 }
 0x49a   : > { %5700 = vrot.lane.b32.xlu0 %v12231_v54, %s9481_s15  ;;  %v12447_v47 = vpop.permute.xlu0 %4932 }
 0x49d   : > { %5346 = vrot.lane.b32.xlu1 %v12274_v32, %s9479_s13  ;;  %v12453_v8 = vpop.permute.xlu1 %4934  ;;  %v4649_v32 = vld [vmem:[#allocation2 + $0x1a] sm:$0xff] }
 0x49e   : > { %5580 = vrot.lane.b32.xlu0 %v12324_v12, %s9480_s14  ;;  %v12455_v25 = vpop.permute.xlu0 %4940 }
 0x49f   : > { %15844 = vst [vmem:[#allocation22_spill] sm:$0xff] %v12455_v25 }
 0x4a1   : > { %5418 = vrot.lane.b32.xlu1 %v12280_v61, %s9482_s16  ;;  %v4653_v61 = vld [vmem:[#allocation2 + $0x4a] sm:$0xff] }
 0x4a2   : > { %5708 = vrot.lane.b32.xlu0 %v12245_v41, %s9481_s15  ;;  %v12461_v54 = vpop.permute.xlu1 %4942 }
 0x4a3   : > { %15845 = vst [vmem:[#allocation24_spill] sm:$0xff] %v12461_v54 }
 0x4a4   : > { %v12463_v15 = vpop.permute.xlu0 %4948 }
 0x4a5   : > { %15846 = vst [vmem:[#allocation21_spill] sm:$0xff] %v12463_v15  ;;  %5550 = vrot.lane.b32.xlu1 %v12344_v29, %s9480_s14  ;;  %v12685_v15 = vld [vmem:[#allocation2 + $0x3a] sm:$0xff] }
 0x4a6   : > { %5036 = vrot.lane.b32.xlu0 %v4649_v32, %s9470_s27 }
 0x4a7   : > { %v12468_v12 = vpop.permute.xlu1 %4950 }
 0x4a8   : > { %15847 = vst [vmem:[#allocation23_spill] sm:$0xff] %v12468_v12  ;;  %v12470_v34 = vpop.permute.xlu0 %4956 }
 0x4a9   : > { %15848 = vst [vmem:[#allocation26_spill] sm:$0xff] %v12470_v34  ;;  %5678 = vrot.lane.b32.xlu1 %v12196_v1, %s9481_s15  ;;  %v4661_v1 = vld [vmem:[#allocation2 + $0xaa] sm:$0xff] }
 0x4aa   : > { %5044 = vrot.lane.b32.xlu0 %v4653_v61, %s9470_s27  ;;  %v12667_v34 = vld [vmem:[#allocation2 + $0x151] sm:$0xff] }
 0x4ab   : > { %v12475_v41 = vpop.permute.xlu1 %4958 }
 0x4ac   : > { %15849 = vst [vmem:[#allocation12_spill] sm:$0xff] %v12475_v41  ;;  %v12477_v46 = vpop.permute.xlu0 %4964 }
 0x4ad   : > { %15850 = vst [vmem:[#allocation25_spill] sm:$0xff] %v12477_v46  ;;  %5424 = vrot.lane.b32.xlu1 %v4653_v61, %s9482_s16  ;;  %v12649_v46 = vld [vmem:[#allocation2 + $0xf9] sm:$0xff] }
 0x4ae   : > { %5052 = vrot.lane.b32.xlu0 %v4657_v0, %s9470_s27 }
 0x4af   : > { %v12481_v14 = vpop.permute.xlu1 %4966 }
 0x4b0   : > { %15851 = vst [vmem:[#allocation40_spill] sm:$0xff] %v12481_v14  ;;  %v12483_v20 = vpop.permute.xlu0 %5160 }
 0x4b1   : > { %5426 = vrot.lane.b32.xlu1 %v12290_v21, %s9482_s16 }
 0x4b2   : > { %5060 = vrot.lane.b32.xlu0 %v4661_v1, %s9470_s27 }
 0x4b3   : > { %v12488_v6 = vpop.permute.xlu1 %5038 }
 0x4b4   : > { %v12490_v29 = vpop.permute.xlu0 %5168 }
 0x4b5   : > { %5558 = vrot.lane.b32.xlu1 %v12351_v19, %s9480_s14  ;;  %v12507_v19 = vld [vmem:[#allocation2 + $0x13a] sm:$0xff] }
 0x4b6   : > { %5068 = vrot.lane.b32.xlu0 %v4665_v45, %s9470_s27 }
 0x4b7   : > { %v12495_v27 = vpop.permute.xlu1 %5046 }
 0x4b8   : > { %v12497_v5 = vpop.permute.xlu0 %5176 }
 0x4b9   : > { %15852 = vst [vmem:[#allocation39_spill] sm:$0xff] %v12497_v5  ;;  %5686 = vrot.lane.b32.xlu1 %v12210_v49, %s9481_s15  ;;  %v4677_v49 = vld [vmem:[#allocation2 + $0x16a] sm:$0xff] }
 0x4ba   : > { %5076 = vrot.lane.b32.xlu0 %v4669_v13, %s9470_s27 }
 0x4bb   : > { %v12502_v17 = vpop.permute.xlu1 %5054 }
 0x4bc   : > { %15853 = vst [vmem:[#allocation28_spill] sm:$0xff] %v12502_v17  ;;  %v12504_v37 = vpop.permute.xlu0 %5184 }
 0x4bd   : > { %15854 = vst [vmem:[#allocation42_spill] sm:$0xff] %v12504_v37  ;;  %5432 = vrot.lane.b32.xlu1 %v4657_v0, %s9482_s16  ;;  %v12763_v37 = vld [vmem:[#allocation2 + $0x180] sm:$0xff] }
 0x4be   : > { %5084 = vrot.lane.b32.xlu0 %v12507_v19, %s9470_s27 }
 0x4bf   : > { %v12511_v59 = vpop.permute.xlu1 %5062 }
 0x4c0   : > { %15855 = vst [vmem:[#allocation43_spill] sm:$0xff] %v12511_v59  ;;  %v12513_v43 = vpop.permute.xlu0 %5192 }
 0x4c1   : > { %15856 = vst [vmem:[#allocation27_spill] sm:$0xff] %v12513_v43  ;;  %5434 = vrot.lane.b32.xlu1 %v12299_v48, %s9482_s16  ;;  %v12739_v43 = vld [vmem:[#allocation2 + $0x120] sm:$0xff] }
 0x4c2   : > { %5092 = vrot.lane.b32.xlu0 %v4677_v49, %s9470_s27 }
 0x4c3   : > { %v12518_v26 = vpop.permute.xlu1 %5070 }
 0x4c4   : > { %15857 = vst [vmem:[#allocation41_spill] sm:$0xff] %v12518_v26  ;;  %v12520_v62 = vpop.permute.xlu0 %5200 }
 0x4c5   : > { %15858 = vst [vmem:[#allocation29_spill] sm:$0xff] %v12520_v62  ;;  %5566 = vrot.lane.b32.xlu1 %v12359_v35, %s9480_s14  ;;  %v12697_v62 = vld [vmem:[#allocation2 + $0x6a] sm:$0xff] }
 0x4c6   : > { %5416 = vrot.lane.b32.xlu0 %v4649_v32, %s9482_s16 }
 0x4c7   : > { %v12525_v24 = vpop.permute.xlu1 %5078 }
 0x4c8   : > { %15859 = vst [vmem:[#allocation30_spill] sm:$0xff] %v12525_v24  ;;  %v12527_v23 = vpop.permute.xlu0 %5208  ;;  %v12679_v24 = vld [vmem:[#allocation2 + $0x30] sm:$0xff] }
 0x4c9   : > { %15860 = vst [vmem:[#allocation46_spill] sm:$0xff] %v12527_v23  ;;  %5694 = vrot.lane.b32.xlu1 %v12224_v50, %s9481_s15 }
 0x4ca   : > { %5804 = vrot.lane.b32.xlu0 %v4653_v61, %s9483_s17  ;;  %v12625_v61 = vld [vmem:[#allocation2 + $0x99] sm:$0xff] }
 0x4cb   : > { %v12532_v3 = vpop.permute.xlu1 %5086 }
 0x4cc   : > { %15861 = vst [vmem:[#allocation5_spill] sm:$0xff] %v12532_v3  ;;  %v12534_v56 = vpop.permute.xlu0 %5216  ;;  %v12661_v3 = vld [vmem:[#allocation2 + $0x129] sm:$0xff] }
 0x4cd   : > { %15862 = vst [vmem:[#allocation44_spill] sm:$0xff] %v12534_v56  ;;  %5440 = vrot.lane.b32.xlu1 %v4661_v1, %s9482_s16 }
 0x4ce   : > { %5806 = vrot.lane.b32.xlu0 %v12290_v21, %s9483_s17 }
 0x4cf   : > { %v12539_v35 = vpop.permute.xlu1 %5094 }
 0x4d0   : > { %15863 = vst [vmem:[#allocation45_spill] sm:$0xff] %v12539_v35  ;;  %v12541_v4 = vpop.permute.xlu0 %5288  ;;  %v12643_v35 = vld [vmem:[#allocation2 + $0xf1] sm:$0xff] }
 0x4d1   : > { %5442 = vrot.lane.b32.xlu1 %v12309_v7, %s9482_s16 }
 0x4d2   : > { %5812 = vrot.lane.b32.xlu0 %v4657_v0, %s9483_s17 }
 0x4d3   : > { %v12546_v50 = vpop.permute.xlu1 %5162 }
 0x4d4   : > { %v12548_v16 = vpop.permute.xlu0 %5296 }
 0x4d5   : > { %15864 = vst [vmem:[#allocation50_spill] sm:$0xff] %v12548_v16  ;;  %5574 = vrot.lane.b32.xlu1 %v12366_v51, %s9480_s14 }
 0x4d6   : > { %5814 = vrot.lane.b32.xlu0 %v12299_v48, %s9483_s17 }
 0x4d7   : > { %v12554_v21 = vpop.permute.xlu1 %5170 }
 0x4d8   : > { %15865 = vst [vmem:[#allocation7_spill] sm:$0xff] %v12554_v21  ;;  %v12556_v22 = vpop.permute.xlu0 %5304 }
 0x4d9   : > { %15866 = vst [vmem:[#allocation48_spill] sm:$0xff] %v12556_v22  ;;  %5702 = vrot.lane.b32.xlu1 %v12238_v9, %s9481_s15 }
 0x4da   : > { %5820 = vrot.lane.b32.xlu0 %v4661_v1, %s9483_s17  ;;  %v12631_v1 = vld [vmem:[#allocation2 + $0xc1] sm:$0xff] }
 0x4db   : > { %v12561_v40 = vpop.permute.xlu1 %5178 }
 0x4dc   : > { %15867 = vst [vmem:[#allocation49_spill] sm:$0xff] %v12561_v40  ;;  %v12563_v44 = vpop.permute.xlu0 %5312  ;;  %v12769_v40 = vld [vmem:[#allocation2 + $0x38] sm:$0xff] }
 0x4dd   : > { %15868 = vst [vmem:[#allocation4_spill] sm:$0xff] %v12563_v44  ;;  %5448 = vrot.lane.b32.xlu1 %v4665_v45, %s9482_s16 }
 0x4de   : > { %5822 = vrot.lane.b32.xlu0 %v12309_v7, %s9483_s17 }
 0x4df   : > { %v12568_v51 = vpop.permute.xlu1 %5186 }
 0x4e0   : > { %15869 = vst [vmem:[#allocation47_spill] sm:$0xff] %v12568_v51  ;;  %v12570_v48 = vpop.permute.xlu0 %5320 }
 0x4e1   : > { %15870 = vst [vmem:[#allocation37_spill] sm:$0xff] %v12570_v48  ;;  %5450 = vrot.lane.b32.xlu1 %v12318_v38, %s9482_s16  ;;  %v12733_v48 = vld [vmem:[#allocation2 + $0xfa] sm:$0xff] }
 0x4e2   : > { %5828 = vrot.lane.b32.xlu0 %v4665_v45, %s9483_s17 }
 0x4e3   : > { %v12575_v9 = vpop.permute.xlu1 %5194 }
 0x4e4   : > { %15871 = vst [vmem:[#allocation52_spill] sm:$0xff] %v12575_v9  ;;  %v12577_v60 = vpop.permute.xlu0 %5328 }
 0x4e5   : > { %15872 = vst [vmem:[#allocation32_spill] sm:$0xff] %v12577_v60  ;;  %5582 = vrot.lane.b32.xlu1 %v12375_v30, %s9480_s14  ;;  %v12601_v30 = vld [vmem:[#allocation2 + $0x39] sm:$0xff] }
 0x4e6   : > { %5830 = vrot.lane.b32.xlu0 %v12318_v38, %s9483_s17 }
 0x4e7   : > { %v12583_v7 = vpop.permute.xlu1 %5202 }
 0x4e8   : > { %15873 = vst [vmem:[#allocation51_spill] sm:$0xff] %v12583_v7  ;;  %v12585_v28 = vpop.permute.xlu0 %5336 }
 0x4e9   : > { %15874 = vst [vmem:[#allocation54_spill] sm:$0xff] %v12585_v28  ;;  %5710 = vrot.lane.b32.xlu1 %v12252_v57, %s9481_s15  ;;  %v12607_v57 = vld [vmem:[#allocation2 + $0x61] sm:$0xff]  ;;  %v12673_v28 = vld [vmem:[#allocation2 + $0x159] sm:$0xff] }
 0x4ea   : > { %5836 = vrot.lane.b32.xlu0 %v4669_v13, %s9483_s17 }
 0x4eb   : > { %v12590_v36 = vpop.permute.xlu1 %5210 }
 0x4ec   : > { %15875 = vst [vmem:[#allocation6_spill] sm:$0xff] %v12590_v36  ;;  %v12592_v10 = vpop.permute.xlu0 %5344 }
 0x4ed   : > { %15876 = vst [vmem:[#allocation31_spill] sm:$0xff] %v12592_v10  ;;  %5456 = vrot.lane.b32.xlu1 %v4669_v13, %s9482_s16  ;;  %v12637_v13 = vld [vmem:[#allocation2 + $0xc9] sm:$0xff]  ;;  %v12655_v10 = vld [vmem:[#allocation2 + $0x121] sm:$0xff] }
 0x4ee   : > { %4912 = vrot.lane.b32.xlu0 %v12595_v39, %s9469_s26 }
 0x4ef   : > { %v12599_v38 = vpop.permute.xlu1 %5218 }
 0x4f0   : > { %15877 = vst [vmem:[#allocation53_spill] sm:$0xff] %v12599_v38  ;;  %v12603_v18 = vpop.permute.xlu0 %5548 }
 0x4f1   : > { %15878 = vst [vmem:[#allocation69_spill] sm:$0xff] %v12603_v18  ;;  %4914 = vrot.lane.b32.xlu1 %v12601_v30, %s9469_s26 }
 0x4f2   : > { %4920 = vrot.lane.b32.xlu0 %v12607_v57, %s9469_s26 }
 0x4f3   : > { %v12611_v53 = vpop.permute.xlu1 %5290 }
 0x4f4   : > { %v12615_v33 = vpop.permute.xlu0 %5676 }
 0x4f5   : > { %15879 = vst [vmem:[#allocation56_spill] sm:$0xff] %v12615_v33  ;;  %4922 = vrot.lane.b32.xlu1 %v12613_v2, %s9469_s26 }
 0x4f6   : > { %4928 = vrot.lane.b32.xlu0 %v12619_v58, %s9469_s26 }
 0x4f7   : > { %v12623_v32 = vpop.permute.xlu1 %5298 }
 0x4f8   : > { %15880 = vst [vmem:[#allocation58_spill] sm:$0xff] %v12623_v32  ;;  %v12627_v0 = vpop.permute.xlu0 %5556 }
 0x4f9   : > { %15881 = vst [vmem:[#allocation38_spill] sm:$0xff] %v12627_v0  ;;  %4930 = vrot.lane.b32.xlu1 %v12625_v61, %s9469_s26 }
 0x4fa   : > { %4936 = vrot.lane.b32.xlu0 %v12631_v1, %s9469_s26 }
 0x4fb   : > { %v12635_v45 = vpop.permute.xlu1 %5306 }
 0x4fc   : > { %15882 = vst [vmem:[#allocation55_spill] sm:$0xff] %v12635_v45  ;;  %v12639_v49 = vpop.permute.xlu0 %5684  ;;  %v12757_v45 = vld [vmem:[#allocation2 + $0x15a] sm:$0xff] }
 0x4fd   : > { %15883 = vst [vmem:[#allocation57_spill] sm:$0xff] %v12639_v49  ;;  %4938 = vrot.lane.b32.xlu1 %v12637_v13, %s9469_s26 }
 0x4fe   : > { %4944 = vrot.lane.b32.xlu0 %v12643_v35, %s9469_s26 }
 0x4ff   : > { %v12647_v14 = vpop.permute.xlu1 %5314 }
 0x500   : > { %15884 = vst [vmem:[#allocation14_spill] sm:$0xff] %v12647_v14  ;;  %v12651_v38 = vpop.permute.xlu0 %5564 }
 0x501   : > { %15885 = vst [vmem:[#allocation62_spill] sm:$0xff] %v12651_v38  ;;  %4946 = vrot.lane.b32.xlu1 %v12649_v46, %s9469_s26  ;;  %v12751_v38 = vld [vmem:[#allocation2 + $0x150] sm:$0xff] }
 0x502   : > { %4952 = vrot.lane.b32.xlu0 %v12655_v10, %s9469_s26 }
 0x503   : > { %v12659_v56 = vpop.permute.xlu1 %5322 }
 0x504   : > { %15886 = vst [vmem:[#allocation33_spill] sm:$0xff] %v12659_v56  ;;  %v12663_v41 = vpop.permute.xlu0 %5692  ;;  %v12709_v56 = vld [vmem:[#allocation2 + $0x9a] sm:$0xff] }
 0x505   : > { %15887 = vst [vmem:[#allocation34_spill] sm:$0xff] %v12663_v41  ;;  %4954 = vrot.lane.b32.xlu1 %v12661_v3, %s9469_s26  ;;  %v12745_v41 = vld [vmem:[#allocation2 + $0x12a] sm:$0xff] }
 0x506   : > { %4960 = vrot.lane.b32.xlu0 %v12667_v34, %s9469_s26 }
 0x507   : > { %v12671_v36 = vpop.permute.xlu1 %5330 }
 0x508   : > { %15888 = vst [vmem:[#allocation60_spill] sm:$0xff] %v12671_v36  ;;  %v12675_v23 = vpop.permute.xlu0 %5572  ;;  %v12691_v36 = vld [vmem:[#allocation2 + $0x60] sm:$0xff] }
 0x509   : > { %15889 = vst [vmem:[#allocation13_spill] sm:$0xff] %v12675_v23  ;;  %4962 = vrot.lane.b32.xlu1 %v12673_v28, %s9469_s26  ;;  %v12727_v23 = vld [vmem:[#allocation2 + $0xf0] sm:$0xff] }
 0x50a   : > { %5164 = vrot.lane.b32.xlu0 %v12679_v24, %s9478_s12 }
 0x50b   : > { %v12683_v12 = vpop.permute.xlu1 %5338 }
 0x50c   : > { %15890 = vst [vmem:[#allocation61_spill] sm:$0xff] %v12683_v12  ;;  %v12687_v7 = vpop.permute.xlu0 %5700  ;;  %v12703_v12 = vld [vmem:[#allocation2 + $0x90] sm:$0xff] }
 0x50d   : > { %15891 = vst [vmem:[#allocation59_spill] sm:$0xff] %v12687_v7  ;;  %5042 = vrot.lane.b32.xlu1 %v12685_v15, %s9470_s27  ;;  %15894 = vst [vmem:[#allocation66_spill] sm:$0xff] %v12703_v12  ;;  %v12721_v7 = vld [vmem:[#allocation2 + $0xca] sm:$0xff] }
 0x50e   : > { %5172 = vrot.lane.b32.xlu0 %v12691_v36, %s9478_s12 }
 0x50f   : > { %v12695_v60 = vpop.permute.xlu1 %5346 }
 0x510   : > { %15892 = vst [vmem:[#allocation16_spill] sm:$0xff] %v12695_v60  ;;  %v12699_v26 = vpop.permute.xlu0 %5580  ;;  %v12715_v60 = vld [vmem:[#allocation2 + $0xc0] sm:$0xff] }
 0x511   : > { %15893 = vst [vmem:[#allocation64_spill] sm:$0xff] %v12699_v26  ;;  %5050 = vrot.lane.b32.xlu1 %v12697_v62, %s9470_s27  ;;  %15896 = vst [vmem:[#allocation36_spill] sm:$0xff] %v12715_v60 }
 0x512   : > { %5180 = vrot.lane.b32.xlu0 %v12703_v12, %s9478_s12 }
 0x513   : > { %v12707_v54 = vpop.permute.xlu1 %5418 }
 0x514   : > { %v12711_v25 = vpop.permute.xlu0 %5708 }
 0x515   : > { %15895 = vst [vmem:[#allocation15_spill] sm:$0xff] %v12711_v25  ;;  %5058 = vrot.lane.b32.xlu1 %v12709_v56, %s9470_s27 }
 0x516   : > { %5188 = vrot.lane.b32.xlu0 %v12715_v60, %s9478_s12 }
 0x517   : > { %v12719_v26 = vpop.permute.xlu1 %5550 }
 0x518   : > { %15897 = vst [vmem:[#allocation63_spill] sm:$0xff] %v12719_v26  ;;  %v12723_v9 = vpop.permute.xlu0 %5036 }
 0x519   : > { %5066 = vrot.lane.b32.xlu1 %v12721_v7, %s9470_s27 }
 0x51a   : > { %5196 = vrot.lane.b32.xlu0 %v12727_v23, %s9478_s12 }
 0x51b   : > { %v12731_v25 = vpop.permute.xlu1 %5678 }
 0x51c   : > { %15898 = vst [vmem:[#allocation65_spill] sm:$0xff] %v12731_v25  ;;  %v12735_v14 = vpop.permute.xlu0 %5044 }
 0x51d   : > { %5074 = vrot.lane.b32.xlu1 %v12733_v48, %s9470_s27 }
 0x51e   : > { %5204 = vrot.lane.b32.xlu0 %v12739_v43, %s9478_s12 }
 0x51f   : > { %v12743_v59 = vpop.permute.xlu1 %5424 }
 0x520   : > { %15899 = vst [vmem:[#allocation19_spill] sm:$0xff] %v12743_v59  ;;  %v12747_v51 = vpop.permute.xlu0 %5052  ;;  %v12829_v59 = vld [vmem:[#allocation2 + $0x158] sm:$0xff] }
 0x521   : > { %15900 = vst [vmem:[#allocation18_spill] sm:$0xff] %v12747_v51  ;;  %5082 = vrot.lane.b32.xlu1 %v12745_v41, %s9470_s27 }
 0x522   : > { %5212 = vrot.lane.b32.xlu0 %v12751_v38, %s9478_s12 }
 0x523   : > { %v12755_v44 = vpop.permute.xlu1 %5426 }
 0x524   : > { %15901 = vst [vmem:[#allocation70_spill] sm:$0xff] %v12755_v44  ;;  %v12759_v17 = vpop.permute.xlu0 %5060  ;;  %v12779_v44 = vld [vmem:[#allocation2 + $0x68] sm:$0xff] }
 0x525   : > { %15902 = vst [vmem:[#allocation35_spill] sm:$0xff] %v12759_v17  ;;  %5090 = vrot.lane.b32.xlu1 %v12757_v45, %s9470_s27  ;;  %15906 = vst [vmem:[#allocation67_spill] sm:$0xff] %v12779_v44 }
 0x526   : > { %5220 = vrot.lane.b32.xlu0 %v12763_v37, %s9478_s12 }
 0x527   : > { %v12767_v49 = vpop.permute.xlu1 %5558 }
 0x528   : > { %15903 = vst [vmem:[#allocation68_spill] sm:$0xff] %v12767_v49  ;;  %v12771_v0 = vpop.permute.xlu0 %5068 }
 0x529   : > { %15904 = vst [vmem:[#allocation17_spill] sm:$0xff] %v12771_v0  ;;  %5166 = vrot.lane.b32.xlu1 %v12769_v40, %s9478_s12  ;;  %v12789_v0 = vld [vmem:[#allocation2 + $0x98] sm:$0xff] }
 0x52a   : > { %5292 = vrot.lane.b32.xlu0 %v12595_v39, %s9479_s13  ;;  %15909 = vst [vmem:[#allocation73_spill] sm:$0xff] %v12789_v0 }
 0x52b   : > { %v12777_v17 = vpop.permute.xlu1 %5686 }
 0x52c   : > { %15905 = vst [vmem:[#allocation20_spill] sm:$0xff] %v12777_v17  ;;  %v12781_v22 = vpop.permute.xlu0 %5076 }
 0x52d   : > { %15907 = vst [vmem:[#allocation71_spill] sm:$0xff] %v12781_v22  ;;  %5174 = vrot.lane.b32.xlu1 %v12779_v44, %s9478_s12  ;;  %v12799_v22 = vld [vmem:[#allocation2 + $0xc8] sm:$0xff] }
 0x52e   : > { %5300 = vrot.lane.b32.xlu0 %v12607_v57, %s9479_s13  ;;  %15912 = vst [vmem:[#allocation76_spill] sm:$0xff] %v12799_v22 }
 0x52f   : > { %v12787_v49 = vpop.permute.xlu1 %5432 }
 0x530   : > { %15908 = vst [vmem:[#allocation72_spill] sm:$0xff] %v12787_v49  ;;  %v12791_v51 = vpop.permute.xlu0 %5084 }
 0x531   : > { %15910 = vst [vmem:[#allocation74_spill] sm:$0xff] %v12791_v51  ;;  %5182 = vrot.lane.b32.xlu1 %v12789_v0, %s9478_s12  ;;  %v12809_v51 = vld [vmem:[#allocation2 + $0xf8] sm:$0xff] }
 0x532   : > { %5308 = vrot.lane.b32.xlu0 %v12619_v58, %s9479_s13  ;;  %15915 = vst [vmem:[#allocation79_spill] sm:$0xff] %v12809_v51 }
 0x533   : > { %v12797_v17 = vpop.permute.xlu1 %5434 }
 0x534   : > { %15911 = vst [vmem:[#allocation75_spill] sm:$0xff] %v12797_v17  ;;  %v12801_v25 = vpop.permute.xlu0 %5092 }
 0x535   : > { %15913 = vst [vmem:[#allocation77_spill] sm:$0xff] %v12801_v25  ;;  %5190 = vrot.lane.b32.xlu1 %v12799_v22, %s9478_s12  ;;  %v12819_v25 = vld [vmem:[#allocation2 + $0x128] sm:$0xff] }
 0x536   : > { %5316 = vrot.lane.b32.xlu0 %v12631_v1, %s9479_s13 }
 0x537   : > { %v12807_v49 = vpop.permute.xlu1 %5566 }
 0x538   : > { %15914 = vst [vmem:[#allocation78_spill] sm:$0xff] %v12807_v49  ;;  %v12811_v5 = vpop.permute.xlu0 %5416 }
 0x539   : > { %5198 = vrot.lane.b32.xlu1 %v12809_v51, %s9478_s12 }
 0x53a   : > { %5324 = vrot.lane.b32.xlu0 %v12643_v35, %s9479_s13 }
 0x53b   : > { %v12817_v17 = vpop.permute.xlu1 %5694 }
 0x53c   : > { %15916 = vst [vmem:[#allocation80_spill] sm:$0xff] %v12817_v17  ;;  %v12821_v33 = vpop.permute.xlu0 %5804 }
 0x53d   : > { %15917 = vst [vmem:[#allocation81_spill] sm:$0xff] %v12821_v33  ;;  %5206 = vrot.lane.b32.xlu1 %v12819_v25, %s9478_s12  ;;  %v12839_v33 = vld [vmem:[#allocation2 + $0x188] sm:$0xff] }
 0x53e   : > { %5332 = vrot.lane.b32.xlu0 %v12655_v10, %s9479_s13 }
 0x53f   : > { %v12827_v49 = vpop.permute.xlu1 %5440 }
 0x540   : > { %15918 = vst [vmem:[#allocation82_spill] sm:$0xff] %v12827_v49  ;;  %v12831_v26 = vpop.permute.xlu0 %5806  ;;  %v12845_v49 = vld [vmem:[#allocation2 + $0x181] sm:$0xff] }
 0x541   : > { %15919 = vst [vmem:[#allocation83_spill] sm:$0xff] %v12831_v26  ;;  %5214 = vrot.lane.b32.xlu1 %v12829_v59, %s9478_s12 }
 0x542   : > { %5340 = vrot.lane.b32.xlu0 %v12667_v34, %s9479_s13 }
 0x543   : > { %v12837_v17 = vpop.permute.xlu1 %5442 }
 0x544   : > { %15920 = vst [vmem:[#allocation84_spill] sm:$0xff] %v12837_v17  ;;  %v12841_v32 = vpop.permute.xlu0 %5812 }
 0x545   : > { %15921 = vst [vmem:[#allocation85_spill] sm:$0xff] %v12841_v32  ;;  %5222 = vrot.lane.b32.xlu1 %v12839_v33, %s9478_s12 }
 0x546   : > { %5348 = vrot.lane.b32.xlu0 %v12845_v49, %s9479_s13 }
 0x547   : > { %v12849_v26 = vpop.permute.xlu1 %5574 }
 0x548   : > { %15922 = vst [vmem:[#allocation86_spill] sm:$0xff] %v12849_v26  ;;  %v12851_v18 = vpop.permute.xlu0 %5814 }
 0x549   : > { %15923 = vst [vmem:[#allocation87_spill] sm:$0xff] %v12851_v18  ;;  %5294 = vrot.lane.b32.xlu1 %v12601_v30, %s9479_s13 }
 0x54a   : > { %5544 = vrot.lane.b32.xlu0 %v12679_v24, %s9480_s14 }
 0x54b   : > { %v12857_v17 = vpop.permute.xlu1 %5702 }
 0x54c   : > { %15924 = vst [vmem:[#allocation88_spill] sm:$0xff] %v12857_v17  ;;  %v12859_v32 = vpop.permute.xlu0 %5820 }
 0x54d   : > { %15925 = vst [vmem:[#allocation89_spill] sm:$0xff] %v12859_v32  ;;  %5302 = vrot.lane.b32.xlu1 %v12613_v2, %s9479_s13 }
 0x54e   : > { %5672 = vrot.lane.b32.xlu0 %v12595_v39, %s9481_s15 }
 0x54f   : > { %v12865_v16 = vpop.permute.xlu1 %5448 }
 0x550   : > { %15926 = vst [vmem:[#allocation90_spill] sm:$0xff] %v12865_v16  ;;  %v12867_v26 = vpop.permute.xlu0 %5822 }
 0x551   : > { %15927 = vst [vmem:[#allocation91_spill] sm:$0xff] %v12867_v26  ;;  %5310 = vrot.lane.b32.xlu1 %v12625_v61, %s9479_s13 }
 0x552   : > { %5552 = vrot.lane.b32.xlu0 %v12691_v36, %s9480_s14 }
 0x553   : > { %v12873_v18 = vpop.permute.xlu1 %5450 }
 0x554   : > { %15928 = vst [vmem:[#allocation92_spill] sm:$0xff] %v12873_v18  ;;  %v12875_v17 = vpop.permute.xlu0 %5828 }
 0x555   : > { %15929 = vst [vmem:[#allocation93_spill] sm:$0xff] %v12875_v17  ;;  %5318 = vrot.lane.b32.xlu1 %v12637_v13, %s9479_s13 }
 0x556   : > { %5680 = vrot.lane.b32.xlu0 %v12607_v57, %s9481_s15 }
 0x557   : > { %v12881_v39 = vpop.permute.xlu1 %5582 }
 0x558   : > { %15930 = vst [vmem:[#allocation94_spill] sm:$0xff] %v12881_v39  ;;  %v12883_v16 = vpop.permute.xlu0 %5830 }
 0x559   : > { %15931 = vst [vmem:[#allocation95_spill] sm:$0xff] %v12883_v16  ;;  %5326 = vrot.lane.b32.xlu1 %v12649_v46, %s9479_s13 }
 0x55a   : > { %5560 = vrot.lane.b32.xlu0 %v12703_v12, %s9480_s14  ;;  %v4651_v12 = vld [vmem:[#allocation2 + $0x32] sm:$0xff] }
 0x55b   : > { %v12889_v26 = vpop.permute.xlu1 %5710 }
 0x55c   : > { %15932 = vst [vmem:[#allocation96_spill] sm:$0xff] %v12889_v26  ;;  %v12891_v18 = vpop.permute.xlu0 %5836  ;;  %v12907_v26 = vld [vmem:[#allocation2 + $0x189] sm:$0xff] }
 0x55d   : > { %15933 = vst [vmem:[#allocation97_spill] sm:$0xff] %v12891_v18  ;;  %5334 = vrot.lane.b32.xlu1 %v12661_v3, %s9479_s13  ;;  %15935 = vst [vmem:[#allocation99_spill] sm:$0xff] %v12907_v26 }
 0x55e   : > { %5688 = vrot.lane.b32.xlu0 %v12619_v58, %s9481_s15 }
 0x55f   : > { %v12897_v57 = vpop.permute.xlu1 %5456 }
 0x560   : > { %15934 = vst [vmem:[#allocation98_spill] sm:$0xff] %v12897_v57  ;;  %v12899_v39 = vpop.permute.xlu0 %4912 }
 0x561   : > { %5342 = vrot.lane.b32.xlu1 %v12673_v28, %s9479_s13 }
 0x562   : > { %5568 = vrot.lane.b32.xlu0 %v12715_v60, %s9480_s14 }
 0x563   : > { %v12905_v16 = vpop.permute.xlu1 %4914 }
 0x564   : > { %v12909_v18 = vpop.permute.xlu0 %4920 }
 0x565   : > { %5350 = vrot.lane.b32.xlu1 %v12907_v26, %s9479_s13  ;;  %v6166_v26 = vld [vmem:[%s15628_s3 + $0x38] sm:$0xff] }
 0x566   : > { %5696 = vrot.lane.b32.xlu0 %v12631_v1, %s9481_s15 }
 0x567   : > { %v12915_v58 = vpop.permute.xlu1 %4922 }
 0x568   : > { %15936 = vst [vmem:[#allocation100_spill] sm:$0xff] %v12915_v58  ;;  %v12917_v57 = vpop.permute.xlu0 %4928 }
 0x569   : > { %15937 = vst [vmem:[#allocation101_spill] sm:$0xff] %v12917_v57  ;;  %5422 = vrot.lane.b32.xlu1 %v12685_v15, %s9482_s16  ;;  %v4663_v57 = vld [vmem:[#allocation2 + $0xc2] sm:$0xff] }
 0x56a   : > { %5576 = vrot.lane.b32.xlu0 %v12727_v23, %s9480_s14 }
 0x56b   : > { %v12923_v17 = vpop.permute.xlu1 %4930 }
 0x56c   : > { %15938 = vst [vmem:[#allocation102_spill] sm:$0xff] %v12923_v17  ;;  %v12925_v32 = vpop.permute.xlu0 %4936 }
 0x56d   : > { %15939 = vst [vmem:[#allocation103_spill] sm:$0xff] %v12925_v32  ;;  %5546 = vrot.lane.b32.xlu1 %v12769_v40, %s9480_s14  ;;  %v4655_v32 = vld [vmem:[#allocation2 + $0x62] sm:$0xff] }
 0x56e   : > { %5704 = vrot.lane.b32.xlu0 %v12643_v35, %s9481_s15 }
 0x56f   : > { %v12931_v1 = vpop.permute.xlu1 %4938 }
 0x570   : > { %15940 = vst [vmem:[#allocation104_spill] sm:$0xff] %v12931_v1  ;;  %v12933_v60 = vpop.permute.xlu0 %4944 }
 0x571   : > { %15941 = vst [vmem:[#allocation105_spill] sm:$0xff] %v12933_v60  ;;  %5674 = vrot.lane.b32.xlu1 %v12601_v30, %s9481_s15  ;;  %v6159_v60 = vld [vmem:[%s15628_s3] sm:$0xff]  ;;  %v6160_v30 = vld [vmem:[%s15628_s3 + $0x8] sm:$0xff] }
 0x572   : > { %5040 = vrot.lane.b32.xlu0 %v4651_v12, %s9470_s27  ;;  %v9383_v1 = vpack.c.bf16 %v6160_v30, %v6159_v60  ;;  %v6162_v60 = vld [vmem:[%s15628_s3 + $0x18] sm:$0xff] }
 0x573   : > { %v12938_v23 = vpop.permute.xlu1 %4946 }
 0x574   : > { %15942 = vst [vmem:[#allocation106_spill] sm:$0xff] %v12938_v23  ;;  %v12940_v17 = vpop.permute.xlu0 %4952  ;;  %9384 = vmatprep.subr.bf16.mxu1 %v9383_v1 }
 0x575   : > { %15943 = vst [vmem:[#allocation107_spill] sm:$0xff] %v12940_v17  ;;  %5802 = vrot.lane.b32.xlu1 %v12685_v15, %s9483_s17  ;;  %v4659_v15 = vld [vmem:[#allocation2 + $0x92] sm:$0xff]  ;;  %9386 = vmatpush3.bf16.msra.mxu1 %v9383_v1  ;;  %v6163_v1 = vld [vmem:[%s15628_s3 + $0x20] sm:$0xff] }
 0x576   : > { %5048 = vrot.lane.b32.xlu0 %v4655_v32, %s9470_s27 }
 0x577   : > { %v12945_v35 = vpop.permute.xlu1 %4954 }
 0x578   : > { %15944 = vst [vmem:[#allocation108_spill] sm:$0xff] %v12945_v35  ;;  %v12953_v23 = vpop.permute.xlu0 %4960  ;;  %v6161_v35 = vld [vmem:[%s15628_s3 + $0x10] sm:$0xff] }
 0x579   : > { %15945 = vst [vmem:[#allocation109_spill] sm:$0xff] %v12953_v23  ;;  %5554 = vrot.lane.b32.xlu1 %v12779_v44, %s9480_s14  ;;  %v9387_v30 = vpack.c.bf16 %v6162_v60, %v6161_v35  ;;  %v6164_v35 = vld [vmem:[%s15628_s3 + $0x28] sm:$0xff] }
 0x57a   : > { %5056 = vrot.lane.b32.xlu0 %v4659_v15, %s9470_s27  ;;  %v9391_v60 = vpack.c.bf16 %v6164_v35, %v6163_v1 }
 0x57b   : > { %v12958_v17 = vpop.permute.xlu1 %4962  ;;  %9388 = vmatprep.subr.bf16.mxu1 %v9387_v30 }
 0x57c   : > { %15946 = vst [vmem:[#allocation110_spill] sm:$0xff] %v12958_v17  ;;  %v12966_v23 = vpop.permute.xlu0 %5164  ;;  %9390 = vmatpush3.bf16.msra.mxu1 %v9387_v30  ;;  %v6165_v30 = vld [vmem:[%s15628_s3 + $0x30] sm:$0xff] }
 0x57d   : > { %5682 = vrot.lane.b32.xlu1 %v12613_v2, %s9481_s15  ;;  %v4667_v2 = vld [vmem:[#allocation2 + $0xf2] sm:$0xff]  ;;  %9392 = vmatprep.subr.bf16.mxu1 %v9391_v60  ;;  %v9395_v1 = vpack.c.bf16 %v6166_v26, %v6165_v30 }
 0x57e   : > { %5064 = vrot.lane.b32.xlu0 %v4663_v57, %s9470_s27  ;;  %v13008_v30 = vld [vmem:[#allocation2 + $0x152] sm:$0xff] }
 0x57f   : > { %v12971_v17 = vpop.permute.xlu1 %5042 }
 0x580   : > { %v12979_v44 = vpop.permute.xlu0 %5172  ;;  %9394 = vmatpush3.bf16.msra.mxu1 %v9391_v60 }
 0x581   : > { %15947 = vst [vmem:[#allocation111_spill] sm:$0xff] %v12979_v44  ;;  %5428 = vrot.lane.b32.xlu1 %v4655_v32, %s9482_s16  ;;  %v6167_v44 = vld [vmem:[%s15628_s3 + $0x40] sm:$0xff]  ;;  %9396 = vmatprep.subr.bf16.mxu1 %v9395_v1 }
 0x582   : > { %5072 = vrot.lane.b32.xlu0 %v4667_v2, %s9470_s27 }
 0x583   : > { %v12983_v58 = vpop.permute.xlu1 %5050 }
 0x584   : > { %15948 = vst [vmem:[#allocation112_spill] sm:$0xff] %v12983_v58  ;;  %v12991_v35 = vpop.permute.xlu0 %5180  ;;  %v12998_v58 = vld [vmem:[#allocation2 + $0x122] sm:$0xff]  ;;  %9398 = vmatpush3.bf16.msra.mxu1 %v9395_v1 }
 0x585   : > { %15949 = vst [vmem:[#allocation113_spill] sm:$0xff] %v12991_v35  ;;  %5430 = vrot.lane.b32.xlu1 %v12697_v62, %s9482_s16  ;;  %9275 = vmatprep.subr.mxu1 %v6167_v44 }
 0x586   : > { %5080 = vrot.lane.b32.xlu0 %v12998_v58, %s9470_s27 }
 0x587   : > { %v13002_v60 = vpop.permute.xlu1 %5058 }
 0x588   : > { %15950 = vst [vmem:[#allocation114_spill] sm:$0xff] %v13002_v60  ;;  %v13004_v26 = vpop.permute.xlu0 %5188  ;;  %9276 = vmatpush3.msra.mxu1 %v6167_v44 }
 0x589   : > { %15951 = vst [vmem:[#allocation115_spill] sm:$0xff] %v13004_v26  ;;  %5562 = vrot.lane.b32.xlu1 %v12789_v0, %s9480_s14 }
 0x58a   : > { %5088 = vrot.lane.b32.xlu0 %v13008_v30, %s9470_s27 }
 0x58b   : > { %v13012_v35 = vpop.permute.xlu1 %5066 }
 0x58c   : > { %15952 = vst [vmem:[#allocation116_spill] sm:$0xff] %v13012_v35  ;;  %v13014_v21 = vpop.permute.xlu0 %5196 }
 0x58d   : > { %15953 = vst [vmem:[#allocation117_spill] sm:$0xff] %v13014_v21  ;;  %5690 = vrot.lane.b32.xlu1 %v12625_v61, %s9481_s15 }
 0x58e   : > { %5420 = vrot.lane.b32.xlu0 %v4651_v12, %s9482_s16 }
 0x58f   : > { %v13019_v1 = vpop.permute.xlu1 %5074 }
 0x590   : > { %15954 = vst [vmem:[#allocation118_spill] sm:$0xff] %v13019_v1  ;;  %v13021_v26 = vpop.permute.xlu0 %5204 }
 0x591   : > { %15955 = vst [vmem:[#allocation119_spill] sm:$0xff] %v13021_v26  ;;  %5436 = vrot.lane.b32.xlu1 %v4659_v15, %s9482_s16 }
 0x592   : > { %5800 = vrot.lane.b32.xlu0 %v4651_v12, %s9483_s17 }
 0x593   : > { %v13025_v60 = vpop.permute.xlu1 %5082 }
 0x594   : > { %15956 = vst [vmem:[#allocation120_spill] sm:$0xff] %v13025_v60  ;;  %v13027_v0 = vpop.permute.xlu0 %5212 }
 0x595   : > { %15957 = vst [vmem:[#allocation121_spill] sm:$0xff] %v13027_v0  ;;  %5438 = vrot.lane.b32.xlu1 %v12709_v56, %s9482_s16 }
 0x596   : > { %5808 = vrot.lane.b32.xlu0 %v4655_v32, %s9483_s17 }
 0x597   : > { %v13032_v44 = vpop.permute.xlu1 %5090 }
 0x598   : > { %15958 = vst [vmem:[#allocation122_spill] sm:$0xff] %v13032_v44  ;;  %v13034_v61 = vpop.permute.xlu0 %5220 }
 0x599   : > { %15959 = vst [vmem:[#allocation123_spill] sm:$0xff] %v13034_v61  ;;  %5570 = vrot.lane.b32.xlu1 %v12799_v22, %s9480_s14 }
 0x59a   : > { %5810 = vrot.lane.b32.xlu0 %v12697_v62, %s9483_s17 }
 0x59b   : > { %v13040_v12 = vpop.permute.xlu1 %5166 }
 0x59c   : > { %v13042_v60 = vpop.permute.xlu0 %5292 }
 0x59d   : > { %5698 = vrot.lane.b32.xlu1 %v12637_v13, %s9481_s15 }
 0x59e   : > { %5816 = vrot.lane.b32.xlu0 %v4659_v15, %s9483_s17 }
 0x59f   : > { %v13047_v32 = vpop.permute.xlu1 %5174 }
 0x5a0   : > { %v13049_v44 = vpop.permute.xlu0 %5300 }
 0x5a1   : > { %5444 = vrot.lane.b32.xlu1 %v4663_v57, %s9482_s16 }
 0x5a2   : > { %5818 = vrot.lane.b32.xlu0 %v12709_v56, %s9483_s17 }
 0x5a3   : > { %v13054_v61 = vpop.permute.xlu1 %5182 }
 0x5a4   : > { %15960 = vst [vmem:[#allocation124_spill] sm:$0xff] %v13054_v61  ;;  %v13056_v62 = vpop.permute.xlu0 %5308  ;;  %v15989_v61 = vld [vmem:[#allocation11_spill] sm:$0xff] }
 0x5a5   : > { %15961 = vst [vmem:[#allocation125_spill] sm:$0xff] %v13056_v62  ;;  %5446 = vrot.lane.b32.xlu1 %v12721_v7, %s9482_s16  ;;  %v9441_v62 = vld [vmem:[#allocation2 + $0x48] sm:$0xff] }
 0x5a6   : > { %5824 = vrot.lane.b32.xlu0 %v4663_v57, %s9483_s17 }
 0x5a7   : > { %v13061_v13 = vpop.permute.xlu1 %5190 }
 0x5a8   : > { %15962 = vst [vmem:[#allocation126_spill] sm:$0xff] %v13061_v13  ;;  %v13063_v15 = vpop.permute.xlu0 %5316 }
 0x5a9   : > { %15963 = vst [vmem:[#allocation127_spill] sm:$0xff] %v13063_v15  ;;  %5578 = vrot.lane.b32.xlu1 %v12809_v51, %s9480_s14  ;;  %v4859_v51 = vld [vmem:[#allocation2 + $0x112] sm:$0xff]  ;;  %v15987_v15 = vld [vmem:[#allocation9_spill] sm:$0xff] }
 0x5aa   : > { %5826 = vrot.lane.b32.xlu0 %v12721_v7, %s9483_s17 }
 0x5ab   : > { %v13069_v56 = vpop.permute.xlu1 %5198 }
 0x5ac   : > { %15964 = vst [vmem:[#allocation128_spill] sm:$0xff] %v13069_v56  ;;  %v13071_v0 = vpop.permute.xlu0 %5324 }
 0x5ad   : > { %15965 = vst [vmem:[#allocation129_spill] sm:$0xff] %v13071_v0  ;;  %5706 = vrot.lane.b32.xlu1 %v12649_v46, %s9481_s15  ;;  %v4831_v0 = vld [vmem:[#allocation2 + $0x141] sm:$0xff] }
 0x5ae   : > { %5832 = vrot.lane.b32.xlu0 %v4667_v2, %s9483_s17 }
 0x5af   : > { %v13076_v57 = vpop.permute.xlu1 %5206 }
 0x5b0   : > { %15966 = vst [vmem:[#allocation130_spill] sm:$0xff] %v13076_v57  ;;  %v13078_v26 = vpop.permute.xlu0 %5332 }
 0x5b1   : > { %15967 = vst [vmem:[#allocation131_spill] sm:$0xff] %v13078_v26  ;;  %5452 = vrot.lane.b32.xlu1 %v4667_v2, %s9482_s16 }
 0x5b2   : > { %5834 = vrot.lane.b32.xlu0 %v12733_v48, %s9483_s17 }
 0x5b3   : > { %v13083_v1 = vpop.permute.xlu1 %5214 }
 0x5b4   : > { %15968 = vst [vmem:[#allocation132_spill] sm:$0xff] %v13083_v1  ;;  %v13085_v7 = vpop.permute.xlu0 %5340 }
 0x5b5   : > { %15969 = vst [vmem:[#allocation133_spill] sm:$0xff] %v13085_v7  ;;  %5454 = vrot.lane.b32.xlu1 %v12733_v48, %s9482_s16  ;;  %v4799_v7 = vld [vmem:[#allocation2 + $0x140] sm:$0xff] }
 0x5b6   : > { %5838 = vrot.lane.b32.xlu0 %v4859_v51, %s9483_s17 }
 0x5b7   : > { %v13090_v46 = vpop.permute.xlu1 %5222 }
 0x5b8   : > { %15970 = vst [vmem:[#allocation134_spill] sm:$0xff] %v13090_v46  ;;  %v13092_v57 = vpop.permute.xlu0 %5348 }
 0x5b9   : > { %15971 = vst [vmem:[#allocation135_spill] sm:$0xff] %v13092_v57  ;;  %5458 = vrot.lane.b32.xlu1 %v4859_v51, %s9482_s16 }
 0x5ba   : > { %5584 = vrot.lane.b32.xlu0 %v12739_v43, %s9480_s14 }
 0x5bb   : > { %v13097_v2 = vpop.permute.xlu1 %5294 }
 0x5bc   : > { %v13099_v1 = vpop.permute.xlu0 %5544 }
 0x5bd   : > { %5586 = vrot.lane.b32.xlu1 %v12819_v25, %s9480_s14 }
 0x5be   : > { %5712 = vrot.lane.b32.xlu0 %v12655_v10, %s9481_s15 }
 0x5bf   : > { %v13105_v48 = vpop.permute.xlu1 %5302 }
 0x5c0   : > { %v13107_v46 = vpop.permute.xlu0 %5672 }
 0x5c1   : > { %5714 = vrot.lane.b32.xlu1 %v12661_v3, %s9481_s15  ;;  %v4798_v3 = vld [vmem:[#allocation2 + $0x138] sm:$0xff] }
 0x5c2   : > { %5840 = vrot.lane.b32.xlu0 %v12998_v58, %s9483_s17 }
 0x5c3   : > { %v13113_v43 = vpop.permute.xlu1 %5310 }
 0x5c4   : > { %15972 = vst [vmem:[#allocation136_spill] sm:$0xff] %v13113_v43  ;;  %v13115_v51 = vpop.permute.xlu0 %5552  ;;  %v15988_v43 = vld [vmem:[#allocation10_spill] sm:$0xff] }
 0x5c5   : > { %5460 = vrot.lane.b32.xlu1 %v12998_v58, %s9482_s16  ;;  %v4830_v58 = vld [vmem:[#allocation2 + $0x139] sm:$0xff] }
 0x5c6   : > { %5842 = vrot.lane.b32.xlu0 %v12745_v41, %s9483_s17 }
 0x5c7   : > { %v13121_v25 = vpop.permute.xlu1 %5318 }
 0x5c8   : > { %15973 = vst [vmem:[#allocation137_spill] sm:$0xff] %v13121_v25  ;;  %v13123_v10 = vpop.permute.xlu0 %5680  ;;  %v4835_v25 = vld [vmem:[#allocation2 + $0x171] sm:$0xff] }
 0x5c9   : > { %5462 = vrot.lane.b32.xlu1 %v12745_v41, %s9482_s16 }
 0x5ca   : > { %5588 = vrot.lane.b32.xlu0 %v4798_v3, %s9480_s14  ;;  %v4767_v3 = vld [vmem:[#allocation2 + $0x13a] sm:$0xff] }
 0x5cb   : > { %v13128_v57 = vpop.permute.xlu1 %5326 }
 0x5cc   : > { %15974 = vst [vmem:[#allocation138_spill] sm:$0xff] %v13128_v57  ;;  %v13130_v26 = vpop.permute.xlu0 %5560 }
 0x5cd   : > { %15975 = vst [vmem:[#allocation139_spill] sm:$0xff] %v13130_v26  ;;  %5590 = vrot.lane.b32.xlu1 %v4799_v7, %s9480_s14  ;;  %v4863_v7 = vld [vmem:[#allocation2 + $0x142] sm:$0xff] }
 0x5ce   : > { %5716 = vrot.lane.b32.xlu0 %v4830_v58, %s9481_s15 }
 0x5cf   : > { %v13134_v56 = vpop.permute.xlu1 %5334 }
 0x5d0   : > { %15976 = vst [vmem:[#allocation140_spill] sm:$0xff] %v13134_v56  ;;  %v13136_v21 = vpop.permute.xlu0 %5688 }
 0x5d1   : > { %15977 = vst [vmem:[#allocation141_spill] sm:$0xff] %v13136_v21  ;;  %5718 = vrot.lane.b32.xlu1 %v4831_v0, %s9481_s15 }
 0x5d2   : > { %5844 = vrot.lane.b32.xlu0 %v12507_v19, %s9483_s17 }
 0x5d3   : > { %v13141_v41 = vpop.permute.xlu1 %5342 }
 0x5d4   : > { %15978 = vst [vmem:[#allocation142_spill] sm:$0xff] %v13141_v41  ;;  %v13143_v57 = vpop.permute.xlu0 %5568 }
 0x5d5   : > { %15979 = vst [vmem:[#allocation143_spill] sm:$0xff] %v13143_v57  ;;  %5464 = vrot.lane.b32.xlu1 %v4767_v3, %s9482_s16  ;;  %v4583_v57 = vld [vmem:[#allocation2] sm:$0xff] }
 0x5d6   : > { %5846 = vrot.lane.b32.xlu0 %v4863_v7, %s9483_s17 }
 0x5d7   : > { %v13147_v58 = vpop.permute.xlu1 %5350 }
 0x5d8   : > { %15980 = vst [vmem:[#allocation144_spill] sm:$0xff] %v13147_v58  ;;  %v13149_v56 = vpop.permute.xlu0 %5696 }
 0x5d9   : > { %15981 = vst [vmem:[#allocation145_spill] sm:$0xff] %v13149_v56  ;;  %5466 = vrot.lane.b32.xlu1 %v4863_v7, %s9482_s16 }
 0x5da   : > { %5592 = vrot.lane.b32.xlu0 %v12751_v38, %s9480_s14 }
 0x5db   : > { %v13154_v19 = vpop.permute.xlu1 %5422 }
 0x5dc   : > { %v13156_v0 = vpop.permute.xlu0 %5576 }
 0x5dd   : > { %15982 = vst [vmem:[#allocation146_spill] sm:$0xff] %v13156_v0  ;;  %5594 = vrot.lane.b32.xlu1 %v12829_v59, %s9480_s14 }
 0x5de   : > { %5720 = vrot.lane.b32.xlu0 %v12667_v34, %s9481_s15 }
 0x5df   : > { %v13162_v3 = vpop.permute.xlu1 %5546 }
 0x5e0   : > { %v13164_v58 = vpop.permute.xlu0 %5704 }
 0x5e1   : > { %15983 = vst [vmem:[#allocation147_spill] sm:$0xff] %v13164_v58  ;;  %5722 = vrot.lane.b32.xlu1 %v12673_v28, %s9481_s15  ;;  %v4802_v28 = vld [vmem:[#allocation2 + $0x168] sm:$0xff]  ;;  %v4803_v58 = vld [vmem:[#allocation2 + $0x170] sm:$0xff] }
 0x5e2   : > { %5848 = vrot.lane.b32.xlu0 %v13008_v30, %s9483_s17 }
 0x5e3   : > { %v13170_v38 = vpop.permute.xlu1 %5674 }
 0x5e4   : > { %v5041_v7 = vpop.permute.xlu0 %5040 }
 0x5e5   : > { %5468 = vrot.lane.b32.xlu1 %v13008_v30, %s9482_s16  ;;  %v4834_v30 = vld [vmem:[#allocation2 + $0x169] sm:$0xff] }
 0x5e6   : > { %5850 = vrot.lane.b32.xlu0 %v12757_v45, %s9483_s17 }
 0x5e7   : > { %v13176_v34 = vpop.permute.xlu1 %5802 }
 0x5e8   : > { %v13178_v59 = vpop.permute.xlu0 %5048 }
 0x5e9   : > { %5470 = vrot.lane.b32.xlu1 %v12757_v45, %s9482_s16  ;;  %v4866_v45 = vld [vmem:[#allocation2 + $0x16a] sm:$0xff] }
 0x5ea   : > { %5596 = vrot.lane.b32.xlu0 %v4802_v28, %s9480_s14  ;;  %v4584_v28 = vld [vmem:[#allocation2 + $0x8] sm:$0xff] }
 0x5eb   : > { %v13183_v41 = vpop.permute.xlu1 %5554  ;;  %v5897_v21 = vsel %vm245_vm0, %v4584_v28, %v15987_v15  ;;  %v9440_v28 = vld [vmem:[#allocation2 + $0x20] sm:$0xff] }
 0x5ec   : > { %v13185_v0 = vpop.permute.xlu0 %5056 }
 0x5ed   : > { %5598 = vrot.lane.b32.xlu1 %v4803_v58, %s9480_s14  ;;  %v15986_v58 = vld [vmem:[#allocation8_spill] sm:$0xff] }
 0x5ee   : > { %5724 = vrot.lane.b32.xlu0 %v4834_v30, %s9481_s15  ;;  %v5896_v30 = vsel %vm245_vm0, %v4583_v57, %v15986_v58  ;;  %v9439_v57 = vld [vmem:[#allocation2 + $0x18] sm:$0xff]  ;;  %v5899_v58 = vsel %vm245_vm0, %v9440_v28, %v12429_v31  ;;  %v5900_v31 = vsel %vm245_vm0, %v12679_v24, %v12899_v39 }
 0x5ef   : > { %v13189_v56 = vpop.permute.xlu1 %5682  ;;  %v5929_v26 = vsel %vm5928_vm7, %v5896_v30, %v15988_v43  ;;  %v5898_v15 = vsel %vm245_vm0, %v9439_v57, %v12423_v63  ;;  %v5902_v43 = vsel %vm245_vm0, %v9441_v62, %v12431_v42  ;;  %v9443_v30 = vld [vmem:[#allocation2 + $0x78] sm:$0xff]  ;;  %v5933_v24 = vsel %vm5928_vm7, %v5900_v31, %v5041_v7 }
 0x5f0   : > { %v13191_v35 = vpop.permute.xlu0 %5064  ;;  %v5932_v39 = vsel %vm5928_vm7, %v5899_v58, %v12488_v6 }
 0x5f1   : > { %15984 = vst [vmem:[#allocation148_spill] sm:$0xff] %v13191_v35  ;;  %5726 = vrot.lane.b32.xlu1 %v4835_v25, %s9481_s15  ;;  %v4867_v35 = vld [vmem:[#allocation2 + $0x172] sm:$0xff] }
 0x5f2   : > { %5852 = vrot.lane.b32.xlu0 %v4866_v45, %s9483_s17 }
 0x5f3   : > { %v13195_v13 = vpop.permute.xlu1 %5428 }
 0x5f4   : > { %v13197_v22 = vpop.permute.xlu0 %5072 }
 0x5f5   : > { %15985 = vst [vmem:[#allocation149_spill] sm:$0xff] %v13197_v22  ;;  %5472 = vrot.lane.b32.xlu1 %v4866_v45, %s9482_s16  ;;  %v5930_v22 = vsel %vm5928_vm7, %v5897_v21, %v15989_v61  ;;  %v9442_v21 = vld [vmem:[#allocation2 + $0x50] sm:$0xff] }
 0x5f6   : > { %5854 = vrot.lane.b32.xlu0 %v4867_v35, %s9483_s17  ;;  %v5903_v61 = vsel %vm245_vm0, %v9442_v21, %v12437_v52  ;;  %v9445_v52 = vld [vmem:[#allocation2 + $0xa8] sm:$0xff] }
 0x5f7   : > { %v13205_v25 = vpop.permute.xlu1 %5430  ;;  %v13239_v62 = vsel %vm245_vm0, %v9445_v52, %v12447_v47  ;;  %v15998_v52 = vld [vmem:[#allocation58_spill] sm:$0xff] }
 0x5f8   : > { %v13211_v45 = vpop.permute.xlu0 %5080 }
 0x5f9   : > { %15990 = vst [vmem:[#allocation8_spill] sm:$0xff] %v13211_v45  ;;  %5474 = vrot.lane.b32.xlu1 %v4867_v35, %s9482_s16  ;;  %v13224_v35 = vsel %vm245_vm0, %v9443_v30, %v12439_v55  ;;  %v9444_v45 = vld [vmem:[#allocation2 + $0x80] sm:$0xff]  ;;  %v9446_v55 = vld [vmem:[#allocation2 + $0xb0] sm:$0xff] }
 0x5fa   : > { %v13228_v63 = vsel %vm245_vm0, %v9444_v45, %v12445_v11  ;;  %5600 = vrot.lane.b32.xlu0 %v12763_v37, %s9480_s14  ;;  %v13243_v57 = vsel %vm245_vm0, %v9446_v55, %v12453_v8  ;;  %v5963_v11 = vsel %vm5961_vm8, %v5930_v22, %v12546_v50  ;;  %v5962_v37 = vsel %vm5961_vm8, %v5929_v26, %v12483_v20  ;;  %v15993_v26 = vld [vmem:[#allocation100_spill] sm:$0xff]  ;;  %v15999_v55 = vld [vmem:[#allocation63_spill] sm:$0xff] }
 0x5fb   : > { %v13235_v42 = vpop.permute.xlu1 %5562  ;;  %v5996_v47 = vsel %vm5994_vm9, %v5963_v11, %v12611_v53  ;;  %v5901_v45 = vsel %vm245_vm0, %v12769_v40, %v12905_v16  ;;  %v5936_v50 = vsel %vm5928_vm7, %v5903_v61, %v12495_v27  ;;  %v5995_v20 = vsel %vm5994_vm9, %v5962_v37, %v12541_v4  ;;  %v16000_v37 = vld [vmem:[#allocation19_spill] sm:$0xff] }
 0x5fc   : > { %v13257_v8 = vpop.permute.xlu0 %5088  ;;  %v6029_v6 = vsel %vm6027_vm10, %v5996_v47, %v12707_v54  ;;  %v5934_v22 = vsel %vm5928_vm7, %v5901_v45, %v12971_v17  ;;  %v5931_v16 = vsel %vm5928_vm7, %v5898_v15, %v12723_v9  ;;  %v5935_v40 = vsel %vm5928_vm7, %v5902_v43, %v12735_v14  ;;  %v15996_v43 = vld [vmem:[#allocation69_spill] sm:$0xff]  ;;  %v16001_v47 = vld [vmem:[#allocation56_spill] sm:$0xff] }
 0x5fd   : > { %5602 = vrot.lane.b32.xlu1 %v12839_v33, %s9480_s14  ;;  %v6028_v53 = vsel %vm6027_vm10, %v5995_v20, %v12811_v5  ;;  %v5966_v27 = vsel %vm5961_vm8, %v5933_v24, %v12490_v29  ;;  %v5964_v54 = vsel %vm5961_vm8, %v5931_v16, %v12966_v23  ;;  %v5965_v17 = vsel %vm5961_vm8, %v5932_v39, %v13040_v12  ;;  %v15991_v5 = vld [vmem:[#allocation7_spill] sm:$0xff] }
 0x5fe   : > { %5728 = vrot.lane.b32.xlu0 %v12845_v49, %s9481_s15  ;;  %v5904_v14 = vsel %vm245_vm0, %v12691_v36, %v12909_v18  ;;  %v5967_v29 = vsel %vm5961_vm8, %v5934_v22, %v15991_v5  ;;  %v5997_v9 = vsel %vm5994_vm9, %v5964_v54, %v13042_v60  ;;  %v5998_v33 = vsel %vm5994_vm9, %v5965_v17, %v13097_v2  ;;  %v15992_v23 = vld [vmem:[#allocation99_spill] sm:$0xff]  ;;  %v15995_v18 = vld [vmem:[#allocation50_spill] sm:$0xff]  ;;  %v4868_v60 = vld [vmem:[#allocation2 + $0x182] sm:$0xff] }
 0x5ff   : > { %v13279_v4 = vpop.permute.xlu1 %5690  ;;  %v15994_v12 = vld [vmem:[#allocation67_spill] sm:$0xff]  ;;  %v6031_v36 = vsel %vm6027_vm10, %v5998_v33, %v13154_v19  ;;  %v5999_v15 = vsel %vm5994_vm9, %v5966_v27, %v15995_v18  ;;  %v6061_v2 = vsel %vm6060_vm11, %v6028_v53, %v13099_v1  ;;  %v5937_v58 = vsel %vm5928_vm7, %v5904_v14, %v13178_v59  ;;  %v16004_v14 = vld [vmem:[#allocation81_spill] sm:$0xff] }
 0x600   : > { %v5421_v49 = vpop.permute.xlu0 %5420  ;;  %v5905_v7 = vsel %vm245_vm0, %v15994_v12, %v15993_v26  ;;  %v15997_v19 = vld [vmem:[#allocation111_spill] sm:$0xff]  ;;  %v6094_v31 = vsel %vm6093_vm12, %v6061_v2, %v13107_v46  ;;  %v6000_v1 = vsel %vm5994_vm9, %v5967_v29, %v15998_v52  ;;  %v6064_v59 = vsel %vm6060_vm11, %v6031_v36, %v15999_v55  ;;  %v16005_v29 = vld [vmem:[#allocation65_spill] sm:$0xff]  ;;  %v16009_v26 = vld [vmem:[#allocation66_spill] sm:$0xff] }
 0x601   : > { %5730 = vrot.lane.b32.xlu1 %v15992_v23, %s9481_s15  ;;  %v6030_v28 = vsel %vm6027_vm10, %v5997_v9, %v5421_v49  ;;  %v5968_v30 = vsel %vm5961_vm8, %v5935_v40, %v15997_v19  ;;  %v6062_v11 = vsel %vm6060_vm11, %v6029_v6, %v13162_v3  ;;  %v6032_v39 = vsel %vm6027_vm10, %v5999_v15, %v16000_v37  ;;  %v16002_v22 = vld [vmem:[#allocation39_spill] sm:$0xff]  ;;  %v4869_v6 = vld [vmem:[#allocation2 + $0x18a] sm:$0xff]  ;;  %v16003_v40 = vld [vmem:[#allocation112_spill] sm:$0xff] }
 0x602   : > { %v6063_v21 = vsel %vm6060_vm11, %v6030_v28, %v15996_v43  ;;  %5856 = vrot.lane.b32.xlu0 %v4868_v60, %s9483_s17  ;;  %v6001_v46 = vsel %vm5994_vm9, %v5968_v30, %v13049_v44  ;;  %v6095_v20 = vsel %vm6093_vm12, %v6062_v11, %v13170_v38  ;;  %v5970_v16 = vsel %vm5961_vm8, %v5937_v58, %v16002_v22  ;;  %v4806_v5 = vld [vmem:[#allocation2 + $0x198] sm:$0xff]  ;;  %v16006_v9 = vld [vmem:[#allocation18_spill] sm:$0xff]  ;;  %v4807_v15 = vld [vmem:[#allocation2 + $0x1a0] sm:$0xff] }
 0x603   : > { %v13311_v61 = vpop.permute.xlu1 %5436  ;;  %v6096_v45 = vsel %vm6093_vm12, %v6063_v21, %v16001_v47  ;;  %v5938_v53 = vsel %vm5928_vm7, %v5905_v7, %v16003_v40  ;;  %v6128_v27 = vsel %vm6126_vm13, %v6095_v20, %v13176_v34  ;;  %v6034_v54 = vsel %vm6027_vm10, %v6001_v46, %v13195_v13  ;;  %v16010_v7 = vld [vmem:[#allocation70_spill] sm:$0xff]  ;;  %v16014_v21 = vld [vmem:[#allocation83_spill] sm:$0xff]  ;;  %v16015_v30 = vld [vmem:[#allocation113_spill] sm:$0xff] }
 0x604   : > { %v5801_v24 = vpop.permute.xlu0 %5800  ;;  %v5969_v38 = vsel %vm5961_vm8, %v5936_v50, %v13047_v32  ;;  %v6065_v17 = vsel %vm6060_vm11, %v6032_v39, %v13115_v51  ;;  %v6129_v34 = vsel %vm6126_vm13, %v6096_v45, %v16004_v14  ;;  %v6097_v13 = vsel %vm6093_vm12, %v6064_v59, %v16005_v29  ;;  %v16007_v32 = vld [vmem:[#allocation48_spill] sm:$0xff]  ;;  %v16008_v51 = vld [vmem:[#allocation101_spill] sm:$0xff]  ;;  %v16019_v47 = vld [vmem:[#allocation102_spill] sm:$0xff] }
 0x605   : > { %5476 = vrot.lane.b32.xlu1 %v4868_v60, %s9482_s16  ;;  %v6127_v3 = vsel %vm6126_vm13, %v6094_v31, %v5801_v24  ;;  %v5939_v33 = vsel %vm5928_vm7, %v13224_v35, %v16006_v9  ;;  %v6002_v49 = vsel %vm5994_vm9, %v5969_v38, %v13105_v48  ;;  %v6003_v50 = vsel %vm5994_vm9, %v5970_v16, %v16007_v32  ;;  %v16011_v35 = vld [vmem:[#allocation38_spill] sm:$0xff]  ;;  %v16016_v55 = vld [vmem:[#allocation72_spill] sm:$0xff]  ;;  %v16020_v45 = vld [vmem:[#allocation73_spill] sm:$0xff] }
 0x606   : > { %9277 = vmatprep.mubr.msk.f32.mxu1 %vm6168_vm14, %v6127_v3  ;;  %5858 = vrot.lane.b32.xlu0 %v4869_v6, %s9483_s17  ;;  %v5908_v12 = vsel %vm245_vm0, %v16009_v26, %v16008_v51  ;;  %v6033_v36 = vsel %vm6027_vm10, %v6000_v1, %v16010_v7  ;;  %v6067_v18 = vsel %vm6060_vm11, %v6034_v54, %v16011_v35  ;;  %v16012_v28 = vmov 0.0   ;;  %v16017_v11 = vld [vmem:[#allocation68_spill] sm:$0xff]  ;;  %v16021_v20 = vld [vmem:[#allocation125_spill] sm:$0xff]  ;;  %v16022_v16 = vld [vmem:[#allocation42_spill] sm:$0xff] }
 0x607   : > { %v13343_v44 = vpop.permute.xlu1 %5438  ;;  %9278 = vmatmul.mubr.msk.f32.vlgmr.msra.gmra.mrb[0].mxu1 %vm6168_vm14, %v6128_v27  ;;  %v6035_v48 = vsel %vm6027_vm10, %v6002_v49, %v13205_v25  ;;  %308 = vst.msk [vmem:[#allocation3 + $0x28] sm:$0x3] %vm304_vm15, %v16012_v28  ;;  %305 = vst.msk [vmem:[#allocation3 + $0x10] sm:$0x3] %vm304_vm15, %v16012_v28  ;;  %v16013_v25 = vld [vmem:[#allocation49_spill] sm:$0xff]  ;;  %v5941_v2 = vsel %vm5928_vm7, %v5908_v12, %v13185_v0  ;;  %v6098_v58 = vsel %vm6093_vm12, %v6065_v17, %v13123_v10  ;;  %v4838_v0 = vld [vmem:[#allocation2 + $0x199] sm:$0xff] }
 0x608   : > { %v5809_v23 = vpop.permute.xlu0 %5808  ;;  %9280 = vmatprep.mubr.msk.f32.mxu1 %vm6168_vm14, %v6129_v34  ;;  %311 = vst.msk [vmem:[#allocation3 + $0x40] sm:$0x3] %vm304_vm15, %v16012_v28  ;;  %314 = vst.msk [vmem:[#allocation3 + $0x58] sm:$0x3] %vm304_vm15, %v16012_v28  ;;  %v5971_v60 = vsel %vm5961_vm8, %v5938_v53, %v16013_v25  ;;  %v6130_v19 = vsel %vm6126_vm13, %v6097_v13, %v16014_v21  ;;  %v5972_v31 = vsel %vm5961_vm8, %v5939_v33, %v16015_v30  ;;  %v16023_v40 = vld [vmem:[#allocation28_spill] sm:$0xff]  ;;  %v16024_v27 = vld [vmem:[#allocation114_spill] sm:$0xff] }
 0x609   : > { %5478 = vrot.lane.b32.xlu1 %v4869_v6, %s9482_s16  ;;  %317 = vst.msk [vmem:[#allocation3 + $0x70] sm:$0x3] %vm304_vm15, %v16012_v28  ;;  %320 = vst.msk [vmem:[#allocation3 + $0x88] sm:$0x3] %vm304_vm15, %v16012_v28  ;;  %v6066_v52 = vsel %vm6060_vm11, %v6033_v36, %v13183_v41  ;;  %v6131_v1 = vsel %vm6126_vm13, %v6098_v58, %v5809_v23  ;;  %v6036_v10 = vsel %vm6027_vm10, %v6003_v50, %v16016_v55  ;;  %v16018_v41 = vld [vmem:[#allocation57_spill] sm:$0xff]  ;;  %v16025_v38 = vld [vmem:[#allocation55_spill] sm:$0xff] }
 0x60a   : > { %323 = vst.msk [vmem:[#allocation3 + $0xa0] sm:$0x3] %vm304_vm15, %v16012_v28  ;;  %326 = vst.msk [vmem:[#allocation3 + $0xb8] sm:$0x3] %vm304_vm15, %v16012_v28  ;;  %5604 = vrot.lane.b32.xlu0 %v4806_v5, %s9480_s14  ;;  %v6099_v59 = vsel %vm6093_vm12, %v6066_v52, %v13189_v56  ;;  %v6068_v24 = vsel %vm6060_vm11, %v6035_v48, %v16017_v11  ;;  %v6100_v39 = vsel %vm6093_vm12, %v6067_v18, %v16018_v41  ;;  %v4839_v6 = vld [vmem:[#allocation2 + $0x1a1] sm:$0xff]  ;;  %v16027_v13 = vld [vmem:[#allocation139_spill] sm:$0xff] }
 0x60b   : > { %329 = vst.msk [vmem:[#allocation3 + $0xd0] sm:$0x3] %vm304_vm15, %v16012_v28  ;;  %332 = vst.msk [vmem:[#allocation3 + $0xe8] sm:$0x3] %vm304_vm15, %v16012_v28  ;;  %v13415_v43 = vpop.permute.xlu1 %5570  ;;  %9281 = vmatmul.mubr.msk.f32.gmra.mrb[2].mxu1 %vm6168_vm14, %v6130_v19  ;;  %v5909_v46 = vsel %vm245_vm0, %v16020_v45, %v16019_v47  ;;  %v6005_v22 = vsel %vm5994_vm9, %v5972_v31, %v16021_v20  ;;  %v5974_v56 = vsel %vm5961_vm8, %v5941_v2, %v16022_v16  ;;  %v16026_v5 = vld [vmem:[#allocation124_spill] sm:$0xff]  ;;  %v16028_v9 = vld [vmem:[#allocation85_spill] sm:$0xff] }
 0x60c   : > { %335 = vst.msk [vmem:[#allocation3 + $0x100] sm:$0x3] %vm304_vm15, %v16012_v28  ;;  %338 = vst.msk [vmem:[#allocation3 + $0x118] sm:$0x3] %vm304_vm15, %v16012_v28  ;;  %v5811_v37 = vpop.permute.xlu0 %5810  ;;  %9283 = vmatprep.mubr.msk.f32.mxu1 %vm6168_vm14, %v6131_v1  ;;  %v5940_v53 = vsel %vm5928_vm7, %v13228_v63, %v16023_v40  ;;  %v5942_v54 = vsel %vm5928_vm7, %v5909_v46, %v16024_v27  ;;  %v6004_v17 = vsel %vm5994_vm9, %v5971_v60, %v16025_v38  ;;  %v4870_v49 = vld [vmem:[#allocation2 + $0x19a] sm:$0xff]  ;;  %v16036_v25 = vld [vmem:[#allocation62_spill] sm:$0xff] }
 0x60d   : > { %341 = vst.msk [vmem:[#allocation3 + $0x130] sm:$0x3] %vm304_vm15, %v16012_v28  ;;  %344 = vst.msk [vmem:[#allocation3 + $0x148] sm:$0x3] %vm304_vm15, %v16012_v28  ;;  %5606 = vrot.lane.b32.xlu1 %v4807_v15, %s9480_s14  ;;  %v6132_v3 = vsel %vm6126_vm13, %v6099_v59, %v5811_v37  ;;  %v6038_v14 = vsel %vm6027_vm10, %v6005_v22, %v13311_v61  ;;  %v5973_v29 = vsel %vm5961_vm8, %v5940_v53, %v16026_v5  ;;  %v16029_v32 = vld [vmem:[#allocation20_spill] sm:$0xff]  ;;  %v16030_v61 = vld [vmem:[#allocation35_spill] sm:$0xff] }
 0x60e   : > { %347 = vst.msk [vmem:[#allocation3 + $0x160] sm:$0x3] %vm304_vm15, %v16012_v28  ;;  %350 = vst.msk [vmem:[#allocation3 + $0x178] sm:$0x3] %vm304_vm15, %v16012_v28  ;;  %5732 = vrot.lane.b32.xlu0 %v4838_v0, %s9481_s15  ;;  %v6069_v63 = vsel %vm6060_vm11, %v6036_v10, %v16027_v13  ;;  %v6133_v33 = vsel %vm6126_vm13, %v6100_v39, %v16028_v9  ;;  %v6101_v50 = vsel %vm6093_vm12, %v6068_v24, %v16029_v32  ;;  %v16031_v51 = vld [vmem:[#allocation136_spill] sm:$0xff]  ;;  %v16033_v35 = vld [vmem:[#allocation103_spill] sm:$0xff] }
 0x60f   : > { %353 = vst.msk [vmem:[#allocation3 + $0x190] sm:$0x3] %vm304_vm15, %v16012_v28  ;;  %356 = vst.msk [vmem:[#allocation3 + $0x1a8] sm:$0x3] %vm304_vm15, %v16012_v28  ;;  %v13453_v34 = vpop.permute.xlu1 %5698  ;;  %9284 = vmatmul.mubr.msk.f32.gmra.mrb[4].mxu1 %vm6168_vm14, %v6132_v3  ;;  %v5943_v23 = vsel %vm5928_vm7, %v13239_v62, %v16030_v61  ;;  %v6006_v26 = vsel %vm5994_vm9, %v5973_v29, %v16031_v51  ;;  %v16032_v12 = vld [vmem:[#allocation4_spill] sm:$0xff]  ;;  %v16035_v15 = vld [vmem:[#allocation75_spill] sm:$0xff]  ;;  %v6071_v62 = vsel %vm6060_vm11, %v6038_v14, %v16036_v25 }
 0x610   : > { %v6007_v7 = vsel %vm5994_vm9, %v5974_v56, %v16032_v12  ;;  %v5817_v36 = vpop.permute.xlu0 %5816  ;;  %9286 = vmatprep.mubr.msk.f32.mxu1 %vm6168_vm14, %v6133_v33  ;;  %v16034_v18 = vld [vmem:[#allocation36_spill] sm:$0xff]  ;;  %v6037_v28 = vsel %vm6027_vm10, %v6004_v17, %v16035_v15  ;;  %v6039_v60 = vsel %vm6027_vm10, %v6006_v26, %v13343_v44  ;;  %v16037_v58 = vld [vmem:[#allocation47_spill] sm:$0xff]  ;;  %v16039_v31 = vld [vmem:[#allocation141_spill] sm:$0xff]  ;;  %s9484_s16 = smov 20  }
 0x611   : > { %5734 = vrot.lane.b32.xlu1 %v4839_v6, %s9481_s15  ;;  %v5912_v48 = vsel %vm245_vm0, %v16034_v18, %v16033_v35  ;;  %v4871_v2 = vld [vmem:[#allocation2 + $0x1a2] sm:$0xff]  ;;  %v5975_v21 = vsel %vm5961_vm8, %v5942_v54, %v16037_v58  ;;  %v16038_v19 = vld [vmem:[#allocation115_spill] sm:$0xff]  ;;  %v6102_v52 = vsel %vm6093_vm12, %v6069_v63, %v16039_v31  ;;  %v6070_v44 = vsel %vm6060_vm11, %v6037_v28, %v13235_v42  ;;  %v16042_v24 = vld [vmem:[#allocation82_spill] sm:$0xff] }
 0x612   : > { %v5976_v30 = vsel %vm5961_vm8, %v5943_v23, %v16038_v19  ;;  %5860 = vrot.lane.b32.xlu0 %v4870_v49, %s9483_s17  ;;  %v16040_v0 = vld [vmem:[#allocation87_spill] sm:$0xff]  ;;  %v16041_v10 = vld [vmem:[#allocation148_spill] sm:$0xff]  ;;  %v6135_v11 = vsel %vm6126_vm13, %v6102_v52, %v5817_v36  ;;  %v6040_v37 = vsel %vm6027_vm10, %v6007_v7, %v16042_v24  ;;  %v6103_v41 = vsel %vm6093_vm12, %v6070_v44, %v13279_v4  ;;  %v16043_v39 = vld [vmem:[#allocation78_spill] sm:$0xff] }
 0x613   : > { %v5445_v1 = vpop.permute.xlu1 %5444  ;;  %v6134_v55 = vsel %vm6126_vm13, %v6101_v50, %v16040_v0  ;;  %v5945_v59 = vsel %vm5928_vm7, %v5912_v48, %v16041_v10  ;;  %v6072_v47 = vsel %vm6060_vm11, %v6039_v60, %v16043_v39  ;;  %v16044_v46 = vld [vmem:[#allocation34_spill] sm:$0xff]  ;;  %v16045_v20 = vld [vmem:[#allocation43_spill] sm:$0xff]  ;;  %v16047_v3 = vld [vmem:[#allocation104_spill] sm:$0xff] }
 0x614   : > { %9287 = vmatmul.mubr.msk.f32.gmra.mrb[6].mxu1 %vm6168_vm14, %v6134_v55  ;;  %v5819_v45 = vpop.permute.xlu0 %5818  ;;  %v6104_v42 = vsel %vm6093_vm12, %v6071_v62, %v16044_v46  ;;  %v5944_v22 = vsel %vm5928_vm7, %v13243_v57, %v16045_v20  ;;  %v16046_v16 = vld [vmem:[#allocation127_spill] sm:$0xff]  ;;  %v16048_v6 = vld [vmem:[#allocation76_spill] sm:$0xff]  ;;  %v16050_v54 = vld [vmem:[#allocation14_spill] sm:$0xff] }
 0x615   : > { %5862 = vrot.lane.b32.xlu1 %v4871_v2, %s9483_s17  ;;  %9289 = vmatprep.mubr.msk.f32.mxu1 %vm6168_vm14, %v6135_v11  ;;  %v6009_v56 = vsel %vm5994_vm9, %v5976_v30, %v16046_v16  ;;  %v6136_v4 = vsel %vm6126_vm13, %v6103_v41, %v5819_v45  ;;  %v5913_v40 = vsel %vm245_vm0, %v16048_v6, %v16047_v3  ;;  %v16049_v53 = vld [vmem:[#allocation27_spill] sm:$0xff]  ;;  %v16051_v5 = vld [vmem:[#allocation126_spill] sm:$0xff]  ;;  %v16053_v63 = vld [vmem:[#allocation89_spill] sm:$0xff] }
 0x616   : > { %v5978_v27 = vsel %vm5961_vm8, %v5945_v59, %v16049_v53  ;;  %v6008_v38 = vsel %vm5994_vm9, %v5975_v21, %v16050_v54  ;;  %v6042_v17 = vsel %vm6027_vm10, %v6009_v56, %v5445_v1  ;;  %v5977_v57 = vsel %vm5961_vm8, %v5944_v22, %v16051_v5  ;;  %v16052_v29 = vld [vmem:[#allocation143_spill] sm:$0xff]  ;;  %v16054_v33 = vld [vmem:[#allocation80_spill] sm:$0xff]  ;;  %v16056_v61 = vld [vmem:[#allocation137_spill] sm:$0xff] }
 0x617   : > { %v5447_v14 = vpop.permute.xlu1 %5446  ;;  %v6073_v13 = vsel %vm6060_vm11, %v6040_v37, %v16052_v29  ;;  %v6137_v9 = vsel %vm6126_vm13, %v6104_v42, %v16053_v63  ;;  %v6105_v49 = vsel %vm6093_vm12, %v6072_v47, %v16054_v33  ;;  %v16055_v32 = vld [vmem:[#allocation116_spill] sm:$0xff]  ;;  %v6010_v23 = vsel %vm5994_vm9, %v5977_v57, %v16056_v61  ;;  %v16057_v26 = vld [vmem:[#allocation37_spill] sm:$0xff]  ;;  %v16061_v62 = vld [vmem:[#allocation91_spill] sm:$0xff] }
 0x618   : > { %9290 = vmatmul.mubr.msk.f32.gmra.mrb[8].mxu1 %vm6168_vm14, %v6136_v4  ;;  %v5946_v50 = vsel %vm5928_vm7, %v5913_v40, %v16055_v32  ;;  %v5825_v51 = vpop.permute.xlu0 %5824  ;;  %v6011_v12 = vsel %vm5994_vm9, %v5978_v27, %v16057_v26  ;;  %v16058_v7 = vld [vmem:[#allocation13_spill] sm:$0xff]  ;;  %v6043_v35 = vsel %vm6027_vm10, %v6010_v23, %v5447_v14  ;;  %v16059_v18 = vld [vmem:[#allocation84_spill] sm:$0xff]  ;;  %v6138_v60 = vsel %vm6126_vm13, %v6105_v49, %v16061_v62  ;;  %v16063_v31 = vld [vmem:[#allocation86_spill] sm:$0xff] }
 0x619   : > { %9292 = vmatprep.mubr.msk.f32.mxu1 %vm6168_vm14, %v6137_v9  ;;  %v6075_v36 = vsel %vm6060_vm11, %v6042_v17, %v16058_v7  ;;  %v6041_v48 = vsel %vm6027_vm10, %v6008_v38, %v16059_v18  ;;  %v16060_v15 = vld [vmem:[#allocation145_spill] sm:$0xff]  ;;  %v16062_v2 = vld [vmem:[#allocation52_spill] sm:$0xff]  ;;  %v6076_v52 = vsel %vm6060_vm11, %v6043_v35, %v16063_v31  ;;  %v16064_v0 = vld [vmem:[#allocation90_spill] sm:$0xff] }
 0x61a   : > { %v6106_v28 = vsel %vm6093_vm12, %v6073_v13, %v16060_v15  ;;  %v5979_v58 = vsel %vm5961_vm8, %v5946_v50, %v16062_v2  ;;  %v6074_v21 = vsel %vm6060_vm11, %v6041_v48, %v13415_v43  ;;  %v6044_v55 = vsel %vm6027_vm10, %v6011_v12, %v16064_v0  ;;  %v16065_v10 = vld [vmem:[#allocation59_spill] sm:$0xff]  ;;  %v16066_v11 = vld [vmem:[#allocation22_spill] sm:$0xff]  ;;  %v16069_v45 = vld [vmem:[#allocation93_spill] sm:$0xff] }
 0x61b   : > { %v5579_v25 = vpop.permute.xlu1 %5578  ;;  %v6139_v19 = vsel %vm6126_vm13, %v6106_v28, %v5825_v51  ;;  %v6107_v30 = vsel %vm6093_vm12, %v6074_v21, %v13453_v34  ;;  %v6108_v59 = vsel %vm6093_vm12, %v6075_v36, %v16065_v10  ;;  %v9447_v44 = vld [vmem:[#allocation2 + $0xd8] sm:$0xff]  ;;  %v16067_v34 = vld [vmem:[#allocation33_spill] sm:$0xff]  ;;  %v16068_v39 = vld [vmem:[#allocation146_spill] sm:$0xff] }
 0x61c   : > { %9293 = vmatmul.mubr.msk.f32.gmra.mrb[10].mxu1 %vm6168_vm14, %v6138_v60  ;;  %v5827_v1 = vpop.permute.xlu0 %5826  ;;  %v5914_v24 = vsel %vm245_vm0, %v9447_v44, %v16066_v11  ;;  %v6012_v41 = vsel %vm5994_vm9, %v5979_v58, %v16067_v34  ;;  %v6077_v47 = vsel %vm6060_vm11, %v6044_v55, %v16068_v39  ;;  %v6141_v46 = vsel %vm6126_vm13, %v6108_v59, %v16069_v45  ;;  %v16070_v42 = vld [vmem:[#allocation88_spill] sm:$0xff]  ;;  %v16071_v22 = vld [vmem:[#allocation17_spill] sm:$0xff]  ;;  %v16075_v54 = vld [vmem:[#allocation147_spill] sm:$0xff] }
 0x61d   : > { %9295 = vmatprep.mubr.msk.f32.mxu1 %vm6168_vm14, %v6139_v19  ;;  %v6140_v43 = vsel %vm6126_vm13, %v6107_v30, %v5827_v1  ;;  %v6109_v20 = vsel %vm6093_vm12, %v6076_v52, %v16070_v42  ;;  %v5947_v16 = vsel %vm5928_vm7, %v5914_v24, %v16071_v22  ;;  %v16072_v4 = vld [vmem:[#allocation117_spill] sm:$0xff]  ;;  %v16074_v53 = vld [vmem:[#allocation92_spill] sm:$0xff]  ;;  %v6110_v38 = vsel %vm6093_vm12, %v6077_v47, %v16075_v54  ;;  %v16076_v14 = vld [vmem:[#allocation95_spill] sm:$0xff] }
 0x61e   : > { %v5980_v3 = vsel %vm5961_vm8, %v5947_v16, %v16072_v4  ;;  %v16073_v6 = vld [vmem:[#allocation129_spill] sm:$0xff]  ;;  %v6045_v27 = vsel %vm6027_vm10, %v6012_v41, %v16074_v53  ;;  %v6142_v5 = vsel %vm6126_vm13, %v6109_v20, %v16076_v14  ;;  %v9448_v57 = vld [vmem:[#allocation2 + $0xe0] sm:$0xff]  ;;  %v16081_v36 = vld [vmem:[#allocation15_spill] sm:$0xff] }
 0x61f   : > { %v5707_v37 = vpop.permute.xlu1 %5706  ;;  %v6013_v40 = vsel %vm5994_vm9, %v5980_v3, %v16073_v6  ;;  %v16077_v29 = vld [vmem:[#allocation24_spill] sm:$0xff]  ;;  %v6078_v63 = vsel %vm6060_vm11, %v6045_v27, %v5579_v25  ;;  %v16078_v49 = vld [vmem:[#allocation41_spill] sm:$0xff]  ;;  %v16082_v18 = vld [vmem:[#allocation138_spill] sm:$0xff] }
 0x620   : > { %9296 = vmatmul.mubr.msk.f32.gmra.mrb[12].mxu1 %vm6168_vm14, %v6140_v43  ;;  %v5833_v56 = vpop.permute.xlu0 %5832  ;;  %v5915_v13 = vsel %vm245_vm0, %v9448_v57, %v16077_v29  ;;  %v6111_v50 = vsel %vm6093_vm12, %v6078_v63, %v5707_v37  ;;  %v16079_v61 = vld [vmem:[#allocation64_spill] sm:$0xff]  ;;  %v16083_v28 = vld [vmem:[#allocation97_spill] sm:$0xff]  ;;  %v9449_v60 = vld [vmem:[#allocation2 + $0xf0] sm:$0xff] }
 0x621   : > { %9298 = vmatprep.mubr.msk.f32.mxu1 %vm6168_vm14, %v6141_v46  ;;  %v6143_v9 = vsel %vm6126_vm13, %v6110_v38, %v5833_v56  ;;  %v5948_v32 = vsel %vm5928_vm7, %v5915_v13, %v16078_v49  ;;  %v16080_v26 = vld [vmem:[#allocation128_spill] sm:$0xff]  ;;  %v16084_v2 = vld [vmem:[#allocation105_spill] sm:$0xff]  ;;  %v16085_v21 = vld [vmem:[#allocation94_spill] sm:$0xff] }
 0x622   : > { %v5981_v12 = vsel %vm5961_vm8, %v5948_v32, %v16080_v26  ;;  %v5916_v58 = vsel %vm245_vm0, %v9449_v60, %v16084_v2  ;;  %v16086_v31 = vld [vmem:[#allocation149_spill] sm:$0xff]  ;;  %v16087_v1 = vld [vmem:[#allocation96_spill] sm:$0xff]  ;;  %v16089_v11 = vld [vmem:[#allocation106_spill] sm:$0xff] }
 0x623   : > { %v5453_v17 = vpop.permute.xlu1 %5452  ;;  %v6014_v48 = vsel %vm5994_vm9, %v5981_v12, %v16082_v18  ;;  %v5949_v52 = vsel %vm5928_vm7, %v5916_v58, %v16086_v31  ;;  %v16088_v59 = vld [vmem:[#allocation29_spill] sm:$0xff]  ;;  %v16090_v24 = vld [vmem:[#allocation79_spill] sm:$0xff]  ;;  %v16091_v41 = vld [vmem:[#allocation118_spill] sm:$0xff] }
 0x624   : > { %v6046_v33 = vsel %vm6027_vm10, %v6013_v40, %v5453_v17  ;;  %9299 = vmatmul.mubr.msk.f32.gmra.mrb[14].mxu1 %vm6168_vm14, %v6142_v5  ;;  %v5835_v51 = vpop.permute.xlu0 %5834  ;;  %v5982_v43 = vsel %vm5961_vm8, %v5949_v52, %v16088_v59  ;;  %v5917_v37 = vsel %vm245_vm0, %v16090_v24, %v16089_v11  ;;  %v16092_v47 = vld [vmem:[#allocation32_spill] sm:$0xff]  ;;  %v16093_v42 = vld [vmem:[#allocation51_spill] sm:$0xff]  ;;  %v16094_v22 = vld [vmem:[#allocation98_spill] sm:$0xff] }
 0x625   : > { %v6079_v23 = vsel %vm6060_vm11, %v6046_v33, %v16079_v61  ;;  %9301 = vmatprep.mubr.msk.f32.mxu1 %vm6168_vm14, %v6143_v9  ;;  %v6144_v7 = vsel %vm6126_vm13, %v6111_v50, %v5835_v51  ;;  %v5950_v39 = vsel %vm5928_vm7, %v5917_v37, %v16091_v41  ;;  %v6015_v45 = vsel %vm5994_vm9, %v5982_v43, %v16092_v47  ;;  %v16095_v40 = vld [vmem:[#allocation60_spill] sm:$0xff]  ;;  %v9450_v63 = vld [vmem:[#allocation2 + $0x108] sm:$0xff]  ;;  %v16097_v32 = vld [vmem:[#allocation71_spill] sm:$0xff] }
 0x626   : > { %v6112_v35 = vsel %vm6093_vm12, %v6079_v23, %v16081_v36  ;;  %v5983_v20 = vsel %vm5961_vm8, %v5950_v39, %v16093_v42  ;;  %v6048_v16 = vsel %vm6027_vm10, %v6015_v45, %v16094_v22  ;;  %v16096_v9 = vld [vmem:[#allocation21_spill] sm:$0xff]  ;;  %v16098_v61 = vld [vmem:[#allocation119_spill] sm:$0xff]  ;;  %v9452_v59 = vld [vmem:[#allocation2 + $0x120] sm:$0xff] }
 0x627   : > { %v5455_v15 = vpop.permute.xlu1 %5454  ;;  %v6145_v25 = vsel %vm6126_vm13, %v6112_v35, %v16083_v28  ;;  %v6016_v53 = vsel %vm5994_vm9, %v5983_v20, %v16095_v40  ;;  %v5918_v33 = vsel %vm245_vm0, %v9450_v63, %v16096_v9  ;;  %v16099_v26 = vld [vmem:[#allocation131_spill] sm:$0xff]  ;;  %v16105_v24 = vld [vmem:[#allocation8_spill] sm:$0xff]  ;;  %v9453_v41 = vld [vmem:[#allocation2 + $0x128] sm:$0xff] }
 0x628   : > { %v6047_v62 = vsel %vm6027_vm10, %v6014_v48, %v5455_v15  ;;  %9302 = vmatmul.mubr.msk.f32.gmra.mrb[16].mxu1 %vm6168_vm14, %v6144_v7  ;;  %v5839_v30 = vpop.permute.xlu0 %5838  ;;  %v5951_v50 = vsel %vm5928_vm7, %v5918_v33, %v16097_v32  ;;  %v9451_v7 = vld [vmem:[#allocation2 + $0x110] sm:$0xff]  ;;  %v16100_v36 = vld [vmem:[#allocation23_spill] sm:$0xff]  ;;  %v16106_v39 = vld [vmem:[#allocation108_spill] sm:$0xff] }
 0x629   : > { %v6080_v19 = vsel %vm6060_vm11, %v6047_v62, %v16085_v21  ;;  %9304 = vmatprep.mubr.msk.f32.mxu1 %vm6168_vm14, %v6145_v25  ;;  %v5984_v23 = vsel %vm5961_vm8, %v5951_v50, %v16098_v61  ;;  %v5919_v35 = vsel %vm245_vm0, %v9451_v7, %v16100_v36  ;;  %v16101_v15 = vld [vmem:[#allocation30_spill] sm:$0xff]  ;;  %v16103_v21 = vld [vmem:[#allocation140_spill] sm:$0xff]  ;;  %v16104_v43 = vld [vmem:[#allocation107_spill] sm:$0xff]  ;;  %v5921_v47 = vsel %vm245_vm0, %v9453_v41, %v16106_v39 }
 0x62a   : > { %v6113_v0 = vsel %vm6093_vm12, %v6080_v19, %v16087_v1  ;;  %v6017_v12 = vsel %vm5994_vm9, %v5984_v23, %v16099_v26  ;;  %v5952_v28 = vsel %vm5928_vm7, %v5919_v35, %v16101_v15  ;;  %v16102_v62 = vld [vmem:[#allocation130_spill] sm:$0xff]  ;;  %v16108_v20 = vld [vmem:[#allocation120_spill] sm:$0xff]  ;;  %v9454_v50 = vld [vmem:[#allocation2 + $0x138] sm:$0xff] }
 0x62b   : > { %v6146_v55 = vsel %vm6126_vm13, %v6113_v0, %v5839_v30  ;;  %v5459_v10 = vpop.permute.xlu1 %5458  ;;  %v5985_v60 = vsel %vm5961_vm8, %v5952_v28, %v16102_v62  ;;  %v16107_v45 = vld [vmem:[#allocation46_spill] sm:$0xff]  ;;  %v5954_v22 = vsel %vm5928_vm7, %v5921_v47, %v16108_v20  ;;  %v16114_v7 = vld [vmem:[#allocation121_spill] sm:$0xff]  ;;  %v9455_v15 = vld [vmem:[#allocation2 + $0x140] sm:$0xff] }
 0x62c   : > { %9305 = vmatmul.mubr.msk.f32.gmra.mrb[18].mxu1 %vm6168_vm14, %v6146_v55  ;;  %v5585_v44 = vpop.permute.xlu0 %5584  ;;  %v6049_v54 = vsel %vm6027_vm10, %v6016_v53, %v5459_v10  ;;  %v6018_v19 = vsel %vm5994_vm9, %v5985_v60, %v16103_v21  ;;  %v16112_v61 = vld [vmem:[#allocation26_spill] sm:$0xff]  ;;  %v16116_v28 = vld [vmem:[#allocation12_spill] sm:$0xff] }
 0x62d   : > { %v6081_v4 = vsel %vm6060_vm11, %v6048_v16, %v5585_v44  ;;  %v5920_v44 = vsel %vm245_vm0, %v9452_v59, %v16104_v43  ;;  %v5922_v23 = vsel %vm245_vm0, %v9454_v50, %v16112_v61  ;;  %v16113_v26 = vld [vmem:[#allocation74_spill] sm:$0xff] }
 0x62e   : > { %v5953_v37 = vsel %vm5928_vm7, %v5920_v44, %v16105_v24 }
 0x62f   : > { %v5587_v34 = vpop.permute.xlu1 %5586 }
 0x630   : > { %v5713_v46 = vpop.permute.xlu0 %5712  ;;  %v6082_v17 = vsel %vm6060_vm11, %v6049_v54, %v5587_v34 }
 0x631   : > { %v6114_v3 = vsel %vm6093_vm12, %v6081_v4, %v5713_v46  ;;  %v5986_v46 = vsel %vm5961_vm8, %v5953_v37, %v16107_v45  ;;  %v9456_v37 = vld [vmem:[#allocation2 + $0x150] sm:$0xff] }
 0x633   : > { %v5715_v56 = vpop.permute.xlu1 %5714 }
 0x634   : > { %v5841_v6 = vpop.permute.xlu0 %5840  ;;  %v6115_v14 = vsel %vm6093_vm12, %v6082_v17, %v5715_v56  ;;  %v16109_v56 = vld [vmem:[#allocation54_spill] sm:$0xff]  ;;  %v16111_v17 = vld [vmem:[#allocation61_spill] sm:$0xff] }
 0x635   : > { %v6147_v27 = vsel %vm6126_vm13, %v6114_v3, %v5841_v6  ;;  %v6019_v4 = vsel %vm5994_vm9, %v5986_v46, %v16109_v56  ;;  %v16110_v3 = vld [vmem:[#allocation6_spill] sm:$0xff]  ;;  %v9457_v46 = vld [vmem:[#allocation2 + $0x158] sm:$0xff] }
 0x636   : > { %9307 = vmatprep.mubr.msk.f32.mxu1 %vm6168_vm14, %v6147_v27  ;;  %v5987_v6 = vsel %vm5961_vm8, %v5954_v22, %v16110_v3  ;;  %v16122_v22 = vld [vmem:[#allocation44_spill] sm:$0xff] }
 0x637   : > { %v5461_v38 = vpop.permute.xlu1 %5460 }
 0x638   : > { %v5843_v5 = vpop.permute.xlu0 %5842  ;;  %v6050_v18 = vsel %vm6027_vm10, %v6017_v12, %v5461_v38  ;;  %v5955_v12 = vsel %vm5928_vm7, %v5922_v23, %v16113_v26  ;;  %v16127_v26 = vld [vmem:[#allocation25_spill] sm:$0xff] }
 0x639   : > { %v6148_v57 = vsel %vm6126_vm13, %v6115_v14, %v5843_v5  ;;  %v6020_v14 = vsel %vm5994_vm9, %v5987_v6, %v16111_v17  ;;  %v5988_v36 = vsel %vm5961_vm8, %v5955_v12, %v16114_v7 }
 0x63a   : > { %9308 = vmatmul.mubr.msk.f32.gmra.mrb[20].mxu1 %vm6168_vm14, %v6148_v57 }
 0x63b   : > { %v5463_v29 = vpop.permute.xlu1 %5462 }
 0x63c   : > { %v5589_v13 = vpop.permute.xlu0 %5588  ;;  %v6051_v31 = vsel %vm6027_vm10, %v6018_v19, %v5463_v29  ;;  %v16118_v19 = vld [vmem:[#allocation132_spill] sm:$0xff] }
 0x63d   : > { %v6083_v25 = vsel %vm6060_vm11, %v6050_v18, %v5589_v13  ;;  %v16115_v18 = vld [vmem:[#allocation133_spill] sm:$0xff] }
 0x63f   : > { %v5591_v49 = vpop.permute.xlu1 %5590 }
 0x640   : > { %v5717_v51 = vpop.permute.xlu0 %5716  ;;  %v6084_v1 = vsel %vm6060_vm11, %v6051_v31, %v5591_v49 }
 0x641   : > { %v6116_v2 = vsel %vm6093_vm12, %v6083_v25, %v5717_v51  ;;  %v5923_v25 = vsel %vm245_vm0, %v9455_v15, %v16116_v28  ;;  %v16130_v28 = vld [vmem:[#allocation123_spill] sm:$0xff] }
 0x643   : > { %v5719_v48 = vpop.permute.xlu1 %5718 }
 0x644   : > { %v5845_v58 = vpop.permute.xlu0 %5844  ;;  %v6117_v0 = vsel %vm6093_vm12, %v6084_v1, %v5719_v48  ;;  %v6021_v48 = vsel %vm5994_vm9, %v5988_v36, %v16115_v18  ;;  %v16119_v1 = vld [vmem:[#allocation142_spill] sm:$0xff]  ;;  %v16128_v36 = vld [vmem:[#allocation77_spill] sm:$0xff] }
 0x645   : > { %v6149_v30 = vsel %vm6126_vm13, %v6116_v2, %v5845_v58  ;;  %v16117_v2 = vld [vmem:[#allocation5_spill] sm:$0xff]  ;;  %v9459_v18 = vld [vmem:[#allocation2 + $0x170] sm:$0xff] }
 0x646   : > { %9310 = vmatprep.mubr.msk.f32.mxu1 %vm6168_vm14, %v6149_v30  ;;  %v5956_v58 = vsel %vm5928_vm7, %v5923_v25, %v16117_v2 }
 0x647   : > { %v5465_v52 = vpop.permute.xlu1 %5464  ;;  %v5989_v30 = vsel %vm5961_vm8, %v5956_v58, %v16118_v19  ;;  %v16132_v58 = vld [vmem:[#allocation135_spill] sm:$0xff]  ;;  %v16133_v19 = vld [vmem:[#allocation134_spill] sm:$0xff] }
 0x648   : > { %v5847_v55 = vpop.permute.xlu0 %5846  ;;  %v6052_v40 = vsel %vm6027_vm10, %v6019_v4, %v5465_v52  ;;  %v16123_v4 = vld [vmem:[#allocation122_spill] sm:$0xff] }
 0x649   : > { %v6150_v10 = vsel %vm6126_vm13, %v6117_v0, %v5847_v55  ;;  %v6022_v0 = vsel %vm5994_vm9, %v5989_v30, %v16119_v1  ;;  %v16134_v1 = vld [vmem:[#allocation144_spill] sm:$0xff] }
 0x64a   : > { %9311 = vmatmul.mubr.msk.f32.gmra.mrb[22].mxu1 %vm6168_vm14, %v6150_v10 }
 0x64b   : > { %v5467_v11 = vpop.permute.xlu1 %5466 }
 0x64c   : > { %v5593_v34 = vpop.permute.xlu0 %5592  ;;  %v6053_v57 = vsel %vm6027_vm10, %v6020_v14, %v5467_v11 }
 0x64d   : > { %v6085_v27 = vsel %vm6060_vm11, %v6052_v40, %v5593_v34  ;;  %v16120_v34 = vld [vmem:[#allocation109_spill] sm:$0xff]  ;;  %v16124_v40 = vld [vmem:[#allocation31_spill] sm:$0xff] }
 0x64e   : > { %v5924_v41 = vsel %vm245_vm0, %v9456_v37, %v16120_v34 }
 0x64f   : > { %v5595_v42 = vpop.permute.xlu1 %5594  ;;  %v5957_v47 = vsel %vm5928_vm7, %v5924_v41, %v13257_v8 }
 0x650   : > { %v5721_v16 = vpop.permute.xlu0 %5720  ;;  %v6086_v13 = vsel %vm6060_vm11, %v6053_v57, %v5595_v42  ;;  %v16121_v42 = vld [vmem:[#allocation110_spill] sm:$0xff]  ;;  %v16126_v57 = vld [vmem:[#allocation16_spill] sm:$0xff] }
 0x651   : > { %v6118_v54 = vsel %vm6093_vm12, %v6085_v27, %v5721_v16  ;;  %v5925_v20 = vsel %vm245_vm0, %v9457_v46, %v16121_v42  ;;  %v5990_v16 = vsel %vm5961_vm8, %v5957_v47, %v16122_v22  ;;  %v16125_v27 = vld [vmem:[#allocation53_spill] sm:$0xff] }
 0x652   : > { %v5958_v3 = vsel %vm5928_vm7, %v5925_v20, %v16123_v4 }
 0x653   : > { %v5723_v53 = vpop.permute.xlu1 %5722 }
 0x654   : > { %v5849_v38 = vpop.permute.xlu0 %5848  ;;  %v6119_v63 = vsel %vm6093_vm12, %v6086_v13, %v5723_v53  ;;  %v6023_v53 = vsel %vm5994_vm9, %v5990_v16, %v16124_v40 }
 0x655   : > { %v6151_v5 = vsel %vm6126_vm13, %v6118_v54, %v5849_v38  ;;  %v5991_v54 = vsel %vm5961_vm8, %v5958_v3, %v16125_v27 }
 0x656   : > { %9313 = vmatprep.mubr.msk.f32.mxu1 %vm6168_vm14, %v6151_v5 }
 0x657   : > { %v5469_v29 = vpop.permute.xlu1 %5468 }
 0x658   : > { %v5851_v9 = vpop.permute.xlu0 %5850  ;;  %v6054_v62 = vsel %vm6027_vm10, %v6021_v48, %v5469_v29  ;;  %v6024_v29 = vsel %vm5994_vm9, %v5991_v54, %v16126_v57  ;;  %v16129_v48 = vld [vmem:[#allocation40_spill] sm:$0xff] }
 0x659   : > { %v6152_v33 = vsel %vm6126_vm13, %v6119_v63, %v5851_v9  ;;  %v5927_v15 = vsel %vm245_vm0, %v9459_v18, %v16129_v48 }
 0x65a   : > { %9314 = vmatmul.mubr.msk.f32.gmra.mrb[24].mxu1 %vm6168_vm14, %v6152_v33 }
 0x65b   : > { %v5471_v49 = vpop.permute.xlu1 %5470 }
 0x65c   : > { %v5597_v32 = vpop.permute.xlu0 %5596  ;;  %v6055_v10 = vsel %vm6027_vm10, %v6022_v0, %v5471_v49 }
 0x65d   : > { %v6087_v21 = vsel %vm6060_vm11, %v6054_v62, %v5597_v32 }
 0x65f   : > { %v5599_v51 = vpop.permute.xlu1 %5598 }
 0x660   : > { %v5725_v35 = vpop.permute.xlu0 %5724  ;;  %v6088_v43 = vsel %vm6060_vm11, %v6055_v10, %v5599_v51  ;;  %v9458_v51 = vld [vmem:[#allocation2 + $0x168] sm:$0xff] }
 0x661   : > { %v6120_v31 = vsel %vm6093_vm12, %v6087_v21, %v5725_v35  ;;  %v5926_v12 = vsel %vm245_vm0, %v9458_v51, %v16127_v26 }
 0x662   : > { %v5959_v35 = vsel %vm5928_vm7, %v5926_v12, %v16128_v36 }
 0x663   : > { %v5727_v60 = vpop.permute.xlu1 %5726  ;;  %v5992_v25 = vsel %vm5961_vm8, %v5959_v35, %v16130_v28 }
 0x664   : > { %v5853_v52 = vpop.permute.xlu0 %5852  ;;  %v6121_v44 = vsel %vm6093_vm12, %v6088_v43, %v5727_v60  ;;  %v16131_v60 = vld [vmem:[#allocation45_spill] sm:$0xff]  ;;  %v6025_v21 = vsel %vm5994_vm9, %v5992_v25, %v16132_v58 }
 0x665   : > { %v6153_v55 = vsel %vm6126_vm13, %v6120_v31, %v5853_v52  ;;  %v5960_v2 = vsel %vm5928_vm7, %v5927_v15, %v16131_v60 }
 0x666   : > { %9316 = vmatprep.mubr.msk.f32.mxu1 %vm6168_vm14, %v6153_v55  ;;  %v5993_v30 = vsel %vm5961_vm8, %v5960_v2, %v16133_v19 }
 0x667   : > { %v5473_v59 = vpop.permute.xlu1 %5472  ;;  %v6026_v0 = vsel %vm5994_vm9, %v5993_v30, %v16134_v1 }
 0x668   : > { %v5855_v11 = vpop.permute.xlu0 %5854  ;;  %v6056_v8 = vsel %vm6027_vm10, %v6023_v53, %v5473_v59 }
 0x669   : > { %v6154_v24 = vsel %vm6126_vm13, %v6121_v44, %v5855_v11 }
 0x66a   : > { %9317 = vmatmul.mubr.msk.f32.gmra.mrb[26].mxu1 %vm6168_vm14, %v6154_v24 }
 0x66b   : > { %v5475_v39 = vpop.permute.xlu1 %5474 }
 0x66c   : > { %v5601_v45 = vpop.permute.xlu0 %5600  ;;  %v6057_v63 = vsel %vm6027_vm10, %v6024_v29, %v5475_v39 }
 0x66d   : > { %v6089_v17 = vsel %vm6060_vm11, %v6056_v8, %v5601_v45 }
 0x66f   : > { %v5603_v56 = vpop.permute.xlu1 %5602 }
 0x670   : > { %v5729_v6 = vpop.permute.xlu0 %5728  ;;  %v6090_v33 = vsel %vm6060_vm11, %v6057_v63, %v5603_v56 }
 0x671   : > { %v6122_v14 = vsel %vm6093_vm12, %v6089_v17, %v5729_v6 }
 0x673   : > { %v5731_v38 = vpop.permute.xlu1 %5730 }
 0x674   : > { %v5857_v5 = vpop.permute.xlu0 %5856  ;;  %v6123_v49 = vsel %vm6093_vm12, %v6090_v33, %v5731_v38 }
 0x675   : > { %v6155_v13 = vsel %vm6126_vm13, %v6122_v14, %v5857_v5 }
 0x676   : > { %9319 = vmatprep.mubr.msk.f32.mxu1 %vm6168_vm14, %v6155_v13 }
 0x677   : > { %v5477_v9 = vpop.permute.xlu1 %5476 }
 0x678   : > { %v5859_v32 = vpop.permute.xlu0 %5858  ;;  %v6058_v31 = vsel %vm6027_vm10, %v6025_v21, %v5477_v9 }
 0x679   : > { %v6156_v50 = vsel %vm6126_vm13, %v6123_v49, %v5859_v32 }
 0x67a   : > { %9320 = vmatmul.mubr.msk.f32.gmra.mrb[28].mxu1 %vm6168_vm14, %v6156_v50 }
 0x67b   : > { %v5479_v61 = vpop.permute.xlu1 %5478 }
 0x67c   : > { %v5605_v23 = vpop.permute.xlu0 %5604  ;;  %v6059_v10 = vsel %vm6027_vm10, %v6026_v0, %v5479_v61 }
 0x67d   : > { %v6091_v55 = vsel %vm6060_vm11, %v6058_v31, %v5605_v23 }
 0x67f   : > { %v5607_v7 = vpop.permute.xlu1 %5606 }
 0x680   : > { %v5733_v62 = vpop.permute.xlu0 %5732  ;;  %v6092_v44 = vsel %vm6060_vm11, %v6059_v10, %v5607_v7 }
 0x681   : > { %v6124_v59 = vsel %vm6093_vm12, %v6091_v55, %v5733_v62 }
 0x683   : > { %v5735_v52 = vpop.permute.xlu1 %5734 }
 0x684   : > { %v5861_v43 = vpop.permute.xlu0 %5860  ;;  %v6125_v24 = vsel %vm6093_vm12, %v6092_v44, %v5735_v52 }
 0x685   : > { %v6157_v11 = vsel %vm6126_vm13, %v6124_v59, %v5861_v43 }
 0x686   : > { %9322 = vmatprep.mubr.msk.f32.mxu1 %vm6168_vm14, %v6157_v11 }
 0x687   : > { %v5863_v37 = vpop.permute.xlu1 %5862 }
 0x688   : > { %v6158_v34 = vsel %vm6126_vm13, %v6125_v24, %v5863_v37 }
 0x689   : > { %9323 = vmatmul.mubr.msk.f32.gmra.mrb[30].mxu1 %vm6168_vm14, %v6158_v34 }
 0x6da   : > { %v13774_v41 = vpop.f32.mrb[0].mxu1 }
 0x6db   : > { %v6491_v39 = vsel %vm301_vm2, %v13774_v41, 0.0  ;;  %v6561_v47 = vmul.f32 %v13774_v41, %v13774_v41  ;;  %v13780_v45 = vpop.f32.mrb[1].mxu1 }
 0x6dc   : > { %v6490_v46 = vsel %vm301_vm2, %v13780_v45, 0.0  ;;  %v6560_v42 = vmul.f32 %v13780_v45, %v13780_v45 }
 0x6dd   : > { %v6593_v20 = vsel %vm301_vm2, %v6561_v47, 0.0  ;;  %v6492_v22 = vadd.f32 %v6491_v39, %v6490_v46 }
 0x6de   : > { %v6592_v16 = vsel %vm301_vm2, %v6560_v42, 0.0  ;;  %v13788_v56 = vpop.f32.mrb[2].mxu1 }
 0x6df   : > { %v6594_v4 = vadd.f32 %v6593_v20, %v6592_v16  ;;  %v13790_v3 = vpop.f32.mrb[3].mxu1  ;;  %v6563_v6 = vmul.f32 %v13788_v56, %v13788_v56  ;;  %v6495_v54 = vsel %vm301_vm2, %v13788_v56, 0.0 }
 0x6e0   : > { %v6493_v40 = vsel %vm301_vm2, %v13790_v3, 0.0  ;;  %v6562_v53 = vmul.f32 %v13790_v3, %v13790_v3 }
 0x6e1   : > { %v6494_v27 = vadd.f32 %v6493_v40, %v6492_v22  ;;  %v6597_v57 = vsel %vm301_vm2, %v6563_v6, 0.0 }
 0x6e2   : > { %v6595_v8 = vsel %vm301_vm2, %v6562_v53, 0.0  ;;  %v13801_v38 = vpop.f32.mrb[4].mxu1 }
 0x6e3   : > { %v6596_v17 = vadd.f32 %v6595_v8, %v6594_v4  ;;  %v13803_v14 = vpop.f32.mrb[5].mxu1  ;;  %v6496_v5 = vadd.f32 %v6495_v54, %v6494_v27  ;;  %v6565_v29 = vmul.f32 %v13801_v38, %v13801_v38  ;;  %v6499_v49 = vsel %vm301_vm2, %v13801_v38, 0.0 }
 0x6e4   : > { %v6497_v13 = vsel %vm301_vm2, %v13803_v14, 0.0  ;;  %v6564_v63 = vmul.f32 %v13803_v14, %v13803_v14 }
 0x6e5   : > { %v6498_v9 = vadd.f32 %v6497_v13, %v6496_v5  ;;  %v6598_v33 = vadd.f32 %v6597_v57, %v6596_v17  ;;  %v6601_v26 = vsel %vm301_vm2, %v6565_v29, 0.0 }
 0x6e6   : > { %v6599_v32 = vsel %vm301_vm2, %v6564_v63, 0.0 }
 0x6e7   : > { %v13815_v50 = vpop.f32.mrb[6].mxu1  ;;  %v6600_v61 = vadd.f32 %v6599_v32, %v6598_v33  ;;  %v6500_v51 = vadd.f32 %v6499_v49, %v6498_v9 }
 0x6e8   : > { %v13817_v23 = vpop.f32.mrb[7].mxu1  ;;  %v6567_v12 = vmul.f32 %v13815_v50, %v13815_v50  ;;  %v6503_v48 = vsel %vm301_vm2, %v13815_v50, 0.0 }
 0x6e9   : > { %v6501_v7 = vsel %vm301_vm2, %v13817_v23, 0.0  ;;  %v6566_v36 = vmul.f32 %v13817_v23, %v13817_v23  ;;  %v6602_v18 = vadd.f32 %v6601_v26, %v6600_v61 }
 0x6ea   : > { %v6502_v35 = vadd.f32 %v6501_v7, %v6500_v51  ;;  %v6605_v2 = vsel %vm301_vm2, %v6567_v12, 0.0 }
 0x6eb   : > { %v6603_v15 = vsel %vm301_vm2, %v6566_v36, 0.0  ;;  %v13829_v28 = vpop.f32.mrb[8].mxu1 }
 0x6ec   : > { %v6604_v25 = vadd.f32 %v6603_v15, %v6602_v18  ;;  %v13831_v62 = vpop.f32.mrb[9].mxu1  ;;  %v6504_v60 = vadd.f32 %v6503_v48, %v6502_v35  ;;  %v6569_v58 = vmul.f32 %v13829_v28, %v13829_v28  ;;  %v6507_v52 = vsel %vm301_vm2, %v13829_v28, 0.0 }
 0x6ed   : > { %v6505_v21 = vsel %vm301_vm2, %v13831_v62, 0.0  ;;  %v6568_v19 = vmul.f32 %v13831_v62, %v13831_v62 }
 0x6ee   : > { %v6506_v30 = vadd.f32 %v6505_v21, %v6504_v60  ;;  %v6606_v31 = vadd.f32 %v6605_v2, %v6604_v25  ;;  %v6609_v43 = vsel %vm301_vm2, %v6569_v58, 0.0 }
 0x6ef   : > { %v6607_v1 = vsel %vm301_vm2, %v6568_v19, 0.0  ;;  %v13843_v0 = vpop.f32.mrb[10].mxu1 }
 0x6f0   : > { %v6608_v55 = vadd.f32 %v6607_v1, %v6606_v31  ;;  %v13845_v10 = vpop.f32.mrb[11].mxu1  ;;  %v6508_v59 = vadd.f32 %v6507_v52, %v6506_v30  ;;  %v6571_v44 = vmul.f32 %v13843_v0, %v13843_v0  ;;  %v6511_v39 = vsel %vm301_vm2, %v13843_v0, 0.0 }
 0x6f1   : > { %v6509_v11 = vsel %vm301_vm2, %v13845_v10, 0.0  ;;  %v6570_v24 = vmul.f32 %v13845_v10, %v13845_v10 }
 0x6f2   : > { %v6510_v37 = vadd.f32 %v6509_v11, %v6508_v59  ;;  %v6610_v34 = vadd.f32 %v6609_v43, %v6608_v55  ;;  %v6613_v16 = vsel %vm301_vm2, %v6571_v44, 0.0 }
 0x6f3   : > { %v6611_v47 = vsel %vm301_vm2, %v6570_v24, 0.0  ;;  %v13857_v46 = vpop.f32.mrb[12].mxu1 }
 0x6f4   : > { %v6612_v42 = vadd.f32 %v6611_v47, %v6610_v34  ;;  %v13859_v20 = vpop.f32.mrb[13].mxu1  ;;  %v6512_v22 = vadd.f32 %v6511_v39, %v6510_v37  ;;  %v6573_v4 = vmul.f32 %v13857_v46, %v13857_v46  ;;  %v6515_v54 = vsel %vm301_vm2, %v13857_v46, 0.0 }
 0x6f5   : > { %v6513_v6 = vsel %vm301_vm2, %v13859_v20, 0.0  ;;  %v6572_v40 = vmul.f32 %v13859_v20, %v13859_v20 }
 0x6f6   : > { %v6514_v53 = vadd.f32 %v6513_v6, %v6512_v22  ;;  %v6614_v27 = vadd.f32 %v6613_v16, %v6612_v42  ;;  %v6617_v13 = vsel %vm301_vm2, %v6573_v4, 0.0  ;;  %v6827_v42 = vld [vmem:[#allocation3 + $0x1] sm:$0xff]  ;;  %v6828_v22 = vld [vmem:[#allocation3 + $0x9] sm:$0xff] }
 0x6f7   : > { %v6615_v8 = vsel %vm301_vm2, %v6572_v40, 0.0  ;;  %v13871_v17 = vpop.f32.mrb[14].mxu1  ;;  %7116 = vrot.lane.b32.xlu0 %v6827_v42, %s9474_s6  ;;  %7118 = vrot.lane.b32.xlu1 %v6828_v22, %s9474_s6 }
 0x6f8   : > { %v6616_v5 = vadd.f32 %v6615_v8, %v6614_v27  ;;  %v13873_v57 = vpop.f32.mrb[15].mxu1  ;;  %v6516_v29 = vadd.f32 %v6515_v54, %v6514_v53  ;;  %v6575_v63 = vmul.f32 %v13871_v17, %v13871_v17  ;;  %v6519_v61 = vsel %vm301_vm2, %v13871_v17, 0.0  ;;  %v6859_v54 = vld [vmem:[#allocation3 + $0x2] sm:$0xff] }
 0x6f9   : > { %v6517_v9 = vsel %vm301_vm2, %v13873_v57, 0.0  ;;  %v6574_v33 = vmul.f32 %v13873_v57, %v13873_v57 }
 0x6fa   : > { %v6518_v49 = vadd.f32 %v6517_v9, %v6516_v29  ;;  %v6618_v32 = vadd.f32 %v6617_v13, %v6616_v5  ;;  %v6621_v35 = vsel %vm301_vm2, %v6575_v63, 0.0  ;;  %v6860_v63 = vld [vmem:[#allocation3 + $0xa] sm:$0xff] }
 0x6fb   : > { %v6619_v51 = vsel %vm301_vm2, %v6574_v33, 0.0  ;;  %v13885_v26 = vpop.f32.mrb[16].mxu1  ;;  %7244 = vrot.lane.b32.xlu0 %v6859_v54, %s9469_s26  ;;  %7246 = vrot.lane.b32.xlu1 %v6860_v63, %s9469_s26 }
 0x6fc   : > { %v6620_v12 = vadd.f32 %v6619_v51, %v6618_v32  ;;  %v13887_v7 = vpop.f32.mrb[17].mxu1  ;;  %v6520_v36 = vadd.f32 %v6519_v61, %v6518_v49  ;;  %v6577_v18 = vmul.f32 %v13885_v26, %v13885_v26  ;;  %v6523_v2 = vsel %vm301_vm2, %v13885_v26, 0.0 }
 0x6fd   : > { %v6521_v48 = vsel %vm301_vm2, %v13887_v7, 0.0  ;;  %v6576_v15 = vmul.f32 %v13887_v7, %v13887_v7 }
 0x6fe   : > { %v6522_v25 = vadd.f32 %v6521_v48, %v6520_v36  ;;  %v6622_v60 = vadd.f32 %v6621_v35, %v6620_v12  ;;  %v6625_v52 = vsel %vm301_vm2, %v6577_v18, 0.0 }
 0x6ff   : > { %v6623_v58 = vsel %vm301_vm2, %v6576_v15, 0.0  ;;  %v13899_v21 = vpop.f32.mrb[18].mxu1 }
 0x700   : > { %v6624_v19 = vadd.f32 %v6623_v58, %v6622_v60  ;;  %v13901_v30 = vpop.f32.mrb[19].mxu1  ;;  %v6524_v31 = vadd.f32 %v6523_v2, %v6522_v25  ;;  %v6579_v1 = vmul.f32 %v13899_v21, %v13899_v21  ;;  %v6527_v11 = vsel %vm301_vm2, %v13899_v21, 0.0 }
 0x701   : > { %v6525_v55 = vsel %vm301_vm2, %v13901_v30, 0.0  ;;  %v6578_v59 = vmul.f32 %v13901_v30, %v13901_v30 }
 0x702   : > { %v6526_v43 = vadd.f32 %v6525_v55, %v6524_v31  ;;  %v6626_v44 = vadd.f32 %v6625_v52, %v6624_v19  ;;  %v6629_v39 = vsel %vm301_vm2, %v6579_v1, 0.0 }
 0x703   : > { %v6627_v24 = vsel %vm301_vm2, %v6578_v59, 0.0 }
 0x704   : > { %v6628_v37 = vadd.f32 %v6627_v24, %v6626_v44  ;;  %v6528_v34 = vadd.f32 %v6527_v11, %v6526_v43 }
 0x706   : > { %v6630_v47 = vadd.f32 %v6629_v39, %v6628_v37 }
 0x70d   : > { %v13916_v16 = vpop.f32.mrb[20].mxu1 }
 0x70e   : > { %v13918_v4 = vpop.f32.mrb[21].mxu1  ;;  %v6581_v6 = vmul.f32 %v13916_v16, %v13916_v16  ;;  %v6531_v8 = vsel %vm301_vm2, %v13916_v16, 0.0 }
 0x70f   : > { %v6529_v40 = vsel %vm301_vm2, %v13918_v4, 0.0  ;;  %v6580_v53 = vmul.f32 %v13918_v4, %v13918_v4 }
 0x710   : > { %v6530_v27 = vadd.f32 %v6529_v40, %v6528_v34  ;;  %v6633_v9 = vsel %vm301_vm2, %v6581_v6, 0.0 }
 0x711   : > { %v6631_v5 = vsel %vm301_vm2, %v6580_v53, 0.0 }
 0x712   : > { %v6632_v29 = vadd.f32 %v6631_v5, %v6630_v47  ;;  %v6532_v13 = vadd.f32 %v6531_v8, %v6530_v27 }
 0x714   : > { %v6634_v33 = vadd.f32 %v6633_v9, %v6632_v29 }
 0x71d   : > { %v13932_v49 = vpop.f32.mrb[22].mxu1 }
 0x71e   : > { %v13934_v32 = vpop.f32.mrb[23].mxu1  ;;  %v6583_v61 = vmul.f32 %v13932_v49, %v13932_v49  ;;  %v6535_v35 = vsel %vm301_vm2, %v13932_v49, 0.0 }
 0x71f   : > { %v6533_v51 = vsel %vm301_vm2, %v13934_v32, 0.0  ;;  %v6582_v12 = vmul.f32 %v13934_v32, %v13934_v32 }
 0x720   : > { %v6534_v36 = vadd.f32 %v6533_v51, %v6532_v13  ;;  %v6637_v25 = vsel %vm301_vm2, %v6583_v61, 0.0 }
 0x721   : > { %v6635_v18 = vsel %vm301_vm2, %v6582_v12, 0.0 }
 0x722   : > { %v6636_v48 = vadd.f32 %v6635_v18, %v6634_v33  ;;  %v6536_v15 = vadd.f32 %v6535_v35, %v6534_v36 }
 0x724   : > { %v6638_v60 = vadd.f32 %v6637_v25, %v6636_v48 }
 0x72d   : > { %v13946_v2 = vpop.f32.mrb[24].mxu1 }
 0x72e   : > { %v13948_v58 = vpop.f32.mrb[25].mxu1  ;;  %v6585_v19 = vmul.f32 %v13946_v2, %v13946_v2  ;;  %v6539_v55 = vsel %vm301_vm2, %v13946_v2, 0.0 }
 0x72f   : > { %v6537_v31 = vsel %vm301_vm2, %v13948_v58, 0.0  ;;  %v6584_v52 = vmul.f32 %v13948_v58, %v13948_v58 }
 0x730   : > { %v6538_v1 = vadd.f32 %v6537_v31, %v6536_v15  ;;  %v6641_v11 = vsel %vm301_vm2, %v6585_v19, 0.0 }
 0x731   : > { %v6639_v59 = vsel %vm301_vm2, %v6584_v52, 0.0 }
 0x732   : > { %v6640_v43 = vadd.f32 %v6639_v59, %v6638_v60  ;;  %v6540_v44 = vadd.f32 %v6539_v55, %v6538_v1 }
 0x734   : > { %v6642_v24 = vadd.f32 %v6641_v11, %v6640_v43 }
 0x73d   : > { %v13960_v37 = vpop.f32.mrb[26].mxu1 }
 0x73e   : > { %v13962_v34 = vpop.f32.mrb[27].mxu1  ;;  %v6587_v39 = vmul.f32 %v13960_v37, %v13960_v37  ;;  %v6543_v6 = vsel %vm301_vm2, %v13960_v37, 0.0 }
 0x73f   : > { %v6541_v47 = vsel %vm301_vm2, %v13962_v34, 0.0  ;;  %v6586_v42 = vmul.f32 %v13962_v34, %v13962_v34 }
 0x740   : > { %v6542_v22 = vadd.f32 %v6541_v47, %v6540_v44  ;;  %v6645_v54 = vsel %vm301_vm2, %v6587_v39, 0.0 }
 0x741   : > { %v6643_v40 = vsel %vm301_vm2, %v6586_v42, 0.0 }
 0x742   : > { %v6644_v53 = vadd.f32 %v6643_v40, %v6642_v24  ;;  %v6544_v27 = vadd.f32 %v6543_v6, %v6542_v22 }
 0x744   : > { %v6646_v8 = vadd.f32 %v6645_v54, %v6644_v53 }
 0x74d   : > { %v13974_v5 = vpop.f32.mrb[28].mxu1 }
 0x74e   : > { %v13976_v29 = vpop.f32.mrb[29].mxu1  ;;  %v6589_v13 = vmul.f32 %v13974_v5, %v13974_v5  ;;  %v6547_v61 = vsel %vm301_vm2, %v13974_v5, 0.0 }
 0x74f   : > { %v6545_v63 = vsel %vm301_vm2, %v13976_v29, 0.0  ;;  %v6588_v9 = vmul.f32 %v13976_v29, %v13976_v29 }
 0x750   : > { %v6546_v33 = vadd.f32 %v6545_v63, %v6544_v27  ;;  %v6649_v35 = vsel %vm301_vm2, %v6589_v13, 0.0 }
 0x751   : > { %v6647_v51 = vsel %vm301_vm2, %v6588_v9, 0.0 }
 0x752   : > { %v6648_v12 = vadd.f32 %v6647_v51, %v6646_v8  ;;  %v6548_v36 = vadd.f32 %v6547_v61, %v6546_v33 }
 0x754   : > { %v6650_v18 = vadd.f32 %v6649_v35, %v6648_v12 }
 0x75c   : > { %v13988_v48 = vpop.f32.mrb[30].mxu1 }
 0x75d   : > { %v13990_v15 = vpop.f32.mrb[31].mxu1  ;;  %v6591_v25 = vmul.f32 %v13988_v48, %v13988_v48  ;;  %v6551_v52 = vsel %vm301_vm2, %v13988_v48, 0.0 }
 0x75e   : > { %v6549_v60 = vsel %vm301_vm2, %v13990_v15, 0.0  ;;  %v6590_v19 = vmul.f32 %v13990_v15, %v13990_v15 }
 0x75f   : > { %v6550_v31 = vadd.f32 %v6549_v60, %v6548_v36  ;;  %v6653_v43 = vsel %vm301_vm2, %v6591_v25, 0.0 }
 0x760   : > { %v6651_v1 = vsel %vm301_vm2, %v6590_v19, 0.0 }
 0x761   : > { %v6552_v55 = vadd.f32 %v6551_v52, %v6550_v31  ;;  %v6652_v59 = vadd.f32 %v6651_v1, %v6650_v18 }
 0x763   : > { %v6553_v44 = vrot.slane %v6552_v55, 4  ;;  %v6654_v11 = vadd.f32 %v6653_v43, %v6652_v59 }
 0x765   : > { %v6554_v24 = vadd.f32 %v6553_v44, %v6552_v55  ;;  %v6655_v39 = vrot.slane %v6654_v11, 4 }
 0x767   : > { %v6555_v47 = vrot.slane %v6554_v24, 2  ;;  %v6656_v42 = vadd.f32 %v6655_v39, %v6654_v11 }
 0x769   : > { %v6556_v22 = vadd.f32 %v6555_v47, %v6554_v24  ;;  %v6657_v6 = vrot.slane %v6656_v42, 2 }
 0x76b   : > { %v6557_v40 = vrot.slane %v6556_v22, 1  ;;  %v6658_v53 = vadd.f32 %v6657_v6, %v6656_v42 }
 0x76d   : > { %v6558_v27 = vadd.f32 %v6557_v40, %v6556_v22  ;;  %v6659_v54 = vrot.slane %v6658_v53, 1 }
 0x76f   : > { %v14002_v8 = vmul.f32 0.00390625, %v6558_v27  ;;  %v6660_v13 = vadd.f32 %v6659_v54, %v6658_v53 }
 0x771   : > { %v6661_v63 = vmul.f32 0.00390625, %v6660_v13  ;;  %v6662_v9 = vmul.f32 %v14002_v8, %v14002_v8  ;;  %v6694_v33 = vsub.f32 %v13990_v15, %v14002_v8  ;;  %v6664_v61 = vsub.f32 %v13780_v45, %v14002_v8 }
 0x772   : > { %v6665_v51 = vsub.f32 %v13774_v41, %v14002_v8  ;;  %v6666_v12 = vsub.f32 %v13790_v3, %v14002_v8  ;;  %v6667_v36 = vsub.f32 %v13788_v56, %v14002_v8  ;;  %v6668_v35 = vsub.f32 %v13803_v14, %v14002_v8 }
 0x773   : > { %v6663_v18 = vsub.f32 %v6661_v63, %v6662_v9  ;;  %v6669_v25 = vsub.f32 %v13801_v38, %v14002_v8  ;;  %v6670_v15 = vsub.f32 %v13817_v23, %v14002_v8  ;;  %v6671_v45 = vsub.f32 %v13815_v50, %v14002_v8 }
 0x774   : > { %v6672_v41 = vsub.f32 %v13831_v62, %v14002_v8  ;;  %v6673_v3 = vsub.f32 %v13829_v28, %v14002_v8  ;;  %v6674_v56 = vsub.f32 %v13845_v10, %v14002_v8  ;;  %v6675_v14 = vsub.f32 %v13843_v0, %v14002_v8 }
 0x775   : > { %v6696_v60 = vadd.f32 1e-05, %v6663_v18  ;;  %v6676_v38 = vsub.f32 %v13859_v20, %v14002_v8  ;;  %v6677_v23 = vsub.f32 %v13857_v46, %v14002_v8  ;;  %v6678_v50 = vsub.f32 %v13873_v57, %v14002_v8 }
 0x776   : > { %v6679_v62 = vsub.f32 %v13871_v17, %v14002_v8  ;;  %v6680_v28 = vsub.f32 %v13887_v7, %v14002_v8  ;;  %v6681_v10 = vsub.f32 %v13885_v26, %v14002_v8  ;;  %v6682_v0 = vsub.f32 %v13901_v30, %v14002_v8 }
 0x777   : > { %9435 = vrsqrt.f32 %v6696_v60  ;;  %v6683_v20 = vsub.f32 %v13899_v21, %v14002_v8  ;;  %v6684_v46 = vsub.f32 %v13918_v4, %v14002_v8  ;;  %v6685_v57 = vsub.f32 %v13916_v16, %v14002_v8 }
 0x778   : > { %v6686_v17 = vsub.f32 %v13934_v32, %v14002_v8  ;;  %v6687_v7 = vsub.f32 %v13932_v49, %v14002_v8  ;;  %v6688_v26 = vsub.f32 %v13948_v58, %v14002_v8  ;;  %v6689_v30 = vsub.f32 %v13946_v2, %v14002_v8 }
 0x779   : > { %v6690_v21 = vsub.f32 %v13962_v34, %v14002_v8  ;;  %v6691_v4 = vsub.f32 %v13960_v37, %v14002_v8  ;;  %v6692_v16 = vsub.f32 %v13976_v29, %v14002_v8  ;;  %v6693_v32 = vsub.f32 %v13974_v5, %v14002_v8 }
 0x77a   : > { %v6695_v49 = vsub.f32 %v13988_v48, %v14002_v8 }
 0x781   : > { %v9436_v19 = vpop.eup %9435 }
 0x782   : > { %v6728_v58 = vmul.f32 %v9436_v19, %v6694_v33  ;;  %v6698_v31 = vmul.f32 %v9436_v19, %v6664_v61  ;;  %v6699_v52 = vmul.f32 %v9436_v19, %v6665_v51  ;;  %v6700_v2 = vmul.f32 %v9436_v19, %v6666_v12 }
 0x783   : > { %v6701_v1 = vmul.f32 %v9436_v19, %v6667_v36  ;;  %v6702_v55 = vmul.f32 %v9436_v19, %v6668_v35  ;;  %v6703_v34 = vmul.f32 %v9436_v19, %v6669_v25  ;;  %v6704_v59 = vmul.f32 %v9436_v19, %v6670_v15 }
 0x784   : > { %v6760_v43 = vmax.f32 %v6728_v58, 0.0  ;;  %v6705_v37 = vmul.f32 %v9436_v19, %v6671_v45  ;;  %v6706_v44 = vmul.f32 %v9436_v19, %v6672_v41  ;;  %v6707_v11 = vmul.f32 %v9436_v19, %v6673_v3 }
 0x785   : > { %v6708_v29 = vmul.f32 %v9436_v19, %v6674_v56  ;;  %v6709_v24 = vmul.f32 %v9436_v19, %v6675_v14  ;;  %v6710_v39 = vmul.f32 %v9436_v19, %v6676_v38  ;;  %v6711_v5 = vmul.f32 %v9436_v19, %v6677_v23 }
 0x786   : > { %6793 = vst.msk [vmem:[#allocation3 + $0x181] sm:$0xff] %vm301_vm2, %v6760_v43  ;;  %v6712_v48 = vmul.f32 %v9436_v19, %v6678_v50  ;;  %v6713_v47 = vmul.f32 %v9436_v19, %v6679_v62  ;;  %v6714_v42 = vmul.f32 %v9436_v19, %v6680_v28  ;;  %v6715_v22 = vmul.f32 %v9436_v19, %v6681_v10 }
 0x787   : > { %v6716_v6 = vmul.f32 %v9436_v19, %v6682_v0  ;;  %v14071_v40 = vmul.f32 %v9436_v19, %v6683_v20  ;;  %v14073_v53 = vmul.f32 %v9436_v19, %v6684_v46  ;;  %v14075_v27 = vmul.f32 %v9436_v19, %v6685_v57 }
 0x788   : > { %v14077_v54 = vmul.f32 %v9436_v19, %v6686_v17  ;;  %v14079_v8 = vmul.f32 %v9436_v19, %v6687_v7  ;;  %v14081_v13 = vmul.f32 %v9436_v19, %v6688_v26  ;;  %v14083_v63 = vmul.f32 %v9436_v19, %v6689_v30 }
 0x789   : > { %v14085_v9 = vmul.f32 %v9436_v19, %v6690_v21  ;;  %v14087_v33 = vmul.f32 %v9436_v19, %v6691_v4  ;;  %v14089_v61 = vmul.f32 %v9436_v19, %v6692_v16  ;;  %v14091_v51 = vmul.f32 %v9436_v19, %v6693_v32 }
 0x78a   : > { %v14093_v12 = vmul.f32 %v9436_v19, %v6695_v49  ;;  %v6730_v36 = vmax.f32 %v6698_v31, 0.0  ;;  %v6731_v35 = vmax.f32 %v6699_v52, 0.0  ;;  %v6732_v18 = vmax.f32 %v6700_v2, 0.0 }
 0x78b   : > { %v6733_v25 = vmax.f32 %v6701_v1, 0.0  ;;  %v6734_v15 = vmax.f32 %v6702_v55, 0.0  ;;  %v6735_v45 = vmax.f32 %v6703_v34, 0.0  ;;  %v6736_v41 = vmax.f32 %v6704_v59, 0.0 }
 0x78c   : > { %v6737_v3 = vmax.f32 %v6705_v37, 0.0  ;;  %v6738_v56 = vmax.f32 %v6706_v44, 0.0  ;;  %v6739_v14 = vmax.f32 %v6707_v11, 0.0  ;;  %v6740_v60 = vmax.f32 %v6708_v29, 0.0  ;;  %6763 = vst.msk [vmem:[#allocation3 + $0x19] sm:$0xff] %vm301_vm2, %v6730_v36  ;;  %6764 = vst.msk [vmem:[#allocation3 + $0x21] sm:$0xff] %vm301_vm2, %v6731_v35 }
 0x78d   : > { %6765 = vst.msk [vmem:[#allocation3 + $0x31] sm:$0xff] %vm301_vm2, %v6732_v18  ;;  %v6741_v38 = vmax.f32 %v6709_v24, 0.0  ;;  %v6742_v23 = vmax.f32 %v6710_v39, 0.0  ;;  %v6743_v50 = vmax.f32 %v6711_v5, 0.0  ;;  %v6744_v62 = vmax.f32 %v6712_v48, 0.0  ;;  %6766 = vst.msk [vmem:[#allocation3 + $0x39] sm:$0xff] %vm301_vm2, %v6733_v25 }
 0x78e   : > { %6767 = vst.msk [vmem:[#allocation3 + $0x49] sm:$0xff] %vm301_vm2, %v6734_v15  ;;  %6768 = vst.msk [vmem:[#allocation3 + $0x51] sm:$0xff] %vm301_vm2, %v6735_v45  ;;  %v6745_v28 = vmax.f32 %v6713_v47, 0.0  ;;  %v6746_v10 = vmax.f32 %v6714_v42, 0.0  ;;  %v6747_v0 = vmax.f32 %v6715_v22, 0.0  ;;  %v6748_v20 = vmax.f32 %v6716_v6, 0.0 }
 0x78f   : > { %6769 = vst.msk [vmem:[#allocation3 + $0x61] sm:$0xff] %vm301_vm2, %v6736_v41  ;;  %6770 = vst.msk [vmem:[#allocation3 + $0x69] sm:$0xff] %vm301_vm2, %v6737_v3  ;;  %v6749_v46 = vmax.f32 %v14071_v40, 0.0  ;;  %v6750_v57 = vmax.f32 %v14073_v53, 0.0  ;;  %v6751_v17 = vmax.f32 %v14075_v27, 0.0  ;;  %v6752_v7 = vmax.f32 %v14077_v54, 0.0 }
 0x790   : > { %6771 = vst.msk [vmem:[#allocation3 + $0x79] sm:$0xff] %vm301_vm2, %v6738_v56  ;;  %6772 = vst.msk [vmem:[#allocation3 + $0x81] sm:$0xff] %vm301_vm2, %v6739_v14  ;;  %v6753_v26 = vmax.f32 %v14079_v8, 0.0  ;;  %v6754_v30 = vmax.f32 %v14081_v13, 0.0  ;;  %v6755_v21 = vmax.f32 %v14083_v63, 0.0  ;;  %v6756_v4 = vmax.f32 %v14085_v9, 0.0 }
 0x791   : > { %6773 = vst.msk [vmem:[#allocation3 + $0x91] sm:$0xff] %vm301_vm2, %v6740_v60  ;;  %6774 = vst.msk [vmem:[#allocation3 + $0x99] sm:$0xff] %vm301_vm2, %v6741_v38  ;;  %v6757_v16 = vmax.f32 %v14087_v33, 0.0  ;;  %v6758_v32 = vmax.f32 %v14089_v61, 0.0  ;;  %v6759_v49 = vmax.f32 %v14091_v51, 0.0  ;;  %v6761_v19 = vmax.f32 %v14093_v12, 0.0 }
 0x792   : > { %6775 = vst.msk [vmem:[#allocation3 + $0xa9] sm:$0xff] %vm301_vm2, %v6742_v23  ;;  %6776 = vst.msk [vmem:[#allocation3 + $0xb1] sm:$0xff] %vm301_vm2, %v6743_v50 }
 0x793   : > { %6777 = vst.msk [vmem:[#allocation3 + $0xc1] sm:$0xff] %vm301_vm2, %v6744_v62  ;;  %6778 = vst.msk [vmem:[#allocation3 + $0xc9] sm:$0xff] %vm301_vm2, %v6745_v28  ;;  %v14138_v58 = vld [vmem:[#allocation3 + $0x21] sm:$0xff]  ;;  %v14140_v31 = vld [vmem:[#allocation3 + $0x19] sm:$0xff] }
 0x794   : > { %6779 = vst.msk [vmem:[#allocation3 + $0xd9] sm:$0xff] %vm301_vm2, %v6746_v10  ;;  %6780 = vst.msk [vmem:[#allocation3 + $0xe1] sm:$0xff] %vm301_vm2, %v6747_v0  ;;  %7122 = vrot.lane.b32.xlu1 %v14138_v58, %s9474_s6  ;;  %7120 = vrot.lane.b32.xlu0 %v14140_v31, %s9474_s6  ;;  %v14146_v52 = vld [vmem:[#allocation3 + $0x39] sm:$0xff]  ;;  %v14148_v2 = vld [vmem:[#allocation3 + $0x31] sm:$0xff] }
 0x795   : > { %6781 = vst.msk [vmem:[#allocation3 + $0xf1] sm:$0xff] %vm301_vm2, %v6748_v20  ;;  %6782 = vst.msk [vmem:[#allocation3 + $0xf9] sm:$0xff] %vm301_vm2, %v6749_v46  ;;  %v14154_v1 = vld [vmem:[#allocation3 + $0x51] sm:$0xff]  ;;  %v14156_v55 = vld [vmem:[#allocation3 + $0x49] sm:$0xff] }
 0x796   : > { %6783 = vst.msk [vmem:[#allocation3 + $0x109] sm:$0xff] %vm301_vm2, %v6750_v57  ;;  %6784 = vst.msk [vmem:[#allocation3 + $0x111] sm:$0xff] %vm301_vm2, %v6751_v17  ;;  %v14162_v34 = vld [vmem:[#allocation3 + $0x69] sm:$0xff]  ;;  %v14164_v59 = vld [vmem:[#allocation3 + $0x61] sm:$0xff]  ;;  %v14292_v17 = vpop.permute.xlu0 %7116 }
 0x797   : > { %6785 = vst.msk [vmem:[#allocation3 + $0x121] sm:$0xff] %vm301_vm2, %v6752_v7  ;;  %6786 = vst.msk [vmem:[#allocation3 + $0x129] sm:$0xff] %vm301_vm2, %v6753_v26  ;;  %v14170_v43 = vld [vmem:[#allocation3 + $0x81] sm:$0xff]  ;;  %v14172_v37 = vld [vmem:[#allocation3 + $0x79] sm:$0xff]  ;;  %v14296_v7 = vpop.permute.xlu1 %7118 }
 0x798   : > { %6787 = vst.msk [vmem:[#allocation3 + $0x139] sm:$0xff] %vm301_vm2, %v6754_v30  ;;  %6788 = vst.msk [vmem:[#allocation3 + $0x141] sm:$0xff] %vm301_vm2, %v6755_v21  ;;  %7126 = vrot.lane.b32.xlu1 %v14146_v52, %s9474_s6  ;;  %7124 = vrot.lane.b32.xlu0 %v14148_v2, %s9474_s6  ;;  %v14178_v44 = vld [vmem:[#allocation3 + $0x99] sm:$0xff]  ;;  %v14180_v11 = vld [vmem:[#allocation3 + $0x91] sm:$0xff] }
 0x799   : > { %6789 = vst.msk [vmem:[#allocation3 + $0x151] sm:$0xff] %vm301_vm2, %v6756_v4  ;;  %6790 = vst.msk [vmem:[#allocation3 + $0x159] sm:$0xff] %vm301_vm2, %v6757_v16  ;;  %v14186_v29 = vld [vmem:[#allocation3 + $0xb1] sm:$0xff]  ;;  %v14188_v24 = vld [vmem:[#allocation3 + $0xa9] sm:$0xff] }
 0x79a   : > { %6791 = vst.msk [vmem:[#allocation3 + $0x169] sm:$0xff] %vm301_vm2, %v6758_v32  ;;  %6792 = vst.msk [vmem:[#allocation3 + $0x171] sm:$0xff] %vm301_vm2, %v6759_v49  ;;  %v14194_v39 = vld [vmem:[#allocation3 + $0xc9] sm:$0xff]  ;;  %v14196_v5 = vld [vmem:[#allocation3 + $0xc1] sm:$0xff]  ;;  %v14300_v21 = vpop.permute.xlu0 %7244 }
 0x79b   : > { %6794 = vst.msk [vmem:[#allocation3 + $0x189] sm:$0xff] %vm301_vm2, %v6761_v19  ;;  %v6846_v48 = vld [vmem:[#allocation3 + $0xe1] sm:$0xff]  ;;  %v6845_v47 = vld [vmem:[#allocation3 + $0xd9] sm:$0xff]  ;;  %v14234_v18 = vld [vmem:[#allocation3 + $0x4a] sm:$0xff]  ;;  %v14302_v4 = vpop.permute.xlu1 %7246 }
 0x79c   : > { %7130 = vrot.lane.b32.xlu1 %v14154_v1, %s9474_s6  ;;  %7128 = vrot.lane.b32.xlu0 %v14156_v55, %s9474_s6  ;;  %v6848_v42 = vld [vmem:[#allocation3 + $0xf9] sm:$0xff]  ;;  %v6847_v22 = vld [vmem:[#allocation3 + $0xf1] sm:$0xff]  ;;  %v14216_v61 = vld [vmem:[#allocation3 + $0x22] sm:$0xff] }
 0x79d   : > { %v6850_v6 = vld [vmem:[#allocation3 + $0x111] sm:$0xff]  ;;  %v6849_v40 = vld [vmem:[#allocation3 + $0x109] sm:$0xff]  ;;  %v14218_v51 = vld [vmem:[#allocation3 + $0x1a] sm:$0xff] }
 0x79e   : > { %v6852_v53 = vld [vmem:[#allocation3 + $0x129] sm:$0xff]  ;;  %v6851_v27 = vld [vmem:[#allocation3 + $0x121] sm:$0xff]  ;;  %v14226_v36 = vld [vmem:[#allocation3 + $0x32] sm:$0xff] }
 0x79f   : > { %v6854_v54 = vld [vmem:[#allocation3 + $0x141] sm:$0xff]  ;;  %v6853_v8 = vld [vmem:[#allocation3 + $0x139] sm:$0xff]  ;;  %v14240_v25 = vld [vmem:[#allocation3 + $0x6a] sm:$0xff] }
 0x7a0   : > { %7134 = vrot.lane.b32.xlu1 %v14162_v34, %s9474_s6  ;;  %7132 = vrot.lane.b32.xlu0 %v14164_v59, %s9474_s6  ;;  %v6856_v13 = vld [vmem:[#allocation3 + $0x159] sm:$0xff]  ;;  %v6855_v63 = vld [vmem:[#allocation3 + $0x151] sm:$0xff]  ;;  %v14242_v15 = vld [vmem:[#allocation3 + $0x62] sm:$0xff] }
 0x7a1   : > { %v6858_v9 = vld [vmem:[#allocation3 + $0x171] sm:$0xff]  ;;  %v6857_v33 = vld [vmem:[#allocation3 + $0x169] sm:$0xff]  ;;  %v14224_v12 = vld [vmem:[#allocation3 + $0x3a] sm:$0xff] }
 0x7a2   : > { %v14232_v35 = vld [vmem:[#allocation3 + $0x52] sm:$0xff]  ;;  %v14248_v45 = vld [vmem:[#allocation3 + $0x82] sm:$0xff]  ;;  %v14250_v41 = vld [vmem:[#allocation3 + $0x7a] sm:$0xff] }
 0x7a3   : > { %v14256_v3 = vld [vmem:[#allocation3 + $0x9a] sm:$0xff]  ;;  %v14258_v56 = vld [vmem:[#allocation3 + $0x92] sm:$0xff]  ;;  %v14266_v60 = vld [vmem:[#allocation3 + $0xaa] sm:$0xff] }
 0x7a4   : > { %7138 = vrot.lane.b32.xlu1 %v14170_v43, %s9474_s6  ;;  %7136 = vrot.lane.b32.xlu0 %v14172_v37, %s9474_s6  ;;  %v14264_v14 = vld [vmem:[#allocation3 + $0xb2] sm:$0xff]  ;;  %v14272_v38 = vld [vmem:[#allocation3 + $0xca] sm:$0xff]  ;;  %v14274_v23 = vld [vmem:[#allocation3 + $0xc2] sm:$0xff] }
 0x7a5   : > { %v14280_v50 = vld [vmem:[#allocation3 + $0xe2] sm:$0xff]  ;;  %v14282_v62 = vld [vmem:[#allocation3 + $0xda] sm:$0xff]  ;;  %v6879_v10 = vld [vmem:[#allocation3 + $0xf2] sm:$0xff] }
 0x7a6   : > { %v6880_v28 = vld [vmem:[#allocation3 + $0xfa] sm:$0xff]  ;;  %v6882_v0 = vld [vmem:[#allocation3 + $0x112] sm:$0xff]  ;;  %v6881_v20 = vld [vmem:[#allocation3 + $0x10a] sm:$0xff] }
 0x7a7   : > { %v6884_v46 = vld [vmem:[#allocation3 + $0x12a] sm:$0xff]  ;;  %v6883_v57 = vld [vmem:[#allocation3 + $0x122] sm:$0xff]  ;;  %v6885_v30 = vld [vmem:[#allocation3 + $0x13a] sm:$0xff] }
 0x7a8   : > { %7142 = vrot.lane.b32.xlu1 %v14178_v44, %s9474_s6  ;;  %7140 = vrot.lane.b32.xlu0 %v14180_v11, %s9474_s6  ;;  %v6886_v26 = vld [vmem:[#allocation3 + $0x142] sm:$0xff]  ;;  %v6888_v16 = vld [vmem:[#allocation3 + $0x15a] sm:$0xff]  ;;  %v6887_v32 = vld [vmem:[#allocation3 + $0x152] sm:$0xff] }
 0x7ac   : > { %7146 = vrot.lane.b32.xlu1 %v14186_v29, %s9474_s6  ;;  %7144 = vrot.lane.b32.xlu0 %v14188_v24, %s9474_s6 }
 0x7b0   : > { %7150 = vrot.lane.b32.xlu1 %v14194_v39, %s9474_s6  ;;  %7148 = vrot.lane.b32.xlu0 %v14196_v5, %s9474_s6 }
 0x7b4   : > { %7154 = vrot.lane.b32.xlu1 %v6846_v48, %s9474_s6  ;;  %7152 = vrot.lane.b32.xlu0 %v6845_v47, %s9474_s6  ;;  %v6890_v48 = vld [vmem:[#allocation3 + $0x172] sm:$0xff]  ;;  %v6889_v47 = vld [vmem:[#allocation3 + $0x16a] sm:$0xff] }
 0x7b8   : > { %7158 = vrot.lane.b32.xlu1 %v6848_v42, %s9474_s6  ;;  %7156 = vrot.lane.b32.xlu0 %v6847_v22, %s9474_s6 }
 0x7bc   : > { %7162 = vrot.lane.b32.xlu1 %v6850_v6, %s9474_s6  ;;  %7160 = vrot.lane.b32.xlu0 %v6849_v40, %s9474_s6  ;;  %v14316_v6 = vld [vmem:[#allocation3 + $0x18] sm:$0xff]  ;;  %v14318_v40 = vld [vmem:[#allocation3 + $0x20] sm:$0xff] }
 0x7c0   : > { %7166 = vrot.lane.b32.xlu1 %v6852_v53, %s9474_s6  ;;  %7164 = vrot.lane.b32.xlu0 %v6851_v27, %s9474_s6 }
 0x7c4   : > { %7170 = vrot.lane.b32.xlu1 %v6854_v54, %s9474_s6  ;;  %7168 = vrot.lane.b32.xlu0 %v6853_v8, %s9474_s6  ;;  %v14328_v54 = vld [vmem:[#allocation3 + $0x30] sm:$0xff]  ;;  %v14330_v8 = vld [vmem:[#allocation3 + $0x38] sm:$0xff] }
 0x7c8   : > { %7174 = vrot.lane.b32.xlu1 %v6856_v13, %s9474_s6  ;;  %7172 = vrot.lane.b32.xlu0 %v6855_v63, %s9474_s6 }
 0x7cc   : > { %7178 = vrot.lane.b32.xlu1 %v6858_v9, %s9474_s6  ;;  %7176 = vrot.lane.b32.xlu0 %v6857_v33, %s9474_s6  ;;  %v8367_v9 = vld [vmem:[%s15629_s4] sm:$0xff]  ;;  %v8368_v33 = vld [vmem:[%s15629_s4 + $0x8] sm:$0xff] }
 0x7d0   : > { %7250 = vrot.lane.b32.xlu1 %v14216_v61, %s9469_s26  ;;  %7248 = vrot.lane.b32.xlu0 %v14218_v51, %s9469_s26 }
 0x7d4   : > { %7254 = vrot.lane.b32.xlu1 %v14224_v12, %s9469_s26  ;;  %7252 = vrot.lane.b32.xlu0 %v14226_v36, %s9469_s26 }
 0x7d8   : > { %7258 = vrot.lane.b32.xlu1 %v14232_v35, %s9469_s26  ;;  %7256 = vrot.lane.b32.xlu0 %v14234_v18, %s9469_s26 }
 0x7dc   : > { %7262 = vrot.lane.b32.xlu1 %v14240_v25, %s9469_s26  ;;  %7260 = vrot.lane.b32.xlu0 %v14242_v15, %s9469_s26 }
 0x7e0   : > { %7266 = vrot.lane.b32.xlu1 %v14248_v45, %s9469_s26  ;;  %7264 = vrot.lane.b32.xlu0 %v14250_v41, %s9469_s26 }
 0x7e4   : > { %7270 = vrot.lane.b32.xlu1 %v14256_v3, %s9469_s26  ;;  %7268 = vrot.lane.b32.xlu0 %v14258_v56, %s9469_s26 }
 0x7e8   : > { %7274 = vrot.lane.b32.xlu1 %v14264_v14, %s9469_s26  ;;  %7272 = vrot.lane.b32.xlu0 %v14266_v60, %s9469_s26 }
 0x7ec   : > { %7278 = vrot.lane.b32.xlu1 %v14272_v38, %s9469_s26  ;;  %7276 = vrot.lane.b32.xlu0 %v14274_v23, %s9469_s26 }
 0x7f0   : > { %7282 = vrot.lane.b32.xlu1 %v14280_v50, %s9469_s26  ;;  %7280 = vrot.lane.b32.xlu0 %v14282_v62, %s9469_s26 }
 0x7f4   : > { %7286 = vrot.lane.b32.xlu1 %v6880_v28, %s9469_s26  ;;  %7284 = vrot.lane.b32.xlu0 %v6879_v10, %s9469_s26  ;;  %v9399_v28 = vpack.c.bf16 %v8368_v33, %v8367_v9 }
 0x7f6   : > { %9400 = vmatprep.subr.bf16.mxu0 %v9399_v28 }
 0x7f7   : > { %9402 = vmatpush3.bf16.msra.mxu0 %v9399_v28  ;;  %v14411_v28 = vld [vmem:[#allocation3 + $0x48] sm:$0xff] }
 0x7f8   : > { %7290 = vrot.lane.b32.xlu1 %v6882_v0, %s9469_s26  ;;  %7288 = vrot.lane.b32.xlu0 %v6881_v20, %s9469_s26 }
 0x7fc   : > { %7294 = vrot.lane.b32.xlu1 %v6884_v46, %s9469_s26  ;;  %7292 = vrot.lane.b32.xlu0 %v6883_v57, %s9469_s26 }
 0x800   : > { %7298 = vrot.lane.b32.xlu1 %v6886_v26, %s9469_s26  ;;  %7296 = vrot.lane.b32.xlu0 %v6885_v30, %s9469_s26 }
 0x804   : > { %7302 = vrot.lane.b32.xlu1 %v6888_v16, %s9469_s26  ;;  %7300 = vrot.lane.b32.xlu0 %v6887_v32, %s9469_s26 }
 0x806   : > { %v14306_v49 = vpop.permute.xlu0 %7120  ;;  %v14308_v19 = vpop.permute.xlu1 %7122 }
 0x808   : > { %7306 = vrot.lane.b32.xlu1 %v6890_v48, %s9469_s26  ;;  %7304 = vrot.lane.b32.xlu0 %v6889_v47, %s9469_s26 }
 0x80a   : > { %v14312_v42 = vpop.permute.xlu0 %7124  ;;  %v14314_v22 = vpop.permute.xlu1 %7126 }
 0x80c   : > { %7374 = vrot.lane.b32.xlu1 %v14318_v40, %s9475_s7  ;;  %7372 = vrot.lane.b32.xlu0 %v14316_v6, %s9475_s7 }
 0x80e   : > { %v14324_v53 = vpop.permute.xlu0 %7128  ;;  %v14326_v27 = vpop.permute.xlu1 %7130 }
 0x810   : > { %7378 = vrot.lane.b32.xlu1 %v14330_v8, %s9475_s7  ;;  %7376 = vrot.lane.b32.xlu0 %v14328_v54, %s9475_s7 }
 0x812   : > { %v14336_v13 = vpop.permute.xlu0 %7132  ;;  %v14338_v63 = vpop.permute.xlu1 %7134 }
 0x814   : > { %7502 = vrot.lane.b32.xlu1 %v14138_v58, %s9470_s27  ;;  %7500 = vrot.lane.b32.xlu0 %v14140_v31, %s9470_s27  ;;  %v8369_v58 = vld [vmem:[%s15629_s4 + $0x10] sm:$0xff]  ;;  %v8370_v31 = vld [vmem:[%s15629_s4 + $0x18] sm:$0xff] }
 0x815   : > { %v9403_v57 = vpack.c.bf16 %v8370_v31, %v8369_v58  ;;  %v14421_v58 = vld [vmem:[#allocation3 + $0x50] sm:$0xff] }
 0x816   : > { %v14350_v10 = vpop.permute.xlu0 %7136  ;;  %v14352_v0 = vpop.permute.xlu1 %7138 }
 0x817   : > { %9404 = vmatprep.subr.bf16.mxu0 %v9403_v57 }
 0x818   : > { %7630 = vrot.lane.b32.xlu1 %v14216_v61, %s9484_s16  ;;  %7628 = vrot.lane.b32.xlu0 %v14218_v51, %s9484_s16  ;;  %v8371_v61 = vld [vmem:[%s15629_s4 + $0x20] sm:$0xf] }
 0x819   : > { %9406 = vmatpush3.bf16.msra.mxu0 %v9403_v57 }
 0x81a   : > { %v14364_v20 = vpop.permute.xlu0 %7140  ;;  %v14366_v46 = vpop.permute.xlu1 %7142  ;;  %9333 = vmatprep.subr.msk.mxu0 %vm8469_vm1, %v8371_v61 }
 0x81b   : > { %16135 = vst [vmem:[#allocation9_spill] sm:$0xff] %v14366_v46 }
 0x81c   : > { %7758 = vrot.lane.b32.xlu1 %v14330_v8, %s9478_s12  ;;  %7756 = vrot.lane.b32.xlu0 %v14328_v54, %s9478_s12 }
 0x81d   : > { %9334 = vmatpush3.msk.msra.mxu0 %vm8469_vm1, %v8371_v61 }
 0x81e   : > { %v14375_v51 = vpop.permute.xlu0 %7144  ;;  %v14377_v26 = vpop.permute.xlu1 %7146 }
 0x81f   : > { %16136 = vst [vmem:[#allocation10_spill] sm:$0xff] %v14375_v51  ;;  %16137 = vst [vmem:[#allocation11_spill] sm:$0xff] %v14377_v26  ;;  %v6795_v26 = vld [vmem:[#allocation3] sm:$0xff] }
 0x820   : > { %7504 = vrot.lane.b32.xlu1 %v14148_v2, %s9470_s27  ;;  %7884 = vrot.lane.b32.xlu0 %v14148_v2, %s9485_s11 }
 0x822   : > { %v14383_v30 = vpop.permute.xlu0 %7148  ;;  %v14385_v16 = vpop.permute.xlu1 %7150 }
 0x823   : > { %16138 = vst [vmem:[#allocation7_spill] sm:$0xff] %v14383_v30  ;;  %16139 = vst [vmem:[#allocation99_spill] sm:$0xff] %v14385_v16  ;;  %v14515_v30 = vld [vmem:[#allocation3 + $0x78] sm:$0xff] }
 0x824   : > { %8012 = vrot.lane.b32.xlu1 %v14226_v36, %s9479_s13  ;;  %7886 = vrot.lane.b32.xlu0 %v14146_v52, %s9485_s11 }
 0x826   : > { %v14391_v32 = vpop.permute.xlu0 %7152  ;;  %v14393_v48 = vpop.permute.xlu1 %7154 }
 0x827   : > { %16140 = vst [vmem:[#allocation100_spill] sm:$0xff] %v14391_v32  ;;  %16141 = vst [vmem:[#allocation67_spill] sm:$0xff] %v14393_v48 }
 0x828   : > { %7632 = vrot.lane.b32.xlu1 %v14226_v36, %s9484_s16  ;;  %7506 = vrot.lane.b32.xlu0 %v14146_v52, %s9470_s27 }
 0x82a   : > { %v14399_v2 = vpop.permute.xlu0 %7156  ;;  %v14401_v47 = vpop.permute.xlu1 %7158 }
 0x82b   : > { %16142 = vst [vmem:[#allocation50_spill] sm:$0xff] %v14399_v2  ;;  %16143 = vst [vmem:[#allocation69_spill] sm:$0xff] %v14401_v47 }
 0x82c   : > { %7634 = vrot.lane.b32.xlu1 %v14224_v12, %s9484_s16  ;;  %8014 = vrot.lane.b32.xlu0 %v14224_v12, %s9479_s13 }
 0x82e   : > { %v14407_v9 = vpop.permute.xlu0 %7160  ;;  %v14409_v33 = vpop.permute.xlu1 %7162 }
 0x82f   : > { %16144 = vst [vmem:[#allocation111_spill] sm:$0xff] %v14407_v9  ;;  %16145 = vst [vmem:[#allocation58_spill] sm:$0xff] %v14409_v33 }
 0x830   : > { %7380 = vrot.lane.b32.xlu1 %v14411_v28, %s9475_s7  ;;  %7760 = vrot.lane.b32.xlu0 %v14411_v28, %s9478_s12 }
 0x832   : > { %v14417_v52 = vpop.permute.xlu0 %7164  ;;  %v14419_v36 = vpop.permute.xlu1 %7166 }
 0x833   : > { %16146 = vst [vmem:[#allocation63_spill] sm:$0xff] %v14417_v52  ;;  %16147 = vst [vmem:[#allocation19_spill] sm:$0xff] %v14419_v36 }
 0x834   : > { %7888 = vrot.lane.b32.xlu1 %v14156_v55, %s9485_s11  ;;  %7762 = vrot.lane.b32.xlu0 %v14421_v58, %s9478_s12 }
 0x836   : > { %v14427_v12 = vpop.permute.xlu0 %7168  ;;  %v14429_v31 = vpop.permute.xlu1 %7170 }
 0x837   : > { %16148 = vst [vmem:[#allocation56_spill] sm:$0xff] %v14427_v12  ;;  %16149 = vst [vmem:[#allocation39_spill] sm:$0xff] %v14429_v31  ;;  %v14473_v31 = vld [vmem:[#allocation3 + $0x68] sm:$0xff] }
 0x838   : > { %7508 = vrot.lane.b32.xlu1 %v14156_v55, %s9470_s27  ;;  %7382 = vrot.lane.b32.xlu0 %v14421_v58, %s9475_s7 }
 0x83a   : > { %v14435_v57 = vpop.permute.xlu0 %7172  ;;  %v14437_v61 = vpop.permute.xlu1 %7174 }
 0x83b   : > { %16150 = vst [vmem:[#allocation112_spill] sm:$0xff] %v14435_v57  ;;  %16151 = vst [vmem:[#allocation81_spill] sm:$0xff] %v14437_v61 }
 0x83c   : > { %8016 = vrot.lane.b32.xlu1 %v14234_v18, %s9479_s13  ;;  %7890 = vrot.lane.b32.xlu0 %v14154_v1, %s9485_s11 }
 0x83e   : > { %v14443_v36 = vpop.permute.xlu0 %7176  ;;  %v14445_v12 = vpop.permute.xlu1 %7178 }
 0x83f   : > { %16152 = vst [vmem:[#allocation65_spill] sm:$0xff] %v14443_v36  ;;  %16153 = vst [vmem:[#allocation18_spill] sm:$0xff] %v14445_v12  ;;  %v14463_v12 = vld [vmem:[#allocation3 + $0x60] sm:$0xff] }
 0x840   : > { %7636 = vrot.lane.b32.xlu1 %v14234_v18, %s9484_s16  ;;  %7510 = vrot.lane.b32.xlu0 %v14154_v1, %s9470_s27 }
 0x842   : > { %v14451_v55 = vpop.permute.xlu0 %7248  ;;  %v14453_v57 = vpop.permute.xlu1 %7250 }
 0x844   : > { %7638 = vrot.lane.b32.xlu1 %v14232_v35, %s9484_s16  ;;  %8018 = vrot.lane.b32.xlu0 %v14232_v35, %s9479_s13 }
 0x846   : > { %v14459_v61 = vpop.permute.xlu0 %7252  ;;  %v14461_v36 = vpop.permute.xlu1 %7254 }
 0x848   : > { %7384 = vrot.lane.b32.xlu1 %v14463_v12, %s9475_s7  ;;  %7764 = vrot.lane.b32.xlu0 %v14463_v12, %s9478_s12 }
 0x84a   : > { %v14469_v1 = vpop.permute.xlu0 %7256  ;;  %v14471_v18 = vpop.permute.xlu1 %7258 }
 0x84c   : > { %7892 = vrot.lane.b32.xlu1 %v14164_v59, %s9485_s11  ;;  %7766 = vrot.lane.b32.xlu0 %v14473_v31, %s9478_s12 }
 0x84e   : > { %v14479_v35 = vpop.permute.xlu0 %7260  ;;  %v14481_v52 = vpop.permute.xlu1 %7262 }
 0x850   : > { %7386 = vrot.lane.b32.xlu0 %v14473_v31, %s9475_s7  ;;  %7512 = vrot.lane.b32.xlu1 %v14164_v59, %s9470_s27 }
 0x852   : > { %v14487_v33 = vpop.permute.xlu0 %7264  ;;  %v14489_v9 = vpop.permute.xlu1 %7266 }
 0x854   : > { %7894 = vrot.lane.b32.xlu0 %v14162_v34, %s9485_s11  ;;  %8020 = vrot.lane.b32.xlu1 %v14242_v15, %s9479_s13 }
 0x856   : > { %v14495_v47 = vpop.permute.xlu0 %7268  ;;  %v14497_v2 = vpop.permute.xlu1 %7270 }
 0x857   : > { %16154 = vst [vmem:[#allocation48_spill] sm:$0xff] %v14495_v47  ;;  %16155 = vst [vmem:[#allocation101_spill] sm:$0xff] %v14497_v2 }
 0x858   : > { %7514 = vrot.lane.b32.xlu0 %v14162_v34, %s9470_s27  ;;  %7640 = vrot.lane.b32.xlu1 %v14242_v15, %s9484_s16 }
 0x85a   : > { %v14503_v59 = vpop.permute.xlu0 %7272  ;;  %v14505_v48 = vpop.permute.xlu1 %7274 }
 0x85b   : > { %16156 = vst [vmem:[#allocation66_spill] sm:$0xff] %v14503_v59  ;;  %16157 = vst [vmem:[#allocation70_spill] sm:$0xff] %v14505_v48  ;;  %v14525_v48 = vld [vmem:[#allocation3 + $0x80] sm:$0xff]  ;;  %v8108_v59 = vsel %vm301_vm2, %v6795_v26, %v14292_v17  ;;  %v6796_v17 = vld [vmem:[#allocation3 + $0x8] sm:$0xff] }
 0x85c   : > { %8022 = vrot.lane.b32.xlu0 %v14240_v25, %s9479_s13  ;;  %7642 = vrot.lane.b32.xlu1 %v14240_v25, %s9484_s16  ;;  %v14614_v26 = vld [vmem:[#allocation3 + $0xb0] sm:$0xff] }
 0x85e   : > { %v14511_v32 = vpop.permute.xlu0 %7276  ;;  %v14513_v16 = vpop.permute.xlu1 %7278 }
 0x85f   : > { %16158 = vst [vmem:[#allocation38_spill] sm:$0xff] %v14511_v32  ;;  %16159 = vst [vmem:[#allocation49_spill] sm:$0xff] %v14513_v16 }
 0x860   : > { %7768 = vrot.lane.b32.xlu0 %v14515_v30, %s9478_s12  ;;  %7388 = vrot.lane.b32.xlu1 %v14515_v30, %s9475_s7 }
 0x862   : > { %v14521_v34 = vpop.permute.xlu0 %7280  ;;  %v14523_v15 = vpop.permute.xlu1 %7282 }
 0x863   : > { %16160 = vst [vmem:[#allocation83_spill] sm:$0xff] %v14521_v34  ;;  %16161 = vst [vmem:[#allocation113_spill] sm:$0xff] %v14523_v15 }
 0x864   : > { %7770 = vrot.lane.b32.xlu0 %v14525_v48, %s9478_s12  ;;  %7896 = vrot.lane.b32.xlu1 %v14172_v37, %s9485_s11 }
 0x866   : > { %v14531_v25 = vpop.permute.xlu0 %7284  ;;  %v14533_v16 = vpop.permute.xlu1 %7286 }
 0x867   : > { %16162 = vst [vmem:[#allocation72_spill] sm:$0xff] %v14531_v25  ;;  %16163 = vst [vmem:[#allocation68_spill] sm:$0xff] %v14533_v16 }
 0x868   : > { %7390 = vrot.lane.b32.xlu0 %v14525_v48, %s9475_s7  ;;  %7516 = vrot.lane.b32.xlu1 %v14172_v37, %s9470_s27 }
 0x86a   : > { %v14539_v34 = vpop.permute.xlu0 %7288  ;;  %v14541_v15 = vpop.permute.xlu1 %7290 }
 0x86b   : > { %16164 = vst [vmem:[#allocation57_spill] sm:$0xff] %v14539_v34  ;;  %16165 = vst [vmem:[#allocation102_spill] sm:$0xff] %v14541_v15 }
 0x86c   : > { %7898 = vrot.lane.b32.xlu0 %v14170_v43, %s9485_s11  ;;  %8024 = vrot.lane.b32.xlu1 %v14250_v41, %s9479_s13 }
 0x86e   : > { %v14547_v32 = vpop.permute.xlu0 %7292  ;;  %v14549_v25 = vpop.permute.xlu1 %7294 }
 0x86f   : > { %16166 = vst [vmem:[#allocation73_spill] sm:$0xff] %v14547_v32  ;;  %16167 = vst [vmem:[#allocation125_spill] sm:$0xff] %v14549_v25  ;;  %v14567_v25 = vld [vmem:[#allocation3 + $0x90] sm:$0xff] }
 0x870   : > { %7518 = vrot.lane.b32.xlu0 %v14170_v43, %s9470_s27  ;;  %7644 = vrot.lane.b32.xlu1 %v14250_v41, %s9484_s16  ;;  %16172 = vst [vmem:[#allocation124_spill] sm:$0xff] %v14567_v25 }
 0x872   : > { %v14555_v37 = vpop.permute.xlu0 %7296  ;;  %v14557_v34 = vpop.permute.xlu1 %7298 }
 0x873   : > { %16168 = vst [vmem:[#allocation42_spill] sm:$0xff] %v14555_v37  ;;  %16169 = vst [vmem:[#allocation28_spill] sm:$0xff] %v14557_v34  ;;  %v14577_v34 = vld [vmem:[#allocation3 + $0x98] sm:$0xff] }
 0x874   : > { %8026 = vrot.lane.b32.xlu0 %v14248_v45, %s9479_s13  ;;  %7646 = vrot.lane.b32.xlu1 %v14248_v45, %s9484_s16  ;;  %16175 = vst [vmem:[#allocation20_spill] sm:$0xff] %v14577_v34 }
 0x876   : > { %v14563_v15 = vpop.permute.xlu0 %7300  ;;  %v14565_v32 = vpop.permute.xlu1 %7302 }
 0x877   : > { %16170 = vst [vmem:[#allocation114_spill] sm:$0xff] %v14563_v15  ;;  %16171 = vst [vmem:[#allocation55_spill] sm:$0xff] %v14565_v32 }
 0x878   : > { %7772 = vrot.lane.b32.xlu0 %v14567_v25, %s9478_s12  ;;  %7392 = vrot.lane.b32.xlu1 %v14567_v25, %s9475_s7 }
 0x87a   : > { %v14573_v43 = vpop.permute.xlu0 %7304  ;;  %v14575_v41 = vpop.permute.xlu1 %7306 }
 0x87b   : > { %16173 = vst [vmem:[#allocation139_spill] sm:$0xff] %v14573_v43  ;;  %16174 = vst [vmem:[#allocation85_spill] sm:$0xff] %v14575_v41 }
 0x87c   : > { %7774 = vrot.lane.b32.xlu0 %v14577_v34, %s9478_s12  ;;  %7900 = vrot.lane.b32.xlu1 %v14180_v11, %s9485_s11 }
 0x87e   : > { %v7373_v45 = vpop.permute.xlu0 %7372  ;;  %v7375_v32 = vpop.permute.xlu1 %7374 }
 0x880   : > { %7394 = vrot.lane.b32.xlu0 %v14577_v34, %s9475_s7  ;;  %7520 = vrot.lane.b32.xlu1 %v14180_v11, %s9470_s27  ;;  %v14605_v34 = vld [vmem:[#allocation3 + $0xa8] sm:$0xff] }
 0x881   : > { %16176 = vst [vmem:[#allocation35_spill] sm:$0xff] %v14605_v34 }
 0x882   : > { %v14587_v15 = vpop.permute.xlu0 %7376  ;;  %v14589_v43 = vpop.permute.xlu1 %7378 }
 0x884   : > { %7902 = vrot.lane.b32.xlu0 %v14178_v44, %s9485_s11  ;;  %8028 = vrot.lane.b32.xlu1 %v14258_v56, %s9479_s13 }
 0x886   : > { %v7501_v41 = vpop.permute.xlu0 %7500  ;;  %v7503_v37 = vpop.permute.xlu1 %7502 }
 0x888   : > { %7522 = vrot.lane.b32.xlu0 %v14178_v44, %s9470_s27  ;;  %7648 = vrot.lane.b32.xlu1 %v14258_v56, %s9484_s16  ;;  %v8140_v44 = vsel %vm245_vm0, %v8108_v59, %v14300_v21  ;;  %v8109_v59 = vsel %vm301_vm2, %v6796_v17, %v14296_v7 }
 0x88a   : > { %v7629_v16 = vpop.permute.xlu0 %7628  ;;  %v7631_v11 = vpop.permute.xlu1 %7630 }
 0x88c   : > { %8030 = vrot.lane.b32.xlu0 %v14256_v3, %s9479_s13  ;;  %7650 = vrot.lane.b32.xlu1 %v14256_v3, %s9484_s16  ;;  %v8173_v3 = vsel %vm8172_vm3, %v8140_v44, %v7373_v45 }
 0x88d   : > { %v8205_v47 = vsel %vm5928_vm7, %v8173_v3, %v7501_v41 }
 0x88e   : > { %v7757_v51 = vpop.permute.xlu0 %7756  ;;  %v7759_v2 = vpop.permute.xlu1 %7758  ;;  %v8238_v25 = vsel %vm8237_vm4, %v8205_v47, %v7629_v16  ;;  %v8141_v16 = vsel %vm245_vm0, %v8109_v59, %v14302_v4 }
 0x88f   : > { %v8270_v21 = vsel %vm5961_vm8, %v8238_v25, %v7757_v51  ;;  %v8174_v7 = vsel %vm8172_vm3, %v8141_v16, %v7375_v32 }
 0x890   : > { %7776 = vrot.lane.b32.xlu0 %v14605_v34, %s9478_s12  ;;  %7396 = vrot.lane.b32.xlu1 %v14605_v34, %s9475_s7  ;;  %v8206_v25 = vsel %vm5928_vm7, %v8174_v7, %v7503_v37 }
 0x891   : > { %v8239_v3 = vsel %vm8237_vm4, %v8206_v25, %v7631_v11 }
 0x892   : > { %v7885_v56 = vpop.permute.xlu0 %7884  ;;  %v7505_v46 = vpop.permute.xlu1 %7504 }
 0x893   : > { %v8303_v45 = vsel %vm8302_vm5, %v8270_v21, %v7885_v56  ;;  %v14653_v21 = vld [vmem:[#allocation3 + $0xc0] sm:$0xff] }
 0x894   : > { %7778 = vrot.lane.b32.xlu0 %v14614_v26, %s9478_s12  ;;  %7904 = vrot.lane.b32.xlu1 %v14188_v24, %s9485_s11 }
 0x896   : > { %v7887_v44 = vpop.permute.xlu0 %7886  ;;  %v8013_v34 = vpop.permute.xlu1 %8012 }
 0x897   : > { %v8335_v41 = vsel %vm5994_vm9, %v8303_v45, %v8013_v34 }
 0x898   : > { %7398 = vrot.lane.b32.xlu0 %v14614_v26, %s9475_s7  ;;  %7524 = vrot.lane.b32.xlu1 %v14188_v24, %s9470_s27  ;;  %v8271_v24 = vsel %vm5961_vm8, %v8239_v3, %v7759_v2 }
 0x899   : > { %9335 = vmatprep.mubr.msk.f32.mxu0 %vm8372_vm6, %v8335_v41  ;;  %v8304_v4 = vsel %vm8302_vm5, %v8271_v24, %v7887_v44  ;;  %v14668_v44 = vld [vmem:[#allocation3 + $0xc8] sm:$0xff] }
 0x89a   : > { %v7507_v51 = vpop.permute.xlu0 %7506  ;;  %v7633_v47 = vpop.permute.xlu1 %7632 }
 0x89c   : > { %7906 = vrot.lane.b32.xlu0 %v14186_v29, %s9485_s11  ;;  %8032 = vrot.lane.b32.xlu1 %v14266_v60, %s9479_s13 }
 0x89e   : > { %v8015_v34 = vpop.permute.xlu0 %8014  ;;  %v7635_v56 = vpop.permute.xlu1 %7634 }
 0x89f   : > { %v8336_v32 = vsel %vm5994_vm9, %v8304_v4, %v8015_v34 }
 0x8a0   : > { %7526 = vrot.lane.b32.xlu0 %v14186_v29, %s9470_s27  ;;  %7652 = vrot.lane.b32.xlu1 %v14266_v60, %s9484_s16  ;;  %v8110_v29 = vsel %vm301_vm2, %v14316_v6, %v14306_v49 }
 0x8a1   : > { %9336 = vmatmul.mubr.msk.f32.vlgmr.msra.gmra.mrb[8].mxu0 %vm8372_vm6, %v8336_v32  ;;  %v8142_v60 = vsel %vm245_vm0, %v8110_v29, %v14451_v55 }
 0x8a2   : > { %v7761_v37 = vpop.permute.xlu0 %7760  ;;  %v7381_v11 = vpop.permute.xlu1 %7380 }
 0x8a4   : > { %8034 = vrot.lane.b32.xlu0 %v14264_v14, %s9479_s13  ;;  %7654 = vrot.lane.b32.xlu1 %v14264_v14, %s9484_s16  ;;  %v8175_v14 = vsel %vm8172_vm3, %v8142_v60, %v14587_v15  ;;  %v14723_v60 = vld [vmem:[#allocation3 + $0xe0] sm:$0xff] }
 0x8a5   : > { %v8207_v41 = vsel %vm5928_vm7, %v8175_v14, %v7505_v46  ;;  %v8111_v46 = vsel %vm301_vm2, %v14318_v40, %v14308_v19 }
 0x8a6   : > { %v7763_v2 = vpop.permute.xlu0 %7762  ;;  %v7889_v17 = vpop.permute.xlu1 %7888  ;;  %v8240_v49 = vsel %vm8237_vm4, %v8207_v41, %v7633_v47  ;;  %v8143_v47 = vsel %vm245_vm0, %v8111_v46, %v14453_v57  ;;  %v7034_v41 = vld [vmem:[#allocation3 + $0xd9] sm:$0xff] }
 0x8a7   : > { %v8272_v6 = vsel %vm5961_vm8, %v8240_v49, %v7761_v37  ;;  %v8176_v25 = vsel %vm8172_vm3, %v8143_v47, %v14589_v43  ;;  %v7035_v47 = vld [vmem:[#allocation3 + $0xe1] sm:$0xff] }
 0x8a8   : > { %7780 = vrot.lane.b32.xlu0 %v14653_v21, %s9478_s12  ;;  %7400 = vrot.lane.b32.xlu1 %v14653_v21, %s9475_s7  ;;  %v8305_v55 = vsel %vm8302_vm5, %v8272_v6, %v7889_v17  ;;  %v8208_v4 = vsel %vm5928_vm7, %v8176_v25, %v7507_v51 }
 0x8a9   : > { %v8241_v19 = vsel %vm8237_vm4, %v8208_v4, %v7635_v56 }
 0x8aa   : > { %v14666_v59 = vpop.permute.xlu0 %7382  ;;  %v7509_v45 = vpop.permute.xlu1 %7508 }
 0x8ac   : > { %7782 = vrot.lane.b32.xlu0 %v14668_v44, %s9478_s12  ;;  %7908 = vrot.lane.b32.xlu1 %v14196_v5, %s9485_s11 }
 0x8ae   : > { %v7891_v15 = vpop.permute.xlu0 %7890  ;;  %v8017_v16 = vpop.permute.xlu1 %8016 }
 0x8af   : > { %v8337_v7 = vsel %vm5994_vm9, %v8305_v55, %v8017_v16 }
 0x8b0   : > { %7402 = vrot.lane.b32.xlu0 %v14668_v44, %s9475_s7  ;;  %7528 = vrot.lane.b32.xlu1 %v14196_v5, %s9470_s27  ;;  %v8273_v5 = vsel %vm5961_vm8, %v8241_v19, %v7763_v2  ;;  %v14709_v2 = vld [vmem:[#allocation3 + $0xd8] sm:$0xff] }
 0x8b1   : > { %9338 = vmatprep.mubr.msk.f32.mxu0 %vm8372_vm6, %v8337_v7  ;;  %v8306_v40 = vsel %vm8302_vm5, %v8273_v5, %v7891_v15 }
 0x8b2   : > { %v7511_v3 = vpop.permute.xlu0 %7510  ;;  %v7637_v24 = vpop.permute.xlu1 %7636 }
 0x8b4   : > { %7910 = vrot.lane.b32.xlu0 %v14194_v39, %s9485_s11  ;;  %8036 = vrot.lane.b32.xlu1 %v14274_v23, %s9479_s13 }
 0x8b6   : > { %v8019_v57 = vpop.permute.xlu0 %8018  ;;  %v7639_v34 = vpop.permute.xlu1 %7638 }
 0x8b7   : > { %v8338_v43 = vsel %vm5994_vm9, %v8306_v40, %v8019_v57  ;;  %v14760_v40 = vld [vmem:[#allocation3 + $0xf0] sm:$0xff]  ;;  %v8114_v57 = vsel %vm301_vm2, %v14411_v28, %v14324_v53 }
 0x8b8   : > { %7530 = vrot.lane.b32.xlu0 %v14194_v39, %s9470_s27  ;;  %7656 = vrot.lane.b32.xlu1 %v14274_v23, %s9484_s16  ;;  %v8112_v39 = vsel %vm301_vm2, %v14328_v54, %v14312_v42 }
 0x8b9   : > { %9339 = vmatmul.mubr.msk.f32.gmra.mrb[10].mxu0 %vm8372_vm6, %v8338_v43  ;;  %v8144_v23 = vsel %vm245_vm0, %v8112_v39, %v14459_v61 }
 0x8ba   : > { %v7765_v51 = vpop.permute.xlu0 %7764  ;;  %v7385_v56 = vpop.permute.xlu1 %7384  ;;  %v8177_v17 = vsel %vm8172_vm3, %v8144_v23, %v7381_v11 }
 0x8bb   : > { %v8209_v14 = vsel %vm5928_vm7, %v8177_v17, %v7509_v45  ;;  %v8113_v45 = vsel %vm301_vm2, %v14330_v8, %v14314_v22  ;;  %v8115_v17 = vsel %vm301_vm2, %v14421_v58, %v14326_v27 }
 0x8bc   : > { %8038 = vrot.lane.b32.xlu0 %v14272_v38, %s9479_s13  ;;  %7658 = vrot.lane.b32.xlu1 %v14272_v38, %s9484_s16  ;;  %v8242_v42 = vsel %vm8237_vm4, %v8209_v14, %v7637_v24  ;;  %v8145_v55 = vsel %vm245_vm0, %v8113_v45, %v14461_v36 }
 0x8bd   : > { %v8274_v54 = vsel %vm5961_vm8, %v8242_v42, %v7765_v51  ;;  %v8178_v15 = vsel %vm8172_vm3, %v8145_v55, %v14666_v59  ;;  %v14774_v51 = vld [vmem:[#allocation3 + $0xf8] sm:$0xff] }
 0x8be   : > { %v7767_v32 = vpop.permute.xlu0 %7766  ;;  %v7893_v37 = vpop.permute.xlu1 %7892  ;;  %v8210_v46 = vsel %vm5928_vm7, %v8178_v15, %v7511_v3  ;;  %v7069_v15 = vld [vmem:[#allocation3 + $0xfa] sm:$0xff] }
 0x8bf   : > { %v8307_v61 = vsel %vm8302_vm5, %v8274_v54, %v7893_v37  ;;  %v8243_v22 = vsel %vm8237_vm4, %v8210_v46, %v7639_v34  ;;  %v7036_v37 = vld [vmem:[#allocation3 + $0xf1] sm:$0xff]  ;;  %v14807_v46 = vld [vmem:[#allocation3 + $0x108] sm:$0xff] }
 0x8c0   : > { %7784 = vrot.lane.b32.xlu0 %v14709_v2, %s9478_s12  ;;  %7404 = vrot.lane.b32.xlu1 %v14709_v2, %s9475_s7  ;;  %v8275_v8 = vsel %vm5961_vm8, %v8243_v22, %v7767_v32 }
 0x8c2   : > { %v14721_v38 = vpop.permute.xlu0 %7386  ;;  %v7513_v29 = vpop.permute.xlu1 %7512 }
 0x8c4   : > { %7786 = vrot.lane.b32.xlu0 %v14723_v60, %s9478_s12  ;;  %7912 = vrot.lane.b32.xlu1 %v7034_v41, %s9485_s11 }
 0x8c6   : > { %v7895_v11 = vpop.permute.xlu0 %7894  ;;  %v8021_v49 = vpop.permute.xlu1 %8020 }
 0x8c7   : > { %v8339_v6 = vsel %vm5994_vm9, %v8307_v61, %v8021_v49  ;;  %v8308_v36 = vsel %vm8302_vm5, %v8275_v8, %v7895_v11  ;;  %v7037_v61 = vld [vmem:[#allocation3 + $0xf9] sm:$0xff] }
 0x8c8   : > { %7406 = vrot.lane.b32.xlu0 %v14723_v60, %s9475_s7  ;;  %7532 = vrot.lane.b32.xlu1 %v7034_v41, %s9470_s27  ;;  %v7068_v11 = vld [vmem:[#allocation3 + $0xf2] sm:$0xff] }
 0x8c9   : > { %9341 = vmatprep.mubr.msk.f32.mxu0 %vm8372_vm6, %v8339_v6 }
 0x8ca   : > { %v7515_v16 = vpop.permute.xlu0 %7514  ;;  %v7641_v7 = vpop.permute.xlu1 %7640 }
 0x8cc   : > { %7914 = vrot.lane.b32.xlu0 %v7035_v47, %s9485_s11  ;;  %8040 = vrot.lane.b32.xlu1 %v14282_v62, %s9479_s13 }
 0x8ce   : > { %v8023_v25 = vpop.permute.xlu0 %8022  ;;  %v7643_v24 = vpop.permute.xlu1 %7642 }
 0x8cf   : > { %v8340_v59 = vsel %vm5994_vm9, %v8308_v36, %v8023_v25 }
 0x8d0   : > { %7534 = vrot.lane.b32.xlu0 %v7035_v47, %s9470_s27  ;;  %7660 = vrot.lane.b32.xlu1 %v14282_v62, %s9484_s16  ;;  %v8146_v62 = vsel %vm245_vm0, %v8114_v57, %v14469_v1  ;;  %v8116_v47 = vsel %vm301_vm2, %v14463_v12, %v14336_v13  ;;  %v8117_v57 = vsel %vm301_vm2, %v14473_v31, %v14338_v63 }
 0x8d1   : > { %9342 = vmatmul.mubr.msk.f32.gmra.mrb[12].mxu0 %vm8372_vm6, %v8340_v59  ;;  %v8179_v34 = vsel %vm8172_vm3, %v8146_v62, %v7385_v56  ;;  %v8148_v22 = vsel %vm245_vm0, %v8116_v47, %v14479_v35  ;;  %v8149_v62 = vsel %vm245_vm0, %v8117_v57, %v14481_v52  ;;  %v16177_v57 = vld [vmem:[#allocation124_spill] sm:$0xff] }
 0x8d2   : > { %v7769_v3 = vpop.permute.xlu0 %7768  ;;  %v7389_v4 = vpop.permute.xlu1 %7388  ;;  %v8211_v32 = vsel %vm5928_vm7, %v8179_v34, %v7513_v29  ;;  %v8147_v29 = vsel %vm245_vm0, %v8115_v17, %v14471_v18  ;;  %v7071_v17 = vld [vmem:[#allocation3 + $0x112] sm:$0xff] }
 0x8d3   : > { %v8244_v53 = vsel %vm8237_vm4, %v8211_v32, %v7641_v7  ;;  %v8180_v14 = vsel %vm8172_vm3, %v8147_v29, %v14721_v38  ;;  %v8181_v8 = vsel %vm8172_vm3, %v8148_v22, %v7389_v4 }
 0x8d4   : > { %8042 = vrot.lane.b32.xlu0 %v14280_v50, %s9479_s13  ;;  %7662 = vrot.lane.b32.xlu1 %v14280_v50, %s9484_s16  ;;  %v8276_v28 = vsel %vm5961_vm8, %v8244_v53, %v7769_v3  ;;  %v8212_v54 = vsel %vm5928_vm7, %v8180_v14, %v7515_v16  ;;  %v7038_v3 = vld [vmem:[#allocation3 + $0x109] sm:$0xff]  ;;  %v7039_v53 = vld [vmem:[#allocation3 + $0x111] sm:$0xff] }
 0x8d5   : > { %v8245_v27 = vsel %vm8237_vm4, %v8212_v54, %v7643_v24  ;;  %v14821_v24 = vld [vmem:[#allocation3 + $0x110] sm:$0xff] }
 0x8d6   : > { %v7771_v19 = vpop.permute.xlu0 %7770  ;;  %v7897_v5 = vpop.permute.xlu1 %7896 }
 0x8d7   : > { %v8309_v1 = vsel %vm8302_vm5, %v8276_v28, %v7897_v5  ;;  %v8277_v58 = vsel %vm5961_vm8, %v8245_v27, %v7771_v19  ;;  %v7070_v28 = vld [vmem:[#allocation3 + $0x10a] sm:$0xff] }
 0x8d8   : > { %7788 = vrot.lane.b32.xlu0 %v14760_v40, %s9478_s12  ;;  %7408 = vrot.lane.b32.xlu1 %v14760_v40, %s9475_s7 }
 0x8da   : > { %v14772_v50 = vpop.permute.xlu0 %7390  ;;  %v7517_v43 = vpop.permute.xlu1 %7516 }
 0x8db   : > { %v8213_v59 = vsel %vm5928_vm7, %v8181_v8, %v7517_v43  ;;  %v8182_v34 = vsel %vm8172_vm3, %v8149_v62, %v14772_v50  ;;  %v7041_v8 = vld [vmem:[#allocation3 + $0x129] sm:$0xff]  ;;  %v8120_v62 = vsel %vm301_vm2, %v16177_v57, %v14364_v20 }
 0x8dc   : > { %7790 = vrot.lane.b32.xlu0 %v14774_v51, %s9478_s12  ;;  %7916 = vrot.lane.b32.xlu1 %v7036_v37, %s9485_s11 }
 0x8de   : > { %v7899_v56 = vpop.permute.xlu0 %7898  ;;  %v8025_v39 = vpop.permute.xlu1 %8024 }
 0x8df   : > { %v8341_v23 = vsel %vm5994_vm9, %v8309_v1, %v8025_v39  ;;  %v8310_v18 = vsel %vm8302_vm5, %v8277_v58, %v7899_v56  ;;  %v14868_v58 = vld [vmem:[#allocation3 + $0x128] sm:$0xff] }
 0x8e0   : > { %7410 = vrot.lane.b32.xlu0 %v14774_v51, %s9475_s7  ;;  %7536 = vrot.lane.b32.xlu1 %v7036_v37, %s9470_s27 }
 0x8e1   : > { %9344 = vmatprep.mubr.msk.f32.mxu0 %vm8372_vm6, %v8341_v23 }
 0x8e2   : > { %v7519_v41 = vpop.permute.xlu0 %7518  ;;  %v7645_v42 = vpop.permute.xlu1 %7644 }
 0x8e3   : > { %v8246_v13 = vsel %vm8237_vm4, %v8213_v59, %v7645_v42  ;;  %v8214_v37 = vsel %vm5928_vm7, %v8182_v34, %v7519_v41  ;;  %v14854_v41 = vld [vmem:[#allocation3 + $0x120] sm:$0xff]  ;;  %v8118_v42 = vsel %vm301_vm2, %v14515_v30, %v14350_v10  ;;  %v16178_v34 = vld [vmem:[#allocation48_spill] sm:$0xff] }
 0x8e4   : > { %7918 = vrot.lane.b32.xlu0 %v7037_v61, %s9485_s11  ;;  %8044 = vrot.lane.b32.xlu1 %v7068_v11, %s9479_s13  ;;  %v8150_v54 = vsel %vm245_vm0, %v8118_v42, %v14487_v33  ;;  %v16181_v42 = vld [vmem:[#allocation101_spill] sm:$0xff] }
 0x8e6   : > { %v8027_v49 = vpop.permute.xlu0 %8026  ;;  %v7647_v6 = vpop.permute.xlu1 %7646 }
 0x8e7   : > { %v8342_v38 = vsel %vm5994_vm9, %v8310_v18, %v8027_v49  ;;  %v8247_v63 = vsel %vm8237_vm4, %v8214_v37, %v7647_v6  ;;  %v7040_v49 = vld [vmem:[#allocation3 + $0x121] sm:$0xff] }
 0x8e8   : > { %7538 = vrot.lane.b32.xlu0 %v7037_v61, %s9470_s27  ;;  %7664 = vrot.lane.b32.xlu1 %v7068_v11, %s9484_s16 }
 0x8e9   : > { %9345 = vmatmul.mubr.msk.f32.gmra.mrb[14].mxu0 %vm8372_vm6, %v8342_v38 }
 0x8ea   : > { %v7773_v45 = vpop.permute.xlu0 %7772  ;;  %v7393_v55 = vpop.permute.xlu1 %7392 }
 0x8eb   : > { %v8278_v12 = vsel %vm5961_vm8, %v8246_v13, %v7773_v45  ;;  %v8183_v61 = vsel %vm8172_vm3, %v8150_v54, %v7393_v55  ;;  %v8119_v55 = vsel %vm301_vm2, %v14525_v48, %v14352_v0 }
 0x8ec   : > { %8046 = vrot.lane.b32.xlu0 %v7069_v15, %s9479_s13  ;;  %7666 = vrot.lane.b32.xlu1 %v7069_v15, %s9484_s16  ;;  %v8151_v15 = vsel %vm245_vm0, %v8119_v55, %v14489_v9 }
 0x8ee   : > { %v7775_v16 = vpop.permute.xlu0 %7774  ;;  %v7901_v7 = vpop.permute.xlu1 %7900 }
 0x8ef   : > { %v8311_v35 = vsel %vm8302_vm5, %v8278_v12, %v7901_v7  ;;  %v8279_v31 = vsel %vm5961_vm8, %v8247_v63, %v7775_v16 }
 0x8f0   : > { %7792 = vrot.lane.b32.xlu0 %v14807_v46, %s9478_s12  ;;  %7412 = vrot.lane.b32.xlu1 %v14807_v46, %s9475_s7 }
 0x8f2   : > { %v14819_v36 = vpop.permute.xlu0 %7394  ;;  %v7521_v25 = vpop.permute.xlu1 %7520 }
 0x8f3   : > { %v8215_v18 = vsel %vm5928_vm7, %v8183_v61, %v7521_v25  ;;  %v8184_v16 = vsel %vm8172_vm3, %v8151_v15, %v14819_v36  ;;  %v7072_v25 = vld [vmem:[#allocation3 + $0x122] sm:$0xff] }
 0x8f4   : > { %7794 = vrot.lane.b32.xlu0 %v14821_v24, %s9478_s12  ;;  %7920 = vrot.lane.b32.xlu1 %v7038_v3, %s9485_s11 }
 0x8f6   : > { %v7903_v4 = vpop.permute.xlu0 %7902  ;;  %v8029_v19 = vpop.permute.xlu1 %8028 }
 0x8f7   : > { %v8343_v5 = vsel %vm5994_vm9, %v8311_v35, %v8029_v19  ;;  %v8312_v52 = vsel %vm8302_vm5, %v8279_v31, %v7903_v4  ;;  %v7073_v35 = vld [vmem:[#allocation3 + $0x12a] sm:$0xff]  ;;  %v7042_v31 = vld [vmem:[#allocation3 + $0x139] sm:$0xff] }
 0x8f8   : > { %7414 = vrot.lane.b32.xlu0 %v14821_v24, %s9475_s7  ;;  %7540 = vrot.lane.b32.xlu1 %v7038_v3, %s9470_s27 }
 0x8f9   : > { %9347 = vmatprep.mubr.msk.f32.mxu0 %vm8372_vm6, %v8343_v5  ;;  %v14901_v5 = vld [vmem:[#allocation3 + $0x138] sm:$0xff] }
 0x8fa   : > { %v7523_v43 = vpop.permute.xlu0 %7522  ;;  %v7649_v32 = vpop.permute.xlu1 %7648 }
 0x8fb   : > { %v8248_v10 = vsel %vm8237_vm4, %v8215_v18, %v7649_v32  ;;  %v8216_v22 = vsel %vm5928_vm7, %v8184_v16, %v7523_v43  ;;  %v8152_v43 = vsel %vm245_vm0, %v8120_v62, %v16178_v34 }
 0x8fc   : > { %7922 = vrot.lane.b32.xlu0 %v7039_v53, %s9485_s11  ;;  %8048 = vrot.lane.b32.xlu1 %v7070_v28, %s9479_s13 }
 0x8fe   : > { %v8031_v1 = vpop.permute.xlu0 %8030  ;;  %v7651_v56 = vpop.permute.xlu1 %7650 }
 0x8ff   : > { %v8344_v50 = vsel %vm5994_vm9, %v8312_v52, %v8031_v1  ;;  %v8249_v0 = vsel %vm8237_vm4, %v8216_v22, %v7651_v56 }
 0x900   : > { %7542 = vrot.lane.b32.xlu0 %v7039_v53, %s9470_s27  ;;  %7668 = vrot.lane.b32.xlu1 %v7070_v28, %s9484_s16  ;;  %v14915_v28 = vld [vmem:[#allocation3 + $0x140] sm:$0xff] }
 0x901   : > { %9348 = vmatmul.mubr.msk.f32.gmra.mrb[16].mxu0 %vm8372_vm6, %v8344_v50 }
 0x902   : > { %v7777_v39 = vpop.permute.xlu0 %7776  ;;  %v7397_v23 = vpop.permute.xlu1 %7396 }
 0x903   : > { %v8280_v30 = vsel %vm5961_vm8, %v8248_v10, %v7777_v39  ;;  %v8185_v32 = vsel %vm8172_vm3, %v8152_v43, %v7397_v23  ;;  %v6916_v23 = vld [vmem:[#allocation3 + $0x140] sm:$0xff] }
 0x904   : > { %8050 = vrot.lane.b32.xlu0 %v7071_v17, %s9479_s13  ;;  %7670 = vrot.lane.b32.xlu1 %v7071_v17, %s9484_s16  ;;  %v16179_v17 = vld [vmem:[#allocation9_spill] sm:$0xff]  ;;  %v7043_v10 = vld [vmem:[#allocation3 + $0x141] sm:$0xff] }
 0x906   : > { %v7779_v29 = vpop.permute.xlu0 %7778  ;;  %v7905_v14 = vpop.permute.xlu1 %7904 }
 0x907   : > { %v8313_v33 = vsel %vm8302_vm5, %v8280_v30, %v7905_v14  ;;  %v8281_v48 = vsel %vm5961_vm8, %v8249_v0, %v7779_v29  ;;  %v16180_v29 = vld [vmem:[#allocation20_spill] sm:$0xff]  ;;  %v7074_v30 = vld [vmem:[#allocation3 + $0x13a] sm:$0xff]  ;;  %v16183_v0 = vld [vmem:[#allocation35_spill] sm:$0xff] }
 0x908   : > { %7796 = vrot.lane.b32.xlu0 %v14854_v41, %s9478_s12  ;;  %7416 = vrot.lane.b32.xlu1 %v14854_v41, %s9475_s7  ;;  %v8121_v14 = vsel %vm301_vm2, %v16180_v29, %v16179_v17 }
 0x909   : > { %v8153_v54 = vsel %vm245_vm0, %v8121_v14, %v16181_v42 }
 0x90a   : > { %v14866_v11 = vpop.permute.xlu0 %7398  ;;  %v7525_v27 = vpop.permute.xlu1 %7524 }
 0x90b   : > { %v8217_v63 = vsel %vm5928_vm7, %v8185_v32, %v7525_v27  ;;  %v8186_v61 = vsel %vm8172_vm3, %v8153_v54, %v14866_v11 }
 0x90c   : > { %7798 = vrot.lane.b32.xlu0 %v14868_v58, %s9478_s12  ;;  %7924 = vrot.lane.b32.xlu1 %v7040_v49, %s9485_s11 }
 0x90e   : > { %v7907_v6 = vpop.permute.xlu0 %7906  ;;  %v8033_v38 = vpop.permute.xlu1 %8032 }
 0x90f   : > { %v8345_v45 = vsel %vm5994_vm9, %v8313_v33, %v8033_v38  ;;  %v8314_v9 = vsel %vm8302_vm5, %v8281_v48, %v7907_v6 }
 0x910   : > { %7418 = vrot.lane.b32.xlu0 %v14868_v58, %s9475_s7  ;;  %7544 = vrot.lane.b32.xlu1 %v7040_v49, %s9470_s27 }
 0x911   : > { %9350 = vmatprep.mubr.msk.f32.mxu0 %vm8372_vm6, %v8345_v45 }
 0x912   : > { %v7527_v7 = vpop.permute.xlu0 %7526  ;;  %v7653_v47 = vpop.permute.xlu1 %7652 }
 0x913   : > { %v8250_v20 = vsel %vm8237_vm4, %v8217_v63, %v7653_v47  ;;  %v8218_v49 = vsel %vm5928_vm7, %v8186_v61, %v7527_v7  ;;  %v7075_v7 = vld [vmem:[#allocation3 + $0x142] sm:$0xff] }
 0x914   : > { %7926 = vrot.lane.b32.xlu0 %v7041_v8, %s9485_s11  ;;  %8052 = vrot.lane.b32.xlu1 %v7072_v25, %s9479_s13  ;;  %v16185_v63 = vld [vmem:[#allocation11_spill] sm:$0xff] }
 0x916   : > { %v8035_v59 = vpop.permute.xlu0 %8034  ;;  %v7655_v3 = vpop.permute.xlu1 %7654 }
 0x917   : > { %v8346_v36 = vsel %vm5994_vm9, %v8314_v9, %v8035_v59  ;;  %v8251_v33 = vsel %vm8237_vm4, %v8218_v49, %v7655_v3  ;;  %v16184_v9 = vld [vmem:[#allocation66_spill] sm:$0xff] }
 0x918   : > { %7546 = vrot.lane.b32.xlu0 %v7041_v8, %s9470_s27  ;;  %7672 = vrot.lane.b32.xlu1 %v7072_v25, %s9484_s16  ;;  %v7012_v8 = vld [vmem:[#allocation3 + $0x150] sm:$0xff]  ;;  %v16182_v25 = vld [vmem:[#allocation10_spill] sm:$0xff] }
 0x919   : > { %9351 = vmatmul.mubr.msk.f32.gmra.mrb[18].mxu0 %vm8372_vm6, %v8346_v36  ;;  %v8122_v48 = vsel %vm301_vm2, %v16183_v0, %v16182_v25 }
 0x91a   : > { %v7781_v13 = vpop.permute.xlu0 %7780  ;;  %v7401_v12 = vpop.permute.xlu1 %7400  ;;  %v8154_v59 = vsel %vm245_vm0, %v8122_v48, %v16184_v9  ;;  %v16189_v48 = vld [vmem:[#allocation99_spill] sm:$0xff] }
 0x91b   : > { %v8282_v52 = vsel %vm5961_vm8, %v8250_v20, %v7781_v13  ;;  %v8187_v3 = vsel %vm8172_vm3, %v8154_v59, %v7401_v12  ;;  %v8125_v9 = vsel %vm301_vm2, %v14668_v44, %v16189_v48  ;;  %v16190_v59 = vld [vmem:[#allocation49_spill] sm:$0xff] }
 0x91c   : > { %8054 = vrot.lane.b32.xlu0 %v7073_v35, %s9479_s13  ;;  %7674 = vrot.lane.b32.xlu1 %v7073_v35, %s9484_s16 }
 0x91e   : > { %v7783_v4 = vpop.permute.xlu0 %7782  ;;  %v7909_v19 = vpop.permute.xlu1 %7908 }
 0x91f   : > { %v8315_v1 = vsel %vm8302_vm5, %v8282_v52, %v7909_v19  ;;  %v8283_v6 = vsel %vm5961_vm8, %v8251_v33, %v7783_v4  ;;  %v7013_v4 = vld [vmem:[#allocation3 + $0x158] sm:$0xff] }
 0x920   : > { %7800 = vrot.lane.b32.xlu0 %v14901_v5, %s9478_s12  ;;  %7420 = vrot.lane.b32.xlu1 %v14901_v5, %s9475_s7  ;;  %v7044_v19 = vld [vmem:[#allocation3 + $0x151] sm:$0xff] }
 0x922   : > { %v14913_v37 = vpop.permute.xlu0 %7402  ;;  %v7529_v53 = vpop.permute.xlu1 %7528 }
 0x923   : > { %v8219_v35 = vsel %vm5928_vm7, %v8187_v3, %v7529_v53  ;;  %v8123_v53 = vsel %vm301_vm2, %v14614_v26, %v16185_v63  ;;  %v8157_v3 = vsel %vm245_vm0, %v8125_v9, %v16190_v59 }
 0x924   : > { %7802 = vrot.lane.b32.xlu0 %v14915_v28, %s9478_s12  ;;  %7928 = vrot.lane.b32.xlu1 %v7042_v31, %s9485_s11 }
 0x926   : > { %v7911_v56 = vpop.permute.xlu0 %7910  ;;  %v8037_v50 = vpop.permute.xlu1 %8036 }
 0x927   : > { %v8347_v39 = vsel %vm5994_vm9, %v8315_v1, %v8037_v50  ;;  %v8316_v38 = vsel %vm8302_vm5, %v8283_v6, %v7911_v56  ;;  %v16188_v6 = vld [vmem:[#allocation38_spill] sm:$0xff] }
 0x928   : > { %7422 = vrot.lane.b32.xlu0 %v6916_v23, %s9475_s7  ;;  %7548 = vrot.lane.b32.xlu1 %v7042_v31, %s9470_s27  ;;  %v16186_v31 = vld [vmem:[#allocation70_spill] sm:$0xff]  ;;  %v7076_v23 = vld [vmem:[#allocation3 + $0x152] sm:$0xff] }
 0x929   : > { %9353 = vmatprep.mubr.msk.f32.mxu0 %vm8372_vm6, %v8347_v39  ;;  %v8155_v20 = vsel %vm245_vm0, %v8123_v53, %v16186_v31  ;;  %v7045_v39 = vld [vmem:[#allocation3 + $0x159] sm:$0xff] }
 0x92a   : > { %v7531_v27 = vpop.permute.xlu0 %7530  ;;  %v7657_v18 = vpop.permute.xlu1 %7656  ;;  %v8188_v52 = vsel %vm8172_vm3, %v8155_v20, %v14913_v37  ;;  %v7079_v31 = vld [vmem:[#allocation3 + $0x172] sm:$0xff] }
 0x92b   : > { %v8252_v57 = vsel %vm8237_vm4, %v8219_v35, %v7657_v18  ;;  %v8220_v50 = vsel %vm5928_vm7, %v8188_v52, %v7531_v27  ;;  %v7077_v27 = vld [vmem:[#allocation3 + $0x15a] sm:$0xff] }
 0x92c   : > { %7930 = vrot.lane.b32.xlu0 %v7043_v10, %s9485_s11  ;;  %8056 = vrot.lane.b32.xlu1 %v7074_v30, %s9479_s13 }
 0x92e   : > { %v8039_v45 = vpop.permute.xlu0 %8038  ;;  %v7659_v55 = vpop.permute.xlu1 %7658 }
 0x92f   : > { %v8348_v11 = vsel %vm5994_vm9, %v8316_v38, %v8039_v45  ;;  %v8253_v26 = vsel %vm8237_vm4, %v8220_v50, %v7659_v55 }
 0x930   : > { %7550 = vrot.lane.b32.xlu0 %v7043_v10, %s9470_s27  ;;  %7676 = vrot.lane.b32.xlu1 %v7074_v30, %s9484_s16  ;;  %v7014_v10 = vld [vmem:[#allocation3 + $0x168] sm:$0xff] }
 0x931   : > { %9354 = vmatmul.mubr.msk.f32.gmra.mrb[20].mxu0 %vm8372_vm6, %v8348_v11  ;;  %v16187_v30 = vld [vmem:[#allocation7_spill] sm:$0xff] }
 0x932   : > { %v7785_v15 = vpop.permute.xlu0 %7784  ;;  %v7405_v16 = vpop.permute.xlu1 %7404  ;;  %v8124_v33 = vsel %vm301_vm2, %v14653_v21, %v16187_v30 }
 0x933   : > { %v8284_v62 = vsel %vm5961_vm8, %v8252_v57, %v7785_v15  ;;  %v8156_v38 = vsel %vm245_vm0, %v8124_v33, %v16188_v6  ;;  %v7047_v57 = vld [vmem:[#allocation3 + $0x171] sm:$0xff] }
 0x934   : > { %8058 = vrot.lane.b32.xlu0 %v7075_v7, %s9479_s13  ;;  %7678 = vrot.lane.b32.xlu1 %v7075_v7, %s9484_s16  ;;  %v8189_v45 = vsel %vm8172_vm3, %v8156_v38, %v7405_v16  ;;  %v7015_v7 = vld [vmem:[#allocation3 + $0x170] sm:$0xff]  ;;  %v16194_v33 = vld [vmem:[#allocation113_spill] sm:$0xff] }
 0x936   : > { %v7787_v47 = vpop.permute.xlu0 %7786  ;;  %v7913_v22 = vpop.permute.xlu1 %7912 }
 0x937   : > { %v8317_v34 = vsel %vm8302_vm5, %v8284_v62, %v7913_v22  ;;  %v8285_v17 = vsel %vm5961_vm8, %v8253_v26, %v7787_v47  ;;  %v7046_v47 = vld [vmem:[#allocation3 + $0x169] sm:$0xff] }
 0x938   : > { %7804 = vrot.lane.b32.xlu0 %v7012_v8, %s9478_s12  ;;  %7424 = vrot.lane.b32.xlu1 %v7012_v8, %s9475_s7  ;;  %v7078_v62 = vld [vmem:[#allocation3 + $0x16a] sm:$0xff] }
 0x93a   : > { %v14955_v36 = vpop.permute.xlu0 %7406  ;;  %v7533_v13 = vpop.permute.xlu1 %7532 }
 0x93b   : > { %v8221_v15 = vsel %vm5928_vm7, %v8189_v45, %v7533_v13  ;;  %v8190_v13 = vsel %vm8172_vm3, %v8157_v3, %v14955_v36 }
 0x93c   : > { %7806 = vrot.lane.b32.xlu0 %v7013_v4, %s9478_s12  ;;  %7932 = vrot.lane.b32.xlu1 %v7044_v19, %s9485_s11 }
 0x93e   : > { %v7915_v43 = vpop.permute.xlu0 %7914  ;;  %v8041_v32 = vpop.permute.xlu1 %8040 }
 0x93f   : > { %v8349_v12 = vsel %vm5994_vm9, %v8317_v34, %v8041_v32  ;;  %v8318_v29 = vsel %vm8302_vm5, %v8285_v17, %v7915_v43 }
 0x940   : > { %7426 = vrot.lane.b32.xlu0 %v7013_v4, %s9475_s7  ;;  %7552 = vrot.lane.b32.xlu1 %v7044_v19, %s9470_s27 }
 0x941   : > { %9356 = vmatprep.mubr.msk.f32.mxu0 %vm8372_vm6, %v8349_v12 }
 0x942   : > { %v7535_v1 = vpop.permute.xlu0 %7534  ;;  %v7661_v56 = vpop.permute.xlu1 %7660 }
 0x943   : > { %v8254_v22 = vsel %vm8237_vm4, %v8221_v15, %v7661_v56  ;;  %v8222_v19 = vsel %vm5928_vm7, %v8190_v13, %v7535_v1  ;;  %v7016_v1 = vld [vmem:[#allocation3 + $0x180] sm:$0xff]  ;;  %v16191_v56 = vld [vmem:[#allocation100_spill] sm:$0xff] }
 0x944   : > { %7934 = vrot.lane.b32.xlu0 %v7045_v39, %s9485_s11  ;;  %8060 = vrot.lane.b32.xlu1 %v7076_v23, %s9479_s13  ;;  %v8126_v50 = vsel %vm301_vm2, %v14709_v2, %v16191_v56 }
 0x946   : > { %v8043_v14 = vpop.permute.xlu0 %8042  ;;  %v7663_v42 = vpop.permute.xlu1 %7662 }
 0x947   : > { %v8350_v37 = vsel %vm5994_vm9, %v8318_v29, %v8043_v14  ;;  %v8255_v44 = vsel %vm8237_vm4, %v8222_v19, %v7663_v42  ;;  %v7017_v42 = vld [vmem:[#allocation3 + $0x188] sm:$0xff] }
 0x948   : > { %7554 = vrot.lane.b32.xlu0 %v7045_v39, %s9470_s27  ;;  %7680 = vrot.lane.b32.xlu1 %v7076_v23, %s9484_s16  ;;  %v16192_v39 = vld [vmem:[#allocation83_spill] sm:$0xff] }
 0x949   : > { %9357 = vmatmul.mubr.msk.f32.gmra.mrb[22].mxu0 %vm8372_vm6, %v8350_v37  ;;  %v8158_v23 = vsel %vm245_vm0, %v8126_v50, %v16192_v39  ;;  %v7048_v37 = vld [vmem:[#allocation3 + $0x181] sm:$0xff] }
 0x94a   : > { %v7789_v54 = vpop.permute.xlu0 %7788  ;;  %v7409_v61 = vpop.permute.xlu1 %7408 }
 0x94b   : > { %v8286_v21 = vsel %vm5961_vm8, %v8254_v22, %v7789_v54  ;;  %v8191_v26 = vsel %vm8172_vm3, %v8158_v23, %v7409_v61 }
 0x94c   : > { %8062 = vrot.lane.b32.xlu0 %v7077_v27, %s9479_s13  ;;  %7682 = vrot.lane.b32.xlu1 %v7077_v27, %s9484_s16 }
 0x94e   : > { %v7791_v18 = vpop.permute.xlu0 %7790  ;;  %v7917_v49 = vpop.permute.xlu1 %7916 }
 0x94f   : > { %v8319_v8 = vsel %vm8302_vm5, %v8286_v21, %v7917_v49  ;;  %v8287_v34 = vsel %vm5961_vm8, %v8255_v44, %v7791_v18  ;;  %v7081_v44 = vld [vmem:[#allocation3 + $0x18a] sm:$0xff] }
 0x950   : > { %7808 = vrot.lane.b32.xlu0 %v7014_v10, %s9478_s12  ;;  %7428 = vrot.lane.b32.xlu1 %v7014_v10, %s9475_s7  ;;  %v16193_v10 = vld [vmem:[#allocation67_spill] sm:$0xff] }
 0x951   : > { %v8127_v30 = vsel %vm301_vm2, %v14723_v60, %v16193_v10 }
 0x952   : > { %v14994_v55 = vpop.permute.xlu0 %7410  ;;  %v7537_v11 = vpop.permute.xlu1 %7536  ;;  %v8159_v6 = vsel %vm245_vm0, %v8127_v30, %v16194_v33 }
 0x953   : > { %v8223_v14 = vsel %vm5928_vm7, %v8191_v26, %v7537_v11  ;;  %v8192_v38 = vsel %vm8172_vm3, %v8159_v6, %v14994_v55 }
 0x954   : > { %7810 = vrot.lane.b32.xlu0 %v7015_v7, %s9478_s12  ;;  %7936 = vrot.lane.b32.xlu1 %v7046_v47, %s9485_s11 }
 0x956   : > { %v7919_v25 = vpop.permute.xlu0 %7918  ;;  %v8045_v0 = vpop.permute.xlu1 %8044 }
 0x957   : > { %v8351_v16 = vsel %vm5994_vm9, %v8319_v8, %v8045_v0  ;;  %v8320_v43 = vsel %vm8302_vm5, %v8287_v34, %v7919_v25  ;;  %v7018_v34 = vld [vmem:[#allocation3 + $0x198] sm:$0xff] }
 0x958   : > { %7430 = vrot.lane.b32.xlu0 %v7015_v7, %s9475_s7  ;;  %7556 = vrot.lane.b32.xlu1 %v7046_v47, %s9470_s27  ;;  %v7049_v7 = vld [vmem:[#allocation3 + $0x189] sm:$0xff] }
 0x959   : > { %9359 = vmatprep.mubr.msk.f32.mxu0 %vm8372_vm6, %v8351_v16  ;;  %v7080_v47 = vld [vmem:[#allocation3 + $0x182] sm:$0xff] }
 0x95a   : > { %v7539_v35 = vpop.permute.xlu0 %7538  ;;  %v7665_v4 = vpop.permute.xlu1 %7664 }
 0x95b   : > { %v8256_v54 = vsel %vm8237_vm4, %v8223_v14, %v7665_v4  ;;  %v8224_v15 = vsel %vm5928_vm7, %v8192_v38, %v7539_v35  ;;  %v7082_v14 = vld [vmem:[#allocation3 + $0x19a] sm:$0xff] }
 0x95c   : > { %7938 = vrot.lane.b32.xlu0 %v7047_v57, %s9485_s11  ;;  %8064 = vrot.lane.b32.xlu1 %v7078_v62, %s9479_s13 }
 0x95e   : > { %v8047_v32 = vpop.permute.xlu0 %8046  ;;  %v7667_v12 = vpop.permute.xlu1 %7666 }
 0x95f   : > { %v8352_v36 = vsel %vm5994_vm9, %v8320_v43, %v8047_v32  ;;  %v8257_v60 = vsel %vm8237_vm4, %v8224_v15, %v7667_v12  ;;  %v7019_v43 = vld [vmem:[#allocation3 + $0x1a0] sm:$0xff] }
 0x960   : > { %7558 = vrot.lane.b32.xlu0 %v7047_v57, %s9470_s27  ;;  %7684 = vrot.lane.b32.xlu1 %v7078_v62, %s9484_s16 }
 0x961   : > { %9360 = vmatmul.mubr.msk.f32.gmra.mrb[24].mxu0 %vm8372_vm6, %v8352_v36  ;;  %v16195_v36 = vld [vmem:[#allocation50_spill] sm:$0xff] }
 0x962   : > { %v7793_v63 = vpop.permute.xlu0 %7792  ;;  %v15023_v53 = vpop.permute.xlu1 %7412 }
 0x963   : > { %v8288_v2 = vsel %vm5961_vm8, %v8256_v54, %v7793_v63  ;;  %v8128_v63 = vsel %vm301_vm2, %v14760_v40, %v16195_v36 }
 0x964   : > { %8066 = vrot.lane.b32.xlu0 %v7079_v31, %s9479_s13  ;;  %7686 = vrot.lane.b32.xlu1 %v7079_v31, %s9484_s16  ;;  %v16196_v31 = vld [vmem:[#allocation72_spill] sm:$0xff] }
 0x966   : > { %v7795_v20 = vpop.permute.xlu0 %7794  ;;  %v7921_v52 = vpop.permute.xlu1 %7920 }
 0x967   : > { %v8321_v27 = vsel %vm8302_vm5, %v8288_v2, %v7921_v52  ;;  %v8289_v21 = vsel %vm5961_vm8, %v8257_v60, %v7795_v20  ;;  %v8160_v20 = vsel %vm245_vm0, %v8128_v63, %v16196_v31  ;;  %v7050_v52 = vld [vmem:[#allocation3 + $0x199] sm:$0xff] }
 0x968   : > { %7812 = vrot.lane.b32.xlu0 %v7016_v1, %s9478_s12  ;;  %7432 = vrot.lane.b32.xlu1 %v7016_v1, %s9475_s7  ;;  %v7051_v1 = vld [vmem:[#allocation3 + $0x1a1] sm:$0xff]  ;;  %v8193_v56 = vsel %vm8172_vm3, %v8160_v20, %v15023_v53 }
 0x96a   : > { %v15035_v17 = vpop.permute.xlu0 %7414  ;;  %v15037_v29 = vpop.permute.xlu1 %7540 }
 0x96b   : > { %v8225_v23 = vsel %vm5928_vm7, %v8193_v56, %v15037_v29  ;;  %v16201_v56 = vld [vmem:[#allocation58_spill] sm:$0xff] }
 0x96c   : > { %7814 = vrot.lane.b32.xlu0 %v7017_v42, %s9478_s12  ;;  %7940 = vrot.lane.b32.xlu1 %v7048_v37, %s9485_s11 }
 0x96e   : > { %v7923_v18 = vpop.permute.xlu0 %7922  ;;  %v8049_v61 = vpop.permute.xlu1 %8048 }
 0x96f   : > { %v8353_v49 = vsel %vm5994_vm9, %v8321_v27, %v8049_v61  ;;  %v8322_v0 = vsel %vm8302_vm5, %v8289_v21, %v7923_v18  ;;  %v16197_v27 = vld [vmem:[#allocation69_spill] sm:$0xff]  ;;  %v16198_v18 = vld [vmem:[#allocation68_spill] sm:$0xff] }
 0x970   : > { %7434 = vrot.lane.b32.xlu0 %v7017_v42, %s9475_s7  ;;  %7560 = vrot.lane.b32.xlu1 %v7048_v37, %s9470_s27  ;;  %v7083_v42 = vld [vmem:[#allocation3 + $0x1a2] sm:$0xff]  ;;  %v8129_v29 = vsel %vm301_vm2, %v14774_v51, %v16197_v27 }
 0x971   : > { %9362 = vmatprep.mubr.msk.f32.mxu0 %vm8372_vm6, %v8353_v49  ;;  %v8161_v61 = vsel %vm245_vm0, %v8129_v29, %v16198_v18 }
 0x972   : > { %v15056_v45 = vpop.permute.xlu0 %7542  ;;  %v7669_v11 = vpop.permute.xlu1 %7668  ;;  %v8194_v49 = vsel %vm8172_vm3, %v8161_v61, %v15035_v17 }
 0x973   : > { %v8258_v26 = vsel %vm8237_vm4, %v8225_v23, %v7669_v11  ;;  %v8226_v33 = vsel %vm5928_vm7, %v8194_v49, %v15056_v45  ;;  %v8131_v23 = vsel %vm301_vm2, %v14821_v24, %v16201_v56 }
 0x974   : > { %v15060_v22 = vpop.f32.mrb[8].mxu0  ;;  %7942 = vrot.lane.b32.xlu0 %v7049_v7, %s9485_s11  ;;  %8068 = vrot.lane.b32.xlu1 %v7080_v47, %s9479_s13 }
 0x975   : > { %v8699_v55 = vsel %vm301_vm2, %v15060_v22, 0.0  ;;  %v8769_v8 = vmul.f32 %v15060_v22, %v15060_v22  ;;  %v15069_v25 = vpop.f32.mrb[9].mxu0 }
 0x976   : > { %v8698_v16 = vsel %vm301_vm2, %v15069_v25, 0.0  ;;  %v8768_v48 = vmul.f32 %v15069_v25, %v15069_v25  ;;  %v8051_v9 = vpop.permute.xlu0 %8050  ;;  %v7671_v59 = vpop.permute.xlu1 %7670 }
 0x977   : > { %v8801_v3 = vsel %vm301_vm2, %v8769_v8, 0.0  ;;  %v8700_v13 = vadd.f32 %v8699_v55, %v8698_v16  ;;  %v8354_v35 = vsel %vm5994_vm9, %v8322_v0, %v8051_v9  ;;  %v8259_v6 = vsel %vm8237_vm4, %v8226_v33, %v7671_v59 }
 0x978   : > { %v8800_v4 = vsel %vm301_vm2, %v8768_v48, 0.0  ;;  %7562 = vrot.lane.b32.xlu0 %v7049_v7, %s9470_s27  ;;  %7688 = vrot.lane.b32.xlu1 %v7080_v47, %s9484_s16 }
 0x979   : > { %v8802_v19 = vadd.f32 %v8801_v3, %v8800_v4  ;;  %9363 = vmatmul.mubr.msk.f32.gmra.mrb[26].mxu0 %vm8372_vm6, %v8354_v35 }
 0x97a   : > { %v7797_v57 = vpop.permute.xlu0 %7796  ;;  %v15082_v62 = vpop.permute.xlu1 %7416 }
 0x97b   : > { %v8290_v40 = vsel %vm5961_vm8, %v8258_v26, %v7797_v57 }
 0x97c   : > { %8070 = vrot.lane.b32.xlu0 %v7081_v44, %s9479_s13  ;;  %7690 = vrot.lane.b32.xlu1 %v7081_v44, %s9484_s16  ;;  %v16199_v44 = vld [vmem:[#allocation111_spill] sm:$0xff] }
 0x97e   : > { %v7799_v32 = vpop.permute.xlu0 %7798  ;;  %v7925_v12 = vpop.permute.xlu1 %7924 }
 0x97f   : > { %v8323_v37 = vsel %vm8302_vm5, %v8290_v40, %v7925_v12  ;;  %v8291_v38 = vsel %vm5961_vm8, %v8259_v6, %v7799_v32 }
 0x980   : > { %7816 = vrot.lane.b32.xlu0 %v7018_v34, %s9478_s12  ;;  %7818 = vrot.lane.b32.xlu1 %v7019_v43, %s9478_s12  ;;  %v16200_v34 = vld [vmem:[#allocation57_spill] sm:$0xff]  ;;  %s15536_s12 = scalar_lea.vmem %s15630_s5, %s9156_s8 }
 0x982   : > { %v7419_v50 = vpop.permute.xlu0 %7418  ;;  %v7545_v39 = vpop.permute.xlu1 %7544 }
 0x984   : > { %7944 = vrot.lane.b32.xlu0 %v7050_v52, %s9485_s11  ;;  %7946 = vrot.lane.b32.xlu1 %v7051_v1, %s9485_s11 }
 0x986   : > { %v7927_v54 = vpop.permute.xlu0 %7926  ;;  %v8053_v2 = vpop.permute.xlu1 %8052 }
 0x987   : > { %v8355_v53 = vsel %vm5994_vm9, %v8323_v37, %v8053_v2  ;;  %v8324_v15 = vsel %vm8302_vm5, %v8291_v38, %v7927_v54 }
 0x988   : > { %8072 = vrot.lane.b32.xlu0 %v7082_v14, %s9479_s13  ;;  %8074 = vrot.lane.b32.xlu1 %v7083_v42, %s9479_s13 }
 0x989   : > { %9365 = vmatprep.mubr.msk.f32.mxu0 %vm8372_vm6, %v8355_v53 }
 0x98a   : > { %v7547_v10 = vpop.permute.xlu0 %7546  ;;  %v7673_v30 = vpop.permute.xlu1 %7672 }
 0x98c   : > { %v15116_v51 = vpop.f32.mrb[10].mxu0 }
 0x98d   : > { %v15119_v11 = vpop.f32.mrb[11].mxu0  ;;  %v8771_v7 = vmul.f32 %v15116_v51, %v15116_v51  ;;  %v8703_v8 = vsel %vm301_vm2, %v15116_v51, 0.0 }
 0x98e   : > { %v8701_v17 = vsel %vm301_vm2, %v15119_v11, 0.0  ;;  %v8770_v47 = vmul.f32 %v15119_v11, %v15119_v11  ;;  %v8055_v45 = vpop.permute.xlu0 %8054  ;;  %v7675_v60 = vpop.permute.xlu1 %7674 }
 0x98f   : > { %v8702_v21 = vadd.f32 %v8701_v17, %v8700_v13  ;;  %v8356_v55 = vsel %vm5994_vm9, %v8324_v15, %v8055_v45  ;;  %v8805_v9 = vsel %vm301_vm2, %v8771_v7, 0.0  ;;  %v8130_v13 = vsel %vm301_vm2, %v14807_v46, %v16199_v44 }
 0x990   : > { %v8803_v0 = vsel %vm301_vm2, %v8770_v47, 0.0  ;;  %9366 = vmatmul.mubr.msk.f32.gmra.mrb[28].mxu0 %vm8372_vm6, %v8356_v55  ;;  %v8162_v43 = vsel %vm245_vm0, %v8130_v13, %v16200_v34 }
 0x991   : > { %v8804_v16 = vadd.f32 %v8803_v0, %v8802_v19  ;;  %v8704_v48 = vadd.f32 %v8703_v8, %v8702_v21  ;;  %v8195_v32 = vsel %vm8172_vm3, %v8162_v43, %v15082_v62  ;;  %v16202_v62 = vld [vmem:[#allocation102_spill] sm:$0xff]  ;;  %v16203_v21 = vld [vmem:[#allocation63_spill] sm:$0xff]  ;;  %v16204_v8 = vld [vmem:[#allocation73_spill] sm:$0xff] }
 0x992   : > { %v7801_v59 = vpop.permute.xlu0 %7800  ;;  %v7421_v3 = vpop.permute.xlu1 %7420  ;;  %v8227_v36 = vsel %vm5928_vm7, %v8195_v32, %v7545_v39  ;;  %v8163_v26 = vsel %vm245_vm0, %v8131_v23, %v16202_v62  ;;  %v8132_v55 = vsel %vm301_vm2, %v14854_v41, %v16203_v21  ;;  %v16205_v41 = vld [vmem:[#allocation19_spill] sm:$0xff] }
 0x993   : > { %v8806_v35 = vadd.f32 %v8805_v9, %v8804_v16  ;;  %v8260_v63 = vsel %vm8237_vm4, %v8227_v36, %v7673_v30  ;;  %v8196_v39 = vsel %vm8172_vm3, %v8163_v26, %v7419_v50  ;;  %v8164_v0 = vsel %vm245_vm0, %v8132_v55, %v16204_v8 }
 0x994   : > { %v8292_v31 = vsel %vm5961_vm8, %v8260_v63, %v7801_v59  ;;  %v8228_v42 = vsel %vm5928_vm7, %v8196_v39, %v7547_v10  ;;  %v8197_v16 = vsel %vm8172_vm3, %v8164_v0, %v7421_v3  ;;  %v8133_v43 = vsel %vm301_vm2, %v14868_v58, %v16205_v41  ;;  %v16206_v3 = vld [vmem:[#allocation125_spill] sm:$0xff] }
 0x995   : > { %v8261_v37 = vsel %vm8237_vm4, %v8228_v42, %v7675_v60  ;;  %v8165_v32 = vsel %vm245_vm0, %v8133_v43, %v16206_v3 }
 0x996   : > { %v7803_v4 = vpop.permute.xlu0 %7802  ;;  %v7929_v57 = vpop.permute.xlu1 %7928 }
 0x997   : > { %v8325_v20 = vsel %vm8302_vm5, %v8292_v31, %v7929_v57  ;;  %v8293_v2 = vsel %vm5961_vm8, %v8261_v37, %v7803_v4 }
 0x99a   : > { %v7423_v12 = vpop.permute.xlu0 %7422  ;;  %v7549_v19 = vpop.permute.xlu1 %7548 }
 0x99b   : > { %v8229_v59 = vsel %vm5928_vm7, %v8197_v16, %v7549_v19  ;;  %v8198_v19 = vsel %vm8172_vm3, %v8165_v32, %v7423_v12 }
 0x99e   : > { %v7931_v52 = vpop.permute.xlu0 %7930  ;;  %v8057_v1 = vpop.permute.xlu1 %8056 }
 0x99f   : > { %v8357_v46 = vsel %vm5994_vm9, %v8325_v20, %v8057_v1  ;;  %v8326_v24 = vsel %vm8302_vm5, %v8293_v2, %v7931_v52 }
 0x9a0   : > { %9368 = vmatprep.mubr.msk.f32.mxu0 %vm8372_vm6, %v8357_v46 }
 0x9a2   : > { %v7551_v40 = vpop.permute.xlu0 %7550  ;;  %v7677_v14 = vpop.permute.xlu1 %7676 }
 0x9a3   : > { %v8230_v31 = vsel %vm5928_vm7, %v8198_v19, %v7551_v40 }
 0x9a4   : > { %v15155_v54 = vpop.f32.mrb[12].mxu0 }
 0x9a5   : > { %v15158_v53 = vpop.f32.mrb[13].mxu0  ;;  %v8773_v27 = vmul.f32 %v15155_v54, %v15155_v54  ;;  %v8707_v30 = vsel %vm301_vm2, %v15155_v54, 0.0 }
 0x9a6   : > { %v8705_v50 = vsel %vm301_vm2, %v15158_v53, 0.0  ;;  %v8772_v29 = vmul.f32 %v15158_v53, %v15158_v53  ;;  %v8059_v18 = vpop.permute.xlu0 %8058  ;;  %v7679_v61 = vpop.permute.xlu1 %7678 }
 0x9a7   : > { %v8706_v49 = vadd.f32 %v8705_v50, %v8704_v48  ;;  %v8358_v10 = vsel %vm5994_vm9, %v8326_v24, %v8059_v18  ;;  %v8809_v15 = vsel %vm301_vm2, %v8773_v27, 0.0  ;;  %v8263_v20 = vsel %vm8237_vm4, %v8230_v31, %v7679_v61 }
 0x9a8   : > { %v8807_v33 = vsel %vm301_vm2, %v8772_v29, 0.0  ;;  %9369 = vmatmul.mubr.msk.f32.gmra.mrb[30].mxu0 %vm8372_vm6, %v8358_v10 }
 0x9a9   : > { %v8808_v6 = vadd.f32 %v8807_v33, %v8806_v35  ;;  %v8708_v38 = vadd.f32 %v8707_v30, %v8706_v49  ;;  %v8262_v35 = vsel %vm8237_vm4, %v8229_v59, %v7677_v14  ;;  %v16207_v49 = vld [vmem:[#allocation56_spill] sm:$0xff]  ;;  %v16208_v30 = vld [vmem:[#allocation42_spill] sm:$0xff] }
 0x9aa   : > { %v7805_v7 = vpop.permute.xlu0 %7804  ;;  %v7425_v17 = vpop.permute.xlu1 %7424  ;;  %v8134_v10 = vsel %vm301_vm2, %v14901_v5, %v16207_v49  ;;  %v16209_v5 = vld [vmem:[#allocation39_spill] sm:$0xff] }
 0x9ab   : > { %v8810_v47 = vadd.f32 %v8809_v15, %v8808_v6  ;;  %v8294_v4 = vsel %vm5961_vm8, %v8262_v35, %v7805_v7  ;;  %v8166_v33 = vsel %vm245_vm0, %v8134_v10, %v16208_v30  ;;  %v8135_v0 = vsel %vm301_vm2, %v14915_v28, %v16209_v5 }
 0x9ac   : > { %v8199_v6 = vsel %vm8172_vm3, %v8166_v33, %v7425_v17  ;;  %v16210_v17 = vld [vmem:[#allocation28_spill] sm:$0xff]  ;;  %v6824_v33 = vld [vmem:[#allocation3 + $0x158] sm:$0xff] }
 0x9ad   : > { %v8167_v16 = vsel %vm245_vm0, %v8135_v0, %v16210_v17 }
 0x9ae   : > { %v7807_v45 = vpop.permute.xlu0 %7806  ;;  %v7933_v60 = vpop.permute.xlu1 %7932 }
 0x9af   : > { %v8327_v57 = vsel %vm8302_vm5, %v8294_v4, %v7933_v60  ;;  %v8295_v1 = vsel %vm5961_vm8, %v8263_v20, %v7807_v45 }
 0x9b2   : > { %v7427_v48 = vpop.permute.xlu0 %7426  ;;  %v7553_v9 = vpop.permute.xlu1 %7552 }
 0x9b3   : > { %v8231_v7 = vsel %vm5928_vm7, %v8199_v6, %v7553_v9  ;;  %v8200_v9 = vsel %vm8172_vm3, %v8167_v16, %v7427_v48 }
 0x9b6   : > { %v7935_v44 = vpop.permute.xlu0 %7934  ;;  %v8061_v13 = vpop.permute.xlu1 %8060 }
 0x9b7   : > { %v8359_v34 = vsel %vm5994_vm9, %v8327_v57, %v8061_v13  ;;  %v8328_v58 = vsel %vm8302_vm5, %v8295_v1, %v7935_v44 }
 0x9b8   : > { %9371 = vmatprep.mubr.msk.f32.mxu0 %vm8372_vm6, %v8359_v34 }
 0x9ba   : > { %v7555_v36 = vpop.permute.xlu0 %7554  ;;  %v7681_v63 = vpop.permute.xlu1 %7680 }
 0x9bb   : > { %v8232_v4 = vsel %vm5928_vm7, %v8200_v9, %v7555_v36 }
 0x9bc   : > { %v15193_v52 = vpop.f32.mrb[14].mxu0 }
 0x9bd   : > { %v15196_v46 = vpop.f32.mrb[15].mxu0  ;;  %v8775_v56 = vmul.f32 %v15193_v52, %v15193_v52  ;;  %v8711_v14 = vsel %vm301_vm2, %v15193_v52, 0.0 }
 0x9be   : > { %v8709_v12 = vsel %vm301_vm2, %v15196_v46, 0.0  ;;  %v8774_v23 = vmul.f32 %v15196_v46, %v15196_v46  ;;  %v8063_v62 = vpop.permute.xlu0 %8062  ;;  %v7683_v26 = vpop.permute.xlu1 %7682 }
 0x9bf   : > { %v8710_v39 = vadd.f32 %v8709_v12, %v8708_v38  ;;  %v8360_v40 = vsel %vm5994_vm9, %v8328_v58, %v8063_v62  ;;  %v8813_v24 = vsel %vm301_vm2, %v8775_v56, 0.0  ;;  %v8265_v57 = vsel %vm8237_vm4, %v8232_v4, %v7683_v26 }
 0x9c0   : > { %v8811_v42 = vsel %vm301_vm2, %v8774_v23, 0.0  ;;  %9372 = vmatmul.mubr.msk.f32.gmra.mrb[32].mxu0 %vm8372_vm6, %v8360_v40  ;;  %v16211_v40 = vld [vmem:[#allocation112_spill] sm:$0xff] }
 0x9c1   : > { %v8812_v37 = vadd.f32 %v8811_v42, %v8810_v47  ;;  %v8712_v2 = vadd.f32 %v8711_v14, %v8710_v39  ;;  %v8264_v47 = vsel %vm8237_vm4, %v8231_v7, %v7681_v63  ;;  %v6823_v39 = vld [vmem:[#allocation3 + $0x150] sm:$0xff]  ;;  %v16212_v42 = vld [vmem:[#allocation114_spill] sm:$0xff]  ;;  %v16213_v7 = vld [vmem:[#allocation81_spill] sm:$0xff] }
 0x9c2   : > { %v7809_v27 = vpop.permute.xlu0 %7808  ;;  %v7429_v50 = vpop.permute.xlu1 %7428  ;;  %v8136_v14 = vsel %vm301_vm2, %v6823_v39, %v16211_v40  ;;  %v16218_v39 = vld [vmem:[#allocation85_spill] sm:$0xff] }
 0x9c3   : > { %v8814_v29 = vadd.f32 %v8813_v24, %v8812_v37  ;;  %v8296_v45 = vsel %vm5961_vm8, %v8264_v47, %v7809_v27  ;;  %v8168_v37 = vsel %vm245_vm0, %v8136_v14, %v16212_v42  ;;  %v8137_v47 = vsel %vm301_vm2, %v6824_v33, %v16213_v7 }
 0x9c6   : > { %v7811_v18 = vpop.permute.xlu0 %7810  ;;  %v7937_v61 = vpop.permute.xlu1 %7936 }
 0x9c7   : > { %v8329_v60 = vsel %vm8302_vm5, %v8296_v45, %v7937_v61  ;;  %v8297_v13 = vsel %vm5961_vm8, %v8265_v57, %v7811_v18 }
 0x9ca   : > { %v7431_v38 = vpop.permute.xlu0 %7430  ;;  %v7557_v15 = vpop.permute.xlu1 %7556 }
 0x9ce   : > { %v7939_v21 = vpop.permute.xlu0 %7938  ;;  %v8065_v55 = vpop.permute.xlu1 %8064 }
 0x9cf   : > { %v8361_v8 = vsel %vm5994_vm9, %v8329_v60, %v8065_v55  ;;  %v8330_v28 = vsel %vm8302_vm5, %v8297_v13, %v7939_v21 }
 0x9d0   : > { %9374 = vmatprep.mubr.msk.f32.mxu0 %vm8372_vm6, %v8361_v8 }
 0x9d2   : > { %v7559_v59 = vpop.permute.xlu0 %7558  ;;  %v7685_v35 = vpop.permute.xlu1 %7684 }
 0x9d4   : > { %v15231_v44 = vpop.f32.mrb[16].mxu0 }
 0x9d5   : > { %v15234_v34 = vpop.f32.mrb[17].mxu0  ;;  %v8777_v41 = vmul.f32 %v15231_v44, %v15231_v44  ;;  %v8715_v63 = vsel %vm301_vm2, %v15231_v44, 0.0 }
 0x9d6   : > { %v8713_v48 = vsel %vm301_vm2, %v15234_v34, 0.0  ;;  %v8776_v43 = vmul.f32 %v15234_v34, %v15234_v34  ;;  %v8067_v3 = vpop.permute.xlu0 %8066  ;;  %v7687_v32 = vpop.permute.xlu1 %7686 }
 0x9d7   : > { %v8714_v19 = vadd.f32 %v8713_v48, %v8712_v2  ;;  %v8362_v36 = vsel %vm5994_vm9, %v8330_v28, %v8067_v3  ;;  %v8817_v58 = vsel %vm301_vm2, %v8777_v41, 0.0  ;;  %v8201_v2 = vsel %vm8172_vm3, %v8168_v37, %v7429_v50  ;;  %v16214_v50 = vld [vmem:[#allocation55_spill] sm:$0xff] }
 0x9d8   : > { %v8815_v31 = vsel %vm301_vm2, %v8776_v43, 0.0  ;;  %9375 = vmatmul.mubr.msk.f32.gmra.mrb[34].mxu0 %vm8372_vm6, %v8362_v36  ;;  %v8169_v45 = vsel %vm245_vm0, %v8137_v47, %v16214_v50  ;;  %v6825_v36 = vld [vmem:[#allocation3 + $0x168] sm:$0xff] }
 0x9d9   : > { %v8816_v20 = vadd.f32 %v8815_v31, %v8814_v29  ;;  %v8716_v1 = vadd.f32 %v8715_v63, %v8714_v19  ;;  %v8233_v29 = vsel %vm5928_vm7, %v8201_v2, %v7557_v15  ;;  %v8202_v15 = vsel %vm8172_vm3, %v8169_v45, %v7431_v38  ;;  %v6826_v63 = vld [vmem:[#allocation3 + $0x170] sm:$0xff] }
 0x9da   : > { %v7813_v56 = vpop.permute.xlu0 %7812  ;;  %v7433_v12 = vpop.permute.xlu1 %7432  ;;  %v8266_v18 = vsel %vm8237_vm4, %v8233_v29, %v7685_v35  ;;  %v8234_v55 = vsel %vm5928_vm7, %v8202_v15, %v7559_v59 }
 0x9db   : > { %v8818_v23 = vadd.f32 %v8817_v58, %v8816_v20  ;;  %v8298_v61 = vsel %vm5961_vm8, %v8266_v18, %v7813_v56  ;;  %v8267_v8 = vsel %vm8237_vm4, %v8234_v55, %v7687_v32  ;;  %v16215_v20 = vld [vmem:[#allocation65_spill] sm:$0xff]  ;;  %v16216_v58 = vld [vmem:[#allocation18_spill] sm:$0xff] }
 0x9dc   : > { %v8139_v56 = vsel %vm301_vm2, %v6826_v63, %v16216_v58 }
 0x9de   : > { %v7815_v62 = vpop.permute.xlu0 %7814  ;;  %v7941_v26 = vpop.permute.xlu1 %7940 }
 0x9df   : > { %v8331_v49 = vsel %vm8302_vm5, %v8298_v61, %v7941_v26  ;;  %v8299_v0 = vsel %vm5961_vm8, %v8267_v8, %v7815_v62  ;;  %v16217_v62 = vld [vmem:[#allocation139_spill] sm:$0xff] }
 0x9e2   : > { %v7435_v24 = vpop.permute.xlu0 %7434  ;;  %v7561_v27 = vpop.permute.xlu1 %7560 }
 0x9e6   : > { %v7943_v10 = vpop.permute.xlu0 %7942  ;;  %v8069_v30 = vpop.permute.xlu1 %8068 }
 0x9e7   : > { %v8363_v6 = vsel %vm5994_vm9, %v8331_v49, %v8069_v30  ;;  %v8332_v16 = vsel %vm8302_vm5, %v8299_v0, %v7943_v10 }
 0x9e8   : > { %9377 = vmatprep.mubr.msk.f32.mxu0 %vm8372_vm6, %v8363_v6 }
 0x9ea   : > { %v7563_v60 = vpop.permute.xlu0 %7562  ;;  %v7689_v21 = vpop.permute.xlu1 %7688 }
 0x9ec   : > { %v15267_v5 = vpop.f32.mrb[18].mxu0 }
 0x9ed   : > { %v15270_v17 = vpop.f32.mrb[19].mxu0  ;;  %v8779_v9 = vmul.f32 %v15267_v5, %v15267_v5  ;;  %v8719_v28 = vsel %vm301_vm2, %v15267_v5, 0.0 }
 0x9ee   : > { %v8717_v38 = vsel %vm301_vm2, %v15270_v17, 0.0  ;;  %v8778_v35 = vmul.f32 %v15270_v17, %v15270_v17  ;;  %v8071_v59 = vpop.permute.xlu0 %8070  ;;  %v7691_v4 = vpop.permute.xlu1 %7690 }
 0x9ef   : > { %v8718_v57 = vadd.f32 %v8717_v38, %v8716_v1  ;;  %v8364_v13 = vsel %vm5994_vm9, %v8332_v16, %v8071_v59  ;;  %v8821_v3 = vsel %vm301_vm2, %v8779_v9, 0.0  ;;  %v8138_v1 = vsel %vm301_vm2, %v6825_v36, %v16215_v20 }
 0x9f0   : > { %v8819_v41 = vsel %vm301_vm2, %v8778_v35, 0.0  ;;  %9378 = vmatmul.mubr.msk.f32.gmra.mrb[36].mxu0 %vm8372_vm6, %v8364_v13  ;;  %v8170_v26 = vsel %vm245_vm0, %v8138_v1, %v16217_v62 }
 0x9f1   : > { %v8820_v48 = vadd.f32 %v8819_v41, %v8818_v23  ;;  %v8720_v43 = vadd.f32 %v8719_v28, %v8718_v57  ;;  %v8171_v23 = vsel %vm245_vm0, %v8139_v56, %v16218_v39  ;;  %v8203_v40 = vsel %vm8172_vm3, %v8170_v26, %v7433_v12 }
 0x9f2   : > { %v7817_v32 = vpop.permute.xlu0 %7816  ;;  %v7819_v19 = vpop.permute.xlu1 %7818  ;;  %v8204_v14 = vsel %vm8172_vm3, %v8171_v23, %v7435_v24  ;;  %v8235_v2 = vsel %vm5928_vm7, %v8203_v40, %v7561_v27 }
 0x9f3   : > { %v8822_v31 = vadd.f32 %v8821_v3, %v8820_v48  ;;  %v8236_v29 = vsel %vm5928_vm7, %v8204_v14, %v7563_v60  ;;  %v8268_v18 = vsel %vm8237_vm4, %v8235_v2, %v7689_v21 }
 0x9f4   : > { %v8269_v61 = vsel %vm8237_vm4, %v8236_v29, %v7691_v4  ;;  %v8300_v49 = vsel %vm5961_vm8, %v8268_v18, %v7817_v32 }
 0x9f5   : > { %v8301_v10 = vsel %vm5961_vm8, %v8269_v61, %v7819_v19 }
 0x9f6   : > { %v7945_v42 = vpop.permute.xlu0 %7944  ;;  %v7947_v37 = vpop.permute.xlu1 %7946 }
 0x9f7   : > { %v8333_v30 = vsel %vm8302_vm5, %v8300_v49, %v7945_v42  ;;  %v8334_v12 = vsel %vm8302_vm5, %v8301_v10, %v7947_v37 }
 0x9fa   : > { %v8073_v33 = vpop.permute.xlu0 %8072  ;;  %v8075_v24 = vpop.permute.xlu1 %8074 }
 0x9fb   : > { %v8365_v6 = vsel %vm5994_vm9, %v8333_v30, %v8073_v33  ;;  %v8366_v27 = vsel %vm5994_vm9, %v8334_v12, %v8075_v24 }
 0x9fc   : > { %9380 = vmatprep.mubr.msk.f32.mxu0 %vm8372_vm6, %v8365_v6 }
 0x9fd   : > { %9381 = vmatmul.mubr.msk.f32.gmra.mrb[38].mxu0 %vm8372_vm6, %v8366_v27 }
 0xa04   : > { %v15307_v7 = vpop.f32.mrb[20].mxu0 }
 0xa05   : > { %v15309_v47 = vpop.f32.mrb[21].mxu0  ;;  %v8781_v50 = vmul.f32 %v15307_v7, %v15307_v7  ;;  %v8723_v21 = vsel %vm301_vm2, %v15307_v7, 0.0 }
 0xa06   : > { %v8721_v45 = vsel %vm301_vm2, %v15309_v47, 0.0  ;;  %v8780_v15 = vmul.f32 %v15309_v47, %v15309_v47 }
 0xa07   : > { %v8722_v60 = vadd.f32 %v8721_v45, %v8720_v43  ;;  %v8825_v16 = vsel %vm301_vm2, %v8781_v50, 0.0 }
 0xa08   : > { %v8823_v55 = vsel %vm301_vm2, %v8780_v15, 0.0 }
 0xa09   : > { %v8824_v8 = vadd.f32 %v8823_v55, %v8822_v31  ;;  %v8724_v0 = vadd.f32 %v8723_v21, %v8722_v60 }
 0xa0b   : > { %v8826_v9 = vadd.f32 %v8825_v16, %v8824_v8 }
 0xa1c   : > { %v15321_v38 = vpop.f32.mrb[22].mxu0 }
 0xa1d   : > { %v15323_v35 = vpop.f32.mrb[23].mxu0  ;;  %v8783_v59 = vmul.f32 %v15321_v38, %v15321_v38  ;;  %v8727_v28 = vsel %vm301_vm2, %v15321_v38, 0.0 }
 0xa1e   : > { %v8725_v4 = vsel %vm301_vm2, %v15323_v35, 0.0  ;;  %v8782_v57 = vmul.f32 %v15323_v35, %v15323_v35 }
 0xa1f   : > { %v8726_v13 = vadd.f32 %v8725_v4, %v8724_v0  ;;  %v8829_v3 = vsel %vm301_vm2, %v8783_v59, 0.0 }
 0xa20   : > { %v8827_v41 = vsel %vm301_vm2, %v8782_v57, 0.0 }
 0xa21   : > { %v8828_v48 = vadd.f32 %v8827_v41, %v8826_v9  ;;  %v8728_v43 = vadd.f32 %v8727_v28, %v8726_v13 }
 0xa23   : > { %v8830_v32 = vadd.f32 %v8829_v3, %v8828_v48 }
 0xa34   : > { %v15335_v19 = vpop.f32.mrb[24].mxu0 }
 0xa35   : > { %v15337_v36 = vpop.f32.mrb[25].mxu0  ;;  %v8785_v63 = vmul.f32 %v15335_v19, %v15335_v19  ;;  %v8731_v58 = vsel %vm301_vm2, %v15335_v19, 0.0 }
 0xa36   : > { %v8729_v31 = vsel %vm301_vm2, %v15337_v36, 0.0  ;;  %v8784_v20 = vmul.f32 %v15337_v36, %v15337_v36 }
 0xa37   : > { %v8730_v1 = vadd.f32 %v8729_v31, %v8728_v43  ;;  %v8833_v39 = vsel %vm301_vm2, %v8785_v63, 0.0 }
 0xa38   : > { %v8831_v56 = vsel %vm301_vm2, %v8784_v20, 0.0 }
 0xa39   : > { %v8832_v62 = vadd.f32 %v8831_v56, %v8830_v32  ;;  %v8732_v26 = vadd.f32 %v8731_v58, %v8730_v1 }
 0xa3b   : > { %v8834_v23 = vadd.f32 %v8833_v39, %v8832_v62 }
 0xa4c   : > { %v15349_v40 = vpop.f32.mrb[26].mxu0 }
 0xa4d   : > { %v15351_v14 = vpop.f32.mrb[27].mxu0  ;;  %v8787_v42 = vmul.f32 %v15349_v40, %v15349_v40  ;;  %v8735_v18 = vsel %vm301_vm2, %v15349_v40, 0.0 }
 0xa4e   : > { %v8733_v37 = vsel %vm301_vm2, %v15351_v14, 0.0  ;;  %v8786_v2 = vmul.f32 %v15351_v14, %v15351_v14 }
 0xa4f   : > { %v8734_v29 = vadd.f32 %v8733_v37, %v8732_v26  ;;  %v8837_v30 = vsel %vm301_vm2, %v8787_v42, 0.0 }
 0xa50   : > { %v8835_v61 = vsel %vm301_vm2, %v8786_v2, 0.0 }
 0xa51   : > { %v8836_v49 = vadd.f32 %v8835_v61, %v8834_v23  ;;  %v8736_v10 = vadd.f32 %v8735_v18, %v8734_v29 }
 0xa53   : > { %v8838_v12 = vadd.f32 %v8837_v30, %v8836_v49 }
 0xa63   : > { %v15363_v33 = vpop.f32.mrb[28].mxu0 }
 0xa64   : > { %v15365_v24 = vpop.f32.mrb[29].mxu0  ;;  %v8789_v6 = vmul.f32 %v15363_v33, %v15363_v33  ;;  %v8739_v15 = vsel %vm301_vm2, %v15363_v33, 0.0 }
 0xa65   : > { %v8737_v27 = vsel %vm301_vm2, %v15365_v24, 0.0  ;;  %v8788_v50 = vmul.f32 %v15365_v24, %v15365_v24 }
 0xa66   : > { %v8738_v45 = vadd.f32 %v8737_v27, %v8736_v10  ;;  %v8841_v8 = vsel %vm301_vm2, %v8789_v6, 0.0 }
 0xa67   : > { %v8839_v60 = vsel %vm301_vm2, %v8788_v50, 0.0 }
 0xa68   : > { %v8840_v21 = vadd.f32 %v8839_v60, %v8838_v12  ;;  %v8740_v55 = vadd.f32 %v8739_v15, %v8738_v45 }
 0xa6a   : > { %v8842_v0 = vadd.f32 %v8841_v8, %v8840_v21 }
 0xa7b   : > { %v15377_v16 = vpop.f32.mrb[30].mxu0 }
 0xa7c   : > { %v15379_v9 = vpop.f32.mrb[31].mxu0  ;;  %v8791_v59 = vmul.f32 %v15377_v16, %v15377_v16  ;;  %v8743_v28 = vsel %vm301_vm2, %v15377_v16, 0.0 }
 0xa7d   : > { %v8741_v4 = vsel %vm301_vm2, %v15379_v9, 0.0  ;;  %v8790_v57 = vmul.f32 %v15379_v9, %v15379_v9 }
 0xa7e   : > { %v8742_v13 = vadd.f32 %v8741_v4, %v8740_v55  ;;  %v8845_v3 = vsel %vm301_vm2, %v8791_v59, 0.0 }
 0xa7f   : > { %v8843_v41 = vsel %vm301_vm2, %v8790_v57, 0.0 }
 0xa80   : > { %v8844_v48 = vadd.f32 %v8843_v41, %v8842_v0  ;;  %v8744_v43 = vadd.f32 %v8743_v28, %v8742_v13 }
 0xa82   : > { %v8846_v32 = vadd.f32 %v8845_v3, %v8844_v48 }
 0xa93   : > { %v15391_v63 = vpop.f32.mrb[32].mxu0 }
 0xa94   : > { %v15393_v31 = vpop.f32.mrb[33].mxu0  ;;  %v8793_v20 = vmul.f32 %v15391_v63, %v15391_v63  ;;  %v8747_v62 = vsel %vm301_vm2, %v15391_v63, 0.0 }
 0xa95   : > { %v8745_v1 = vsel %vm301_vm2, %v15393_v31, 0.0  ;;  %v8792_v58 = vmul.f32 %v15393_v31, %v15393_v31 }
 0xa96   : > { %v8746_v56 = vadd.f32 %v8745_v1, %v8744_v43  ;;  %v8849_v42 = vsel %vm301_vm2, %v8793_v20, 0.0 }
 0xa97   : > { %v8847_v26 = vsel %vm301_vm2, %v8792_v58, 0.0 }
 0xa98   : > { %v8848_v39 = vadd.f32 %v8847_v26, %v8846_v32  ;;  %v8748_v23 = vadd.f32 %v8747_v62, %v8746_v56 }
 0xa9a   : > { %v8850_v37 = vadd.f32 %v8849_v42, %v8848_v39 }
 0xaab   : > { %v15405_v2 = vpop.f32.mrb[34].mxu0 }
 0xaac   : > { %v15407_v29 = vpop.f32.mrb[35].mxu0  ;;  %v8795_v18 = vmul.f32 %v15405_v2, %v15405_v2  ;;  %v8751_v30 = vsel %vm301_vm2, %v15405_v2, 0.0 }
 0xaad   : > { %v8749_v61 = vsel %vm301_vm2, %v15407_v29, 0.0  ;;  %v8794_v49 = vmul.f32 %v15407_v29, %v15407_v29 }
 0xaae   : > { %v8750_v10 = vadd.f32 %v8749_v61, %v8748_v23  ;;  %v8853_v50 = vsel %vm301_vm2, %v8795_v18, 0.0 }
 0xaaf   : > { %v8851_v12 = vsel %vm301_vm2, %v8794_v49, 0.0 }
 0xab0   : > { %v8852_v6 = vadd.f32 %v8851_v12, %v8850_v37  ;;  %v8752_v27 = vadd.f32 %v8751_v30, %v8750_v10 }
 0xab2   : > { %v8854_v45 = vadd.f32 %v8853_v50, %v8852_v6 }
 0xac3   : > { %v15419_v15 = vpop.f32.mrb[36].mxu0 }
 0xac4   : > { %v15421_v60 = vpop.f32.mrb[37].mxu0  ;;  %v8797_v21 = vmul.f32 %v15419_v15, %v15419_v15  ;;  %v8755_v59 = vsel %vm301_vm2, %v15419_v15, 0.0 }
 0xac5   : > { %v8753_v55 = vsel %vm301_vm2, %v15421_v60, 0.0  ;;  %v8796_v8 = vmul.f32 %v15421_v60, %v15421_v60 }
 0xac6   : > { %v8754_v0 = vadd.f32 %v8753_v55, %v8752_v27  ;;  %v8857_v28 = vsel %vm301_vm2, %v8797_v21, 0.0 }
 0xac7   : > { %v8855_v4 = vsel %vm301_vm2, %v8796_v8, 0.0 }
 0xac8   : > { %v8856_v57 = vadd.f32 %v8855_v4, %v8854_v45  ;;  %v8756_v13 = vadd.f32 %v8755_v59, %v8754_v0 }
 0xaca   : > { %v8858_v41 = vadd.f32 %v8857_v28, %v8856_v57 }
 0xad0   : > { %v15433_v48 = vpop.f32.mrb[38].mxu0 }
 0xad1   : > { %v15435_v43 = vpop.f32.mrb[39].mxu0  ;;  %v8799_v3 = vmul.f32 %v15433_v48, %v15433_v48  ;;  %v8759_v58 = vsel %vm301_vm2, %v15433_v48, 0.0 }
 0xad2   : > { %v8757_v32 = vsel %vm301_vm2, %v15435_v43, 0.0  ;;  %v8798_v20 = vmul.f32 %v15435_v43, %v15435_v43 }
 0xad3   : > { %v8758_v1 = vadd.f32 %v8757_v32, %v8756_v13  ;;  %v8861_v39 = vsel %vm301_vm2, %v8799_v3, 0.0 }
 0xad4   : > { %v8859_v56 = vsel %vm301_vm2, %v8798_v20, 0.0 }
 0xad5   : > { %v8760_v62 = vadd.f32 %v8759_v58, %v8758_v1  ;;  %v8860_v26 = vadd.f32 %v8859_v56, %v8858_v41 }
 0xad7   : > { %v8761_v23 = vrot.slane %v8760_v62, 4  ;;  %v8862_v42 = vadd.f32 %v8861_v39, %v8860_v26 }
 0xad9   : > { %v8762_v37 = vadd.f32 %v8761_v23, %v8760_v62  ;;  %v8863_v18 = vrot.slane %v8862_v42, 4 }
 0xadb   : > { %v8763_v61 = vrot.slane %v8762_v37, 2  ;;  %v8864_v49 = vadd.f32 %v8863_v18, %v8862_v42 }
 0xadd   : > { %v8764_v10 = vadd.f32 %v8763_v61, %v8762_v37  ;;  %v8865_v30 = vrot.slane %v8864_v49, 2 }
 0xadf   : > { %v8765_v12 = vrot.slane %v8764_v10, 1  ;;  %v8866_v6 = vadd.f32 %v8865_v30, %v8864_v49 }
 0xae1   : > { %v8766_v27 = vadd.f32 %v8765_v12, %v8764_v10  ;;  %v8867_v50 = vrot.slane %v8866_v6, 1 }
 0xae3   : > { %v15447_v45 = vmul.f32 0.00390625, %v8766_v27  ;;  %v8868_v21 = vadd.f32 %v8867_v50, %v8866_v6 }
 0xae5   : > { %v8869_v55 = vmul.f32 0.00390625, %v8868_v21  ;;  %v8870_v8 = vmul.f32 %v15447_v45, %v15447_v45  ;;  %v8872_v0 = vsub.f32 %v15069_v25, %v15447_v45  ;;  %v8873_v59 = vsub.f32 %v15060_v22, %v15447_v45 }
 0xae6   : > { %v8874_v4 = vsub.f32 %v15119_v11, %v15447_v45  ;;  %v8875_v57 = vsub.f32 %v15116_v51, %v15447_v45  ;;  %v8876_v13 = vsub.f32 %v15158_v53, %v15447_v45  ;;  %v8877_v28 = vsub.f32 %v15155_v54, %v15447_v45 }
 0xae7   : > { %v8871_v41 = vsub.f32 %v8869_v55, %v8870_v8  ;;  %v8878_v3 = vsub.f32 %v15196_v46, %v15447_v45  ;;  %v8879_v25 = vsub.f32 %v15193_v52, %v15447_v45  ;;  %v8880_v22 = vsub.f32 %v15234_v34, %v15447_v45 }
 0xae8   : > { %v8881_v11 = vsub.f32 %v15231_v44, %v15447_v45  ;;  %v8882_v51 = vsub.f32 %v15270_v17, %v15447_v45  ;;  %v8883_v53 = vsub.f32 %v15267_v5, %v15447_v45  ;;  %v8884_v54 = vsub.f32 %v15309_v47, %v15447_v45 }
 0xae9   : > { %v8885_v46 = vsub.f32 %v15307_v7, %v15447_v45  ;;  %v8886_v52 = vsub.f32 %v15323_v35, %v15447_v45  ;;  %v8887_v34 = vsub.f32 %v15321_v38, %v15447_v45  ;;  %v8888_v44 = vsub.f32 %v15337_v36, %v15447_v45 }
 0xaea   : > { %v8889_v17 = vsub.f32 %v15335_v19, %v15447_v45  ;;  %v8890_v5 = vsub.f32 %v15351_v14, %v15447_v45  ;;  %v8891_v47 = vsub.f32 %v15349_v40, %v15447_v45  ;;  %v8892_v7 = vsub.f32 %v15365_v24, %v15447_v45 }
 0xaeb   : > { %v8893_v35 = vsub.f32 %v15363_v33, %v15447_v45  ;;  %v8894_v38 = vsub.f32 %v15379_v9, %v15447_v45  ;;  %v8895_v36 = vsub.f32 %v15377_v16, %v15447_v45  ;;  %v8896_v19 = vsub.f32 %v15393_v31, %v15447_v45 }
 0xaec   : > { %v8897_v14 = vsub.f32 %v15391_v63, %v15447_v45  ;;  %v8898_v40 = vsub.f32 %v15407_v29, %v15447_v45  ;;  %v8899_v24 = vsub.f32 %v15405_v2, %v15447_v45  ;;  %v8900_v33 = vsub.f32 %v15421_v60, %v15447_v45 }
 0xaed   : > { %v8901_v9 = vsub.f32 %v15419_v15, %v15447_v45  ;;  %v8902_v16 = vsub.f32 %v15435_v43, %v15447_v45  ;;  %v8903_v31 = vsub.f32 %v15433_v48, %v15447_v45  ;;  %v8904_v32 = vadd.f32 1e-05, %v8871_v41 }
 0xaef   : > { %9437 = vrsqrt.f32 %v8904_v32 }
 0xaf9   : > { %v9438_v63 = vpop.eup %9437 }
 0xafa   : > { %v8906_v20 = vmul.f32 %v9438_v63, %v8872_v0  ;;  %v8907_v29 = vmul.f32 %v9438_v63, %v8873_v59  ;;  %v8908_v1 = vmul.f32 %v9438_v63, %v8874_v4  ;;  %v8909_v58 = vmul.f32 %v9438_v63, %v8875_v57 }
 0xafb   : > { %v8910_v2 = vmul.f32 %v9438_v63, %v8876_v13  ;;  %v8911_v56 = vmul.f32 %v9438_v63, %v8877_v28  ;;  %v8912_v62 = vmul.f32 %v9438_v63, %v8878_v3  ;;  %v8913_v60 = vmul.f32 %v9438_v63, %v8879_v25 }
 0xafc   : > { %v8914_v26 = vmul.f32 %v9438_v63, %v8880_v22  ;;  %v8915_v39 = vmul.f32 %v9438_v63, %v8881_v11  ;;  %v8916_v15 = vmul.f32 %v9438_v63, %v8882_v51  ;;  %v8917_v23 = vmul.f32 %v9438_v63, %v8883_v53 }
 0xafd   : > { %v8918_v42 = vmul.f32 %v9438_v63, %v8884_v54  ;;  %v8919_v43 = vmul.f32 %v9438_v63, %v8885_v46  ;;  %v8920_v37 = vmul.f32 %v9438_v63, %v8886_v52  ;;  %v8921_v48 = vmul.f32 %v9438_v63, %v8887_v34 }
 0xafe   : > { %v8922_v18 = vmul.f32 %v9438_v63, %v8888_v44  ;;  %v8923_v61 = vmul.f32 %v9438_v63, %v8889_v17  ;;  %v8924_v49 = vmul.f32 %v9438_v63, %v8890_v5  ;;  %v8925_v10 = vmul.f32 %v9438_v63, %v8891_v47 }
 0xaff   : > { %v15515_v30 = vmul.f32 %v9438_v63, %v8892_v7  ;;  %v15517_v12 = vmul.f32 %v9438_v63, %v8893_v35  ;;  %v15519_v6 = vmul.f32 %v9438_v63, %v8894_v38  ;;  %v15521_v27 = vmul.f32 %v9438_v63, %v8895_v36 }
 0xb00   : > { %v15523_v50 = vmul.f32 %v9438_v63, %v8896_v19  ;;  %v15525_v45 = vmul.f32 %v9438_v63, %v8897_v14  ;;  %v15527_v21 = vmul.f32 %v9438_v63, %v8898_v40  ;;  %v15529_v55 = vmul.f32 %v9438_v63, %v8899_v24 }
 0xb01   : > { %v15538_v8 = vmul.f32 %v9438_v63, %v8900_v33  ;;  %v15540_v0 = vmul.f32 %v9438_v63, %v8901_v9  ;;  %v15542_v59 = vmul.f32 %v9438_v63, %v8902_v16  ;;  %v15544_v4 = vmul.f32 %v9438_v63, %v8903_v31 }
 0xb02   : > { %v8938_v57 = vmax.f32 %v8906_v20, 0.0  ;;  %v8939_v13 = vmax.f32 %v8907_v29, 0.0  ;;  %v8940_v28 = vmax.f32 %v8908_v1, 0.0  ;;  %v8941_v41 = vmax.f32 %v8909_v58, 0.0 }
 0xb03   : > { %v8942_v3 = vmax.f32 %v8910_v2, 0.0  ;;  %v8943_v25 = vmax.f32 %v8911_v56, 0.0  ;;  %v8944_v22 = vmax.f32 %v8912_v62, 0.0  ;;  %v8945_v11 = vmax.f32 %v8913_v60, 0.0 }
 0xb04   : > { %v8946_v51 = vmax.f32 %v8914_v26, 0.0  ;;  %v8947_v53 = vmax.f32 %v8915_v39, 0.0  ;;  %v8948_v54 = vmax.f32 %v8916_v15, 0.0  ;;  %v8949_v46 = vmax.f32 %v8917_v23, 0.0  ;;  %8970 = vst.msk [vmem:[%s15536_s12] sm:$0xff] %vm301_vm2, %v8938_v57  ;;  %8971 = vst.msk [vmem:[%s15536_s12 + $0x8] sm:$0xff] %vm301_vm2, %v8939_v13 }
 0xb05   : > { %8972 = vst.msk [vmem:[%s15536_s12 + $0x10] sm:$0xff] %vm301_vm2, %v8940_v28  ;;  %8973 = vst.msk [vmem:[%s15536_s12 + $0x18] sm:$0xff] %vm301_vm2, %v8941_v41  ;;  %v8950_v52 = vmax.f32 %v8918_v42, 0.0  ;;  %v8951_v34 = vmax.f32 %v8919_v43, 0.0  ;;  %v8952_v44 = vmax.f32 %v8920_v37, 0.0  ;;  %v8953_v17 = vmax.f32 %v8921_v48, 0.0 }
 0xb06   : > { %8974 = vst.msk [vmem:[%s15536_s12 + $0x20] sm:$0xff] %vm301_vm2, %v8942_v3  ;;  %8975 = vst.msk [vmem:[%s15536_s12 + $0x28] sm:$0xff] %vm301_vm2, %v8943_v25  ;;  %v8954_v5 = vmax.f32 %v8922_v18, 0.0  ;;  %v8955_v47 = vmax.f32 %v8923_v61, 0.0  ;;  %v8956_v7 = vmax.f32 %v8924_v49, 0.0  ;;  %v8957_v35 = vmax.f32 %v8925_v10, 0.0 }
 0xb07   : > { %8976 = vst.msk [vmem:[%s15536_s12 + $0x30] sm:$0xff] %vm301_vm2, %v8944_v22  ;;  %8977 = vst.msk [vmem:[%s15536_s12 + $0x38] sm:$0xff] %vm301_vm2, %v8945_v11  ;;  %v8958_v38 = vmax.f32 %v15515_v30, 0.0  ;;  %v8959_v36 = vmax.f32 %v15517_v12, 0.0  ;;  %v8960_v19 = vmax.f32 %v15519_v6, 0.0  ;;  %v8961_v14 = vmax.f32 %v15521_v27, 0.0 }
 0xb08   : > { %8978 = vst.msk [vmem:[%s15536_s12 + $0x40] sm:$0xff] %vm301_vm2, %v8946_v51  ;;  %8979 = vst.msk [vmem:[%s15536_s12 + $0x48] sm:$0xff] %vm301_vm2, %v8947_v53  ;;  %v8962_v40 = vmax.f32 %v15523_v50, 0.0  ;;  %v8963_v24 = vmax.f32 %v15525_v45, 0.0  ;;  %v8964_v33 = vmax.f32 %v15527_v21, 0.0  ;;  %v8965_v9 = vmax.f32 %v15529_v55, 0.0 }
 0xb09   : > { %8980 = vst.msk [vmem:[%s15536_s12 + $0x50] sm:$0xff] %vm301_vm2, %v8948_v54  ;;  %8981 = vst.msk [vmem:[%s15536_s12 + $0x58] sm:$0xff] %vm301_vm2, %v8949_v46  ;;  %v8966_v16 = vmax.f32 %v15538_v8, 0.0  ;;  %v8967_v31 = vmax.f32 %v15540_v0, 0.0  ;;  %v8968_v32 = vmax.f32 %v15542_v59, 0.0  ;;  %v8969_v63 = vmax.f32 %v15544_v4, 0.0 }
 0xb0a   : > { %8982 = vst.msk [vmem:[%s15536_s12 + $0x60] sm:$0xff] %vm301_vm2, %v8950_v52  ;;  %8983 = vst.msk [vmem:[%s15536_s12 + $0x68] sm:$0xff] %vm301_vm2, %v8951_v34 }
 0xb0b   : > { %8984 = vst.msk [vmem:[%s15536_s12 + $0x70] sm:$0xff] %vm301_vm2, %v8952_v44  ;;  %8985 = vst.msk [vmem:[%s15536_s12 + $0x78] sm:$0xff] %vm301_vm2, %v8953_v17 }
 0xb0c   : > { %8986 = vst.msk [vmem:[%s15536_s12 + $0x80] sm:$0xff] %vm301_vm2, %v8954_v5  ;;  %8987 = vst.msk [vmem:[%s15536_s12 + $0x88] sm:$0xff] %vm301_vm2, %v8955_v47 }
 0xb0d   : > { %8988 = vst.msk [vmem:[%s15536_s12 + $0x90] sm:$0xff] %vm301_vm2, %v8956_v7  ;;  %8989 = vst.msk [vmem:[%s15536_s12 + $0x98] sm:$0xff] %vm301_vm2, %v8957_v35 }
 0xb0e   : > { %8990 = vst.msk [vmem:[%s15536_s12 + $0xa0] sm:$0xff] %vm301_vm2, %v8958_v38  ;;  %8991 = vst.msk [vmem:[%s15536_s12 + $0xa8] sm:$0xff] %vm301_vm2, %v8959_v36 }
 0xb0f   : > { %8992 = vst.msk [vmem:[%s15536_s12 + $0xb0] sm:$0xff] %vm301_vm2, %v8960_v19  ;;  %8993 = vst.msk [vmem:[%s15536_s12 + $0xb8] sm:$0xff] %vm301_vm2, %v8961_v14 }
 0xb10   : > { %8994 = vst.msk [vmem:[%s15536_s12 + $0xc0] sm:$0xff] %vm301_vm2, %v8962_v40  ;;  %8995 = vst.msk [vmem:[%s15536_s12 + $0xc8] sm:$0xff] %vm301_vm2, %v8963_v24 }
 0xb11   : > { %8996 = vst.msk [vmem:[%s15536_s12 + $0xd0] sm:$0xff] %vm301_vm2, %v8964_v33  ;;  %8997 = vst.msk [vmem:[%s15536_s12 + $0xd8] sm:$0xff] %vm301_vm2, %v8965_v9 }
 0xb12   : > { %8998 = vst.msk [vmem:[%s15536_s12 + $0xe0] sm:$0xff] %vm301_vm2, %v8966_v16  ;;  %8999 = vst.msk [vmem:[%s15536_s12 + $0xe8] sm:$0xff] %vm301_vm2, %v8967_v31 }
 0xb13   : > { %9000 = vst.msk [vmem:[%s15536_s12 + $0xf0] sm:$0xff] %vm301_vm2, %v8968_v32  ;;  %9001 = vst.msk [vmem:[%s15536_s12 + $0xf8] sm:$0xff] %vm301_vm2, %v8969_v63 }
 0xb14 PF: > { %s15_s18 = sadd.s32 1, %s9466_s18  }
 0xb15   : > { %p12_p4 = scmp.ge.s32.totalorder %s15_s18, 4  }
 0xb17   :  { %14 = sbr.rel (!%p12_p4) target bundleno = 1 (0x1), region = 77 }

</bundles_post_ra>
